<compile_context>
chip_gen: v7x
topology: tpu7x:2x2x1
jax: 0.10.0
libtpu: 0.0.40
codegen_flags: <defaults>
</compile_context>

<pallas_src>
import functools

import jax
import jax.numpy as jnp
from jax.experimental import pallas as pl
from jax.experimental.pallas import tpu as pltpu

C_PAD = 128  # one full lane-width channel slot


def _iconv_kernel(x_ref, w1_ref, w2_ref, o_ref, xp_ref, *, H, W, eps=1e-5):
    """Fused conv2: two (pano-pad -> SNConv3x3 -> InstanceNorm -> ReLU) blocks.

    Per grid step (one batch sample), C = 128 padded channel slot:
      x_ref  : (1, H, W, C)    bf16  input, channels zero-padded to C
      w1_ref : (9*C, C)        bf16  tap-major flattened conv weight (padded)
      w2_ref : (9*C, C)        bf16
      o_ref  : (1, H*W, C)     f32   lane-dense output (first out_ch lanes real)
      xp_ref : (H+2, W+2, C)   f32   scratch: pano-padded activation stage
    """
    C = x_ref.shape[-1]
    HW = H * W
    inv_n = 1.0 / HW

    def conv_in_relu(y_hwc, w_ref):
        # ---- pano padding into the staging scratch (halo copies) ----
        xp_ref[1:H + 1, 1:W + 1, :] = y_hwc
        # circular along width: padded col 0 <- col W-1, padded col W+1 <- col 0
        xp_ref[1:H + 1, 0:1, :] = xp_ref[1:H + 1, W:W + 1, :]
        xp_ref[1:H + 1, W + 1:W + 2, :] = xp_ref[1:H + 1, 1:2, :]
        # replicate along height (rows already carry the circular columns)
        xp_ref[0:1, :, :] = xp_ref[1:2, :, :]
        xp_ref[H + 1:H + 2, :, :] = xp_ref[H:H + 1, :, :]

        # ---- nine accumulating MXU dots, no im2col scratch ----
        # tap t = (kh, kw) reads window xp[kh:kh+H, kw:kw+W]; bf16 operands,
        # f32 accumulation on the MXU result path.
        acc = None
        for t in range(9):
            kh, kw = t // 3, t % 3
            tap = xp_ref[kh:kh + H, kw:kw + W, :].reshape(HW, C)
            part = jnp.dot(tap.astype(w_ref.dtype),
                           w_ref[t * C:(t + 1) * C, :],
                           preferred_element_type=jnp.float32)   # (HW, C) f32
            acc = part if acc is None else acc + part

        # ---- InstanceNorm2d (affine=False), one-pass stats, then ReLU ----
        mean = jnp.sum(acc, axis=0, keepdims=True) * inv_n
        ex2 = jnp.sum(acc * acc, axis=0, keepdims=True) * inv_n
        var = ex2 - mean * mean
        y = (acc - mean) * jax.lax.rsqrt(var + eps)
        return jnp.maximum(y, 0.0)                                # (HW, C) f32

    x = x_ref[0].astype(jnp.float32)                    # bf16 input -> f32 stage
    y1 = conv_in_relu(x, w1_ref)                        # conv1(in_ch -> out_ch)
    y2 = conv_in_relu(y1.reshape(H, W, C), w2_ref)      # conv1(out_ch -> out_ch)
    o_ref[0] = y2.astype(o_ref.dtype)


def _spectral_normalize(w_oihw):
    """SNConv2d weight normalization: W / sigma_max(W.reshape(out, -1)).

    # TODO(synk): torch's SNConv2d uses a persistent u-vector with one
    # power-iteration step per forward; we use the exact largest singular value
    # (its fixed point), so values differ from a mid-training torch checkpoint.
    """
    out_ch = w_oihw.shape[0]
    sigma = jnp.linalg.svd(w_oihw.reshape(out_ch, -1), compute_uv=False)[0]
    return w_oihw / sigma


def _prep_weight(w_oihw):
    """OIHW conv weight -> spectrally-normalized, tap-major (9*128, 128) bf16."""
    out_ch, in_ch, kh, kw = w_oihw.shape
    assert kh == 3 and kw == 3 and in_ch <= C_PAD and out_ch <= C_PAD
    w = _spectral_normalize(w_oihw.astype(jnp.float32))
    w = jnp.transpose(w, (2, 3, 1, 0))                       # (3, 3, in, out)
    w = jnp.pad(w, ((0, 0), (0, 0), (0, C_PAD - in_ch), (0, C_PAD - out_ch)))
    return w.reshape(9 * C_PAD, C_PAD).astype(jnp.bfloat16)


@jax.jit
def iconv_forward(x_nchw, w1_oihw, w2_oihw):
    """iconv(in_ch, out_ch, conv='conv2', norm='in', act='relu', pad='pano')."""
    n, in_ch, h, w = x_nchw.shape
    out_ch = w1_oihw.shape[0]
    assert in_ch <= C_PAD and out_ch <= C_PAD

    # layout glue: NCHW -> NHWC (bf16), zero-pad channels to a full 128-lane slot
    x = jnp.transpose(x_nchw, (0, 2, 3, 1)).astype(jnp.bfloat16)
    x = jnp.pad(x, ((0, 0), (0, 0), (0, 0), (0, C_PAD - in_ch)))
    w1 = _prep_weight(w1_oihw)
    w2 = _prep_weight(w2_oihw)

    hw = h * w
    flops = 2 * (2 * hw * (9 * C_PAD) * C_PAD) * n            # 2 convs / sample
    bytes_accessed = (x.size * 2 + w1.size * 2 + w2.size * 2
                      + n * hw * C_PAD * 4)

    kernel = functools.partial(_iconv_kernel, H=h, W=w)
    out = pl.pallas_call(
        kernel,
        out_shape=jax.ShapeDtypeStruct((n, hw, C_PAD), jnp.float32),
        grid=(n,),
        in_specs=[
            pl.BlockSpec((1, h, w, C_PAD), lambda i: (i, 0, 0, 0)),
            pl.BlockSpec((9 * C_PAD, C_PAD), lambda i: (0, 0)),
            pl.BlockSpec((9 * C_PAD, C_PAD), lambda i: (0, 0)),
        ],
        out_specs=pl.BlockSpec((1, hw, C_PAD), lambda i: (i, 0, 0)),
        scratch_shapes=[
            pltpu.VMEM((h + 2, w + 2, C_PAD), jnp.float32),   # pano-padded stage
        ],
        compiler_params=pltpu.CompilerParams(
            dimension_semantics=("parallel",)),
        cost_estimate=pl.CostEstimate(
            flops=flops, transcendentals=2 * n * C_PAD,
            bytes_accessed=bytes_accessed),
    )(x, w1, w2)
    # TODO(synk): for large H*W, tile H on an "arbitrary" grid axis and finalize
    # InstanceNorm from partial sum/sumsq scratch (v7x 64 MiB VMEM; also restores
    # DMA/compute pipelining).  Whole-image blocks are fine at these sizes.
    # TODO(synk): when 9*in_ch <= 128, pack all taps' real channels into one
    # 128-lane K slot (single K=128 MXU pass per conv) once in-kernel lane
    # packing is wired up; also keep chained iconv blocks in padded NHWC to
    # avoid the post-kernel slice/transpose round trip.

    out = out[:, :, :out_ch].reshape(n, h, w, out_ch)
    return jnp.transpose(out, (0, 3, 1, 2))                   # back to NCHW


@jax.jit
def _reference_iconv(x_nchw, w1_oihw, w2_oihw):
    """Pure-JAX reference (mimics the kernel's bf16 operand rounding)."""
    def block(x, w_oihw):
        w = _spectral_normalize(w_oihw.astype(jnp.float32))
        w = w.astype(jnp.bfloat16).astype(jnp.float32)
        xp = jnp.pad(x, ((0, 0), (0, 0), (0, 0), (1, 1)), mode="wrap")
        xp = jnp.pad(xp, ((0, 0), (0, 0), (1, 1), (0, 0)), mode="edge")
        xp = xp.astype(jnp.bfloat16).astype(jnp.float32)
        y = jax.lax.conv_general_dilated(
            xp, w, window_strides=(1, 1), padding="VALID",
            dimension_numbers=("NCHW", "OIHW", "NCHW"),
            precision=jax.lax.Precision.HIGHEST)
        mean = jnp.mean(y, axis=(2, 3), keepdims=True)
        var = jnp.mean((y - mean) ** 2, axis=(2, 3), keepdims=True)
        return jnp.maximum((y - mean) * jax.lax.rsqrt(var + 1e-5), 0.0)

    return block(block(x_nchw, w1_oihw), w2_oihw)


if __name__ == "__main__":
    key = jax.random.PRNGKey(0)
    kx, k1, k2 = jax.random.split(key, 3)

    N, IN_CH, H, W = 2, 4, 16, 16
    OUT_CH = 8

    x = jax.random.normal(kx, (N, IN_CH, H, W), jnp.float32)
    w1 = jax.random.normal(k1, (OUT_CH, IN_CH, 3, 3), jnp.float32) * (2.0 / (IN_CH * 9)) ** 0.5
    w2 = jax.random.normal(k2, (OUT_CH, OUT_CH, 3, 3), jnp.float32) * (2.0 / (OUT_CH * 9)) ** 0.5

    y = iconv_forward(x, w1, w2)
    jax.block_until_ready(y)

    assert y.shape == (N, OUT_CH, H, W), y.shape
    assert bool(jnp.all(y >= 0.0))            # ReLU output
    assert bool(jnp.all(jnp.isfinite(y)))

    y_ref = _reference_iconv(x, w1, w2)
    err = float(jnp.max(jnp.abs(y - y_ref)))
    assert err < 2e-2, f"max abs err vs reference: {err}"

    print("KERNEL_OK")
</pallas_src>

<mosaic_0001>
module attributes {stable_mosaic.version = 11 : i64} {
  func.func @_iconv_kernel(%arg0: i32, %arg1: memref<1x16x16x128xbf16, #tpu.memory_space<vmem>>, %arg2: memref<1152x128xbf16, #tpu.memory_space<vmem>>, %arg3: memref<1152x128xbf16, #tpu.memory_space<vmem>>, %arg4: memref<1x256x128xf32, #tpu.memory_space<vmem>>, %arg5: memref<18x18x128xf32, #tpu.memory_space<vmem>>) attributes {dimension_semantics = [#tpu.dimension_semantics<parallel>], iteration_bounds = array<i64: 2>, scalar_prefetch = 0 : i64, scratch_operands = 1 : i64, tpu.core_type = #tpu.core_type<tc>, window_params = [{transform_indices = @transform_0, window_bounds = array<i64: 1, 16, 16, 128>}, {pipeline_mode = #tpu.pipeline_mode<synchronous>, transform_indices = @transform_1, window_bounds = array<i64: 1152, 128>}, {pipeline_mode = #tpu.pipeline_mode<synchronous>, transform_indices = @transform_2, window_bounds = array<i64: 1152, 128>}, {transform_indices = @transform_3, window_bounds = array<i64: 1, 256, 128>}]} {
    %c0 = arith.constant 0 : index
    %c0_0 = arith.constant 0 : index
    %c0_1 = arith.constant 0 : index
    %c0_2 = arith.constant 0 : index
    %0 = vector.load %arg1[%c0, %c0_0, %c0_1, %c0_2] : memref<1x16x16x128xbf16, #tpu.memory_space<vmem>>, vector<1x16x16x128xbf16>
    %1 = vector.shape_cast %0 : vector<1x16x16x128xbf16> to vector<16x16x128xbf16>
    %2 = arith.extf %1 : vector<16x16x128xbf16> to vector<16x16x128xf32>
    %c1 = arith.constant 1 : index
    %c1_3 = arith.constant 1 : index
    %c0_4 = arith.constant 0 : index
    %3 = vector.load %arg5[%c1, %c1_3, %c0_4] : memref<18x18x128xf32, #tpu.memory_space<vmem>>, vector<16x16x128xf32>
    tpu.vector_store %arg5[%c1, %c1_3, %c0_4], %2 {strides = array<i32>} : memref<18x18x128xf32, #tpu.memory_space<vmem>>, vector<16x16x128xf32>,
    %c1_5 = arith.constant 1 : index
    %c16 = arith.constant 16 : index
    %c0_6 = arith.constant 0 : index
    %4 = vector.load %arg5[%c1_5, %c16, %c0_6] : memref<18x18x128xf32, #tpu.memory_space<vmem>>, vector<16x1x128xf32>
    %c1_7 = arith.constant 1 : index
    %c0_8 = arith.constant 0 : index
    %c0_9 = arith.constant 0 : index
    %5 = vector.load %arg5[%c1_7, %c0_8, %c0_9] : memref<18x18x128xf32, #tpu.memory_space<vmem>>, vector<16x1x128xf32>
    tpu.vector_store %arg5[%c1_7, %c0_8, %c0_9], %4 {strides = array<i32>} : memref<18x18x128xf32, #tpu.memory_space<vmem>>, vector<16x1x128xf32>,
    %c1_10 = arith.constant 1 : index
    %c1_11 = arith.constant 1 : index
    %c0_12 = arith.constant 0 : index
    %6 = vector.load %arg5[%c1_10, %c1_11, %c0_12] : memref<18x18x128xf32, #tpu.memory_space<vmem>>, vector<16x1x128xf32>
    %c1_13 = arith.constant 1 : index
    %c17 = arith.constant 17 : index
    %c0_14 = arith.constant 0 : index
    %7 = vector.load %arg5[%c1_13, %c17, %c0_14] : memref<18x18x128xf32, #tpu.memory_space<vmem>>, vector<16x1x128xf32>
    tpu.vector_store %arg5[%c1_13, %c17, %c0_14], %6 {strides = array<i32>} : memref<18x18x128xf32, #tpu.memory_space<vmem>>, vector<16x1x128xf32>,
    %c1_15 = arith.constant 1 : index
    %c0_16 = arith.constant 0 : index
    %c0_17 = arith.constant 0 : index
    %8 = vector.load %arg5[%c1_15, %c0_16, %c0_17] : memref<18x18x128xf32, #tpu.memory_space<vmem>>, vector<1x18x128xf32>
    %c0_18 = arith.constant 0 : index
    %c0_19 = arith.constant 0 : index
    %c0_20 = arith.constant 0 : index
    %9 = vector.load %arg5[%c0_18, %c0_19, %c0_20] : memref<18x18x128xf32, #tpu.memory_space<vmem>>, vector<1x18x128xf32>
    tpu.vector_store %arg5[%c0_18, %c0_19, %c0_20], %8 {strides = array<i32>} : memref<18x18x128xf32, #tpu.memory_space<vmem>>, vector<1x18x128xf32>,
    %c16_21 = arith.constant 16 : index
    %c0_22 = arith.constant 0 : index
    %c0_23 = arith.constant 0 : index
    %10 = vector.load %arg5[%c16_21, %c0_22, %c0_23] : memref<18x18x128xf32, #tpu.memory_space<vmem>>, vector<1x18x128xf32>
    %c17_24 = arith.constant 17 : index
    %c0_25 = arith.constant 0 : index
    %c0_26 = arith.constant 0 : index
    %11 = vector.load %arg5[%c17_24, %c0_25, %c0_26] : memref<18x18x128xf32, #tpu.memory_space<vmem>>, vector<1x18x128xf32>
    tpu.vector_store %arg5[%c17_24, %c0_25, %c0_26], %10 {strides = array<i32>} : memref<18x18x128xf32, #tpu.memory_space<vmem>>, vector<1x18x128xf32>,
    %c0_27 = arith.constant 0 : index
    %c0_28 = arith.constant 0 : index
    %c0_29 = arith.constant 0 : index
    %12 = vector.load %arg5[%c0_27, %c0_28, %c0_29] : memref<18x18x128xf32, #tpu.memory_space<vmem>>, vector<16x16x128xf32>
    %13 = vector.shape_cast %12 : vector<16x16x128xf32> to vector<256x128xf32>
    %14 = arith.truncf %13 : vector<256x128xf32> to vector<256x128xbf16>
    %c0_30 = arith.constant 0 : index
    %c0_31 = arith.constant 0 : index
    %15 = vector.load %arg2[%c0_30, %c0_31] : memref<1152x128xbf16, #tpu.memory_space<vmem>>, vector<128x128xbf16>
    %cst = arith.constant dense<0.000000e+00> : vector<256x128xf32>
    %16 = tpu.matmul %14, %15, %cst {dimension_numbers = #tpu.dot_dimension_numbers<[1], [0], [0], [1], [0, 0, 1, 1], [], []>} : vector<256x128xbf16>, vector<128x128xbf16>, vector<256x128xf32> -> vector<256x128xf32>
    %c0_32 = arith.constant 0 : index
    %c1_33 = arith.constant 1 : index
    %c0_34 = arith.constant 0 : index
    %17 = vector.load %arg5[%c0_32, %c1_33, %c0_34] : memref<18x18x128xf32, #tpu.memory_space<vmem>>, vector<16x16x128xf32>
    %18 = vector.shape_cast %17 : vector<16x16x128xf32> to vector<256x128xf32>
    %19 = arith.truncf %18 : vector<256x128xf32> to vector<256x128xbf16>
    %c128 = arith.constant 128 : index
    %c0_35 = arith.constant 0 : index
    %20 = vector.load %arg2[%c128, %c0_35] : memref<1152x128xbf16, #tpu.memory_space<vmem>>, vector<128x128xbf16>
    %cst_36 = arith.constant dense<0.000000e+00> : vector<256x128xf32>
    %21 = tpu.matmul %19, %20, %cst_36 {dimension_numbers = #tpu.dot_dimension_numbers<[1], [0], [0], [1], [0, 0, 1, 1], [], []>} : vector<256x128xbf16>, vector<128x128xbf16>, vector<256x128xf32> -> vector<256x128xf32>
    %22 = arith.addf %16, %21 : vector<256x128xf32>
    %c0_37 = arith.constant 0 : index
    %c2 = arith.constant 2 : index
    %c0_38 = arith.constant 0 : index
    %23 = vector.load %arg5[%c0_37, %c2, %c0_38] : memref<18x18x128xf32, #tpu.memory_space<vmem>>, vector<16x16x128xf32>
    %24 = vector.shape_cast %23 : vector<16x16x128xf32> to vector<256x128xf32>
    %25 = arith.truncf %24 : vector<256x128xf32> to vector<256x128xbf16>
    %c256 = arith.constant 256 : index
    %c0_39 = arith.constant 0 : index
    %26 = vector.load %arg2[%c256, %c0_39] : memref<1152x128xbf16, #tpu.memory_space<vmem>>, vector<128x128xbf16>
    %cst_40 = arith.constant dense<0.000000e+00> : vector<256x128xf32>
    %27 = tpu.matmul %25, %26, %cst_40 {dimension_numbers = #tpu.dot_dimension_numbers<[1], [0], [0], [1], [0, 0, 1, 1], [], []>} : vector<256x128xbf16>, vector<128x128xbf16>, vector<256x128xf32> -> vector<256x128xf32>
    %28 = arith.addf %22, %27 : vector<256x128xf32>
    %c1_41 = arith.constant 1 : index
    %c0_42 = arith.constant 0 : index
    %c0_43 = arith.constant 0 : index
    %29 = vector.load %arg5[%c1_41, %c0_42, %c0_43] : memref<18x18x128xf32, #tpu.memory_space<vmem>>, vector<16x16x128xf32>
    %30 = vector.shape_cast %29 : vector<16x16x128xf32> to vector<256x128xf32>
    %31 = arith.truncf %30 : vector<256x128xf32> to vector<256x128xbf16>
    %c384 = arith.constant 384 : index
    %c0_44 = arith.constant 0 : index
    %32 = vector.load %arg2[%c384, %c0_44] : memref<1152x128xbf16, #tpu.memory_space<vmem>>, vector<128x128xbf16>
    %cst_45 = arith.constant dense<0.000000e+00> : vector<256x128xf32>
    %33 = tpu.matmul %31, %32, %cst_45 {dimension_numbers = #tpu.dot_dimension_numbers<[1], [0], [0], [1], [0, 0, 1, 1], [], []>} : vector<256x128xbf16>, vector<128x128xbf16>, vector<256x128xf32> -> vector<256x128xf32>
    %34 = arith.addf %28, %33 : vector<256x128xf32>
    %c1_46 = arith.constant 1 : index
    %c1_47 = arith.constant 1 : index
    %c0_48 = arith.constant 0 : index
    %35 = vector.load %arg5[%c1_46, %c1_47, %c0_48] : memref<18x18x128xf32, #tpu.memory_space<vmem>>, vector<16x16x128xf32>
    %36 = vector.shape_cast %35 : vector<16x16x128xf32> to vector<256x128xf32>
    %37 = arith.truncf %36 : vector<256x128xf32> to vector<256x128xbf16>
    %c512 = arith.constant 512 : index
    %c0_49 = arith.constant 0 : index
    %38 = vector.load %arg2[%c512, %c0_49] : memref<1152x128xbf16, #tpu.memory_space<vmem>>, vector<128x128xbf16>
    %cst_50 = arith.constant dense<0.000000e+00> : vector<256x128xf32>
    %39 = tpu.matmul %37, %38, %cst_50 {dimension_numbers = #tpu.dot_dimension_numbers<[1], [0], [0], [1], [0, 0, 1, 1], [], []>} : vector<256x128xbf16>, vector<128x128xbf16>, vector<256x128xf32> -> vector<256x128xf32>
    %40 = arith.addf %34, %39 : vector<256x128xf32>
    %c1_51 = arith.constant 1 : index
    %c2_52 = arith.constant 2 : index
    %c0_53 = arith.constant 0 : index
    %41 = vector.load %arg5[%c1_51, %c2_52, %c0_53] : memref<18x18x128xf32, #tpu.memory_space<vmem>>, vector<16x16x128xf32>
    %42 = vector.shape_cast %41 : vector<16x16x128xf32> to vector<256x128xf32>
    %43 = arith.truncf %42 : vector<256x128xf32> to vector<256x128xbf16>
    %c640 = arith.constant 640 : index
    %c0_54 = arith.constant 0 : index
    %44 = vector.load %arg2[%c640, %c0_54] : memref<1152x128xbf16, #tpu.memory_space<vmem>>, vector<128x128xbf16>
    %cst_55 = arith.constant dense<0.000000e+00> : vector<256x128xf32>
    %45 = tpu.matmul %43, %44, %cst_55 {dimension_numbers = #tpu.dot_dimension_numbers<[1], [0], [0], [1], [0, 0, 1, 1], [], []>} : vector<256x128xbf16>, vector<128x128xbf16>, vector<256x128xf32> -> vector<256x128xf32>
    %46 = arith.addf %40, %45 : vector<256x128xf32>
    %c2_56 = arith.constant 2 : index
    %c0_57 = arith.constant 0 : index
    %c0_58 = arith.constant 0 : index
    %47 = vector.load %arg5[%c2_56, %c0_57, %c0_58] : memref<18x18x128xf32, #tpu.memory_space<vmem>>, vector<16x16x128xf32>
    %48 = vector.shape_cast %47 : vector<16x16x128xf32> to vector<256x128xf32>
    %49 = arith.truncf %48 : vector<256x128xf32> to vector<256x128xbf16>
    %c768 = arith.constant 768 : index
    %c0_59 = arith.constant 0 : index
    %50 = vector.load %arg2[%c768, %c0_59] : memref<1152x128xbf16, #tpu.memory_space<vmem>>, vector<128x128xbf16>
    %cst_60 = arith.constant dense<0.000000e+00> : vector<256x128xf32>
    %51 = tpu.matmul %49, %50, %cst_60 {dimension_numbers = #tpu.dot_dimension_numbers<[1], [0], [0], [1], [0, 0, 1, 1], [], []>} : vector<256x128xbf16>, vector<128x128xbf16>, vector<256x128xf32> -> vector<256x128xf32>
    %52 = arith.addf %46, %51 : vector<256x128xf32>
    %c2_61 = arith.constant 2 : index
    %c1_62 = arith.constant 1 : index
    %c0_63 = arith.constant 0 : index
    %53 = vector.load %arg5[%c2_61, %c1_62, %c0_63] : memref<18x18x128xf32, #tpu.memory_space<vmem>>, vector<16x16x128xf32>
    %54 = vector.shape_cast %53 : vector<16x16x128xf32> to vector<256x128xf32>
    %55 = arith.truncf %54 : vector<256x128xf32> to vector<256x128xbf16>
    %c896 = arith.constant 896 : index
    %c0_64 = arith.constant 0 : index
    %56 = vector.load %arg2[%c896, %c0_64] : memref<1152x128xbf16, #tpu.memory_space<vmem>>, vector<128x128xbf16>
    %cst_65 = arith.constant dense<0.000000e+00> : vector<256x128xf32>
    %57 = tpu.matmul %55, %56, %cst_65 {dimension_numbers = #tpu.dot_dimension_numbers<[1], [0], [0], [1], [0, 0, 1, 1], [], []>} : vector<256x128xbf16>, vector<128x128xbf16>, vector<256x128xf32> -> vector<256x128xf32>
    %58 = arith.addf %52, %57 : vector<256x128xf32>
    %c2_66 = arith.constant 2 : index
    %c2_67 = arith.constant 2 : index
    %c0_68 = arith.constant 0 : index
    %59 = vector.load %arg5[%c2_66, %c2_67, %c0_68] : memref<18x18x128xf32, #tpu.memory_space<vmem>>, vector<16x16x128xf32>
    %60 = vector.shape_cast %59 : vector<16x16x128xf32> to vector<256x128xf32>
    %61 = arith.truncf %60 : vector<256x128xf32> to vector<256x128xbf16>
    %c1024 = arith.constant 1024 : index
    %c0_69 = arith.constant 0 : index
    %62 = vector.load %arg2[%c1024, %c0_69] : memref<1152x128xbf16, #tpu.memory_space<vmem>>, vector<128x128xbf16>
    %cst_70 = arith.constant dense<0.000000e+00> : vector<256x128xf32>
    %63 = tpu.matmul %61, %62, %cst_70 {dimension_numbers = #tpu.dot_dimension_numbers<[1], [0], [0], [1], [0, 0, 1, 1], [], []>} : vector<256x128xbf16>, vector<128x128xbf16>, vector<256x128xf32> -> vector<256x128xf32>
    %64 = arith.addf %58, %63 : vector<256x128xf32>
    %cst_71 = arith.constant dense<0.000000e+00> : vector<128xf32>
    %65 = vector.multi_reduction <add>, %64, %cst_71 [0] : vector<256x128xf32> to vector<128xf32>
    %66 = vector.shape_cast %65 : vector<128xf32> to vector<1x128xf32>
    %cst_72 = arith.constant 3.906250e-03 : f32
    %67 = vector.broadcast %cst_72 : f32 to vector<1x128xf32>
    %68 = arith.mulf %66, %67 : vector<1x128xf32>
    %69 = arith.mulf %64, %64 : vector<256x128xf32>
    %cst_73 = arith.constant dense<0.000000e+00> : vector<128xf32>
    %70 = vector.multi_reduction <add>, %69, %cst_73 [0] : vector<256x128xf32> to vector<128xf32>
    %71 = vector.shape_cast %70 : vector<128xf32> to vector<1x128xf32>
    %cst_74 = arith.constant 3.906250e-03 : f32
    %72 = vector.broadcast %cst_74 : f32 to vector<1x128xf32>
    %73 = arith.mulf %71, %72 : vector<1x128xf32>
    %74 = arith.mulf %68, %68 : vector<1x128xf32>
    %75 = arith.subf %73, %74 : vector<1x128xf32>
    %76 = vector.broadcast %68 : vector<1x128xf32> to vector<256x128xf32>
    %77 = arith.subf %64, %76 : vector<256x128xf32>
    %cst_75 = arith.constant 9.99999974E-6 : f32
    %78 = vector.broadcast %cst_75 : f32 to vector<1x128xf32>
    %79 = arith.addf %75, %78 : vector<1x128xf32>
    %80 = math.rsqrt %79 : vector<1x128xf32>
    %81 = vector.broadcast %80 : vector<1x128xf32> to vector<256x128xf32>
    %82 = arith.mulf %77, %81 : vector<256x128xf32>
    %cst_76 = arith.constant 0.000000e+00 : f32
    %83 = vector.broadcast %cst_76 : f32 to vector<256x128xf32>
    %84 = arith.maximumf %82, %83 : vector<256x128xf32>
    %85 = vector.shape_cast %84 : vector<256x128xf32> to vector<16x16x128xf32>
    %c1_77 = arith.constant 1 : index
    %c1_78 = arith.constant 1 : index
    %c0_79 = arith.constant 0 : index
    %86 = vector.load %arg5[%c1_77, %c1_78, %c0_79] : memref<18x18x128xf32, #tpu.memory_space<vmem>>, vector<16x16x128xf32>
    tpu.vector_store %arg5[%c1_77, %c1_78, %c0_79], %85 {strides = array<i32>} : memref<18x18x128xf32, #tpu.memory_space<vmem>>, vector<16x16x128xf32>,
    %c1_80 = arith.constant 1 : index
    %c16_81 = arith.constant 16 : index
    %c0_82 = arith.constant 0 : index
    %87 = vector.load %arg5[%c1_80, %c16_81, %c0_82] : memref<18x18x128xf32, #tpu.memory_space<vmem>>, vector<16x1x128xf32>
    %c1_83 = arith.constant 1 : index
    %c0_84 = arith.constant 0 : index
    %c0_85 = arith.constant 0 : index
    %88 = vector.load %arg5[%c1_83, %c0_84, %c0_85] : memref<18x18x128xf32, #tpu.memory_space<vmem>>, vector<16x1x128xf32>
    tpu.vector_store %arg5[%c1_83, %c0_84, %c0_85], %87 {strides = array<i32>} : memref<18x18x128xf32, #tpu.memory_space<vmem>>, vector<16x1x128xf32>,
    %c1_86 = arith.constant 1 : index
    %c1_87 = arith.constant 1 : index
    %c0_88 = arith.constant 0 : index
    %89 = vector.load %arg5[%c1_86, %c1_87, %c0_88] : memref<18x18x128xf32, #tpu.memory_space<vmem>>, vector<16x1x128xf32>
    %c1_89 = arith.constant 1 : index
    %c17_90 = arith.constant 17 : index
    %c0_91 = arith.constant 0 : index
    %90 = vector.load %arg5[%c1_89, %c17_90, %c0_91] : memref<18x18x128xf32, #tpu.memory_space<vmem>>, vector<16x1x128xf32>
    tpu.vector_store %arg5[%c1_89, %c17_90, %c0_91], %89 {strides = array<i32>} : memref<18x18x128xf32, #tpu.memory_space<vmem>>, vector<16x1x128xf32>,
    %c1_92 = arith.constant 1 : index
    %c0_93 = arith.constant 0 : index
    %c0_94 = arith.constant 0 : index
    %91 = vector.load %arg5[%c1_92, %c0_93, %c0_94] : memref<18x18x128xf32, #tpu.memory_space<vmem>>, vector<1x18x128xf32>
    %c0_95 = arith.constant 0 : index
    %c0_96 = arith.constant 0 : index
    %c0_97 = arith.constant 0 : index
    %92 = vector.load %arg5[%c0_95, %c0_96, %c0_97] : memref<18x18x128xf32, #tpu.memory_space<vmem>>, vector<1x18x128xf32>
    tpu.vector_store %arg5[%c0_95, %c0_96, %c0_97], %91 {strides = array<i32>} : memref<18x18x128xf32, #tpu.memory_space<vmem>>, vector<1x18x128xf32>,
    %c16_98 = arith.constant 16 : index
    %c0_99 = arith.constant 0 : index
    %c0_100 = arith.constant 0 : index
    %93 = vector.load %arg5[%c16_98, %c0_99, %c0_100] : memref<18x18x128xf32, #tpu.memory_space<vmem>>, vector<1x18x128xf32>
    %c17_101 = arith.constant 17 : index
    %c0_102 = arith.constant 0 : index
    %c0_103 = arith.constant 0 : index
    %94 = vector.load %arg5[%c17_101, %c0_102, %c0_103] : memref<18x18x128xf32, #tpu.memory_space<vmem>>, vector<1x18x128xf32>
    tpu.vector_store %arg5[%c17_101, %c0_102, %c0_103], %93 {strides = array<i32>} : memref<18x18x128xf32, #tpu.memory_space<vmem>>, vector<1x18x128xf32>,
    %c0_104 = arith.constant 0 : index
    %c0_105 = arith.constant 0 : index
    %c0_106 = arith.constant 0 : index
    %95 = vector.load %arg5[%c0_104, %c0_105, %c0_106] : memref<18x18x128xf32, #tpu.memory_space<vmem>>, vector<16x16x128xf32>
    %96 = vector.shape_cast %95 : vector<16x16x128xf32> to vector<256x128xf32>
    %97 = arith.truncf %96 : vector<256x128xf32> to vector<256x128xbf16>
    %c0_107 = arith.constant 0 : index
    %c0_108 = arith.constant 0 : index
    %98 = vector.load %arg3[%c0_107, %c0_108] : memref<1152x128xbf16, #tpu.memory_space<vmem>>, vector<128x128xbf16>
    %cst_109 = arith.constant dense<0.000000e+00> : vector<256x128xf32>
    %99 = tpu.matmul %97, %98, %cst_109 {dimension_numbers = #tpu.dot_dimension_numbers<[1], [0], [0], [1], [0, 0, 1, 1], [], []>} : vector<256x128xbf16>, vector<128x128xbf16>, vector<256x128xf32> -> vector<256x128xf32>
    %c0_110 = arith.constant 0 : index
    %c1_111 = arith.constant 1 : index
    %c0_112 = arith.constant 0 : index
    %100 = vector.load %arg5[%c0_110, %c1_111, %c0_112] : memref<18x18x128xf32, #tpu.memory_space<vmem>>, vector<16x16x128xf32>
    %101 = vector.shape_cast %100 : vector<16x16x128xf32> to vector<256x128xf32>
    %102 = arith.truncf %101 : vector<256x128xf32> to vector<256x128xbf16>
    %c128_113 = arith.constant 128 : index
    %c0_114 = arith.constant 0 : index
    %103 = vector.load %arg3[%c128_113, %c0_114] : memref<1152x128xbf16, #tpu.memory_space<vmem>>, vector<128x128xbf16>
    %cst_115 = arith.constant dense<0.000000e+00> : vector<256x128xf32>
    %104 = tpu.matmul %102, %103, %cst_115 {dimension_numbers = #tpu.dot_dimension_numbers<[1], [0], [0], [1], [0, 0, 1, 1], [], []>} : vector<256x128xbf16>, vector<128x128xbf16>, vector<256x128xf32> -> vector<256x128xf32>
    %105 = arith.addf %99, %104 : vector<256x128xf32>
    %c0_116 = arith.constant 0 : index
    %c2_117 = arith.constant 2 : index
    %c0_118 = arith.constant 0 : index
    %106 = vector.load %arg5[%c0_116, %c2_117, %c0_118] : memref<18x18x128xf32, #tpu.memory_space<vmem>>, vector<16x16x128xf32>
    %107 = vector.shape_cast %106 : vector<16x16x128xf32> to vector<256x128xf32>
    %108 = arith.truncf %107 : vector<256x128xf32> to vector<256x128xbf16>
    %c256_119 = arith.constant 256 : index
    %c0_120 = arith.constant 0 : index
    %109 = vector.load %arg3[%c256_119, %c0_120] : memref<1152x128xbf16, #tpu.memory_space<vmem>>, vector<128x128xbf16>
    %cst_121 = arith.constant dense<0.000000e+00> : vector<256x128xf32>
    %110 = tpu.matmul %108, %109, %cst_121 {dimension_numbers = #tpu.dot_dimension_numbers<[1], [0], [0], [1], [0, 0, 1, 1], [], []>} : vector<256x128xbf16>, vector<128x128xbf16>, vector<256x128xf32> -> vector<256x128xf32>
    %111 = arith.addf %105, %110 : vector<256x128xf32>
    %c1_122 = arith.constant 1 : index
    %c0_123 = arith.constant 0 : index
    %c0_124 = arith.constant 0 : index
    %112 = vector.load %arg5[%c1_122, %c0_123, %c0_124] : memref<18x18x128xf32, #tpu.memory_space<vmem>>, vector<16x16x128xf32>
    %113 = vector.shape_cast %112 : vector<16x16x128xf32> to vector<256x128xf32>
    %114 = arith.truncf %113 : vector<256x128xf32> to vector<256x128xbf16>
    %c384_125 = arith.constant 384 : index
    %c0_126 = arith.constant 0 : index
    %115 = vector.load %arg3[%c384_125, %c0_126] : memref<1152x128xbf16, #tpu.memory_space<vmem>>, vector<128x128xbf16>
    %cst_127 = arith.constant dense<0.000000e+00> : vector<256x128xf32>
    %116 = tpu.matmul %114, %115, %cst_127 {dimension_numbers = #tpu.dot_dimension_numbers<[1], [0], [0], [1], [0, 0, 1, 1], [], []>} : vector<256x128xbf16>, vector<128x128xbf16>, vector<256x128xf32> -> vector<256x128xf32>
    %117 = arith.addf %111, %116 : vector<256x128xf32>
    %c1_128 = arith.constant 1 : index
    %c1_129 = arith.constant 1 : index
    %c0_130 = arith.constant 0 : index
    %118 = vector.load %arg5[%c1_128, %c1_129, %c0_130] : memref<18x18x128xf32, #tpu.memory_space<vmem>>, vector<16x16x128xf32>
    %119 = vector.shape_cast %118 : vector<16x16x128xf32> to vector<256x128xf32>
    %120 = arith.truncf %119 : vector<256x128xf32> to vector<256x128xbf16>
    %c512_131 = arith.constant 512 : index
    %c0_132 = arith.constant 0 : index
    %121 = vector.load %arg3[%c512_131, %c0_132] : memref<1152x128xbf16, #tpu.memory_space<vmem>>, vector<128x128xbf16>
    %cst_133 = arith.constant dense<0.000000e+00> : vector<256x128xf32>
    %122 = tpu.matmul %120, %121, %cst_133 {dimension_numbers = #tpu.dot_dimension_numbers<[1], [0], [0], [1], [0, 0, 1, 1], [], []>} : vector<256x128xbf16>, vector<128x128xbf16>, vector<256x128xf32> -> vector<256x128xf32>
    %123 = arith.addf %117, %122 : vector<256x128xf32>
    %c1_134 = arith.constant 1 : index
    %c2_135 = arith.constant 2 : index
    %c0_136 = arith.constant 0 : index
    %124 = vector.load %arg5[%c1_134, %c2_135, %c0_136] : memref<18x18x128xf32, #tpu.memory_space<vmem>>, vector<16x16x128xf32>
    %125 = vector.shape_cast %124 : vector<16x16x128xf32> to vector<256x128xf32>
    %126 = arith.truncf %125 : vector<256x128xf32> to vector<256x128xbf16>
    %c640_137 = arith.constant 640 : index
    %c0_138 = arith.constant 0 : index
    %127 = vector.load %arg3[%c640_137, %c0_138] : memref<1152x128xbf16, #tpu.memory_space<vmem>>, vector<128x128xbf16>
    %cst_139 = arith.constant dense<0.000000e+00> : vector<256x128xf32>
    %128 = tpu.matmul %126, %127, %cst_139 {dimension_numbers = #tpu.dot_dimension_numbers<[1], [0], [0], [1], [0, 0, 1, 1], [], []>} : vector<256x128xbf16>, vector<128x128xbf16>, vector<256x128xf32> -> vector<256x128xf32>
    %129 = arith.addf %123, %128 : vector<256x128xf32>
    %c2_140 = arith.constant 2 : index
    %c0_141 = arith.constant 0 : index
    %c0_142 = arith.constant 0 : index
    %130 = vector.load %arg5[%c2_140, %c0_141, %c0_142] : memref<18x18x128xf32, #tpu.memory_space<vmem>>, vector<16x16x128xf32>
    %131 = vector.shape_cast %130 : vector<16x16x128xf32> to vector<256x128xf32>
    %132 = arith.truncf %131 : vector<256x128xf32> to vector<256x128xbf16>
    %c768_143 = arith.constant 768 : index
    %c0_144 = arith.constant 0 : index
    %133 = vector.load %arg3[%c768_143, %c0_144] : memref<1152x128xbf16, #tpu.memory_space<vmem>>, vector<128x128xbf16>
    %cst_145 = arith.constant dense<0.000000e+00> : vector<256x128xf32>
    %134 = tpu.matmul %132, %133, %cst_145 {dimension_numbers = #tpu.dot_dimension_numbers<[1], [0], [0], [1], [0, 0, 1, 1], [], []>} : vector<256x128xbf16>, vector<128x128xbf16>, vector<256x128xf32> -> vector<256x128xf32>
    %135 = arith.addf %129, %134 : vector<256x128xf32>
    %c2_146 = arith.constant 2 : index
    %c1_147 = arith.constant 1 : index
    %c0_148 = arith.constant 0 : index
    %136 = vector.load %arg5[%c2_146, %c1_147, %c0_148] : memref<18x18x128xf32, #tpu.memory_space<vmem>>, vector<16x16x128xf32>
    %137 = vector.shape_cast %136 : vector<16x16x128xf32> to vector<256x128xf32>
    %138 = arith.truncf %137 : vector<256x128xf32> to vector<256x128xbf16>
    %c896_149 = arith.constant 896 : index
    %c0_150 = arith.constant 0 : index
    %139 = vector.load %arg3[%c896_149, %c0_150] : memref<1152x128xbf16, #tpu.memory_space<vmem>>, vector<128x128xbf16>
    %cst_151 = arith.constant dense<0.000000e+00> : vector<256x128xf32>
    %140 = tpu.matmul %138, %139, %cst_151 {dimension_numbers = #tpu.dot_dimension_numbers<[1], [0], [0], [1], [0, 0, 1, 1], [], []>} : vector<256x128xbf16>, vector<128x128xbf16>, vector<256x128xf32> -> vector<256x128xf32>
    %141 = arith.addf %135, %140 : vector<256x128xf32>
    %c2_152 = arith.constant 2 : index
    %c2_153 = arith.constant 2 : index
    %c0_154 = arith.constant 0 : index
    %142 = vector.load %arg5[%c2_152, %c2_153, %c0_154] : memref<18x18x128xf32, #tpu.memory_space<vmem>>, vector<16x16x128xf32>
    %143 = vector.shape_cast %142 : vector<16x16x128xf32> to vector<256x128xf32>
    %144 = arith.truncf %143 : vector<256x128xf32> to vector<256x128xbf16>
    %c1024_155 = arith.constant 1024 : index
    %c0_156 = arith.constant 0 : index
    %145 = vector.load %arg3[%c1024_155, %c0_156] : memref<1152x128xbf16, #tpu.memory_space<vmem>>, vector<128x128xbf16>
    %cst_157 = arith.constant dense<0.000000e+00> : vector<256x128xf32>
    %146 = tpu.matmul %144, %145, %cst_157 {dimension_numbers = #tpu.dot_dimension_numbers<[1], [0], [0], [1], [0, 0, 1, 1], [], []>} : vector<256x128xbf16>, vector<128x128xbf16>, vector<256x128xf32> -> vector<256x128xf32>
    %147 = arith.addf %141, %146 : vector<256x128xf32>
    %cst_158 = arith.constant dense<0.000000e+00> : vector<128xf32>
    %148 = vector.multi_reduction <add>, %147, %cst_158 [0] : vector<256x128xf32> to vector<128xf32>
    %149 = vector.shape_cast %148 : vector<128xf32> to vector<1x128xf32>
    %cst_159 = arith.constant 3.906250e-03 : f32
    %150 = vector.broadcast %cst_159 : f32 to vector<1x128xf32>
    %151 = arith.mulf %149, %150 : vector<1x128xf32>
    %152 = arith.mulf %147, %147 : vector<256x128xf32>
    %cst_160 = arith.constant dense<0.000000e+00> : vector<128xf32>
    %153 = vector.multi_reduction <add>, %152, %cst_160 [0] : vector<256x128xf32> to vector<128xf32>
    %154 = vector.shape_cast %153 : vector<128xf32> to vector<1x128xf32>
    %cst_161 = arith.constant 3.906250e-03 : f32
    %155 = vector.broadcast %cst_161 : f32 to vector<1x128xf32>
    %156 = arith.mulf %154, %155 : vector<1x128xf32>
    %157 = arith.mulf %151, %151 : vector<1x128xf32>
    %158 = arith.subf %156, %157 : vector<1x128xf32>
    %159 = vector.broadcast %151 : vector<1x128xf32> to vector<256x128xf32>
    %160 = arith.subf %147, %159 : vector<256x128xf32>
    %cst_162 = arith.constant 9.99999974E-6 : f32
    %161 = vector.broadcast %cst_162 : f32 to vector<1x128xf32>
    %162 = arith.addf %158, %161 : vector<1x128xf32>
    %163 = math.rsqrt %162 : vector<1x128xf32>
    %164 = vector.broadcast %163 : vector<1x128xf32> to vector<256x128xf32>
    %165 = arith.mulf %160, %164 : vector<256x128xf32>
    %cst_163 = arith.constant 0.000000e+00 : f32
    %166 = vector.broadcast %cst_163 : f32 to vector<256x128xf32>
    %167 = arith.maximumf %165, %166 : vector<256x128xf32>
    %c0_164 = arith.constant 0 : index
    %c0_165 = arith.constant 0 : index
    %c0_166 = arith.constant 0 : index
    %168 = vector.load %arg4[%c0_164, %c0_165, %c0_166] : memref<1x256x128xf32, #tpu.memory_space<vmem>>, vector<1x256x128xf32>
    %169 = vector.shape_cast %168 : vector<1x256x128xf32> to vector<256x128xf32>
    %170 = vector.shape_cast %167 : vector<256x128xf32> to vector<1x256x128xf32>
    tpu.vector_store %arg4[%c0_164, %c0_165, %c0_166], %170 {strides = array<i32>} : memref<1x256x128xf32, #tpu.memory_space<vmem>>, vector<1x256x128xf32>,
    return
  }
  func.func @transform_0(%arg0: i32) -> (i32, i32, i32, i32) {
    %c0_i32 = arith.constant 0 : i32
    %c0_i32_0 = arith.constant 0 : i32
    %c0_i32_1 = arith.constant 0 : i32
    %c0_i32_2 = arith.constant 0 : i32
    return %arg0, %c0_i32, %c0_i32_0, %c0_i32_1 : i32, i32, i32, i32
  }
  func.func @transform_1(%arg0: i32) -> (i32, i32) {
    %c0_i32 = arith.constant 0 : i32
    %c0_i32_0 = arith.constant 0 : i32
    %c0_i32_1 = arith.constant 0 : i32
    return %c0_i32, %c0_i32_0 : i32, i32
  }
  func.func @transform_2(%arg0: i32) -> (i32, i32) {
    %c0_i32 = arith.constant 0 : i32
    %c0_i32_0 = arith.constant 0 : i32
    %c0_i32_1 = arith.constant 0 : i32
    return %c0_i32, %c0_i32_0 : i32, i32
  }
  func.func @transform_3(%arg0: i32) -> (i32, i32, i32) {
    %c0_i32 = arith.constant 0 : i32
    %c0_i32_0 = arith.constant 0 : i32
    %c0_i32_1 = arith.constant 0 : i32
    return %arg0, %c0_i32, %c0_i32_0 : i32, i32, i32
  }
}

</mosaic_0001>

<bundles_post_ra>
// kernel: custom-call.26
= control target key start
LH: loop header
LB: loop body
LE: loop exit
PB: predicated region body
PF: predicated region fallthrough
CT: control target
= control target key end

     0   :  { %4 = vsyncpa [#allocation4], 0  ;;  %v618_v5 = vmov 0.0   ;;  %s651_s19 = smov 0   ;;  %s859_s0 = inlined_call_operand.vmem [shape: f32[36,8], index: 0, kind: input, shape index: {}]   ;;  %s860_s1 = inlined_call_operand.vmem [shape: f32[36,8], index: 1, kind: output, shape index: {0}]   ;;  %s861_s2 = inlined_call_operand.hbm [shape: f32[8], index: 2, kind: output, shape index: {1}]  }
   0x1   :  { %v40_v0 = vld [vmem:[%s859_s0] sm:$0xff]  ;;  %v42_v1 = vld [vmem:[%s859_s0 + $0x8] sm:$0xff]  ;;  %v44_v2 = vld [vmem:[%s859_s0 + $0x10] sm:$0xff]  ;;  %71 = vst [vmem:[#allocation2] sm:$0x1] %v618_v5 }
   0x2   :  { %v46_v3 = vld [vmem:[%s859_s0 + $0x18] sm:$0xff]  ;;  %v48_v4 = vld [vmem:[%s859_s0 + $0x20] sm:$0xff]  ;;  %54 = vst [vmem:[#allocation1] sm:$0xff] %v40_v0  ;;  %58 = vst [vmem:[#allocation1 + $0x8] sm:$0xff] %v42_v1 }
   0x3   :  { %62 = vst [vmem:[#allocation1 + $0x10] sm:$0xff] %v44_v2  ;;  %66 = vst [vmem:[#allocation1 + $0x18] sm:$0xff] %v46_v3 }
   0x4   :  { %70 = vst [vmem:[#allocation1 + $0x20] sm:$0xff] %v48_v4 }
   0x5 LB: > { %v79_v6 = vlaneseq  ;;  %v660_v9 = vstv %s616_s19  ;;  %s146_s0 = scalar_lea.vmem [#allocation1], %s616_s19  ;;  %s182_s20 = smov [#allocation1]  ;;  %s616_s19 = sphi %s651_s19, %s77_s19  }
   0x6   : > { %s276_s21 = scalar_lea.vmem [#allocation5], %s616_s19  ;;  %s737_s22 = smov [#allocation1] }
   0x7   : > { %v657_v8 = vshrl.u32 %v79_v6, 7  ;;  %s739_s23 = smov [#allocation5] }
   0x9   : > { %v78_v7 = vld [vmem:[#allocation1] sm:$0xff]  ;;  %vm83_vm0 = vcmp.gt.s32.totalorder %v657_v8, %v660_v9  ;;  %v87_v10 = vld [vmem:[#allocation1 + $0x8] sm:$0xff]  ;;  %v90_v11 = vadd.s32 8, %v657_v8  ;;  %v100_v13 = vadd.s32 16, %v657_v8  ;;  %v110_v15 = vadd.s32 24, %v657_v8 }
   0xa   : > { %v97_v12 = vld [vmem:[#allocation1 + $0x10] sm:$0xff]  ;;  %v107_v14 = vld [vmem:[#allocation1 + $0x18] sm:$0xff]  ;;  %v84_v16 = vsel %vm83_vm0, %v78_v7, 0.0  ;;  %v120_v17 = vadd.s32 32, %v657_v8  ;;  %v185_v8 = vmov %v657_v8 }
   0xb   : > { %v85_v18 = vmul.f32 %v84_v16, %v84_v16  ;;  %vm92_vm1 = vcmp.gt.s32.totalorder %v90_v11, %v660_v9  ;;  %vm102_vm2 = vcmp.gt.s32.totalorder %v100_v13, %v660_v9  ;;  %vm112_vm3 = vcmp.gt.s32.totalorder %v110_v15, %v660_v9  ;;  %v117_v22 = vld [vmem:[#allocation1 + $0x20] sm:$0xff]  ;;  %v541_v13 = vld [vmem:[%s182_s20 + $0x8] sm:$0xff] }
   0xc   : > { %v93_v19 = vsel %vm92_vm1, %v87_v10, 0.0  ;;  %v103_v20 = vsel %vm102_vm2, %v97_v12, 0.0  ;;  %v113_v21 = vsel %vm112_vm3, %v107_v14, 0.0  ;;  %vm122_vm4 = vcmp.gt.s32.totalorder %v120_v17, %v660_v9  ;;  %v676_v38 = vld [vmem:[%s146_s0] ss:$0 sm:$0xff]  ;;  %v542_v12 = vld [vmem:[%s182_s20 + $0x10] sm:$0xff] }
   0xd   : > { %v94_v23 = vmul.f32 %v93_v19, %v93_v19  ;;  %v104_v24 = vmul.f32 %v103_v20, %v103_v20  ;;  %vm123_vm5 = vcmp.lt.s32.totalorder %v120_v17, 36  ;;  %v114_v26 = vmul.f32 %v113_v21, %v113_v21  ;;  %v186_v11 = vld [vmem:[%s182_s20] sm:$0xff]  ;;  %v543_v14 = vld [vmem:[%s182_s20 + $0x18] sm:$0xff] }
   0xe   : > { %vm124_vm6 = vmand %vm122_vm4, %vm123_vm5  ;;  %v148_v39 = vand.u32 2147483647, %v676_v38  ;;  %vm173_vm12 = vcmp.lt.f32.partialorder %v676_v38, 0.0  ;;  %v258_v4 = vadd.s32 32, %v185_v8  ;;  %v222_v5 = vadd.s32 16, %v185_v8  ;;  %v544_v16 = vld [vmem:[%s182_s20 + $0x20] sm:$0xff] }
   0xf   : > { %v95_v25 = vadd.f32 %v94_v23, %v85_v18  ;;  %v125_v27 = vsel %vm124_vm6, %v117_v22, 0.0  ;;  %v204_v7 = vadd.s32 8, %v185_v8  ;;  %v240_v10 = vadd.s32 24, %v185_v8 }
  0x10   : > { %v126_v29 = vmul.f32 %v125_v27, %v125_v27  ;;  %v149_v44 = vmax.f32 %v148_v39, 0.0  ;;  %vm260_vm13 = vcmp.gt.s32.totalorder %v258_v4, %v660_v9  ;;  %vm261_vm14 = vcmp.lt.s32.totalorder %v258_v4, 36 }
  0x11   : > { %v105_v28 = vadd.f32 %v104_v24, %v95_v25  ;;  %vm189_vm15 = vcmp.gt.s32.totalorder %v185_v8, %v660_v9  ;;  %vm224_vm0 = vcmp.gt.s32.totalorder %v222_v5, %v660_v9  ;;  %vm206_vm1 = vcmp.gt.s32.totalorder %v204_v7, %v660_v9  ;;  %vm262_vm3 = vmand %vm260_vm13, %vm261_vm14 }
  0x12   : > { %vm242_vm2 = vcmp.gt.s32.totalorder %v240_v10, %v660_v9  ;;  %v701_v15 = vand.u32 127, %v79_v6  ;;  %v190_v17 = vsel %vm189_vm15, %v186_v11, 0.0  ;;  %v225_v18 = vsel %vm224_vm0, %v542_v12, 0.0 }
  0x13   : > { %v115_v30 = vadd.f32 %v114_v26, %v105_v28  ;;  %v207_v19 = vsel %vm206_vm1, %v541_v13, 0.0  ;;  %v243_v20 = vsel %vm242_vm2, %v543_v14, 0.0  ;;  %v263_v23 = vsel %vm262_vm3, %v544_v16, 0.0 }
  0x14   : > { %vm706_vm4 = vcmp.eq.s32.totalorder %v701_v15, %v660_v9  ;;  %v296_v8 = vmov %v657_v8 }
  0x15   : > { %v127_v31 = vadd.f32 %v126_v29, %v115_v30 }
  0x17   : > { %v128_v32 = vrot.slane %v127_v31, 4 }
  0x19   : > { %v129_v33 = vadd.f32 %v128_v32, %v127_v31 }
  0x1b   : > { %v130_v34 = vrot.slane %v129_v33, 2 }
  0x1d   : > { %v131_v35 = vadd.f32 %v130_v34, %v129_v33 }
  0x1f   : > { %v132_v36 = vrot.slane %v131_v35, 1 }
  0x21   : > { %v672_v37 = vadd.f32 %v132_v36, %v131_v35 }
  0x23   : > { %576 = vrsqrt.f32 %v672_v37  ;;  %vm136_vm7 = vcmp.eq.f32.partialorder %v672_v37, inf  ;;  %v139_v41 = vand.u32 2147483648, %v672_v37  ;;  %vm138_vm8 = vcmp.eq.f32.partialorder %v672_v37, 0.0 }
  0x2d   : > { %v577_v40 = vpop.eup %576 }
  0x2e   : > { %v135_v42 = vmul.f32 %v577_v40, %v672_v37 }
  0x30   : > { %v137_v43 = vsel %vm136_vm7, %v672_v37, %v135_v42  ;;  %v289_v37 = vld [vmem:[#allocation2] ss:$0 sm:$0xff] }
  0x31   : > { %v140_v45 = vsel %vm138_vm8, %v139_v41, %v137_v43 }
  0x32   : > { %v150_v46 = vand.u32 2147483647, %v140_v45 }
  0x34   : > { %v151_v47 = vmax.f32 %v149_v44, %v150_v46 }
  0x36   : > { %578 = vrcp.f32 %v151_v47  ;;  %vm163_vm11 = vcmp.eq.f32.partialorder %v151_v47, 0.0 }
  0x40   : > { %v579_v48 = vpop.eup %578 }
  0x41   : > { %v153_v49 = vmul.f32 %v579_v48, %v148_v39  ;;  %v156_v50 = vmul.f32 0.0, %v579_v48  ;;  %v160_v51 = vmul.f32 %v579_v48, %v150_v46 }
  0x43   : > { %v154_v52 = vmul.f32 %v153_v49, %v153_v49  ;;  %v157_v53 = vmul.f32 %v156_v50, %v156_v50  ;;  %v161_v54 = vmul.f32 %v160_v51, %v160_v51  ;;  %v619_v51 = vmov 1.0  }
  0x45   : > { %v158_v55 = vadd.f32 %v157_v53, %v154_v52  ;;  %v299_v52 = vld [vmem:[%s737_s22] sm:$0xff]  ;;  %v546_v53 = vld [vmem:[%s737_s22 + $0x8] sm:$0xff] }
  0x47   : > { %v162_v56 = vadd.f32 %v161_v54, %v158_v55  ;;  %v548_v54 = vld [vmem:[%s737_s22 + $0x10] sm:$0xff] }
  0x49   : > { %580 = vrsqrt.f32 %v162_v56  ;;  %vm166_vm9 = vcmp.eq.f32.partialorder %v162_v56, inf  ;;  %v169_v58 = vand.u32 2147483648, %v162_v56  ;;  %vm168_vm10 = vcmp.eq.f32.partialorder %v162_v56, 0.0 }
  0x53   : > { %v581_v57 = vpop.eup %580 }
  0x54   : > { %v165_v59 = vmul.f32 %v581_v57, %v162_v56 }
  0x56   : > { %v167_v60 = vsel %vm166_vm9, %v162_v56, %v165_v59 }
  0x57   : > { %v170_v61 = vsel %vm168_vm10, %v169_v58, %v167_v60  ;;  %v322_v60 = vadd.s32 32, %v296_v8  ;;  %v341_v8 = vmov %v657_v8 }
  0x58   : > { %v171_v62 = vmul.f32 %v170_v61, %v151_v47  ;;  %vm358_vm6 = vcmp.ge.s32.totalorder %v341_v8, %v660_v9 }
  0x59   : > { %vm328_vm5 = vcmp.lt.s32.totalorder %v322_v60, 36 }
  0x5a   : > { %v172_v63 = vsel %vm163_vm11, 0.0, %v171_v62  ;;  %v552_v62 = vld [vmem:[%s737_s22 + $0x20] sm:$0xff] }
  0x5b   : > { %v174_v0 = vxor.u32 2147483648, %v172_v63 }
  0x5d   : > { %v175_v1 = vsel %vm173_vm12, %v172_v63, %v174_v0  ;;  %v550_v0 = vld [vmem:[%s737_s22 + $0x18] sm:$0xff]  ;;  %s754_s22 = smov %s737_s22  ;;  %vm780_vm12 = vcmp.gt.s32.totalorder %v701_v15, %v660_v9 }
  0x5e   : > { %v690_v2 = vsel %vm138_vm8, %v676_v38, %v175_v1  ;;  %582 = vrcp.f32 %v175_v1  ;;  %v176_v21 = vsub.f32 %v175_v1, %v676_v38  ;;  %s446_s24 = scalar_lea.vmem %s754_s22, %s616_s19  ;;  %s77_s19 = sadd.s32 1, %s616_s19  }
  0x5f   : > { %v181_v3 = vsub.f32 %v676_v38, %v690_v2  ;;  %p74_p0 = scmp.ge.s32.totalorder %s77_s19, 8  }
  0x60   :  { %s620_s29 = smov (%p74_p0), [#allocation3]  }
  0x61   : > { %584 = vrcp.f32 %v181_v3  ;;  %s514_s30 = sshll.u32 (%p74_p0), %s620_s29, 4  ;;  %s515_s30 = int_to_ptr.vmem [resolvable:$true] %s514_s30 }
  0x62   :  { %s586_s9 = scalar_lea.vmem (%p74_p0), %s515_s30, 16  ;;  %s590_s10 = scalar_lea.vmem (%p74_p0), %s515_s30, 32 }
  0x63   :  { %p587_p1 = scmp.ne.s32.totalorder (%p74_p0), %s515_s30, %s586_s9  ;;  %p591_p2 = scmp.lt.s32.totalorder (%p74_p0), %s515_s30, %s515_s30 }
  0x64   :  { %p592_p3 = scmp.lt.s32.totalorder (%p74_p0), %s590_s10, %s586_s9 }
  0x66   :  { %p593_p4 = por (%p74_p0), %p592_p3, %p591_p2 }
  0x68   : > { %v583_v22 = vpop.eup %582  ;;  %p594_p5 = pnand (%p74_p0), %p593_p4, %p587_p1 }
  0x69   : > { %v178_v30 = vmul.f32 %v583_v22, %v176_v21  ;;  %v404_v21 = vadd.s32 24, %v341_v8 }
  0x6b   : > { %v585_v24 = vpop.eup %584  ;;  %v180_v41 = vsel %vm138_vm8, 0.0, %v178_v30  ;;  %vm421_vm10 = vcmp.ge.s32.totalorder %v404_v21, %v660_v9 }
  0x6c   : > { %v192_v26 = vmul.f32 %v585_v24, %v190_v17  ;;  %v227_v6 = vmul.f32 %v585_v24, %v225_v18  ;;  %v209_v27 = vmul.f32 %v585_v24, %v207_v19  ;;  %v245_v28 = vmul.f32 %v585_v24, %v243_v20  ;;  %vm795_vm15 = vmand %vm706_vm4, %vm421_vm10 }
  0x6d   : > { %v265_v29 = vmul.f32 %v585_v24, %v263_v23  ;;  %v282_v43 = vsel %vm706_vm4, %v180_v41, 0.0  ;;  %v362_v18 = vadd.s32 8, %v341_v8  ;;  %v383_v20 = vadd.s32 16, %v341_v8  ;;  %v348_v23 = vld [vmem:[%s754_s22] sm:$0xff]  ;;  %v554_v24 = vld [vmem:[%s754_s22 + $0x8] sm:$0xff] }
  0x6e   : > { %v193_v31 = vsel %vm138_vm8, 0.0, %v192_v26  ;;  %v228_v32 = vsel %vm138_vm8, 0.0, %v227_v6  ;;  %v210_v33 = vsel %vm138_vm8, 0.0, %v209_v27  ;;  %v246_v34 = vsel %vm138_vm8, 0.0, %v245_v28  ;;  %v557_v26 = vld [vmem:[%s754_s22 + $0x10] sm:$0xff] }
  0x6f   : > { %v198_v35 = vsel %vm706_vm4, %v193_v31, 0.0  ;;  %v233_v36 = vsel %vm706_vm4, %v228_v32, 0.0  ;;  %v215_v38 = vsel %vm706_vm4, %v210_v33, 0.0  ;;  %v251_v39 = vsel %vm706_vm4, %v246_v34, 0.0 }
  0x70   : > { %199 = vadd.xlane.f32.xlu0 %v198_v35  ;;  %234 = vadd.xlane.f32.xlu1 %v233_v36  ;;  %v266_v40 = vsel %vm138_vm8, 0.0, %v265_v29  ;;  %vm379_vm7 = vcmp.ge.s32.totalorder %v362_v18, %v660_v9  ;;  %v425_v6 = vadd.s32 32, %v341_v8  ;;  %vm764_vm8 = vmand %vm706_vm4, %vm358_vm6  ;;  %vm400_vm9 = vcmp.ge.s32.totalorder %v383_v20, %v660_v9  ;;  %v560_v29 = vld [vmem:[%s754_s22 + $0x18] sm:$0xff]  ;;  %v563_v35 = vld [vmem:[%s754_s22 + $0x20] sm:$0xff] }
  0x71   : > { %v271_v42 = vsel %vm706_vm4, %v266_v40, 0.0  ;;  %vm773_vm11 = vmand %vm706_vm4, %vm379_vm7 }
  0x72   : > { %vm788_vm13 = vmand %vm706_vm4, %vm400_vm9  ;;  %vm442_vm14 = vcmp.ge.s32.totalorder %v425_v6, %v660_v9 }
  0x73   : > { %vm443_vm0 = vmand %vm706_vm4, %vm442_vm14 }
  0x74   : > { %216 = vadd.xlane.f32.xlu0 %v215_v38  ;;  %252 = vadd.xlane.f32.xlu1 %v251_v39 }
  0x78   : > { %272 = vadd.xlane.f32.xlu0 %v271_v42  ;;  %283 = vadd.xlane.f32.xlu1 %v282_v43 }
  0xfd   : > { %v200_v44 = vpop.xlane.xlu0 %199  ;;  %v235_v45 = vpop.xlane.xlu1 %234 }
  0xfe   : > { %201 = vst [vmem:[#allocation5] sm:$0xff] %v200_v44  ;;  %237 = vst [vmem:[#allocation5 + $0x10] sm:$0xff] %v235_v45 }
 0x101   : > { %v217_v46 = vpop.xlane.xlu0 %216  ;;  %v253_v47 = vpop.xlane.xlu1 %252 }
 0x102   : > { %219 = vst [vmem:[#allocation5 + $0x8] sm:$0xff] %v217_v46  ;;  %255 = vst [vmem:[#allocation5 + $0x18] sm:$0xff] %v253_v47 }
 0x105   : > { %v273_v48 = vpop.xlane.xlu0 %272  ;;  %v284_v49 = vpop.xlane.xlu1 %283 }
 0x106   : > { %275 = vst [vmem:[#allocation5 + $0x20] sm:$0xff] %v273_v48  ;;  %v290_v50 = vsel %vm706_vm4, %v284_v49, %v289_v37 }
 0x107   : > { %277 = vst [vmem:[%s276_s21] sm:$0x1] %v619_v51  ;;  %291 = vst [vmem:[#allocation2] sm:$0x1] %v290_v50 }
 0x10e   : > { %v298_v55 = vld [vmem:[%s739_s23] sm:$0xff]  ;;  %v545_v56 = vld [vmem:[%s739_s23 + $0x8] sm:$0xff]  ;;  %v547_v57 = vld [vmem:[%s739_s23 + $0x10] sm:$0xff] }
 0x10f   : > { %v300_v58 = vmul.f32 %v299_v52, %v298_v55  ;;  %v306_v59 = vmul.f32 %v546_v53, %v545_v56  ;;  %v551_v61 = vld [vmem:[%s739_s23 + $0x20] sm:$0xff]  ;;  %v549_v63 = vld [vmem:[%s739_s23 + $0x18] sm:$0xff]  ;;  %v313_v3 = vmul.f32 %v548_v54, %v547_v57  ;;  %s338_s23 = smov %s739_s23 }
 0x110   : > { %v327_v4 = vmul.f32 %v552_v62, %v551_v61  ;;  %v320_v7 = vmul.f32 %v550_v0, %v549_v63  ;;  %v346_v27 = vld [vmem:[%s338_s23] sm:$0xff]  ;;  %v553_v31 = vld [vmem:[%s338_s23 + $0x8] sm:$0xff]  ;;  %v556_v32 = vld [vmem:[%s338_s23 + $0x10] sm:$0xff] }
 0x111   : > { %v307_v1 = vadd.f32 %v306_v59, %v300_v58  ;;  %v559_v33 = vld [vmem:[%s338_s23 + $0x18] sm:$0xff]  ;;  %v562_v34 = vld [vmem:[%s338_s23 + $0x20] sm:$0xff]  ;;  %v457_v59 = vld [vmem:[#allocation2] sm:$0x1] (%p74_p0) }
 0x112   : > { %v329_v11 = vsel %vm328_vm5, %v327_v4, 0.0  ;;  %459 = vst [vmem:[#allocation3] sm:$0x1] (%p74_p0), %v457_v59 }
 0x113   : > { %v314_v5 = vadd.f32 %v313_v3, %v307_v1 }
 0x115   : > { %v321_v10 = vadd.f32 %v320_v7, %v314_v5 }
 0x117   : > { %v330_v12 = vadd.f32 %v329_v11, %v321_v10 }
 0x119   : > { %v331_v13 = vrot.slane %v330_v12, 4 }
 0x11b   : > { %v332_v14 = vadd.f32 %v331_v13, %v330_v12 }
 0x11d   : > { %v333_v16 = vrot.slane %v332_v14, 2 }
 0x11f   : > { %v334_v17 = vadd.f32 %v333_v16, %v332_v14 }
 0x121   : > { %v335_v19 = vrot.slane %v334_v17, 1 }
 0x123   : > { %v336_v22 = vadd.f32 %v335_v19, %v334_v17 }
 0x125   : > { %v342_v30 = vmul.f32 %v336_v22, %v284_v49 }
 0x127   : > { %v347_v36 = vmul.f32 %v346_v27, %v342_v30  ;;  %v367_v38 = vmul.f32 %v553_v31, %v342_v30  ;;  %v388_v39 = vmul.f32 %v556_v32, %v342_v30  ;;  %v409_v40 = vmul.f32 %v559_v33, %v342_v30 }
 0x128   : > { %v430_v43 = vmul.f32 %v562_v34, %v342_v30 }
 0x129   : > { %v351_v15 = vsub.f32 %v348_v23, %v347_v36  ;;  %v372_v45 = vsub.f32 %v554_v24, %v367_v38  ;;  %v393_v46 = vsub.f32 %v557_v26, %v388_v39  ;;  %v414_v47 = vsub.f32 %v560_v29, %v409_v40 }
 0x12a   : > { %v435_v37 = vsub.f32 %v563_v35, %v430_v43 }
 0x12b   : > { %v352_v9 = vsel %vm780_vm12, %v351_v15, %v348_v23  ;;  %v373_v48 = vsel %vm780_vm12, %v372_v45, %v554_v24  ;;  %v394_v49 = vsel %vm780_vm12, %v393_v46, %v557_v26  ;;  %v415_v50 = vsel %vm780_vm12, %v414_v47, %v560_v29 }
 0x12c   : > { %v360_v51 = vsel %vm764_vm8, %v346_v27, %v352_v9  ;;  %v381_v52 = vsel %vm773_vm11, %v553_v31, %v373_v48  ;;  %v402_v53 = vsel %vm788_vm13, %v556_v32, %v394_v49  ;;  %v423_v54 = vsel %vm795_vm15, %v559_v33, %v415_v50 }
 0x12d   : > { %361 = vst [vmem:[%s754_s22] sm:$0xff] %v360_v51  ;;  %555 = vst [vmem:[%s754_s22 + $0x8] sm:$0xff] %v381_v52  ;;  %v436_v55 = vsel %vm780_vm12, %v435_v37, %v563_v35 }
 0x12e   : > { %558 = vst [vmem:[%s754_s22 + $0x10] sm:$0xff] %v402_v53  ;;  %561 = vst [vmem:[%s754_s22 + $0x18] sm:$0xff] %v423_v54  ;;  %v444_v56 = vsel %vm443_vm0, %v562_v34, %v436_v55 }
 0x12f   : > { %564 = vst [vmem:[%s754_s22 + $0x20] sm:$0xff] %v444_v56 }
 0x132   :  { %76 = sbr.rel (!%p74_p0) target bundleno = 5 (0x5), region = 141 }
 0x136   : > { %v447_v57 = vld [vmem:[%s446_s24] ss:$0 sm:$0xff] }
 0x137   : > { %v452_v58 = vsel %vm706_vm4, %v690_v2, %v447_v57 }
 0x138   : > { %453 = vst [vmem:[%s446_s24] sm:$0x1] %v452_v58 }
 0x13f   :  { %v495_v60 = vld [vmem:[#allocation1] sm:$0xff]  ;;  %v497_v61 = vld [vmem:[#allocation1 + $0x8] sm:$0xff]  ;;  %v499_v2 = vld [vmem:[#allocation1 + $0x10] sm:$0xff] }
 0x140   :  { %496 = vst [vmem:[%s860_s1] sm:$0xff] %v495_v60  ;;  %498 = vst [vmem:[%s860_s1 + $0x8] sm:$0xff] %v497_v61  ;;  %v501_v25 = vld [vmem:[#allocation1 + $0x18] sm:$0xff]  ;;  %v503_v62 = vld [vmem:[#allocation1 + $0x20] sm:$0xff] }
 0x141   :  { %500 = vst [vmem:[%s860_s1 + $0x10] sm:$0xff] %v499_v2  ;;  %502 = vst [vmem:[%s860_s1 + $0x18] sm:$0xff] %v501_v25 }
 0x142   :  { %504 = vst [vmem:[%s860_s1 + $0x20] sm:$0xff] %v503_v62 }
 0x143   :  { %597 = shalt.err (!%p594_p5)
}
 0x144   :  { %s598_s13 = scalar_lea.hbm %s861_s2, 16 }
 0x145   :  { %p599_p6 = scmp.ne.s32.totalorder %s861_s2, %s598_s13  ;;  %p602_p7 = scmp.lt.u32.totalorder %s598_s13, %s861_s2 }
 0x147   :  { %p604_p8 = pnand %p602_p7, %p599_p6 }
 0x149   :  { %607 = shalt.err (!%p604_p8)
}
 0x14a   :  { %517 = dma.vmem_to_hbm [thread:$0]  %s515_s30, 16, %s861_s2, [#allocation4]  }
 0x14b   :  { %612 = dma.done.wait [#allocation4], 16  }
 0x14c   :  { %613 = vsyncadd [#allocation4], 4294967280 }
 0x14d   :  { %521 = vsyncpa [#allocation4], 1 }

// kernel: custom-call.84
= control target key start
LH: loop header
LB: loop body
LE: loop exit
PB: predicated region body
PF: predicated region fallthrough
CT: control target
= control target key end

     0   :  { %v395_v2 = vmov 0.0   ;;  %s418_s13 = smov 0   ;;  %s502_s0 = inlined_call_operand.vmem [shape: f32[16,8], index: 0, kind: input, shape index: {}]   ;;  %s503_s1 = inlined_call_operand.vmem [shape: f32[16,8], index: 1, kind: output, shape index: {0}]   ;;  %s504_s2 = inlined_call_operand.vmem [shape: f32[8], index: 2, kind: output, shape index: {1}]  }
   0x1   :  { %v33_v0 = vld [vmem:[%s502_s0] sm:$0xff]  ;;  %v35_v1 = vld [vmem:[%s502_s0 + $0x8] sm:$0xff]  ;;  %46 = vst [vmem:[#allocation2] sm:$0x1] %v395_v2 }
   0x2   :  { %41 = vst [vmem:[#allocation1] sm:$0xff] %v33_v0  ;;  %45 = vst [vmem:[#allocation1 + $0x8] sm:$0xff] %v35_v1 }
   0x3 LB: > { %v54_v3 = vlaneseq  ;;  %v427_v6 = vstv %s393_s13  ;;  %s91_s0 = scalar_lea.vmem [#allocation1], %s393_s13  ;;  %s127_s14 = smov [#allocation1]  ;;  %s393_s13 = sphi %s418_s13, %s52_s13  }
   0x4   : > { %s167_s15 = scalar_lea.vmem [#allocation4], %s393_s13  ;;  %s183_s16 = smov [#allocation1] }
   0x5   : > { %v424_v5 = vshrl.u32 %v54_v3, 7  ;;  %v453_v54 = vand.u32 127, %v54_v3  ;;  %s184_s17 = smov [#allocation4] }
   0x7   : > { %vm58_vm0 = vcmp.gt.s32.totalorder %v424_v5, %v427_v6  ;;  %v65_v8 = vadd.s32 8, %v424_v5  ;;  %v130_v5 = vmov %v424_v5  ;;  %vm457_vm12 = vcmp.eq.s32.totalorder %v453_v54, %v427_v6 }
   0x8   : > { %v149_v50 = vadd.s32 8, %v130_v5  ;;  %vm134_vm10 = vcmp.gt.s32.totalorder %v130_v5, %v427_v6  ;;  %v187_v5 = vmov %v424_v5 }
   0x9   : > { %v53_v4 = vld [vmem:[#allocation1] sm:$0xff]  ;;  %v62_v7 = vld [vmem:[#allocation1 + $0x8] sm:$0xff]  ;;  %vm67_vm1 = vcmp.gt.s32.totalorder %v65_v8, %v427_v6 }
   0xa   : > { %v59_v9 = vsel %vm58_vm0, %v53_v4, 0.0  ;;  %v70_v11 = vsel %vm67_vm1, %v62_v7, 0.0  ;;  %v92_v20 = vld [vmem:[%s91_s0] ss:$0 sm:$0xff]  ;;  %vm151_vm8 = vcmp.gt.s32.totalorder %v149_v50, %v427_v6  ;;  %vm152_vm9 = vcmp.lt.s32.totalorder %v149_v50, 16  ;;  %v361_v53 = vld [vmem:[%s127_s14 + $0x8] sm:$0xff] }
   0xb   : > { %v60_v10 = vmul.f32 %v59_v9, %v59_v9  ;;  %v71_v12 = vmul.f32 %v70_v11, %v70_v11  ;;  %v93_v21 = vand.u32 2147483647, %v92_v20  ;;  %vm118_vm7 = vcmp.lt.f32.partialorder %v92_v20, 0.0  ;;  %v131_v52 = vld [vmem:[%s127_s14] sm:$0xff]  ;;  %vm153_vm11 = vmand %vm151_vm8, %vm152_vm9  ;;  %v180_v7 = vld [vmem:[#allocation2] ss:$0 sm:$0xff] }
   0xc   : > { %v135_v56 = vsel %vm134_vm10, %v131_v52, 0.0  ;;  %v154_v57 = vsel %vm153_vm11, %v361_v53, 0.0  ;;  %vm220_vm0 = vcmp.gt.s32.totalorder %v453_v54, %v427_v6 }
   0xd   : > { %v72_v13 = vadd.f32 %v71_v12, %v60_v10  ;;  %v94_v26 = vmax.f32 %v93_v21, 0.0  ;;  %v396_v12 = vmov 1.0  }
   0xf   : > { %v73_v14 = vrot.slane %v72_v13, 4 }
  0x11   : > { %v74_v15 = vadd.f32 %v73_v14, %v72_v13  ;;  %v192_v13 = vadd.s32 8, %v187_v5  ;;  %v190_v14 = vld [vmem:[%s183_s16] sm:$0xff]  ;;  %v211_v5 = vmov %v424_v5 }
  0x12   : > { %vm228_vm14 = vcmp.ge.s32.totalorder %v211_v5, %v427_v6 }
  0x13   : > { %v75_v16 = vrot.slane %v74_v15, 2  ;;  %vm198_vm13 = vcmp.lt.s32.totalorder %v192_v13, 16  ;;  %vm229_vm1 = vmand %vm457_vm12, %vm228_vm14 }
  0x15   : > { %v76_v17 = vadd.f32 %v75_v16, %v74_v15  ;;  %v363_v15 = vld [vmem:[%s183_s16 + $0x8] sm:$0xff]  ;;  %s207_s16 = smov %s183_s16 }
  0x16   : > { %s253_s18 = scalar_lea.vmem %s207_s16, %s393_s13  ;;  %s52_s13 = sadd.s32 1, %s393_s13  }
  0x17   : > { %v77_v18 = vrot.slane %v76_v17, 1  ;;  %p49_p0 = scmp.ge.s32.totalorder %s52_s13, 8  }
  0x19   : > { %v433_v19 = vadd.f32 %v77_v18, %v76_v17 }
  0x1b   : > { %377 = vrsqrt.f32 %v433_v19  ;;  %vm81_vm2 = vcmp.eq.f32.partialorder %v433_v19, inf  ;;  %v84_v23 = vand.u32 2147483648, %v433_v19  ;;  %vm83_vm3 = vcmp.eq.f32.partialorder %v433_v19, 0.0 }
  0x25   : > { %v378_v22 = vpop.eup %377 }
  0x26   : > { %v80_v24 = vmul.f32 %v378_v22, %v433_v19 }
  0x28   : > { %v82_v25 = vsel %vm81_vm2, %v433_v19, %v80_v24 }
  0x29   : > { %v85_v27 = vsel %vm83_vm3, %v84_v23, %v82_v25 }
  0x2a   : > { %v95_v28 = vand.u32 2147483647, %v85_v27  ;;  %v232_v27 = vadd.s32 8, %v211_v5 }
  0x2c   : > { %v96_v29 = vmax.f32 %v94_v26, %v95_v28  ;;  %vm249_vm15 = vcmp.ge.s32.totalorder %v232_v27, %v427_v6 }
  0x2d   : > { %vm250_vm2 = vmand %vm457_vm12, %vm249_vm15 }
  0x2e   : > { %379 = vrcp.f32 %v96_v29  ;;  %vm108_vm6 = vcmp.eq.f32.partialorder %v96_v29, 0.0 }
  0x38   : > { %v380_v30 = vpop.eup %379 }
  0x39   : > { %v98_v31 = vmul.f32 %v380_v30, %v93_v21  ;;  %v101_v32 = vmul.f32 0.0, %v380_v30  ;;  %v105_v33 = vmul.f32 %v380_v30, %v95_v28 }
  0x3b   : > { %v99_v34 = vmul.f32 %v98_v31, %v98_v31  ;;  %v102_v35 = vmul.f32 %v101_v32, %v101_v32  ;;  %v106_v36 = vmul.f32 %v105_v33, %v105_v33  ;;  %v365_v33 = vld [vmem:[%s207_s16 + $0x8] sm:$0xff] }
  0x3d   : > { %v103_v37 = vadd.f32 %v102_v35, %v99_v34 }
  0x3f   : > { %v107_v38 = vadd.f32 %v106_v36, %v103_v37 }
  0x41   : > { %381 = vrsqrt.f32 %v107_v38  ;;  %vm111_vm4 = vcmp.eq.f32.partialorder %v107_v38, inf  ;;  %v114_v40 = vand.u32 2147483648, %v107_v38  ;;  %vm113_vm5 = vcmp.eq.f32.partialorder %v107_v38, 0.0 }
  0x4b   : > { %v382_v39 = vpop.eup %381 }
  0x4c   : > { %v110_v41 = vmul.f32 %v382_v39, %v107_v38 }
  0x4e   : > { %v112_v42 = vsel %vm111_vm4, %v107_v38, %v110_v41 }
  0x4f   : > { %v115_v43 = vsel %vm113_vm5, %v114_v40, %v112_v42 }
  0x50   : > { %v116_v44 = vmul.f32 %v115_v43, %v96_v29  ;;  %v218_v29 = vld [vmem:[%s207_s16] sm:$0xff] }
  0x52   : > { %v117_v45 = vsel %vm108_vm6, 0.0, %v116_v44 }
  0x53   : > { %v119_v46 = vxor.u32 2147483648, %v117_v45 }
  0x55   : > { %v120_v47 = vsel %vm118_vm7, %v117_v45, %v119_v46 }
  0x56   : > { %v447_v48 = vsel %vm83_vm3, %v92_v20, %v120_v47  ;;  %383 = vrcp.f32 %v120_v47  ;;  %v121_v51 = vsub.f32 %v120_v47, %v92_v20 }
  0x57   : > { %v126_v49 = vsub.f32 %v92_v20, %v447_v48 }
  0x59   : > { %385 = vrcp.f32 %v126_v49 }
  0x60   : > { %v384_v55 = vpop.eup %383 }
  0x61   : > { %v123_v58 = vmul.f32 %v384_v55, %v121_v51 }
  0x63   : > { %v386_v59 = vpop.eup %385  ;;  %v125_v61 = vsel %vm83_vm3, 0.0, %v123_v58 }
  0x64   : > { %v137_v62 = vmul.f32 %v386_v59, %v135_v56  ;;  %v156_v63 = vmul.f32 %v386_v59, %v154_v57  ;;  %v173_v0 = vsel %vm457_vm12, %v125_v61, 0.0 }
  0x65   : > { %174 = vadd.xlane.f32.xlu1 %v173_v0 }
  0x66   : > { %v138_v1 = vsel %vm83_vm3, 0.0, %v137_v62  ;;  %v157_v2 = vsel %vm83_vm3, 0.0, %v156_v63 }
  0x67   : > { %v143_v3 = vsel %vm457_vm12, %v138_v1, 0.0  ;;  %v162_v4 = vsel %vm457_vm12, %v157_v2, 0.0 }
  0x68   : > { %144 = vadd.xlane.f32.xlu0 %v143_v3 }
  0x6c   : > { %163 = vadd.xlane.f32.xlu0 %v162_v4 }
  0xf2   : > { %v175_v8 = vpop.xlane.xlu1 %174 }
  0xf3   : > { %v181_v9 = vsel %vm457_vm12, %v175_v8, %v180_v7 }
  0xf4   : > { %182 = vst [vmem:[#allocation2] sm:$0x1] %v181_v9 }
  0xf5   : > { %v145_v10 = vpop.xlane.xlu0 %144 }
  0xf6   : > { %146 = vst [vmem:[#allocation4] sm:$0xff] %v145_v10 }
  0xf9   : > { %v164_v11 = vpop.xlane.xlu0 %163 }
  0xfa   : > { %166 = vst [vmem:[#allocation4 + $0x8] sm:$0xff] %v164_v11 }
  0xfb   : > { %168 = vst [vmem:[%s167_s15] sm:$0x1] %v396_v12  ;;  %v264_v42 = vld [vmem:[#allocation2] sm:$0x1] (%p49_p0) }
  0xfc   :  { %266 = vst [vmem:[#allocation3] sm:$0x1] (%p49_p0), %v264_v42 }
 0x102   : > { %v189_v16 = vld [vmem:[%s184_s17] sm:$0xff]  ;;  %v362_v17 = vld [vmem:[%s184_s17 + $0x8] sm:$0xff]  ;;  %s208_s17 = smov %s184_s17 }
 0x103   : > { %v191_v18 = vmul.f32 %v190_v14, %v189_v16  ;;  %v197_v19 = vmul.f32 %v363_v15, %v362_v17  ;;  %v216_v31 = vld [vmem:[%s208_s17] sm:$0xff]  ;;  %v364_v32 = vld [vmem:[%s208_s17 + $0x8] sm:$0xff]  ;;  %v320_v45 = vld [vmem:[#allocation3] sm:$0x1] (%p49_p0) }
 0x104   :  { %321 = vst [vmem:[%s504_s2] sm:$0x1] (%p49_p0), %v320_v45 }
 0x105   : > { %v199_v20 = vsel %vm198_vm13, %v197_v19, 0.0 }
 0x106   : > { %v200_v21 = vadd.f32 %v199_v20, %v191_v18 }
 0x108   : > { %v201_v22 = vrot.slane %v200_v21, 4 }
 0x10a   : > { %v202_v23 = vadd.f32 %v201_v22, %v200_v21 }
 0x10c   : > { %v203_v24 = vrot.slane %v202_v23, 2 }
 0x10e   : > { %v204_v25 = vadd.f32 %v203_v24, %v202_v23 }
 0x110   : > { %v205_v26 = vrot.slane %v204_v25, 1 }
 0x112   : > { %v206_v28 = vadd.f32 %v205_v26, %v204_v25 }
 0x114   : > { %v212_v30 = vmul.f32 %v206_v28, %v175_v8 }
 0x116   : > { %v217_v34 = vmul.f32 %v216_v31, %v212_v30  ;;  %v237_v35 = vmul.f32 %v364_v32, %v212_v30 }
 0x118   : > { %v221_v36 = vsub.f32 %v218_v29, %v217_v34  ;;  %v242_v5 = vsub.f32 %v365_v33, %v237_v35 }
 0x11a   : > { %v222_v37 = vsel %vm220_vm0, %v221_v36, %v218_v29  ;;  %v243_v38 = vsel %vm220_vm0, %v242_v5, %v365_v33 }
 0x11b   : > { %v230_v39 = vsel %vm229_vm1, %v216_v31, %v222_v37  ;;  %v251_v40 = vsel %vm250_vm2, %v364_v32, %v243_v38 }
 0x11c   : > { %231 = vst [vmem:[%s207_s16] sm:$0xff] %v230_v39  ;;  %366 = vst [vmem:[%s207_s16 + $0x8] sm:$0xff] %v251_v40 }
 0x11f   :  { %51 = sbr.rel (!%p49_p0) target bundleno = 3 (0x3), region = 148 }
 0x123   : > { %v254_v41 = vld [vmem:[%s253_s18] ss:$0 sm:$0xff] }
 0x124   : > { %v259_v6 = vsel %vm457_vm12, %v447_v48, %v254_v41 }
 0x125   : > { %260 = vst [vmem:[%s253_s18] sm:$0x1] %v259_v6 }
 0x12c   :  { %v296_v43 = vld [vmem:[#allocation1] sm:$0xff]  ;;  %v298_v44 = vld [vmem:[#allocation1 + $0x8] sm:$0xff] }
 0x12d   :  { %297 = vst [vmem:[%s503_s1] sm:$0xff] %v296_v43  ;;  %299 = vst [vmem:[%s503_s1 + $0x8] sm:$0xff] %v298_v44 }

// kernel: custom-call.85
= control target key start
LH: loop header
LB: loop body
LE: loop exit
PB: predicated region body
PF: predicated region fallthrough
CT: control target
= control target key end

     0   :  { %s437_s6 = smov [#allocation0]   ;;  %s479_s0 = inlined_call_operand.vmem [shape: f32[8,8], index: 0, kind: input, shape index: {}]   ;;  %s480_s1 = inlined_call_operand.vmem [shape: f32[8,8], index: 1, kind: output, shape index: {}]  }
   0x1   :  { %s441_s9 = smov %s479_s0  }
   0x2 LB: > { %v49_v0 = vld [vmem:[%s443_s9] sm:$0xff]  ;;  %s51_s9 = scalar_lea.vmem %s443_s9, 8   ;;  %s443_s9 = sphi %s441_s9, %s51_s9   ;;  %s439_s6 = sphi %s437_s6, %s52_s6  }
   0x3   : > { %50 = vst [vmem:[%s439_s6] sm:$0xff] %v49_v0  ;;  %s52_s6 = scalar_lea.vmem %s439_s6, 8   ;;  %p46_p0 = scmp.gt.s32.totalorder %s51_s9, %s479_s0 }
   0x4   :  { %v64_v1 = vlaneseq (%p46_p0)  ;;  %vm78_vm0 = vcmask (%p46_p0), 64512   ;;  %s445_s13 = smov (%p46_p0), %s480_s1   ;;  %s449_s14 = smov (%p46_p0), [#allocation1]  }
   0x5   :  { %48 = sbr.rel (!%p46_p0) target bundleno = 2 (0x2), region = 87 }
   0x6   :  { %v65_v3 = vand.u32 (%p46_p0), 127, %v64_v1  ;;  %v67_v4 = vshrl.u32 (%p46_p0), %v64_v1, 7 }
   0x8   :  { %vm69_vm1 = vcmp.eq.s32.totalorder (%p46_p0), %v65_v3, %v67_v4  ;;  %vm73_vm2 = vcmp.eq.s32.totalorder (%p46_p0), %v65_v3, 0  ;;  %vm82_vm3 = vcmp.eq.s32.totalorder (%p46_p0), %v65_v3, 1  ;;  %vm93_vm4 = vcmp.eq.s32.totalorder (%p46_p0), %v65_v3, 2 }
   0x9   :  { %vm104_vm5 = vcmp.eq.s32.totalorder (%p46_p0), %v65_v3, 3  ;;  %vm115_vm6 = vcmp.eq.s32.totalorder (%p46_p0), %v65_v3, 4  ;;  %vm126_vm7 = vcmp.eq.s32.totalorder (%p46_p0), %v65_v3, 5  ;;  %vm137_vm8 = vcmp.eq.s32.totalorder (%p46_p0), %v65_v3, 6 }
   0xa   :  { %v77_v2 = vld [vmem:[#allocation0 + $0x1] ss:$0 sm:$0xff] (%p46_p0)  ;;  %v88_v10 = vld [vmem:[#allocation0 + $0x2] ss:$0 sm:$0xff] (%p46_p0)  ;;  %v99_v15 = vld [vmem:[#allocation0 + $0x3] ss:$0 sm:$0xff] (%p46_p0) }
   0xb   :  { %v70_v5 = vld [vmem:[#allocation0] sm:$0xff] (%p46_p0)  ;;  %v79_v6 = vsel (%p46_p0), %vm78_vm0, %v77_v2, 0.0  ;;  %v90_v11 = vsel (%p46_p0), %vm78_vm0, %v88_v10, 0.0  ;;  %v101_v16 = vsel (%p46_p0), %vm78_vm0, %v99_v15, 0.0  ;;  %vm148_vm9 = vcmp.eq.s32.totalorder (%p46_p0), %v65_v3, 7 }
   0xc   :  { %v74_v7 = vsel %vm73_vm2, %v70_v5, 1.0  ;;  %v110_v20 = vld [vmem:[#allocation0 + $0x4] ss:$0 sm:$0xff]  ;;  %v121_v25 = vld [vmem:[#allocation0 + $0x5] ss:$0 sm:$0xff] }
   0xd   :  { %v75_v8 = vsel %vm69_vm1, %v74_v7, 0.0  ;;  %v112_v21 = vsel %vm78_vm0, %v110_v20, 0.0  ;;  %v123_v26 = vsel %vm78_vm0, %v121_v25, 0.0  ;;  %v132_v30 = vld [vmem:[#allocation0 + $0x6] ss:$0 sm:$0xff] }
   0xe   :  { %v83_v9 = vmul.f32 %v79_v6, %v75_v8  ;;  %v134_v31 = vsel %vm78_vm0, %v132_v30, 0.0  ;;  %v143_v35 = vld [vmem:[#allocation0 + $0x7] ss:$0 sm:$0xff] }
   0xf   :  { %v145_v36 = vsel %vm78_vm0, %v143_v35, 0.0 }
  0x10   :  { %84 = vadd.xlane.f32.xlu0 %v83_v9 }
  0x9d   :  { %v85_v12 = vpop.xlane.xlu0 %84 }
  0x9e   :  { %v86_v13 = vsel %vm82_vm3, %v85_v12, %v75_v8 }
  0x9f   :  { %v94_v14 = vmul.f32 %v90_v11, %v86_v13 }
  0xa1   :  { %95 = vadd.xlane.f32.xlu0 %v94_v14 }
 0x12e   :  { %v96_v17 = vpop.xlane.xlu0 %95 }
 0x12f   :  { %v97_v18 = vsel %vm93_vm4, %v96_v17, %v86_v13 }
 0x130   :  { %v105_v19 = vmul.f32 %v101_v16, %v97_v18 }
 0x132   :  { %106 = vadd.xlane.f32.xlu1 %v105_v19 }
 0x1bf   :  { %v107_v22 = vpop.xlane.xlu1 %106 }
 0x1c0   :  { %v108_v23 = vsel %vm104_vm5, %v107_v22, %v97_v18 }
 0x1c1   :  { %v116_v24 = vmul.f32 %v112_v21, %v108_v23 }
 0x1c3   :  { %117 = vadd.xlane.f32.xlu1 %v116_v24 }
 0x250   :  { %v118_v27 = vpop.xlane.xlu1 %117 }
 0x251   :  { %v119_v28 = vsel %vm115_vm6, %v118_v27, %v108_v23 }
 0x252   :  { %v127_v29 = vmul.f32 %v123_v26, %v119_v28 }
 0x254   :  { %128 = vadd.xlane.f32.xlu0 %v127_v29 }
 0x2e1   :  { %v129_v32 = vpop.xlane.xlu0 %128 }
 0x2e2   :  { %v130_v33 = vsel %vm126_vm7, %v129_v32, %v119_v28 }
 0x2e3   :  { %v138_v34 = vmul.f32 %v134_v31, %v130_v33 }
 0x2e5   :  { %139 = vadd.xlane.f32.xlu1 %v138_v34 }
 0x372   :  { %v140_v37 = vpop.xlane.xlu1 %139 }
 0x373   :  { %v141_v38 = vsel %vm137_vm8, %v140_v37, %v130_v33 }
 0x374   :  { %v149_v39 = vmul.f32 %v145_v36, %v141_v38 }
 0x376   :  { %150 = vadd.xlane.f32.xlu0 %v149_v39 }
 0x403   :  { %v151_v40 = vpop.xlane.xlu0 %150 }
 0x404   :  { %v152_v41 = vsel %vm148_vm9, %v151_v40, %v141_v38  }
 0x405   :  { %153 = vst [vmem:[#allocation1] sm:$0xff] %v152_v41 }
 0x406 LB:  { %s451_s14 = sphi %s449_s14, %s203_s14   ;;  %s447_s13 = sphi %s445_s13, %s204_s13  }
 0x40c   : > { %v201_v42 = vld [vmem:[%s451_s14] sm:$0xff]  ;;  %s203_s14 = scalar_lea.vmem %s451_s14, 8  }
 0x40d   : > { %202 = vst [vmem:[%s447_s13] sm:$0xff] %v201_v42  ;;  %s204_s13 = scalar_lea.vmem %s447_s13, 8   ;;  %p198_p1 = scmp.gt.s32.totalorder %s203_s14, [#allocation1] }
 0x40f   :  { %200 = sbr.rel (!%p198_p1) target bundleno = 1030 (0x406), region = 109 }

// kernel: custom-call.86
= control target key start
LH: loop header
LB: loop body
LE: loop exit
PB: predicated region body
PF: predicated region fallthrough
CT: control target
= control target key end

     0   :  { %v264_v0 = vmov 0.0   ;;  %vm35_vm0 = vcmask 7168   ;;  %vm53_vm1 = vcmask 15368   ;;  %vm70_vm2 = vcmask 1047553   ;;  %s292_s0 = inlined_call_operand.vmem [shape: f32[8,8], index: 0, kind: input, shape index: {}]   ;;  %s293_s1 = inlined_call_operand.vmem [shape: f32[8,8], index: 1, kind: output, shape index: {}]  }
   0x1   :  { %34 = vst [vmem:[#allocation1] sm:$0xff] %v264_v0  ;;  %v278_v4 = vld [vmem:[%s292_s0] sm:$0xff]  ;;  %vm71_vm3 = vmand %vm53_vm1, %vm70_vm2  ;;  %vm75_vm4 = vcmask 23568   ;;  %vm92_vm5 = vcmask 1047554   ;;  %vm97_vm7 = vcmask 31768   ;;  %vm114_vm8 = vcmask 1047555  }
   0x2   :  { %30 = vst [vmem:[#allocation0] sm:$0xff] %v278_v4  ;;  %vm93_vm6 = vmand %vm75_vm4, %vm92_vm5  ;;  %vm119_vm10 = vcmask 39968   ;;  %vm136_vm11 = vcmask 1047556   ;;  %vm141_vm13 = vcmask 48168   ;;  %vm158_vm14 = vcmask 1047557  }
   0x3   :  { %vm115_vm9 = vmand %vm97_vm7, %vm114_vm8  ;;  %vm180_vm1 = vcmask 1047558   ;;  %vm202_vm4 = vcmask 1047559  }
   0x4   :  { %vm137_vm12 = vmand %vm119_vm10, %vm136_vm11 }
   0x5   :  { %vm159_vm15 = vmand %vm141_vm13, %vm158_vm14 }
   0x8   :  { %v36_v1 = vld [vmem:[#allocation1] ss:$0 sm:$0xff] }
   0x9   :  { %v38_v2 = vmul.f32 %v36_v1, %v36_v1  ;;  %v45_v3 = vmul.f32 0.0, %v36_v1  ;;  %v37_v5 = vld [vmem:[#allocation0] ss:$0 sm:$0xff]  ;;  %v57_v16 = vld [vmem:[#allocation0 + $0x1] ss:$0 sm:$0xff] }
   0xa   :  { %v79_v28 = vld [vmem:[#allocation0 + $0x2] ss:$0 sm:$0xff]  ;;  %v101_v40 = vld [vmem:[#allocation0 + $0x3] ss:$0 sm:$0xff]  ;;  %v123_v52 = vld [vmem:[#allocation0 + $0x4] ss:$0 sm:$0xff] }
   0xb   :  { %39 = vadd.xlane.f32.xlu0 %v38_v2  ;;  %v145_v0 = vld [vmem:[#allocation0 + $0x5] ss:$0 sm:$0xff] }
   0xf   :  { %46 = vadd.xlane.f32.xlu0 %v45_v3 }
  0x98   :  { %v40_v6 = vpop.xlane.xlu0 %39 }
  0x99   :  { %v41_v7 = vsub.f32 %v37_v5, %v40_v6 }
  0x9b   :  { %248 = vrsqrt.f32 %v41_v7 }
  0x9c   :  { %v47_v8 = vpop.xlane.xlu0 %46 }
  0x9d   :  { %v48_v9 = vsub.f32 %v278_v4, %v47_v8 }
  0xa5   :  { %v249_v10 = vpop.eup %248 }
  0xa6   :  { %v49_v11 = vmul.f32 %v249_v10, %v48_v9 }
  0xa8   :  { %v50_v12 = vsel %vm35_vm0, %v49_v11, 0.0  ;;  %vm163_vm0 = vcmask 56368  }
  0xa9   :  { %52 = vst [vmem:[#allocation1] sm:$0xff] %v50_v12  ;;  %vm181_vm2 = vmand %vm163_vm0, %vm180_vm1 }
  0xb0   :  { %v55_v13 = vld [vmem:[#allocation1 + $0x1] ss:$0 sm:$0xff] }
  0xb1   :  { %v58_v14 = vmul.f32 %v55_v13, %v55_v13  ;;  %v65_v15 = vmul.f32 %v55_v13, %v50_v12  ;;  %v167_v13 = vld [vmem:[#allocation0 + $0x6] ss:$0 sm:$0xff] }
  0xb3   :  { %59 = vadd.xlane.f32.xlu1 %v58_v14 }
  0xb7   :  { %66 = vadd.xlane.f32.xlu1 %v65_v15 }
 0x140   :  { %v60_v17 = vpop.xlane.xlu1 %59 }
 0x141   :  { %v61_v18 = vsub.f32 %v57_v16, %v60_v17 }
 0x143   :  { %250 = vrsqrt.f32 %v61_v18 }
 0x144   :  { %v67_v19 = vpop.xlane.xlu1 %66 }
 0x145   :  { %v68_v20 = vsub.f32 %v278_v4, %v67_v19 }
 0x14d   :  { %v251_v21 = vpop.eup %250 }
 0x14e   :  { %v69_v22 = vmul.f32 %v251_v21, %v68_v20 }
 0x150   :  { %v72_v23 = vsel %vm71_vm3, %v69_v22, 0.0  ;;  %vm185_vm3 = vcmask 64568  }
 0x151   :  { %v73_v24 = vadd.f32 %v72_v23, %v50_v12  ;;  %vm203_vm5 = vmand %vm185_vm3, %vm202_vm4 }
 0x153   :  { %74 = vst [vmem:[#allocation1] sm:$0xff] %v73_v24 }
 0x15a   :  { %v77_v25 = vld [vmem:[#allocation1 + $0x2] ss:$0 sm:$0xff] }
 0x15b   :  { %v87_v26 = vmul.f32 %v77_v25, %v73_v24  ;;  %v80_v27 = vmul.f32 %v77_v25, %v77_v25  ;;  %v189_v25 = vld [vmem:[#allocation0 + $0x7] ss:$0 sm:$0xff] }
 0x15d   :  { %88 = vadd.xlane.f32.xlu1 %v87_v26  ;;  %81 = vadd.xlane.f32.xlu0 %v80_v27 }
 0x1ea   :  { %v82_v29 = vpop.xlane.xlu0 %81  ;;  %v89_v31 = vpop.xlane.xlu1 %88 }
 0x1eb   :  { %v83_v30 = vsub.f32 %v79_v28, %v82_v29  ;;  %v90_v32 = vsub.f32 %v278_v4, %v89_v31 }
 0x1ed   :  { %252 = vrsqrt.f32 %v83_v30 }
 0x1f7   :  { %v253_v33 = vpop.eup %252 }
 0x1f8   :  { %v91_v34 = vmul.f32 %v253_v33, %v90_v32 }
 0x1fa   :  { %v94_v35 = vsel %vm93_vm6, %v91_v34, 0.0 }
 0x1fb   :  { %v95_v36 = vadd.f32 %v94_v35, %v73_v24 }
 0x1fd   :  { %96 = vst [vmem:[#allocation1] sm:$0xff] %v95_v36 }
 0x204   :  { %v99_v37 = vld [vmem:[#allocation1 + $0x3] ss:$0 sm:$0xff] }
 0x205   :  { %v109_v38 = vmul.f32 %v99_v37, %v95_v36  ;;  %v102_v39 = vmul.f32 %v99_v37, %v99_v37 }
 0x207   :  { %110 = vadd.xlane.f32.xlu1 %v109_v38  ;;  %103 = vadd.xlane.f32.xlu0 %v102_v39 }
 0x294   :  { %v104_v41 = vpop.xlane.xlu0 %103  ;;  %v111_v43 = vpop.xlane.xlu1 %110 }
 0x295   :  { %v105_v42 = vsub.f32 %v101_v40, %v104_v41  ;;  %v112_v44 = vsub.f32 %v278_v4, %v111_v43 }
 0x297   :  { %254 = vrsqrt.f32 %v105_v42 }
 0x2a1   :  { %v255_v45 = vpop.eup %254 }
 0x2a2   :  { %v113_v46 = vmul.f32 %v255_v45, %v112_v44 }
 0x2a4   :  { %v116_v47 = vsel %vm115_vm9, %v113_v46, 0.0 }
 0x2a5   :  { %v117_v48 = vadd.f32 %v116_v47, %v95_v36 }
 0x2a7   :  { %118 = vst [vmem:[#allocation1] sm:$0xff] %v117_v48 }
 0x2ae   :  { %v121_v49 = vld [vmem:[#allocation1 + $0x4] ss:$0 sm:$0xff] }
 0x2af   :  { %v131_v50 = vmul.f32 %v121_v49, %v117_v48  ;;  %v124_v51 = vmul.f32 %v121_v49, %v121_v49 }
 0x2b1   :  { %132 = vadd.xlane.f32.xlu1 %v131_v50  ;;  %125 = vadd.xlane.f32.xlu0 %v124_v51 }
 0x33e   :  { %v126_v53 = vpop.xlane.xlu0 %125  ;;  %v133_v55 = vpop.xlane.xlu1 %132 }
 0x33f   :  { %v127_v54 = vsub.f32 %v123_v52, %v126_v53  ;;  %v134_v56 = vsub.f32 %v278_v4, %v133_v55 }
 0x341   :  { %256 = vrsqrt.f32 %v127_v54 }
 0x34b   :  { %v257_v57 = vpop.eup %256 }
 0x34c   :  { %v135_v58 = vmul.f32 %v257_v57, %v134_v56 }
 0x34e   :  { %v138_v59 = vsel %vm137_vm12, %v135_v58, 0.0 }
 0x34f   :  { %v139_v60 = vadd.f32 %v138_v59, %v117_v48 }
 0x351   :  { %140 = vst [vmem:[#allocation1] sm:$0xff] %v139_v60 }
 0x358   :  { %v143_v61 = vld [vmem:[#allocation1 + $0x5] ss:$0 sm:$0xff] }
 0x359   :  { %v153_v62 = vmul.f32 %v143_v61, %v139_v60  ;;  %v146_v63 = vmul.f32 %v143_v61, %v143_v61 }
 0x35b   :  { %154 = vadd.xlane.f32.xlu1 %v153_v62  ;;  %147 = vadd.xlane.f32.xlu0 %v146_v63 }
 0x3e8   :  { %v148_v1 = vpop.xlane.xlu0 %147  ;;  %v155_v3 = vpop.xlane.xlu1 %154 }
 0x3e9   :  { %v149_v2 = vsub.f32 %v145_v0, %v148_v1  ;;  %v156_v5 = vsub.f32 %v278_v4, %v155_v3 }
 0x3eb   :  { %258 = vrsqrt.f32 %v149_v2 }
 0x3f5   :  { %v259_v6 = vpop.eup %258 }
 0x3f6   :  { %v157_v7 = vmul.f32 %v259_v6, %v156_v5 }
 0x3f8   :  { %v160_v8 = vsel %vm159_vm15, %v157_v7, 0.0 }
 0x3f9   :  { %v161_v9 = vadd.f32 %v160_v8, %v139_v60 }
 0x3fb   :  { %162 = vst [vmem:[#allocation1] sm:$0xff] %v161_v9 }
 0x402   :  { %v165_v10 = vld [vmem:[#allocation1 + $0x6] ss:$0 sm:$0xff] }
 0x403   :  { %v175_v11 = vmul.f32 %v165_v10, %v161_v9  ;;  %v168_v12 = vmul.f32 %v165_v10, %v165_v10 }
 0x405   :  { %176 = vadd.xlane.f32.xlu1 %v175_v11  ;;  %169 = vadd.xlane.f32.xlu0 %v168_v12 }
 0x492   :  { %v170_v14 = vpop.xlane.xlu0 %169  ;;  %v177_v16 = vpop.xlane.xlu1 %176 }
 0x493   :  { %v171_v15 = vsub.f32 %v167_v13, %v170_v14  ;;  %v178_v17 = vsub.f32 %v278_v4, %v177_v16 }
 0x495   :  { %260 = vrsqrt.f32 %v171_v15 }
 0x49f   :  { %v261_v18 = vpop.eup %260 }
 0x4a0   :  { %v179_v19 = vmul.f32 %v261_v18, %v178_v17 }
 0x4a2   :  { %v182_v20 = vsel %vm181_vm2, %v179_v19, 0.0 }
 0x4a3   :  { %v183_v21 = vadd.f32 %v182_v20, %v161_v9 }
 0x4a5   :  { %184 = vst [vmem:[#allocation1] sm:$0xff] %v183_v21 }
 0x4ac   :  { %v187_v22 = vld [vmem:[#allocation1 + $0x7] ss:$0 sm:$0xff] }
 0x4ad   :  { %v197_v23 = vmul.f32 %v187_v22, %v183_v21  ;;  %v190_v24 = vmul.f32 %v187_v22, %v187_v22 }
 0x4af   :  { %198 = vadd.xlane.f32.xlu1 %v197_v23  ;;  %191 = vadd.xlane.f32.xlu0 %v190_v24 }
 0x53c   :  { %v192_v26 = vpop.xlane.xlu0 %191  ;;  %v199_v28 = vpop.xlane.xlu1 %198 }
 0x53d   :  { %v193_v27 = vsub.f32 %v189_v25, %v192_v26  ;;  %v200_v29 = vsub.f32 %v278_v4, %v199_v28 }
 0x53f   :  { %262 = vrsqrt.f32 %v193_v27 }
 0x549   :  { %v263_v30 = vpop.eup %262 }
 0x54a   :  { %v201_v31 = vmul.f32 %v263_v30, %v200_v29 }
 0x54c   :  { %v204_v32 = vsel %vm203_vm5, %v201_v31, 0.0 }
 0x54d   :  { %v205_v33 = vadd.f32 %v204_v32, %v183_v21 }
 0x54f   :  { %206 = vst [vmem:[#allocation1] sm:$0xff] %v205_v33  ;;  %235 = vst [vmem:[%s293_s1] sm:$0xff] %v205_v33 }

// kernel: custom-call.87
= control target key start
LH: loop header
LB: loop body
LE: loop exit
PB: predicated region body
PF: predicated region fallthrough
CT: control target
= control target key end

     0   :  { %v34_v0 = vlaneseq  ;;  %v180_v9 = vmov -1.0   ;;  %s215_s0 = inlined_call_operand.vmem [shape: f32[1,8,8], index: 0, kind: input, shape index: {}]   ;;  %s216_s1 = inlined_call_operand.vmem [shape: f32[1,8,8], index: 1, kind: output, shape index: {}]  }
   0x1   :  { %v29_v1 = vld [vmem:[%s215_s0] sm:$0xff] }
   0x2   :  { %v194_v2 = vand.u32 127, %v34_v0  ;;  %v38_v3 = vshrl.u32 %v34_v0, 7 }
   0x4   :  { %vm36_vm0 = vcmp.lt.s32.totalorder %v194_v2, 8  ;;  %vm40_vm1 = vcmp.eq.s32.totalorder %v38_v3, %v194_v2  ;;  %vm45_vm2 = vcmp.ge.s32.totalorder %v38_v3, %v194_v2  ;;  %vm59_vm4 = vcmp.eq.s32.totalorder %v194_v2, 0 }
   0x5   :  { %v42_v4 = vsel %vm40_vm1, %v29_v1, 0.0  ;;  %vm46_vm3 = vmand %vm45_vm2, %vm36_vm0  ;;  %vm56_vm5 = vcmp.eq.s32.totalorder %v194_v2, %v38_v3  ;;  %v60_v10 = vsel %vm59_vm4, 1.0, %v180_v9  ;;  %vm67_vm6 = vcmp.eq.s32.totalorder %v194_v2, 1 }
   0x6   :  { %v47_v5 = vsel %vm46_vm3, %v29_v1, 0.0  ;;  %43 = vadd.xlane.f32.xlu0 %v42_v4  ;;  %v61_v11 = vsel %vm56_vm5, %v60_v10, 0.0  ;;  %vm77_vm7 = vcmp.eq.s32.totalorder %v194_v2, 2  ;;  %vm87_vm8 = vcmp.eq.s32.totalorder %v194_v2, 3 }
   0x7   :  { %vm97_vm9 = vcmp.eq.s32.totalorder %v194_v2, 4  ;;  %vm107_vm10 = vcmp.eq.s32.totalorder %v194_v2, 5  ;;  %vm117_vm11 = vcmp.eq.s32.totalorder %v194_v2, 6  ;;  %vm127_vm12 = vcmp.eq.s32.totalorder %v194_v2, 7 }
  0x93   :  { %v199_v6 = vpop.xlane.xlu0 %43 }
  0x94   :  { %178 = vrcp.f32 %v199_v6  ;;  %vm134_vm13 = vweird.f32 %v199_v6 }
  0x9e   :  { %v179_v7 = vpop.eup %178 }
  0x9f   :  { %v49_v8 = vmul.f32 %v179_v7, %v47_v5 }
  0xa1   :  { %50 = vst [vmem:[#allocation2] sm:$0xff] %v49_v8 }
  0xa8   :  { %v63_v12 = vld [vmem:[#allocation2 + $0x1] ss:$0 sm:$0xff]  ;;  %v73_v15 = vld [vmem:[#allocation2 + $0x2] ss:$0 sm:$0xff]  ;;  %v83_v20 = vld [vmem:[#allocation2 + $0x3] ss:$0 sm:$0xff] }
  0xa9   :  { %v64_v13 = vxor.u32 2147483648, %v63_v12  ;;  %v74_v17 = vxor.u32 2147483648, %v73_v15  ;;  %v84_v22 = vxor.u32 2147483648, %v83_v20  ;;  %v93_v25 = vld [vmem:[#allocation2 + $0x4] ss:$0 sm:$0xff] }
  0xaa   :  { %v94_v27 = vxor.u32 2147483648, %v93_v25  ;;  %v103_v30 = vld [vmem:[#allocation2 + $0x5] ss:$0 sm:$0xff]  ;;  %v113_v35 = vld [vmem:[#allocation2 + $0x6] ss:$0 sm:$0xff] }
  0xab   :  { %v68_v14 = vmul.f32 %v64_v13, %v61_v11  ;;  %v104_v32 = vxor.u32 2147483648, %v103_v30  ;;  %v114_v37 = vxor.u32 2147483648, %v113_v35  ;;  %v123_v40 = vld [vmem:[#allocation2 + $0x7] ss:$0 sm:$0xff] }
  0xac   :  { %v124_v42 = vxor.u32 2147483648, %v123_v40 }
  0xad   :  { %69 = vadd.xlane.f32.xlu0 %v68_v14 }
 0x13a   :  { %v70_v16 = vpop.xlane.xlu0 %69 }
 0x13b   :  { %v71_v18 = vsel %vm67_vm6, %v70_v16, %v61_v11 }
 0x13c   :  { %v78_v19 = vmul.f32 %v74_v17, %v71_v18 }
 0x13e   :  { %79 = vadd.xlane.f32.xlu1 %v78_v19 }
 0x1cb   :  { %v80_v21 = vpop.xlane.xlu1 %79 }
 0x1cc   :  { %v81_v23 = vsel %vm77_vm7, %v80_v21, %v71_v18 }
 0x1cd   :  { %v88_v24 = vmul.f32 %v84_v22, %v81_v23 }
 0x1cf   :  { %89 = vadd.xlane.f32.xlu1 %v88_v24 }
 0x25c   :  { %v90_v26 = vpop.xlane.xlu1 %89 }
 0x25d   :  { %v91_v28 = vsel %vm87_vm8, %v90_v26, %v81_v23 }
 0x25e   :  { %v98_v29 = vmul.f32 %v94_v27, %v91_v28 }
 0x260   :  { %99 = vadd.xlane.f32.xlu0 %v98_v29 }
 0x2ed   :  { %v100_v31 = vpop.xlane.xlu0 %99 }
 0x2ee   :  { %v101_v33 = vsel %vm97_vm9, %v100_v31, %v91_v28 }
 0x2ef   :  { %v108_v34 = vmul.f32 %v104_v32, %v101_v33 }
 0x2f1   :  { %109 = vadd.xlane.f32.xlu1 %v108_v34 }
 0x37e   :  { %v110_v36 = vpop.xlane.xlu1 %109 }
 0x37f   :  { %v111_v38 = vsel %vm107_vm10, %v110_v36, %v101_v33 }
 0x380   :  { %v118_v39 = vmul.f32 %v114_v37, %v111_v38 }
 0x382   :  { %119 = vadd.xlane.f32.xlu0 %v118_v39 }
 0x40f   :  { %v120_v41 = vpop.xlane.xlu0 %119 }
 0x410   :  { %v121_v43 = vsel %vm117_vm11, %v120_v41, %v111_v38 }
 0x411   :  { %v128_v44 = vmul.f32 %v124_v42, %v121_v43 }
 0x413   :  { %129 = vadd.xlane.f32.xlu1 %v128_v44 }
 0x4a0   :  { %v130_v45 = vpop.xlane.xlu1 %129 }
 0x4a1   :  { %v131_v46 = vsel %vm127_vm12, %v130_v45, %v121_v43 }
 0x4a2   :  { %v133_v47 = vmul.f32 %v179_v7, %v131_v46 }
 0x4a4   :  { %v135_v48 = vsel %vm134_vm13, %v131_v46, %v133_v47 }
 0x4a5   :  { %165 = vst [vmem:[%s216_s1] sm:$0xff] %v135_v48 }

// kernel: custom-call.66
= control target key start
LH: loop header
LB: loop body
LE: loop exit
PB: predicated region body
PF: predicated region fallthrough
CT: control target
= control target key end

     0   :  { %11 = vsyncpa [#allocation14], 0  ;;  %s1851_s0 = inlined_call_operand.vmem [shape: f32[4,4], index: 0, kind: input, shape index: {}]   ;;  %s1852_s1 = inlined_call_operand.vmem [shape: f32[4,4], index: 1, kind: input, shape index: {}]   ;;  %s1853_s2 = inlined_call_operand.vmem [shape: f32[4,4], index: 2, kind: input, shape index: {}]   ;;  %s1854_s3 = inlined_call_operand.vmem [shape: f32[4,4], index: 3, kind: input, shape index: {}]   ;;  %s1855_s4 = inlined_call_operand.vmem [shape: f32[4], index: 4, kind: output, shape index: {0}]   ;;  %s1856_s5 = inlined_call_operand.vmem [shape: f32[4], index: 5, kind: output, shape index: {1}]   ;;  %s1857_s6 = inlined_call_operand.hbm [shape: f32[4,4], index: 6, kind: output, shape index: {2}]   ;;  %s1858_s7 = inlined_call_operand.hbm [shape: f32[4,4], index: 7, kind: output, shape index: {3}]   ;;  %s1859_s8 = inlined_call_operand.hbm [shape: f32[4,4], index: 8, kind: output, shape index: {4}]   ;;  %s1860_s9 = inlined_call_operand.hbm [shape: f32[4,4], index: 9, kind: output, shape index: {5}]  }
   0x1   :  { %12 = vsyncpa [#allocation17], 0 }
   0x2   :  { %13 = vsyncpa [#allocation22], 0  ;;  %v74_v0 = vld [vmem:[%s1851_s0] sm:$0xf]  ;;  %v295_v2 = vlaneseq  ;;  %v1527_v7 = vmov 0.0   ;;  %s294_s0 = smov [#allocation12] }
   0x3   :  { %v136_v1 = vld [vmem:[%s1852_s1] sm:$0xf]  ;;  %75 = vst [vmem:[#allocation1] sm:$0xf] %v74_v0  ;;  %290 = vst [vmem:[#allocation12] sm:$0xff] %v1527_v7  ;;  %s307_s1 = smov [#allocation20] }
   0x4   :  { %137 = vst [vmem:[#allocation3] sm:$0xf] %v136_v1  ;;  %v198_v3 = vld [vmem:[%s1853_s2] sm:$0xf]  ;;  %v1596_v5 = vand.u32 127, %v295_v2  ;;  %v1598_v6 = vshrl.u32 %v295_v2, 7 }
   0x5   :  { %v260_v4 = vld [vmem:[%s1854_s3] sm:$0xf]  ;;  %199 = vst [vmem:[#allocation5] sm:$0xf] %v198_v3  ;;  %291 = vst [vmem:[#allocation15] sm:$0xff] %v1527_v7  ;;  %s278_s2 = smov [#allocation23] }
   0x6   :  { %261 = vst [vmem:[#allocation7] sm:$0xf] %v260_v4  ;;  %292 = vst [vmem:[#allocation18] sm:$0xff] %v1527_v7  ;;  %v297_v5 = vmov %v1596_v5  ;;  %v300_v6 = vmov %v1598_v6  ;;  %s281_s3 = smov [#allocation24]  ;;  %s284_s17 = smov [#allocation25]  ;;  %vm1223_vm2 = vcmp.lt.s32.totalorder %v1596_v5, 4 }
   0x7   :  { %293 = vst [vmem:[#allocation20] sm:$0xff] %v1527_v7  ;;  %v310_v5 = vmov %v1596_v5  ;;  %v313_v6 = vmov %v1598_v6  ;;  %vm304_vm0 = vcmp.eq.s32.totalorder %v300_v6, %v297_v5  ;;  %s287_s18 = smov [#allocation26]  ;;  %s1219_s19 = smov [#allocation23] }
   0x8   :  { %vm317_vm1 = vcmp.eq.s32.totalorder %v313_v6, %v310_v5  ;;  %s1236_s20 = smov [#allocation24]  ;;  %v1215_v5 = vmov %v1596_v5  ;;  %v1218_v6 = vmov %v1598_v6  ;;  %s1253_s21 = smov [#allocation25] }
   0x9   :  { %s1270_s22 = smov [#allocation26]  ;;  %vm1228_vm3 = vcmp.eq.s32.totalorder %v1218_v6, %v1215_v5  ;;  %v1266_v5 = vmov %v1596_v5  ;;  %v1235_v6 = vmov %v1598_v6 }
   0xa   :  { %v264_v8 = vld [vmem:[#allocation1] sm:$0xf]  ;;  %v301_v12 = vld [vmem:[%s294_s0] sm:$0xf]  ;;  %v1232_v5 = vmov %v1596_v5  ;;  %v1269_v6 = vmov %v1598_v6 }
   0xb   :  { %v268_v9 = vld [vmem:[#allocation3] sm:$0xf]  ;;  %265 = vst [vmem:[#allocation0] sm:$0xf] %v264_v8  ;;  %v305_v14 = vsel %vm304_vm0, 1.0, %v301_v12  ;;  %v1249_v5 = vmov %v1596_v5  ;;  %v1252_v6 = vmov %v1598_v6  ;;  %vm1279_vm4 = vcmp.eq.s32.totalorder %v1269_v6, %v1266_v5 }
   0xc   :  { %269 = vst [vmem:[#allocation2] sm:$0xf] %v268_v9  ;;  %v272_v10 = vld [vmem:[#allocation5] sm:$0xf]  ;;  %306 = vst [vmem:[%s294_s0] sm:$0xf] %v305_v14 }
   0xd   :  { %v276_v11 = vld [vmem:[#allocation7] sm:$0xf]  ;;  %273 = vst [vmem:[#allocation4] sm:$0xf] %v272_v10 }
   0xe   :  { %277 = vst [vmem:[#allocation6] sm:$0xf] %v276_v11  ;;  %v314_v13 = vld [vmem:[%s307_s1] sm:$0xf] }
   0xf   :  { %v318_v15 = vsel %vm317_vm1, 1.0, %v314_v13 }
  0x10   :  { %319 = vst [vmem:[%s307_s1] sm:$0xf] %v318_v15 }
  0x12   :  { %v279_v16 = vld [vmem:[#allocation0] sm:$0xff] }
  0x13   :  { %v282_v17 = vld [vmem:[#allocation2] sm:$0xff]  ;;  %280 = vst [vmem:[%s278_s2] sm:$0xff] %v279_v16 }
  0x14   :  { %283 = vst [vmem:[%s281_s3] sm:$0xff] %v282_v17  ;;  %v285_v18 = vld [vmem:[#allocation4] sm:$0xff] }
  0x15   :  { %v288_v19 = vld [vmem:[#allocation6] sm:$0xff]  ;;  %286 = vst [vmem:[%s284_s17] sm:$0xff] %v285_v18 }
  0x16   :  { %289 = vst [vmem:[%s287_s18] sm:$0xff] %v288_v19 }
  0x1a   :  { %v1225_v20 = vld [vmem:[%s1219_s19] sm:$0xf] }
  0x1b   :  { %v1242_v21 = vld [vmem:[%s1236_s20] sm:$0xf]  ;;  %v1226_v22 = vsel %vm1223_vm2, %v1225_v20, 0.0 }
  0x1c   :  { %v1243_v23 = vsel %vm1223_vm2, %v1242_v21, 0.0  ;;  %v1259_v24 = vld [vmem:[%s1253_s21] sm:$0xf]  ;;  %v1227_v26 = vmul.f32 %v1226_v22, %v1226_v22 }
  0x1d   :  { %v1276_v25 = vld [vmem:[%s1270_s22] sm:$0xf]  ;;  %v1244_v27 = vmul.f32 %v1243_v23, %v1243_v23  ;;  %v1260_v28 = vsel %vm1223_vm2, %v1259_v24, 0.0 }
  0x1e   :  { %v1277_v29 = vsel %vm1223_vm2, %v1276_v25, 0.0  ;;  %v1261_v30 = vmul.f32 %v1260_v28, %v1260_v28  ;;  %v1229_v33 = vsel %vm1228_vm3, 0.0, %v1227_v26 }
  0x1f   :  { %v1246_v31 = vadd.f32 %v1244_v27, %v1227_v26  ;;  %v1278_v32 = vmul.f32 %v1277_v29, %v1277_v29  ;;  %v1245_v34 = vadd.f32 %v1244_v27, %v1229_v33 }
  0x21   :  { %v1263_v35 = vadd.f32 %v1261_v30, %v1246_v31  ;;  %v1262_v36 = vadd.f32 %v1261_v30, %v1245_v34  ;;  %v1280_v37 = vsel %vm1279_vm4, 0.0, %v1278_v32 }
  0x23   :  { %v1282_v38 = vadd.f32 %v1278_v32, %v1263_v35  ;;  %v1281_v39 = vadd.f32 %v1280_v37, %v1262_v36 }
  0x25   :  { %1283 = vadd.xlane.f32.xlu0 %v1282_v38 }
  0x29   :  { %1291 = vadd.xlane.f32.xlu0 %v1281_v39 }
  0xb2   :  { %v1284_v40 = vpop.xlane.xlu0 %1283 }
  0xb3   :  { %v1285_v41 = vrot.slane %v1284_v40, 4 }
  0xb5   :  { %v1286_v42 = vadd.f32 %v1285_v41, %v1284_v40 }
  0xb6   :  { %v1292_v43 = vpop.xlane.xlu0 %1291 }
  0xb7   :  { %v1287_v44 = vrot.slane %v1286_v42, 2  ;;  %v1293_v45 = vrot.slane %v1292_v43, 4 }
  0xb9   :  { %v1294_v46 = vadd.f32 %v1293_v45, %v1292_v43  ;;  %v1288_v47 = vadd.f32 %v1287_v44, %v1286_v42 }
  0xbb   :  { %v1295_v48 = vrot.slane %v1294_v46, 2  ;;  %v1289_v50 = vrot.slane %v1288_v47, 1 }
  0xbd   :  { %v1296_v49 = vadd.f32 %v1295_v48, %v1294_v46  ;;  %v1290_v53 = vadd.f32 %v1289_v50, %v1288_v47 }
  0xbf   :  { %v1297_v51 = vrot.slane %v1296_v49, 1 }
  0xc1   :  { %v1298_v52 = vadd.f32 %v1297_v51, %v1296_v49 }
  0xc3   :  { %1378 = vpush %v1298_v52 }
  0xc4   :  { %1380 = vpush %v1290_v53 }
  0xf4   :  { %s1379_s23 = spop %1378 }
  0xf5   :  { %s1381_s24 = spop %1380 }
  0xf6   :  { %s1301_s25 = smul.f32 1e-10, %s1381_s24 }
  0xf8   :  { %p1302_p0 = scmp.le.f32.partialorder %s1379_s23, %s1301_s25 }
  0xf9   :  { %s1622_s26 = smov (!%p1302_p0), 0  }
  0xfa   :  { %1305 = sbr.rel (%p1302_p0) target bundleno = 932 (0x3a4), region = 324 }
 0x101 LB: > { %s1627_s27 = smov 0   ;;  %s1521_s26 = sphi %s1622_s26, %s1861_s26  }
 0x102 LB: >> { %s424_s28 = smov [#allocation23]  ;;  %v428_v5 = vmov %v1596_v5  ;;  %v431_v6 = vmov %v1598_v6  ;;  %s444_s29 = smov [#allocation24]  ;;  %vm747_vm14 = vcmp.eq.s32.totalorder %v1598_v6, 0  ;;  %vm759_vm15 = vcmp.eq.s32.totalorder %v1598_v6, 3  ;;  %s1525_s27 = sphi %s1627_s27, %s423_s27  }
 0x103   : >> { %v448_v5 = vmov %v1596_v5  ;;  %v451_v6 = vmov %v1598_v6  ;;  %v432_v54 = vld [vmem:[%s424_s28] sm:$0xf]  ;;  %vm435_vm5 = vcmp.eq.s32.totalorder %v431_v6, %v428_v5  ;;  %s464_s30 = smov [#allocation26]  ;;  %s425_s10 = smov [#allocation27] }
 0x104   : >> { %vm455_vm6 = vcmp.eq.s32.totalorder %v451_v6, %v448_v5  ;;  %v468_v5 = vmov %v1596_v5  ;;  %v471_v6 = vmov %v1598_v6  ;;  %v436_v55 = vsel %vm435_vm5, %v432_v54, 0.0  ;;  %v452_v56 = vld [vmem:[%s444_s29] sm:$0xf]  ;;  %s445_s11 = smov [#allocation28]  ;;  %s465_s12 = smov [#allocation29] }
 0x105   : >> { %vm475_vm7 = vcmp.eq.s32.totalorder %v471_v6, %v468_v5  ;;  %v437_v57 = vrot.slane %v436_v55, 4  ;;  %v456_v58 = vsel %vm455_vm6, %v452_v56, 0.0  ;;  %v472_v59 = vld [vmem:[%s464_s30] sm:$0xf]  ;;  %s488_s13 = smov [#allocation28]  ;;  %s486_s14 = smov [#allocation27]  ;;  %v537_v5 = vmov %v1596_v5 }
 0x106   : >> { %v457_v60 = vrot.slane %v456_v58, 4  ;;  %v476_v61 = vsel %vm475_vm7, %v472_v59, 0.0  ;;  %s490_s15 = smov [#allocation29]  ;;  %s525_s16 = smov [#allocation30]  ;;  %v540_v6 = vmov %v1598_v6  ;;  %v552_v5 = vmov %v1596_v5 }
 0x107   : >> { %v438_v62 = vadd.f32 %v437_v57, %v436_v55  ;;  %v477_v63 = vrot.slane %v476_v61, 4  ;;  %s527_s0 = smov [#allocation31]  ;;  %s484_s1 = smov [#allocation32]  ;;  %v555_v6 = vmov %v1598_v6  ;;  %vm542_vm12 = vcmp.eq.s32.totalorder %v540_v6, %v537_v5 }
 0x108   : >> { %v458_v0 = vadd.f32 %v457_v60, %v456_v58  ;;  %s485_s2 = smov [#allocation33]  ;;  %s529_s1 = smov %s484_s1  ;;  %vm557_vm13 = vcmp.eq.s32.totalorder %v555_v6, %v552_v5  ;;  %v650_v5 = vmov %v1596_v5  ;;  %v653_v6 = vmov %v1598_v6 }
 0x109   : >> { %v439_v1 = vrot.slane %v438_v62, 2  ;;  %v478_v2 = vadd.f32 %v477_v63, %v476_v61  ;;  %s531_s2 = smov %s485_s2  ;;  %s533_s3 = smov [#allocation32]  ;;  %v664_v5 = vmov %v1596_v5  ;;  %v667_v6 = vmov %v1598_v6 }
 0x10a   : >> { %v459_v3 = vrot.slane %v458_v0, 2  ;;  %s548_s17 = smov [#allocation33]  ;;  %s546_s18 = smov [#allocation34]  ;;  %vm657_vm0 = vcmp.eq.s32.totalorder %v653_v6, %v650_v5  ;;  %v623_v5 = vmov %v1596_v5  ;;  %v626_v6 = vmov %v1598_v6 }
 0x10b   : >> { %v440_v4 = vadd.f32 %v439_v1, %v438_v62  ;;  %v479_v7 = vrot.slane %v478_v2, 2  ;;  %s563_s19 = smov [#allocation34]  ;;  %s1642_s20 = smov [#allocation23]  ;;  %v637_v5 = vmov %v1596_v5  ;;  %v640_v6 = vmov %v1598_v6 }
 0x10c   : >> { %v460_v8 = vadd.f32 %v459_v3, %v458_v0  ;;  %s561_s21 = smov [#allocation35]  ;;  %s1644_s22 = smov [#allocation24]  ;;  %v571_v53 = vld [vmem:[%s1642_s20] sm:$0xf]  ;;  %vm672_vm1 = vcmp.eq.s32.totalorder %v667_v6, %v664_v5  ;;  %vm631_vm3 = vcmp.eq.s32.totalorder %v626_v6, %v623_v5  ;;  %vm644_vm4 = vcmp.eq.s32.totalorder %v640_v6, %v637_v5 }
 0x10d   : >> { %v441_v9 = vrot.slane %v440_v4, 1  ;;  %v480_v10 = vadd.f32 %v479_v7, %v478_v2  ;;  %s1646_s23 = smov [#allocation25]  ;;  %s1648_s24 = smov [#allocation26]  ;;  %v572_v54 = vld [vmem:[%s1644_s22] sm:$0xf]  ;;  %vm686_vm5 = vcmp.eq.s32.totalorder %v1596_v5, 0 }
 0x10e   : >> { %v461_v11 = vrot.slane %v460_v8, 1  ;;  %s1650_s25 = smov [#allocation12]  ;;  %s1652_s28 = smov [#allocation15]  ;;  %v573_v55 = vld [vmem:[%s1646_s23] sm:$0xf]  ;;  %vm690_vm6 = vcmp.eq.s32.totalorder %v1596_v5, 1 }
 0x10f   : >> { %v442_v12 = vadd.f32 %v441_v9, %v440_v4  ;;  %v481_v13 = vrot.slane %v480_v10, 1  ;;  %s1654_s29 = smov [#allocation18]  ;;  %s787_s30 = smov [#allocation34]  ;;  %v574_v56 = vld [vmem:[%s1648_s24] sm:$0xf]  ;;  %vm703_vm7 = vcmp.eq.s32.totalorder %v1596_v5, 3 }
 0x110   : >> { %v462_v14 = vadd.f32 %v461_v11, %v460_v8  ;;  %v795_v57 = vld [vmem:[%s1650_s25] sm:$0xf]  ;;  %s423_s27 = sadd.s32 1, %s1525_s27  }
 0x111   : >> { %443 = vst [vmem:[%s425_s10] sm:$0x1] %v442_v12  ;;  %v482_v15 = vadd.f32 %v481_v13, %v480_v10  ;;  %s1658_s10 = smov [#allocation20]  ;;  %v796_v58 = vld [vmem:[%s1652_s28] sm:$0xf]  ;;  %p420_p1 = scmp.ge.s32.totalorder %s423_s27, 7  }
 0x112   : >> { %463 = vst [vmem:[%s445_s11] sm:$0x1] %v462_v14  ;;  %v797_v59 = vld [vmem:[%s1654_s29] sm:$0xf]  ;;  %s565_s11 = smov [#allocation35]  ;;  %v324_v5 = vmov (%p420_p1), %v1596_v5  ;;  %v327_v6 = vmov (%p420_p1), %v1598_v6 }
 0x113   : >> { %483 = vst [vmem:[%s465_s12] sm:$0x1] %v482_v15  ;;  %v798_v61 = vld [vmem:[%s1658_s10] sm:$0xf]  ;;  %s789_s12 = smov [#allocation35]  ;;  %v377_v5 = vmov (%p420_p1), %v1596_v5 }
 0x118   : >> { %v487_v18 = vld [vmem:[%s486_s14] sm:$0xff]  ;;  %s593_s14 = smov [#allocation33] }
 0x119   : >> { %v489_v16 = vld [vmem:[%s488_s13] sm:$0xff]  ;;  %v510_v31 = vand.u32 2147483647, %v487_v18  ;;  %s591_s13 = smov [#allocation32] }
 0x11a   : >> { %v493_v17 = vmul.f32 2.0, %v489_v16  ;;  %v491_v19 = vld [vmem:[%s490_s15] sm:$0xff]  ;;  %v511_v36 = vand.u32 2147483647, %v489_v16  ;;  %s1674_s15 = smov [#allocation12] }
 0x11b   : >> { %v492_v20 = vsub.f32 %v491_v19, %v487_v18  ;;  %v512_v32 = vand.u32 2147483647, %v491_v19 }
 0x11c   : >> { %1409 = vrcp.f32 %v493_v17 }
 0x11d   : >> { %v513_v35 = vmin.f32 %v510_v31, %v512_v32 }
 0x11f   : >> { %v514_v37 = vmul.f32 1.1920929e-08, %v513_v35 }
 0x121   : >> { %vm515_vm11 = vcmp.le.f32.partialorder %v511_v36, %v514_v37 }
 0x126   : >> { %v1410_v21 = vpop.eup %1409 }
 0x127   : >> { %v495_v22 = vmul.f32 %v1410_v21, %v492_v20 }
 0x129   : >> { %v497_v23 = vmul.f32 %v495_v22, %v495_v22  ;;  %vm496_vm10 = vcmp.ge.f32.partialorder %v495_v22, 0.0 }
 0x12b   : >> { %v498_v24 = vadd.f32 1.0, %v497_v23 }
 0x12d   : >> { %1411 = vrsqrt.f32 %v498_v24  ;;  %vm501_vm8 = vcmp.eq.f32.partialorder %v498_v24, inf  ;;  %v504_v26 = vand.u32 2147483648, %v498_v24  ;;  %vm503_vm9 = vcmp.eq.f32.partialorder %v498_v24, 0.0 }
 0x137   : >> { %v1412_v25 = vpop.eup %1411 }
 0x138   : >> { %v500_v27 = vmul.f32 %v1412_v25, %v498_v24 }
 0x13a   : >> { %v502_v28 = vsel %vm501_vm8, %v498_v24, %v500_v27  ;;  %vm339_vm8 = vcmp.eq.s32.totalorder (%p420_p1), %v327_v6, %v324_v5  ;;  %v380_v6 = vmov (%p420_p1), %v1598_v6  ;;  %v343_v5 = vmov (%p420_p1), %v1596_v5 }
 0x13b   : >> { %v505_v29 = vsel %vm503_vm9, %v504_v26, %v502_v28  ;;  %v346_v6 = vmov (%p420_p1), %v1598_v6  ;;  %v360_v5 = vmov (%p420_p1), %v1596_v5  ;;  %vm392_vm9 = vcmp.eq.s32.totalorder (%p420_p1), %v380_v6, %v377_v5 }
 0x13c   : >> { %v506_v30 = vxor.u32 2147483648, %v505_v29  ;;  %v363_v6 = vmov (%p420_p1), %v1598_v6 }
 0x13e   : >> { %v507_v33 = vsel %vm496_vm10, %v505_v29, %v506_v30 }
 0x13f   : >> { %v508_v34 = vadd.f32 %v507_v33, %v495_v22 }
 0x141   : >> { %1413 = vrcp.f32 %v508_v34 }
 0x14b   : >> { %v1414_v38 = vpop.eup %1413 }
 0x14c   : >> { %v516_v39 = vsel %vm515_vm11, 0.0, %v1414_v38 }
 0x14d   : >> { %v517_v40 = vmul.f32 %v516_v39, %v516_v39  ;;  %v521_v41 = vmul.f32 %v516_v39, %v489_v16 }
 0x14f   : >> { %v518_v42 = vadd.f32 1.0, %v517_v40  ;;  %v522_v43 = vsub.f32 %v487_v18, %v521_v41  ;;  %v524_v44 = vadd.f32 %v521_v41, %v491_v19 }
 0x151   : >> { %1415 = vrsqrt.f32 %v518_v42  ;;  %526 = vst [vmem:[%s525_s16] sm:$0xff] %v522_v43  ;;  %528 = vst [vmem:[%s527_s0] sm:$0xff] %v524_v44  ;;  %s1676_s16 = smov [#allocation25]  ;;  %s1678_s0 = smov [#allocation26] }
 0x15b   : >> { %v1416_v45 = vpop.eup %1415 }
 0x15c   : >> { %530 = vst [vmem:[%s529_s1] sm:$0xff] %v1416_v45  ;;  %v520_v46 = vmul.f32 %v1416_v45, %v516_v39  ;;  %s1680_s1 = smov [#allocation23] }
 0x15e   : >> { %532 = vst [vmem:[%s531_s2] sm:$0xff] %v520_v46  ;;  %s1682_s2 = smov [#allocation18] }
 0x163   : >> { %v534_v47 = vld [vmem:[%s533_s3] ss:$0 sm:$0xff]  ;;  %s1684_s3 = smov [#allocation15] }
 0x164   : >> { %v543_v48 = vsel %vm542_vm12, %v534_v47, 0.0  ;;  %v592_v27 = vld [vmem:[%s591_s13] ss:$0 sm:$0xff]  ;;  %s763_s13 = smov [#allocation24] }
 0x165   : >> { %544 = vadd.xlane.f32.xlu0 %v543_v48  ;;  %v549_v49 = vld [vmem:[%s548_s17] ss:$0 sm:$0xff]  ;;  %s1688_s17 = smov [#allocation20] }
 0x166   : >> { %v558_v50 = vsel %vm557_vm13, %v549_v49, 0.0  ;;  %v594_v28 = vld [vmem:[%s593_s14] ss:$0 sm:$0xff]  ;;  %s740_s14 = smov [#allocation25] }
 0x169   : >> { %559 = vadd.xlane.f32.xlu0 %v558_v50 }
 0x1f2   : >> { %v545_v51 = vpop.xlane.xlu0 %544 }
 0x1f3   : >> { %547 = vst [vmem:[%s546_s18] sm:$0xff] %v545_v51  ;;  %s1690_s18 = smov [#allocation24] }
 0x1f6   : >> { %v560_v52 = vpop.xlane.xlu0 %559 }
 0x1f7   : >> { %562 = vst [vmem:[%s561_s21] sm:$0xff] %v560_v52  ;;  %s660_s21 = smov [#allocation26] }
 0x1fa   : >> { %v564_v60 = vld [vmem:[%s563_s19] sm:$0xff]  ;;  %s661_s19 = smov [#allocation31] }
 0x1fb   : >> { %v788_v62 = vld [vmem:[%s787_s30] sm:$0xff]  ;;  %v575_v63 = vmul.f32 %v571_v53, %v564_v60  ;;  %v578_v0 = vmul.f32 %v572_v54, %v564_v60  ;;  %v582_v1 = vmul.f32 %v573_v55, %v564_v60  ;;  %v585_v2 = vmul.f32 %v574_v56, %v564_v60  ;;  %s676_s30 = smov [#allocation24] }
 0x1fc   : >> { %v799_v3 = vmul.f32 %v795_v57, %v788_v62  ;;  %v802_v4 = vmul.f32 %v796_v58, %v788_v62  ;;  %v806_v7 = vmul.f32 %v797_v59, %v788_v62  ;;  %v809_v8 = vmul.f32 %v798_v61, %v788_v62 }
 0x1fe   : >> { %v566_v9 = vld [vmem:[%s565_s11] sm:$0xff]  ;;  %s1735_s11 = smov [#allocation26] }
 0x1ff   : >> { %v790_v10 = vld [vmem:[%s789_s12] sm:$0xff]  ;;  %v576_v11 = vmul.f32 %v573_v55, %v566_v9  ;;  %v579_v12 = vmul.f32 %v574_v56, %v566_v9  ;;  %v581_v13 = vmul.f32 %v571_v53, %v566_v9  ;;  %v584_v14 = vmul.f32 %v572_v54, %v566_v9  ;;  %s739_s12 = smov [#allocation23] }
 0x200   : >> { %v800_v15 = vmul.f32 %v797_v59, %v790_v10  ;;  %v803_v16 = vmul.f32 %v798_v61, %v790_v10  ;;  %v805_v17 = vmul.f32 %v795_v57, %v790_v10  ;;  %v808_v18 = vmul.f32 %v796_v58, %v790_v10  ;;  %v668_v59 = vld [vmem:[%s661_s19] ss:$0 sm:$0xff] }
 0x201   : >> { %v577_v19 = vsub.f32 %v575_v63, %v576_v11  ;;  %v580_v20 = vsub.f32 %v578_v0, %v579_v12  ;;  %v583_v21 = vadd.f32 %v582_v1, %v581_v13  ;;  %v586_v22 = vadd.f32 %v585_v2, %v584_v14 }
 0x202   : >> { %v801_v23 = vsub.f32 %v799_v3, %v800_v15  ;;  %v804_v24 = vsub.f32 %v802_v4, %v803_v16  ;;  %v807_v25 = vadd.f32 %v806_v7, %v805_v17  ;;  %v810_v26 = vadd.f32 %v809_v8, %v808_v18 }
 0x203   : >> { %588 = vst [vmem:[%s1644_s22] sm:$0xf] %v580_v20  ;;  %590 = vst [vmem:[%s1648_s24] sm:$0xf] %v586_v22  ;;  %s620_s22 = smov [#allocation30]  ;;  %s634_s24 = smov [#allocation24] }
 0x204   : >> { %587 = vst [vmem:[%s1642_s20] sm:$0xf] %v577_v19  ;;  %589 = vst [vmem:[%s1646_s23] sm:$0xf] %v583_v21  ;;  %s647_s20 = smov [#allocation25]  ;;  %s619_s23 = smov [#allocation23]  ;;  %v627_v63 = vld [vmem:[%s620_s22] ss:$0 sm:$0xff] }
 0x205   : >> { %811 = vst [vmem:[%s1650_s25] sm:$0xf] %v801_v23  ;;  %812 = vst [vmem:[%s1652_s28] sm:$0xf] %v804_v24  ;;  %s1732_s25 = smov [#allocation25]  ;;  %s1528_s28 = smov 1  }
 0x206   : >> { %813 = vst [vmem:[%s1654_s29] sm:$0xf] %v807_v25  ;;  %814 = vst [vmem:[%s1658_s10] sm:$0xf] %v810_v26  ;;  %s675_s29 = smov [#allocation23]  ;;  %s1529_s10 = smov 127  }
 0x20a   : >> { %v602_v30 = vld [vmem:[%s1678_s0] sm:$0xf] }
 0x20b   : >> { %v601_v29 = vld [vmem:[%s1676_s16] sm:$0xf]  ;;  %v610_v36 = vmul.f32 %v602_v30, %v594_v28  ;;  %v613_v42 = vmul.f32 %v602_v30, %v592_v27 }
 0x20c   : >> { %v599_v31 = vld [vmem:[%s1680_s1] sm:$0xf]  ;;  %v609_v35 = vmul.f32 %v601_v29, %v592_v27  ;;  %v612_v37 = vmul.f32 %v601_v29, %v594_v28 }
 0x20d   : >> { %v817_v32 = vld [vmem:[%s1674_s15] ss:$0 sm:$0xff]  ;;  %v1365_v34 = vld [vmem:[%s1674_s15 + $0x3] ss:$0 sm:$0xff]  ;;  %v603_v48 = vmul.f32 %v599_v31, %v592_v27  ;;  %v606_v49 = vmul.f32 %v599_v31, %v594_v28 }
 0x20e   : >> { %v1364_v33 = vld [vmem:[%s1674_s15 - $0x1] sm:$0xe]  ;;  %v1369_v45 = vld [vmem:[%s1684_s3 + $0x3] ss:$0 sm:$0xff]  ;;  %v611_v47 = vsub.f32 %v609_v35, %v610_v36  ;;  %v614_v53 = vadd.f32 %v613_v42, %v612_v37 }
 0x20f   : >> { %v824_v38 = vsel %vm747_vm14, %v817_v32, %v1364_v33  ;;  %v828_v39 = vld [vmem:[%s1682_s2] ss:$0 sm:$0xff]  ;;  %v1367_v40 = vld [vmem:[%s1682_s2 + $0x1] sm:$0x7] }
 0x210   : >> { %v841_v41 = vld [vmem:[%s1684_s3] ss:$0 sm:$0xff]  ;;  %827 = vst [vmem:[%s1674_s15] sm:$0xf] %v824_v38  ;;  %v836_v43 = vsel %vm759_vm15, %v1365_v34, %v1367_v40  ;;  %v1371_v51 = vld [vmem:[%s1688_s17 + $0x1] sm:$0x7]  ;;  %617 = vst [vmem:[%s1676_s16] sm:$0xf] %v611_v47 }
 0x211   : >> { %v1368_v44 = vld [vmem:[%s1684_s3 - $0x1] sm:$0xe]  ;;  %1366 = vst [vmem:[%s1674_s15 + $0x1] sm:$0x1] %v828_v39  ;;  %838 = vst [vmem:[%s1682_s2] sm:$0xf] %v836_v43  ;;  %v860_v54 = vsel %vm759_vm15, %v1369_v45, %v1371_v51  ;;  %s764_s15 = smov [#allocation26] }
 0x212   : >> { %v852_v46 = vld [vmem:[%s1688_s17] ss:$0 sm:$0xff]  ;;  %v848_v50 = vsel %vm747_vm14, %v841_v41, %v1368_v44  ;;  %618 = vst [vmem:[%s1678_s0] sm:$0xf] %v614_v53  ;;  %s863_s16 = sadd.s32 (%p420_p1), 1, %s1521_s26   ;;  %s328_s0 = smov (%p420_p1), [#allocation23] }
 0x213   : >> { %v600_v52 = vld [vmem:[%s1690_s18] sm:$0xf]  ;;  %851 = vst [vmem:[%s1684_s3] sm:$0xf] %v848_v50  ;;  %862 = vst [vmem:[%s1688_s17] sm:$0xf] %v860_v54  ;;  %s364_s2 = smov (%p420_p1), [#allocation25]  ;;  %p416_p2 = scmp.ge.s32.totalorder (%p420_p1), %s863_s16, 15 }
 0x214   : >> { %v604_v55 = vmul.f32 %v600_v52, %v594_v28  ;;  %v607_v56 = vmul.f32 %v600_v52, %v592_v27  ;;  %1370 = vst [vmem:[%s1684_s3 + $0x1] sm:$0x1] %v852_v46  ;;  %s381_s3 = smov (%p420_p1), [#allocation26]  ;;  %s1861_s26 = smov (%p420_p1), %s863_s16 }
 0x216   : >> { %v605_v57 = vsub.f32 %v603_v48, %v604_v55  ;;  %v608_v58 = vadd.f32 %v607_v56, %v606_v49 }
 0x217   : >> { %v654_v60 = vld [vmem:[%s647_s20] sm:$0xf] }
 0x218   : >> { %615 = vst [vmem:[%s1680_s1] sm:$0xf] %v605_v57  ;;  %616 = vst [vmem:[%s1690_s18] sm:$0xf] %v608_v58  ;;  %v658_v61 = vsel %vm657_vm0, 0.0, %v654_v60  ;;  %s347_s1 = smov (%p420_p1), [#allocation24] }
 0x219   : >> { %v669_v62 = vld [vmem:[%s660_s21] sm:$0xf]  ;;  %659 = vst [vmem:[%s647_s20] sm:$0xf] %v658_v61 }
 0x21a   : >> { %v673_v0 = vsel %vm672_vm1, %v668_v59, %v669_v62 }
 0x21b   : >> { %674 = vst [vmem:[%s660_s21] sm:$0xf] %v673_v0 }
 0x21f   : >> { %v628_v1 = vld [vmem:[%s619_s23] sm:$0xf] }
 0x220   : >> { %v641_v2 = vld [vmem:[%s634_s24] sm:$0xf]  ;;  %v632_v3 = vsel %vm631_vm3, %v627_v63, %v628_v1 }
 0x221   : >> { %v645_v4 = vsel %vm644_vm4, 0.0, %v641_v2  ;;  %633 = vst [vmem:[%s619_s23] sm:$0xf] %v632_v3  ;;  %v713_v7 = vld [vmem:[%s1732_s25] sm:$0xf] }
 0x222   : >> { %646 = vst [vmem:[%s634_s24] sm:$0xf] %v645_v4  ;;  %714 = vrot.lane.b32.xlu0 %v713_v7, %s1528_s28  ;;  %v709_v11 = vld [vmem:[%s1735_s11] sm:$0xf] }
 0x223   : >> { %v730_v12 = vld [vmem:[%s1735_s11] sm:$0xf] }
 0x224   : >> { %v712_v30 = vld [vmem:[%s1732_s25] sm:$0xf] }
 0x228   : >> { %v681_v8 = vld [vmem:[%s675_s29] sm:$0xf] }
 0x229   : >> { %682 = vrot.lane.b32.xlu1 %v681_v8, %s1528_s28  ;;  %v677_v9 = vld [vmem:[%s676_s30] sm:$0xf] }
 0x22a   : >> { %v698_v10 = vld [vmem:[%s676_s30] sm:$0xf] }
 0x22b   : >> { %v680_v18 = vld [vmem:[%s675_s29] sm:$0xf] }
 0x22d   : >> { %678 = vrot.lane.b32.xlu1 %v677_v9, %s1528_s28 }
 0x231   : >> { %699 = vrot.lane.b32.xlu1 %v698_v10, %s1529_s10 }
 0x235   : >> { %710 = vrot.lane.b32.xlu1 %v709_v11, %s1528_s28 }
 0x239   : >> { %731 = vrot.lane.b32.xlu1 %v730_v12, %s1529_s10 }
 0x294   : >> { %v715_v20 = vpop.permute.xlu0 %714 }
 0x295   : >> { %v719_v22 = vsel %vm686_vm5, %v713_v7, %v715_v20 }
 0x29b   : >> { %v683_v13 = vpop.permute.xlu1 %682 }
 0x29c   : >> { %v687_v14 = vsel %vm686_vm5, %v681_v8, %v683_v13 }
 0x29f   : >> { %v679_v15 = vpop.permute.xlu1 %678 }
 0x2a0   : >> { %v691_v16 = vsel %vm690_vm6, %v679_v15, %v687_v14 }
 0x2a1   : >> { %v697_v17 = vsel %vm1223_vm2, %v691_v16, 0.0 }
 0x2a2   : >> { %705 = vst [vmem:[%s675_s29] sm:$0xf] %v697_v17 }
 0x2a3   : >> { %v700_v19 = vpop.permute.xlu1 %699 }
 0x2a4   : >> { %v704_v21 = vsel %vm703_vm7, %v680_v18, %v700_v19 }
 0x2a5   : >> { %706 = vst [vmem:[%s676_s30] sm:$0xf] %v704_v21 }
 0x2a7   : >> { %v711_v23 = vpop.permute.xlu1 %710 }
 0x2a8   : >> { %v723_v24 = vsel %vm690_vm6, %v711_v23, %v719_v22 }
 0x2a9   : >> { %v741_v25 = vld [vmem:[%s739_s12] ss:$0 sm:$0xff]  ;;  %v1357_v27 = vld [vmem:[%s739_s12 + $0x3] ss:$0 sm:$0xff]  ;;  %v729_v29 = vsel %vm1223_vm2, %v723_v24, 0.0 }
 0x2aa   : >> { %v1356_v26 = vld [vmem:[%s739_s12 - $0x1] sm:$0xe]  ;;  %737 = vst [vmem:[%s1732_s25] sm:$0xf] %v729_v29 }
 0x2ab   : >> { %v748_v28 = vsel %vm747_vm14, %v741_v25, %v1356_v26  ;;  %v732_v31 = vpop.permute.xlu1 %731 }
 0x2ac   : >> { %751 = vst [vmem:[%s739_s12] sm:$0xf] %v748_v28  ;;  %v765_v32 = vld [vmem:[%s763_s13] ss:$0 sm:$0xff]  ;;  %v1361_v34 = vld [vmem:[%s763_s13 + $0x3] ss:$0 sm:$0xff]  ;;  %v736_v35 = vsel %vm703_vm7, %v712_v30, %v732_v31 }
 0x2ad   : >> { %v1360_v33 = vld [vmem:[%s763_s13 - $0x1] sm:$0xe]  ;;  %738 = vst [vmem:[%s1735_s11] sm:$0xf] %v736_v35 }
 0x2ae   : >> { %v772_v36 = vsel %vm747_vm14, %v765_v32, %v1360_v33 }
 0x2af   : >> { %775 = vst [vmem:[%s763_s13] sm:$0xf] %v772_v36 }
 0x2b1   : >> { %v752_v37 = vld [vmem:[%s740_s14] ss:$0 sm:$0xff]  ;;  %v1359_v38 = vld [vmem:[%s740_s14 + $0x1] sm:$0x7] }
 0x2b2   : >> { %1358 = vst [vmem:[%s739_s12 + $0x1] sm:$0x1] %v752_v37  ;;  %v760_v39 = vsel %vm759_vm15, %v1357_v27, %v1359_v38  ;;  %422 = sbr.rel (!%p420_p1) target bundleno = 258 (0x102), region = 319 }
 0x2b3   : >> { %762 = vst [vmem:[%s740_s14] sm:$0xf] %v760_v39 }
 0x2b4   : >> { %v776_v40 = vld [vmem:[%s764_s15] ss:$0 sm:$0xff]  ;;  %v1363_v41 = vld [vmem:[%s764_s15 + $0x1] sm:$0x7] }
 0x2b5   : >> { %1362 = vst [vmem:[%s763_s13 + $0x1] sm:$0x1] %v776_v40  ;;  %v784_v42 = vsel %vm759_vm15, %v1361_v34, %v1363_v41 }
 0x2b6   : >> { %786 = vst [vmem:[%s764_s15] sm:$0xf] %v784_v42 }
 0x2b9   : > { %v334_v43 = vld [vmem:[%s328_s0] sm:$0xf] }
 0x2ba   : > { %v335_v45 = vsel %vm1223_vm2, %v334_v43, 0.0  ;;  %v370_v47 = vld [vmem:[%s364_s2] sm:$0xf] }
 0x2bb   : > { %v336_v49 = vmul.f32 %v335_v45, %v335_v45  ;;  %v371_v51 = vsel %vm1223_vm2, %v370_v47, 0.0 }
 0x2bc   : > { %v353_v44 = vld [vmem:[%s347_s1] sm:$0xf]  ;;  %v372_v53 = vmul.f32 %v371_v51, %v371_v51 }
 0x2bd   : > { %v354_v46 = vsel %vm1223_vm2, %v353_v44, 0.0  ;;  %v387_v48 = vld [vmem:[%s381_s3] sm:$0xf]  ;;  %v340_v56 = vsel %vm339_vm8, 0.0, %v336_v49 }
 0x2be   : > { %v355_v50 = vmul.f32 %v354_v46, %v354_v46  ;;  %v388_v52 = vsel %vm1223_vm2, %v387_v48, 0.0 }
 0x2bf   : > { %v389_v55 = vmul.f32 %v388_v52, %v388_v52 }
 0x2c0   : > { %v357_v54 = vadd.f32 %v355_v50, %v336_v49  ;;  %v356_v57 = vadd.f32 %v355_v50, %v340_v56 }
 0x2c1   : > { %v393_v60 = vsel %vm392_vm9, 0.0, %v389_v55 }
 0x2c2   : > { %v374_v58 = vadd.f32 %v372_v53, %v357_v54  ;;  %v373_v59 = vadd.f32 %v372_v53, %v356_v57 }
 0x2c4   : > { %v395_v61 = vadd.f32 %v389_v55, %v374_v58  ;;  %v394_v62 = vadd.f32 %v393_v60, %v373_v59 }
 0x2c6   : > { %396 = vadd.xlane.f32.xlu0 %v395_v61 }
 0x2ca   : > { %404 = vadd.xlane.f32.xlu0 %v394_v62 }
 0x353   : > { %v397_v63 = vpop.xlane.xlu0 %396 }
 0x354   : > { %v398_v0 = vrot.slane %v397_v63, 4 }
 0x356   : > { %v399_v1 = vadd.f32 %v398_v0, %v397_v63 }
 0x357   : > { %v405_v2 = vpop.xlane.xlu0 %404 }
 0x358   : > { %v400_v3 = vrot.slane %v399_v1, 2  ;;  %v406_v4 = vrot.slane %v405_v2, 4 }
 0x35a   : > { %v407_v7 = vadd.f32 %v406_v4, %v405_v2  ;;  %v401_v8 = vadd.f32 %v400_v3, %v399_v1 }
 0x35c   : > { %v408_v9 = vrot.slane %v407_v7, 2  ;;  %v402_v11 = vrot.slane %v401_v8, 1 }
 0x35e   : > { %v409_v10 = vadd.f32 %v408_v9, %v407_v7  ;;  %v403_v14 = vadd.f32 %v402_v11, %v401_v8 }
 0x360   : > { %v410_v12 = vrot.slane %v409_v10, 1 }
 0x362   : > { %v411_v13 = vadd.f32 %v410_v12, %v409_v10 }
 0x364   : > { %1382 = vpush %v411_v13 }
 0x365   : > { %1384 = vpush %v403_v14 }
 0x395   : > { %s1383_s27 = spop %1382 }
 0x396   : > { %s1385_s17 = spop %1384 }
 0x397   : > { %s414_s18 = smul.f32 1e-10, %s1385_s17 }
 0x399   : > { %p415_p3 = scmp.le.f32.partialorder %s1383_s27, %s414_s18 }
 0x39b   : > { %p417_p4 = por %p416_p2, %p415_p3 }
 0x39d   :  { %865 = sbr.rel (!%p417_p4) target bundleno = 257 (0x101), region = 330 }
 0x3a4 PF:  { %v927_v15 = vld [vmem:[#allocation15] sm:$0xf]  ;;  %s866_s19 = smov [#allocation23]  ;;  %v870_v5 = vmov %v1596_v5  ;;  %v873_v6 = vmov %v1598_v6  ;;  %v921_v16 = vld [vmem:[#allocation12] sm:$0xf]  ;;  %s1530_s20 = smov [#allocation16]  }
 0x3a5   :  { %v890_v5 = vmov %v1596_v5  ;;  %v893_v6 = vmov %v1598_v6  ;;  %929 = vst [vmem:[#allocation16] sm:$0xf] %v927_v15  ;;  %s1080_s21 = sshll.u32 %s1530_s20, 4  ;;  %v874_v17 = vld [vmem:[%s866_s19] sm:$0xf]  ;;  %vm877_vm10 = vcmp.eq.s32.totalorder %v873_v6, %v870_v5  ;;  %s886_s26 = smov [#allocation26]  ;;  %s1081_s21 = int_to_ptr.vmem [resolvable:$true] %s1080_s21 }
 0x3a6   :  { %vm897_vm11 = vcmp.eq.s32.totalorder %v893_v6, %v890_v5  ;;  %923 = vst [vmem:[#allocation13] sm:$0xf] %v921_v16  ;;  %v933_v18 = vld [vmem:[#allocation18] sm:$0xf]  ;;  %v878_v19 = vsel %vm877_vm10, %v874_v17, 0.0  ;;  %s1417_s22 = scalar_lea.vmem %s1081_s21, 64  ;;  %p1422_p6 = scmp.lt.s32.totalorder %s1081_s21, %s1081_s21 }
 0x3a7   :  { %935 = vst [vmem:[#allocation19] sm:$0xf] %v933_v18  ;;  %v939_v20 = vld [vmem:[#allocation20] sm:$0xf]  ;;  %p1418_p5 = scmp.ne.s32.totalorder %s1081_s21, %s1417_s22  ;;  %p1423_p7 = scmp.lt.s32.totalorder %s1417_s22, %s1417_s22 }
 0x3a9   :  { %p1424_p8 = por %p1423_p7, %p1422_p6 }
 0x3ab   :  { %p1425_p9 = pnand %p1424_p8, %p1418_p5 }
 0x3ad   :  { %1428 = shalt.err (!%p1425_p9)
}
 0x3ae   :  { %s1429_s25 = scalar_lea.hbm %s1858_s7, 64 }
 0x3af   :  { %p1430_p10 = scmp.ne.s32.totalorder %s1858_s7, %s1429_s25  ;;  %p1433_p11 = scmp.lt.u32.totalorder %s1429_s25, %s1858_s7 }
 0x3b1   :  { %p1435_p12 = pnand %p1433_p11, %p1430_p10 }
 0x3b3   :  { %1438 = shalt.err (!%p1435_p12)
}
 0x3b4   :  { %1083 = dma.vmem_to_hbm [thread:$0]  %s1081_s21, 64, %s1858_s7, [#allocation17]   ;;  %v879_v21 = vrot.slane %v878_v19, 4  ;;  %v894_v22 = vld [vmem:[%s886_s26] sm:$0xf] }
 0x3b5   :  { %941 = vst [vmem:[#allocation21] sm:$0xf] %v939_v20  ;;  %v898_v23 = vsel %vm897_vm11, %v894_v22, 0.0  ;;  %s1531_s13 = smov [#allocation13]   ;;  %s1532_s15 = smov [#allocation19]  }
 0x3b6   :  { %v880_v24 = vadd.f32 %v879_v21, %v878_v19  ;;  %v899_v25 = vrot.slane %v898_v23, 4  ;;  %s1073_s14 = sshll.u32 %s1531_s13, 4  ;;  %s1087_s16 = sshll.u32 %s1532_s15, 4  ;;  %s1074_s14 = int_to_ptr.vmem [resolvable:$true] %s1073_s14  ;;  %s1088_s16 = int_to_ptr.vmem [resolvable:$true] %s1087_s16 }
 0x3b7   :  { %s1439_s0 = scalar_lea.vmem %s1074_s14, 64  ;;  %p1444_p0 = scmp.lt.s32.totalorder %s1074_s14, %s1074_s14 }
 0x3b8   :  { %v881_v26 = vrot.slane %v880_v24, 2  ;;  %v900_v27 = vadd.f32 %v899_v25, %v898_v23  ;;  %p1440_p13 = scmp.ne.s32.totalorder %s1074_s14, %s1439_s0  ;;  %p1445_p1 = scmp.lt.s32.totalorder %s1439_s0, %s1439_s0 }
 0x3ba   :  { %p1446_p2 = por %p1445_p1, %p1444_p0 }
 0x3bc   :  { %p1447_p3 = pnand %p1446_p2, %p1440_p13 }
 0x3be   :  { %1450 = shalt.err (!%p1447_p3)
}
 0x3bf   :  { %s1451_s2 = scalar_lea.hbm %s1857_s6, 64 }
 0x3c0   :  { %p1452_p4 = scmp.ne.s32.totalorder %s1857_s6, %s1451_s2  ;;  %p1455_p5 = scmp.lt.u32.totalorder %s1451_s2, %s1857_s6 }
 0x3c2   :  { %p1457_p6 = pnand %p1455_p5, %p1452_p4 }
 0x3c4   :  { %1460 = shalt.err (!%p1457_p6)
}
 0x3c5   :  { %1076 = dma.vmem_to_hbm [thread:$0]  %s1074_s14, 64, %s1857_s6, [#allocation14]   ;;  %v882_v5 = vadd.f32 %v881_v26, %v880_v24  ;;  %v901_v6 = vrot.slane %v900_v27, 2 }
 0x3c6   :  { %s1461_s21 = scalar_lea.vmem %s1088_s16, 64  ;;  %p1466_p8 = scmp.lt.s32.totalorder %s1088_s16, %s1088_s16 }
 0x3c7   :  { %p1462_p7 = scmp.ne.s32.totalorder %s1088_s16, %s1461_s21  ;;  %p1467_p9 = scmp.lt.s32.totalorder %s1461_s21, %s1461_s21 }
 0x3c9   :  { %p1468_p10 = por %p1467_p9, %p1466_p8 }
 0x3cb   :  { %p1469_p11 = pnand %p1468_p10, %p1462_p7 }
 0x3cd   :  { %1472 = shalt.err (!%p1469_p11)
}
 0x3ce   :  { %s1473_s23 = scalar_lea.hbm %s1859_s8, 64 }
 0x3cf   :  { %p1474_p12 = scmp.ne.s32.totalorder %s1859_s8, %s1473_s23  ;;  %p1477_p13 = scmp.lt.u32.totalorder %s1473_s23, %s1859_s8 }
 0x3d1   :  { %p1479_p0 = pnand %p1477_p13, %p1474_p12 }
 0x3d3   :  { %1482 = shalt.err (!%p1479_p0)
}
 0x3d4   :  { %1090 = dma.vmem_to_hbm [thread:$0]  %s1088_s16, 64, %s1859_s8, [#allocation17]   ;;  %v883_v28 = vrot.slane %v882_v5, 1  ;;  %v902_v29 = vadd.f32 %v901_v6, %v900_v27 }
 0x3d5   :  { %s1533_s10 = smov [#allocation21]   ;;  %s867_s12 = smov [#allocation8] }
 0x3d6   :  { %s1094_s11 = sshll.u32 %s1533_s10, 4  ;;  %s1095_s11 = int_to_ptr.vmem [resolvable:$true] %s1094_s11 }
 0x3d7   :  { %s1483_s13 = scalar_lea.vmem %s1095_s11, 64  ;;  %p1488_p2 = scmp.lt.s32.totalorder %s1095_s11, %s1095_s11 }
 0x3d8   :  { %p1484_p1 = scmp.ne.s32.totalorder %s1095_s11, %s1483_s13  ;;  %p1489_p3 = scmp.lt.s32.totalorder %s1483_s13, %s1483_s13 }
 0x3da   :  { %p1490_p4 = por %p1489_p3, %p1488_p2 }
 0x3dc   :  { %p1491_p5 = pnand %p1490_p4, %p1484_p1 }
 0x3de   :  { %1494 = shalt.err (!%p1491_p5)
}
 0x3df   :  { %s1495_s0 = scalar_lea.hbm %s1860_s9, 64 }
 0x3e0   :  { %p1496_p6 = scmp.ne.s32.totalorder %s1860_s9, %s1495_s0  ;;  %p1499_p7 = scmp.lt.u32.totalorder %s1495_s0, %s1860_s9 }
 0x3e2   :  { %p1501_p8 = pnand %p1499_p7, %p1496_p6 }
 0x3e4   :  { %1504 = shalt.err (!%p1501_p8)
}
 0x3e5   :  { %1097 = dma.vmem_to_hbm [thread:$0]  %s1095_s11, 64, %s1860_s9, [#allocation22]   ;;  %v884_v30 = vadd.f32 %v883_v28, %v882_v5  ;;  %v903_v31 = vrot.slane %v902_v29, 1 }
 0x3e6   :  { %s887_s27 = smov [#allocation10] }
 0x3e7   :  { %885 = vst [vmem:[%s867_s12] sm:$0x1] %v884_v30  ;;  %v904_v32 = vadd.f32 %v903_v31, %v902_v29 }
 0x3e9   :  { %905 = vst [vmem:[%s887_s27] sm:$0x1] %v904_v32 }
 0x3ee   :  { %v909_v33 = vld [vmem:[#allocation8] sm:$0x1] }
 0x3ef   :  { %911 = vst [vmem:[#allocation9] sm:$0x1] %v909_v33 }
 0x3f0   :  { %v915_v34 = vld [vmem:[#allocation10] sm:$0x1] }
 0x3f1   :  { %917 = vst [vmem:[#allocation11] sm:$0x1] %v915_v34 }
 0x3f6   :  { %v1004_v35 = vld [vmem:[#allocation9] sm:$0x1] }
 0x3f7   :  { %1005 = vst [vmem:[%s1855_s4] sm:$0x1] %v1004_v35 }
 0x3f8   :  { %v1068_v36 = vld [vmem:[#allocation11] sm:$0x1] }
 0x3f9   :  { %1069 = vst [vmem:[%s1856_s5] sm:$0x1] %v1068_v36 }
 0x3fa   :  { %1513 = dma.done.wait [#allocation14], 64  }
 0x3fb   :  { %1514 = vsyncadd [#allocation14], 4294967232 }
 0x3fc   :  { %1515 = dma.done.wait [#allocation17], 128  }
 0x3fd   :  { %1516 = vsyncadd [#allocation17], 4294967168 }
 0x3fe   :  { %1517 = dma.done.wait [#allocation22], 64  }
 0x3ff   :  { %1518 = vsyncadd [#allocation22], 4294967232 }
 0x400   :  { %1106 = vsyncpa [#allocation14], 1 }
 0x401   :  { %1107 = vsyncpa [#allocation17], 1 }
 0x402   :  { %1108 = vsyncpa [#allocation22], 1 }

// kernel: reverse.2
= control target key start
LH: loop header
LB: loop body
LE: loop exit
PB: predicated region body
PF: predicated region fallthrough
CT: control target
= control target key end

     0   :  { %v2_v0 = vlaneseq  ;;  %s123_s0 = inlined_call_operand.vmem [shape: f32[8], index: 0, kind: input, shape index: {}]   ;;  %s124_s1 = inlined_call_operand.vmem [shape: f32[8], index: 1, kind: output, shape index: {}]  }
   0x2   :  { %v3_v1 = vsub.s32 7, %v2_v0 }
   0x4   :  { %4 = vset.pattern.permute.xlu0 %v3_v1 }
   0x5   :  { %v43_v2 = vld [vmem:[#allocation1] sm:$0x1]  ;;  %v21_v3 = vld [vmem:[%s123_s0] sm:$0x1]  ;;  %v58_v10 = vshrl.u32 %v2_v0, 7 }
   0x6   :  { %44 = vst [vmem:[#allocation0] sm:$0x1] %v43_v2  ;;  %22 = vst [vmem:[#allocation1 + $0x1] sm:$0x1] %v21_v3 }
   0x7   :  { %vm59_vm0 = vcmp.lt.s32.totalorder %v58_v10, 1 }
   0xd   :  { %v46_v4 = vld [vmem:[#allocation0 + $0x7] ss:$-1 sm:$0xff]  ;;  %v40_v5 = vld [vmem:[#allocation1 + $0x1] sm:$0x1] }
   0xe   :  { %v47_v6 = vrot.slane %v46_v4, 7  ;;  %42 = vst [vmem:[#allocation0 + $0x8] sm:$0x1] %v40_v5 }
  0x10   :  { %48 = vperm.xlu0 %4, %v47_v6  }
  0x15   :  { %v53_v7 = vld [vmem:[#allocation0 + $0xf] ss:$-1 sm:$0xff] }
  0x16   :  { %v54_v8 = vrot.slane %v53_v7, 7 }
  0x18   :  { %55 = vperm.xlu0 %4, %v54_v8  }
  0x8f   :  { %v49_v9 = vpop.permute.xlu0 %48 }
  0x90   :  { %50 = vst [vmem:[#allocation2] sm:$0xff] %v49_v9 }
  0x97   :  { %v56_v11 = vpop.permute.xlu0 %55 }
  0x98   :  { %60 = vst.msk [vmem:[#allocation2] sm:$0xff] %vm59_vm0, %v56_v11 }
  0x9f   :  { %v64_v12 = vld [vmem:[#allocation2] sm:$0x1] }
  0xa0   :  { %66 = vst [vmem:[#allocation3] sm:$0x1] %v64_v12 }
  0xa7   :  { %v82_v13 = vld [vmem:[#allocation3] sm:$0x1] }
  0xa8   :  { %83 = vst [vmem:[%s124_s1] sm:$0x1] %v82_v13 }

// kernel: custom-call.28
= control target key start
LH: loop header
LB: loop body
LE: loop exit
PB: predicated region body
PF: predicated region fallthrough
CT: control target
= control target key end

     0   :  { %4 = vsyncpa [#allocation4], 0  ;;  %v914_v5 = vmov 0.0   ;;  %s959_s27 = smov 0   ;;  %s1320_s0 = inlined_call_operand.vmem [shape: f32[72,8], index: 0, kind: input, shape index: {}]   ;;  %s1321_s1 = inlined_call_operand.vmem [shape: f32[72,8], index: 1, kind: output, shape index: {0}]   ;;  %s1322_s2 = inlined_call_operand.hbm [shape: f32[8], index: 2, kind: output, shape index: {1}]  }
   0x1   :  { %v48_v0 = vld [vmem:[%s1320_s0] sm:$0xff]  ;;  %v50_v1 = vld [vmem:[%s1320_s0 + $0x8] sm:$0xff]  ;;  %v52_v2 = vld [vmem:[%s1320_s0 + $0x10] sm:$0xff]  ;;  %103 = vst [vmem:[#allocation2] sm:$0x1] %v914_v5 }
   0x2   :  { %v54_v3 = vld [vmem:[%s1320_s0 + $0x18] sm:$0xff]  ;;  %v56_v4 = vld [vmem:[%s1320_s0 + $0x20] sm:$0xff]  ;;  %70 = vst [vmem:[#allocation1] sm:$0xff] %v48_v0  ;;  %74 = vst [vmem:[#allocation1 + $0x8] sm:$0xff] %v50_v1 }
   0x3   :  { %v58_v6 = vld [vmem:[%s1320_s0 + $0x28] sm:$0xff]  ;;  %v60_v7 = vld [vmem:[%s1320_s0 + $0x30] sm:$0xff]  ;;  %v62_v8 = vld [vmem:[%s1320_s0 + $0x38] sm:$0xff]  ;;  %78 = vst [vmem:[#allocation1 + $0x10] sm:$0xff] %v52_v2 }
   0x4   :  { %82 = vst [vmem:[#allocation1 + $0x18] sm:$0xff] %v54_v3  ;;  %86 = vst [vmem:[#allocation1 + $0x20] sm:$0xff] %v56_v4  ;;  %v64_v9 = vld [vmem:[%s1320_s0 + $0x40] sm:$0xff] }
   0x5   :  { %90 = vst [vmem:[#allocation1 + $0x28] sm:$0xff] %v58_v6  ;;  %94 = vst [vmem:[#allocation1 + $0x30] sm:$0xff] %v60_v7 }
   0x6   :  { %98 = vst [vmem:[#allocation1 + $0x38] sm:$0xff] %v62_v8  ;;  %102 = vst [vmem:[#allocation1 + $0x40] sm:$0xff] %v64_v9 }
   0x7 LB: > { %v111_v10 = vlaneseq  ;;  %v968_v13 = vstv %s912_s27  ;;  %s218_s0 = scalar_lea.vmem [#allocation1], %s912_s27  ;;  %s1014_s28 = smov [#allocation1]  ;;  %s912_s27 = sphi %s959_s27, %s109_s27  }
   0x8   : > { %s420_s29 = scalar_lea.vmem [#allocation5], %s912_s27  ;;  %s1102_s30 = smov [#allocation1] }
   0x9   : > { %v110_v11 = vld [vmem:[#allocation1] sm:$0xff]  ;;  %v965_v12 = vshrl.u32 %v111_v10, 7  ;;  %v119_v14 = vld [vmem:[#allocation1 + $0x8] sm:$0xff]  ;;  %s1104_s3 = smov [#allocation5] }
   0xa   : > { %v129_v16 = vld [vmem:[#allocation1 + $0x10] sm:$0xff] }
   0xb   : > { %vm115_vm0 = vcmp.gt.s32.totalorder %v965_v12, %v968_v13  ;;  %v122_v15 = vadd.s32 8, %v965_v12  ;;  %v132_v17 = vadd.s32 16, %v965_v12  ;;  %v139_v18 = vld [vmem:[#allocation1 + $0x18] sm:$0xff]  ;;  %v142_v19 = vadd.s32 24, %v965_v12  ;;  %v149_v25 = vld [vmem:[#allocation1 + $0x20] sm:$0xff] }
   0xc   : > { %v116_v20 = vsel %vm115_vm0, %v110_v11, 0.0  ;;  %v152_v21 = vadd.s32 32, %v965_v12  ;;  %v162_v22 = vadd.s32 40, %v965_v12  ;;  %v172_v23 = vadd.s32 48, %v965_v12  ;;  %v159_v31 = vld [vmem:[#allocation1 + $0x28] sm:$0xff]  ;;  %v169_v36 = vld [vmem:[#allocation1 + $0x30] sm:$0xff] }
   0xd   : > { %v117_v24 = vmul.f32 %v116_v20, %v116_v20  ;;  %vm124_vm1 = vcmp.gt.s32.totalorder %v122_v15, %v968_v13  ;;  %vm134_vm2 = vcmp.gt.s32.totalorder %v132_v17, %v968_v13  ;;  %vm144_vm3 = vcmp.gt.s32.totalorder %v142_v19, %v968_v13  ;;  %v179_v41 = vld [vmem:[#allocation1 + $0x38] sm:$0xff]  ;;  %v189_v45 = vld [vmem:[#allocation1 + $0x40] sm:$0xff] }
   0xe   : > { %v125_v26 = vsel %vm124_vm1, %v119_v14, 0.0  ;;  %v135_v27 = vsel %vm134_vm2, %v129_v16, 0.0  ;;  %v145_v28 = vsel %vm144_vm3, %v139_v18, 0.0  ;;  %vm154_vm4 = vcmp.gt.s32.totalorder %v152_v21, %v968_v13  ;;  %v992_v62 = vld [vmem:[%s218_s0] ss:$0 sm:$0xff] }
   0xf   : > { %v126_v29 = vmul.f32 %v125_v26, %v125_v26  ;;  %v136_v30 = vmul.f32 %v135_v27, %v135_v27  ;;  %v155_v32 = vsel %vm154_vm4, %v149_v25, 0.0  ;;  %vm164_vm5 = vcmp.gt.s32.totalorder %v162_v22, %v968_v13 }
  0x10   : > { %v182_v33 = vadd.s32 56, %v965_v12  ;;  %v146_v35 = vmul.f32 %v145_v28, %v145_v28  ;;  %vm174_vm6 = vcmp.gt.s32.totalorder %v172_v23, %v968_v13  ;;  %v192_v37 = vadd.s32 64, %v965_v12 }
  0x11   : > { %v127_v34 = vadd.f32 %v126_v29, %v117_v24  ;;  %v165_v38 = vsel %vm164_vm5, %v159_v31, 0.0  ;;  %v156_v40 = vmul.f32 %v155_v32, %v155_v32  ;;  %v175_v42 = vsel %vm174_vm6, %v169_v36, 0.0  ;;  %v258_v36 = vld [vmem:[%s1014_s28] sm:$0xff] }
  0x12   : > { %vm184_vm7 = vcmp.gt.s32.totalorder %v182_v33, %v968_v13  ;;  %v166_v44 = vmul.f32 %v165_v38, %v165_v38  ;;  %vm194_vm8 = vcmp.gt.s32.totalorder %v192_v37, %v968_v13  ;;  %v176_v48 = vmul.f32 %v175_v42, %v175_v42  ;;  %v814_v37 = vld [vmem:[%s1014_s28 + $0x10] sm:$0xff]  ;;  %v817_v42 = vld [vmem:[%s1014_s28 + $0x28] sm:$0xff] }
  0x13   : > { %v137_v39 = vadd.f32 %v136_v30, %v127_v34  ;;  %v185_v46 = vsel %vm184_vm7, %v179_v41, 0.0  ;;  %v197_v49 = vsel %vm194_vm8, %v189_v45, 0.0  ;;  %v220_v63 = vand.u32 2147483647, %v992_v62  ;;  %v816_v41 = vld [vmem:[%s1014_s28 + $0x20] sm:$0xff] }
  0x14   : > { %v186_v51 = vmul.f32 %v185_v46, %v185_v46  ;;  %v198_v53 = vmul.f32 %v197_v49, %v197_v49  ;;  %vm245_vm14 = vcmp.lt.f32.partialorder %v992_v62, 0.0  ;;  %v257_v12 = vmov %v965_v12 }
  0x15   : > { %v147_v43 = vadd.f32 %v146_v35, %v137_v39  ;;  %v221_v4 = vmax.f32 %v220_v63, 0.0  ;;  %v294_v31 = vadd.s32 16, %v257_v12  ;;  %v276_v32 = vadd.s32 8, %v257_v12  ;;  %v813_v39 = vld [vmem:[%s1014_s28 + $0x8] sm:$0xff] }
  0x16   : > { %v312_v33 = vadd.s32 24, %v257_v12  ;;  %v330_v34 = vadd.s32 32, %v257_v12  ;;  %v348_v35 = vadd.s32 40, %v257_v12  ;;  %vm261_vm15 = vcmp.gt.s32.totalorder %v257_v12, %v968_v13 }
  0x17   : > { %v157_v47 = vadd.f32 %v156_v40, %v147_v43  ;;  %vm296_vm0 = vcmp.gt.s32.totalorder %v294_v31, %v968_v13  ;;  %v1021_v38 = vand.u32 127, %v111_v10  ;;  %vm278_vm1 = vcmp.gt.s32.totalorder %v276_v32, %v968_v13  ;;  %v815_v40 = vld [vmem:[%s1014_s28 + $0x18] sm:$0xff] }
  0x18   : > { %vm314_vm2 = vcmp.gt.s32.totalorder %v312_v33, %v968_v13  ;;  %vm332_vm3 = vcmp.gt.s32.totalorder %v330_v34, %v968_v13  ;;  %vm350_vm4 = vcmp.gt.s32.totalorder %v348_v35, %v968_v13  ;;  %v366_v43 = vadd.s32 48, %v257_v12 }
  0x19   : > { %v167_v50 = vadd.f32 %v166_v44, %v157_v47  ;;  %v384_v44 = vadd.s32 56, %v257_v12  ;;  %v262_v45 = vsel %vm261_vm15, %v258_v36, 0.0  ;;  %v297_v46 = vsel %vm296_vm0, %v814_v37, 0.0 }
  0x1a   : > { %v279_v10 = vsel %vm278_vm1, %v813_v39, 0.0  ;;  %v315_v47 = vsel %vm314_vm2, %v815_v40, 0.0  ;;  %v333_v49 = vsel %vm332_vm3, %v816_v41, 0.0  ;;  %vm1034_vm5 = vcmp.eq.s32.totalorder %v1021_v38, %v968_v13  ;;  %v433_v41 = vld [vmem:[#allocation2] ss:$0 sm:$0xff] }
  0x1b   : > { %v177_v52 = vadd.f32 %v176_v48, %v167_v50  ;;  %v402_v48 = vadd.s32 64, %v257_v12  ;;  %v351_v50 = vsel %vm350_vm4, %v817_v42, 0.0  ;;  %vm368_vm6 = vcmp.gt.s32.totalorder %v366_v43, %v968_v13 }
  0x1c   : > { %vm386_vm7 = vcmp.gt.s32.totalorder %v384_v44, %v968_v13  ;;  %v440_v12 = vmov %v965_v12  ;;  %vm1164_vm3 = vcmp.gt.s32.totalorder %v1021_v38, %v968_v13 }
  0x1d   : > { %v187_v54 = vadd.f32 %v186_v51, %v177_v52  ;;  %vm404_vm8 = vcmp.gt.s32.totalorder %v402_v48, %v968_v13 }
  0x1f   : > { %v199_v55 = vadd.f32 %v198_v53, %v187_v54 }
  0x21   : > { %v200_v56 = vrot.slane %v199_v55, 4 }
  0x23   : > { %v201_v57 = vadd.f32 %v200_v56, %v199_v55 }
  0x25   : > { %v202_v58 = vrot.slane %v201_v57, 2 }
  0x27   : > { %v203_v59 = vadd.f32 %v202_v58, %v201_v57  ;;  %v818_v57 = vld [vmem:[%s1014_s28 + $0x30] sm:$0xff]  ;;  %v819_v58 = vld [vmem:[%s1014_s28 + $0x38] sm:$0xff] }
  0x29   : > { %v204_v60 = vrot.slane %v203_v59, 1 }
  0x2b   : > { %v988_v61 = vadd.f32 %v204_v60, %v203_v59 }
  0x2d   : > { %872 = vrsqrt.f32 %v988_v61  ;;  %vm208_vm9 = vcmp.eq.f32.partialorder %v988_v61, inf  ;;  %v211_v1 = vand.u32 2147483648, %v988_v61  ;;  %vm210_vm10 = vcmp.eq.f32.partialorder %v988_v61, 0.0 }
  0x37   : > { %v873_v0 = vpop.eup %872 }
  0x38   : > { %v207_v2 = vmul.f32 %v873_v0, %v988_v61 }
  0x3a   : > { %v209_v3 = vsel %vm208_vm9, %v988_v61, %v207_v2  ;;  %vm405_vm9 = vcmp.lt.s32.totalorder %v402_v48, 72 }
  0x3b   : > { %v212_v5 = vsel %vm210_vm10, %v211_v1, %v209_v3 }
  0x3c   : > { %v222_v6 = vand.u32 2147483647, %v212_v5  ;;  %v369_v5 = vsel %vm368_vm6, %v818_v57, 0.0 }
  0x3e   : > { %v223_v7 = vmax.f32 %v221_v4, %v222_v6 }
  0x40   : > { %874 = vrcp.f32 %v223_v7  ;;  %vm235_vm13 = vcmp.eq.f32.partialorder %v223_v7, 0.0 }
  0x4a   : > { %v875_v8 = vpop.eup %874 }
  0x4b   : > { %v225_v9 = vmul.f32 %v875_v8, %v220_v63  ;;  %v228_v11 = vmul.f32 0.0, %v875_v8  ;;  %v232_v14 = vmul.f32 %v875_v8, %v222_v6  ;;  %v387_v6 = vsel %vm386_vm7, %v819_v58, 0.0 }
  0x4c   : > { %v494_v8 = vadd.s32 64, %v440_v12  ;;  %v513_v12 = vmov %v965_v12 }
  0x4d   : > { %v226_v15 = vmul.f32 %v225_v9, %v225_v9  ;;  %v229_v16 = vmul.f32 %v228_v11, %v228_v11  ;;  %v233_v17 = vmul.f32 %v232_v14, %v232_v14 }
  0x4f   : > { %v230_v18 = vadd.f32 %v229_v16, %v226_v15 }
  0x51   : > { %v234_v19 = vadd.f32 %v233_v17, %v230_v18 }
  0x53   : > { %876 = vrsqrt.f32 %v234_v19  ;;  %vm238_vm11 = vcmp.eq.f32.partialorder %v234_v19, inf  ;;  %v241_v21 = vand.u32 2147483648, %v234_v19  ;;  %vm240_vm12 = vcmp.eq.f32.partialorder %v234_v19, 0.0 }
  0x5d   : > { %v877_v20 = vpop.eup %876 }
  0x5e   : > { %v237_v22 = vmul.f32 %v877_v20, %v234_v19 }
  0x60   : > { %v239_v23 = vsel %vm238_vm11, %v234_v19, %v237_v22  ;;  %vm1060_vm11 = vmand %vm404_vm8, %vm405_vm9 }
  0x61   : > { %v242_v24 = vsel %vm240_vm12, %v241_v21, %v239_v23  ;;  %vm530_vm12 = vcmp.ge.s32.totalorder %v513_v12, %v968_v13 }
  0x62   : > { %v243_v25 = vmul.f32 %v242_v24, %v223_v7  ;;  %v820_v7 = vld [vmem:[%s1014_s28 + $0x40] sm:$0xff]  ;;  %vm1137_vm15 = vmand %vm1034_vm5, %vm530_vm12 }
  0x63   : > { %v407_v20 = vsel %vm1060_vm11, %v820_v7, 0.0 }
  0x64   : > { %v244_v26 = vsel %vm235_vm13, 0.0, %v243_v25 }
  0x65   : > { %v246_v27 = vxor.u32 2147483648, %v244_v26 }
  0x67   : > { %v1003_v28 = vsel %vm245_vm14, %v244_v26, %v246_v27 }
  0x68   : > { %v1009_v29 = vsel %vm210_vm10, %v992_v62, %v1003_v28  ;;  %v248_v14 = vsub.f32 %v1003_v28, %v992_v62 }
  0x69   : > { %v253_v30 = vsub.f32 %v992_v62, %v1009_v29 }
  0x6b   : > { %878 = vrcp.f32 %v253_v30 }
  0x6c   : > { %880 = vrcp.f32 %v1003_v28 }
  0x75   : > { %v879_v51 = vpop.eup %878 }
  0x76   : > { %v264_v53 = vmul.f32 %v879_v51, %v262_v45  ;;  %v299_v54 = vmul.f32 %v879_v51, %v297_v46  ;;  %v281_v55 = vmul.f32 %v879_v51, %v279_v10  ;;  %v317_v56 = vmul.f32 %v879_v51, %v315_v47  ;;  %v881_v19 = vpop.eup %880  ;;  %v443_v46 = vld [vmem:[%s1102_s30] sm:$0xff]  ;;  %v822_v10 = vld [vmem:[%s1102_s30 + $0x8] sm:$0xff]  ;;  %v824_v47 = vld [vmem:[%s1102_s30 + $0x10] sm:$0xff] }
  0x77   : > { %v335_v59 = vmul.f32 %v879_v51, %v333_v49  ;;  %v353_v60 = vmul.f32 %v879_v51, %v351_v50  ;;  %v371_v17 = vmul.f32 %v879_v51, %v369_v5  ;;  %v389_v18 = vmul.f32 %v879_v51, %v387_v6  ;;  %v832_v5 = vld [vmem:[%s1102_s30 + $0x30] sm:$0xff] }
  0x78   : > { %v265_v63 = vsel %vm210_vm10, 0.0, %v264_v53  ;;  %v300_v0 = vsel %vm210_vm10, 0.0, %v299_v54  ;;  %v282_v1 = vsel %vm210_vm10, 0.0, %v281_v55  ;;  %v318_v2 = vsel %vm210_vm10, 0.0, %v317_v56  ;;  %v826_v55 = vld [vmem:[%s1102_s30 + $0x18] sm:$0xff] }
  0x79   : > { %v270_v3 = vsel %vm1034_vm5, %v265_v63, 0.0  ;;  %v305_v4 = vsel %vm1034_vm5, %v300_v0, 0.0  ;;  %v287_v9 = vsel %vm1034_vm5, %v282_v1, 0.0  ;;  %v323_v11 = vsel %vm1034_vm5, %v318_v2, 0.0  ;;  %v830_v1 = vld [vmem:[%s1102_s30 + $0x28] sm:$0xff] }
  0x7a   : > { %271 = vadd.xlane.f32.xlu0 %v270_v3  ;;  %306 = vadd.xlane.f32.xlu1 %v305_v4  ;;  %v336_v15 = vsel %vm210_vm10, 0.0, %v335_v59  ;;  %v354_v16 = vsel %vm210_vm10, 0.0, %v353_v60  ;;  %v372_v22 = vsel %vm210_vm10, 0.0, %v371_v17  ;;  %v390_v23 = vsel %vm210_vm10, 0.0, %v389_v18  ;;  %v828_v59 = vld [vmem:[%s1102_s30 + $0x20] sm:$0xff] }
  0x7b   : > { %v341_v21 = vsel %vm1034_vm5, %v336_v15, 0.0  ;;  %v359_v62 = vsel %vm1034_vm5, %v354_v16, 0.0  ;;  %v409_v24 = vmul.f32 %v879_v51, %v407_v20  ;;  %v250_v25 = vmul.f32 %v881_v19, %v248_v14  ;;  %v834_v15 = vld [vmem:[%s1102_s30 + $0x38] sm:$0xff] }
  0x7c   : > { %v377_v26 = vsel %vm1034_vm5, %v372_v22, 0.0  ;;  %v395_v27 = vsel %vm1034_vm5, %v390_v23, 0.0  ;;  %v915_v45 = vmov 1.0  }
  0x7d   : > { %v410_v28 = vsel %vm210_vm10, 0.0, %v409_v24  ;;  %v252_v30 = vsel %vm210_vm10, 0.0, %v250_v25  ;;  %vm500_vm10 = vcmp.lt.s32.totalorder %v494_v8, 72  ;;  %v534_v25 = vadd.s32 8, %v513_v12 }
  0x7e   : > { %288 = vadd.xlane.f32.xlu0 %v287_v9  ;;  %324 = vadd.xlane.f32.xlu1 %v323_v11  ;;  %v415_v31 = vsel %vm1034_vm5, %v410_v28, 0.0  ;;  %v426_v32 = vsel %vm1034_vm5, %v252_v30, 0.0  ;;  %v836_v11 = vld [vmem:[%s1102_s30 + $0x40] sm:$0xff]  ;;  %v576_v28 = vadd.s32 24, %v513_v12  ;;  %s1129_s30 = smov %s1102_s30 }
  0x7f   : > { %vm551_vm13 = vcmp.ge.s32.totalorder %v534_v25, %v968_v13  ;;  %s702_s4 = scalar_lea.vmem %s1129_s30, %s912_s27  ;;  %s109_s27 = sadd.s32 1, %s912_s27  }
  0x80   : > { %vm593_vm0 = vcmp.ge.s32.totalorder %v576_v28, %v968_v13  ;;  %vm1146_vm1 = vmand %vm1034_vm5, %vm551_vm13  ;;  %p106_p0 = scmp.ge.s32.totalorder %s109_s27, 8  }
  0x81   : > { %vm1170_vm4 = vmand %vm1034_vm5, %vm593_vm0  ;;  %s916_s9 = smov (%p106_p0), [#allocation3]  }
  0x82   : > { %342 = vadd.xlane.f32.xlu0 %v341_v21  ;;  %360 = vadd.xlane.f32.xlu1 %v359_v62  ;;  %s786_s10 = sshll.u32 (%p106_p0), %s916_s9, 4  ;;  %s787_s10 = int_to_ptr.vmem [resolvable:$true] %s786_s10 }
  0x83   :  { %s882_s23 = scalar_lea.vmem (%p106_p0), %s787_s10, 16  ;;  %s886_s24 = scalar_lea.vmem (%p106_p0), %s787_s10, 32 }
  0x84   :  { %p883_p1 = scmp.ne.s32.totalorder (%p106_p0), %s787_s10, %s882_s23  ;;  %p887_p2 = scmp.lt.s32.totalorder (%p106_p0), %s787_s10, %s787_s10 }
  0x85   :  { %p888_p3 = scmp.lt.s32.totalorder (%p106_p0), %s886_s24, %s882_s23 }
  0x86   : > { %378 = vadd.xlane.f32.xlu0 %v377_v26  ;;  %396 = vadd.xlane.f32.xlu1 %v395_v27  ;;  %v555_v27 = vadd.s32 16, %v513_v12 }
  0x87   :  { %p889_p4 = por (%p106_p0), %p888_p3, %p887_p2 }
  0x88   : > { %vm572_vm14 = vcmp.ge.s32.totalorder %v555_v27, %v968_v13 }
  0x89   : > { %vm1155_vm2 = vmand %vm1034_vm5, %vm572_vm14  ;;  %p890_p5 = pnand (%p106_p0), %p889_p4, %p883_p1 }
  0x8a   : > { %416 = vadd.xlane.f32.xlu0 %v415_v31  ;;  %427 = vadd.xlane.f32.xlu1 %v426_v32  ;;  %v597_v32 = vadd.s32 32, %v513_v12 }
  0x8c   : > { %vm614_vm6 = vcmp.ge.s32.totalorder %v597_v32, %v968_v13  ;;  %v859_v32 = vld [vmem:[%s1129_s30 + $0x40] sm:$0xff] }
 0x107   : > { %v272_v33 = vpop.xlane.xlu0 %271  ;;  %v307_v34 = vpop.xlane.xlu1 %306 }
 0x108   : > { %273 = vst [vmem:[#allocation5] sm:$0xff] %v272_v33  ;;  %309 = vst [vmem:[#allocation5 + $0x10] sm:$0xff] %v307_v34  ;;  %v618_v33 = vadd.s32 40, %v513_v12 }
 0x10a   : > { %vm635_vm7 = vcmp.ge.s32.totalorder %v618_v33, %v968_v13 }
 0x10b   : > { %v289_v35 = vpop.xlane.xlu0 %288  ;;  %v325_v36 = vpop.xlane.xlu1 %324  ;;  %vm1203_vm12 = vmand %vm1034_vm5, %vm635_vm7 }
 0x10c   : > { %291 = vst [vmem:[#allocation5 + $0x8] sm:$0xff] %v289_v35  ;;  %327 = vst [vmem:[#allocation5 + $0x18] sm:$0xff] %v325_v36  ;;  %v639_v35 = vadd.s32 48, %v513_v12  ;;  %v660_v36 = vadd.s32 56, %v513_v12 }
 0x10e   : > { %vm656_vm8 = vcmp.ge.s32.totalorder %v639_v35, %v968_v13  ;;  %vm677_vm9 = vcmp.ge.s32.totalorder %v660_v36, %v968_v13 }
 0x10f   : > { %v343_v61 = vpop.xlane.xlu0 %342  ;;  %v361_v37 = vpop.xlane.xlu1 %360  ;;  %vm1211_vm13 = vmand %vm1034_vm5, %vm656_vm8 }
 0x110   : > { %345 = vst [vmem:[#allocation5 + $0x20] sm:$0xff] %v343_v61  ;;  %363 = vst [vmem:[#allocation5 + $0x28] sm:$0xff] %v361_v37  ;;  %v1142_v61 = vadd.s32 64, %v513_v12  ;;  %v844_v12 = vld [vmem:[%s1129_s30 + $0x18] sm:$0xff] }
 0x111   : > { %vm1219_vm14 = vmand %vm1034_vm5, %vm677_vm9 }
 0x112   : > { %vm698_vm11 = vcmp.ge.s32.totalorder %v1142_v61, %v968_v13 }
 0x113   : > { %v379_v39 = vpop.xlane.xlu0 %378  ;;  %v397_v40 = vpop.xlane.xlu1 %396 }
 0x114   : > { %381 = vst [vmem:[#allocation5 + $0x30] sm:$0xff] %v379_v39  ;;  %399 = vst [vmem:[#allocation5 + $0x38] sm:$0xff] %v397_v40  ;;  %v520_v40 = vld [vmem:[%s1129_s30] sm:$0xff] }
 0x117   : > { %v417_v42 = vpop.xlane.xlu0 %416  ;;  %v1096_v43 = vpop.xlane.xlu1 %427 }
 0x118   : > { %419 = vst [vmem:[#allocation5 + $0x40] sm:$0xff] %v417_v42  ;;  %v434_v44 = vsel %vm1034_vm5, %v1096_v43, %v433_v41  ;;  %v838_v41 = vld [vmem:[%s1129_s30 + $0x8] sm:$0xff]  ;;  %v841_v42 = vld [vmem:[%s1129_s30 + $0x10] sm:$0xff] }
 0x119   : > { %421 = vst [vmem:[%s420_s29] sm:$0x1] %v915_v45  ;;  %435 = vst [vmem:[#allocation2] sm:$0x1] %v434_v44 }
 0x120   : > { %v442_v48 = vld [vmem:[%s1104_s3] sm:$0xff]  ;;  %v821_v49 = vld [vmem:[%s1104_s3 + $0x8] sm:$0xff]  ;;  %v823_v50 = vld [vmem:[%s1104_s3 + $0x10] sm:$0xff] }
 0x121   : > { %v444_v51 = vmul.f32 %v443_v46, %v442_v48  ;;  %v450_v53 = vmul.f32 %v822_v10, %v821_v49  ;;  %v825_v54 = vld [vmem:[%s1104_s3 + $0x18] sm:$0xff]  ;;  %v457_v57 = vmul.f32 %v824_v47, %v823_v50  ;;  %v827_v58 = vld [vmem:[%s1104_s3 + $0x20] sm:$0xff]  ;;  %v829_v0 = vld [vmem:[%s1104_s3 + $0x28] sm:$0xff] }
 0x122   : > { %v464_v63 = vmul.f32 %v826_v55, %v825_v54  ;;  %v471_v3 = vmul.f32 %v828_v59, %v827_v58  ;;  %v831_v4 = vld [vmem:[%s1104_s3 + $0x30] sm:$0xff]  ;;  %v478_v7 = vmul.f32 %v830_v1, %v829_v0  ;;  %v835_v9 = vld [vmem:[%s1104_s3 + $0x40] sm:$0xff]  ;;  %v833_v14 = vld [vmem:[%s1104_s3 + $0x38] sm:$0xff]  ;;  %s1133_s3 = smov %s1104_s3 }
 0x123   : > { %v451_v56 = vadd.f32 %v450_v53, %v444_v51  ;;  %v485_v17 = vmul.f32 %v832_v5, %v831_v4  ;;  %v499_v18 = vmul.f32 %v836_v11, %v835_v9  ;;  %v492_v20 = vmul.f32 %v834_v15, %v833_v14  ;;  %v518_v45 = vld [vmem:[%s1133_s3] sm:$0xff]  ;;  %v837_v46 = vld [vmem:[%s1133_s3 + $0x8] sm:$0xff]  ;;  %v853_v50 = vld [vmem:[%s1129_s30 + $0x30] sm:$0xff] }
 0x124   : > { %v847_v48 = vld [vmem:[%s1129_s30 + $0x20] sm:$0xff]  ;;  %v850_v49 = vld [vmem:[%s1129_s30 + $0x28] sm:$0xff]  ;;  %v856_v51 = vld [vmem:[%s1129_s30 + $0x38] sm:$0xff] }
 0x125   : > { %v458_v60 = vadd.f32 %v457_v57, %v451_v56  ;;  %v501_v62 = vsel %vm500_vm10, %v499_v18, 0.0  ;;  %v840_v38 = vld [vmem:[%s1133_s3 + $0x10] sm:$0xff]  ;;  %v843_v54 = vld [vmem:[%s1133_s3 + $0x18] sm:$0xff]  ;;  %v846_v55 = vld [vmem:[%s1133_s3 + $0x20] sm:$0xff] }
 0x126   : > { %v849_v56 = vld [vmem:[%s1133_s3 + $0x28] sm:$0xff]  ;;  %v852_v57 = vld [vmem:[%s1133_s3 + $0x30] sm:$0xff]  ;;  %v855_v58 = vld [vmem:[%s1133_s3 + $0x38] sm:$0xff] }
 0x127   : > { %v465_v2 = vadd.f32 %v464_v63, %v458_v60  ;;  %vm1195_vm10 = vmand %vm1034_vm5, %vm614_vm6  ;;  %v713_v13 = vld [vmem:[#allocation2] sm:$0x1] (%p106_p0) }
 0x128   :  { %715 = vst [vmem:[#allocation3] sm:$0x1] (%p106_p0), %v713_v13 }
 0x129   : > { %v472_v6 = vadd.f32 %v471_v3, %v465_v2 }
 0x12b   : > { %v479_v16 = vadd.f32 %v478_v7, %v472_v6 }
 0x12d   : > { %v486_v19 = vadd.f32 %v485_v17, %v479_v16 }
 0x12f   : > { %v493_v21 = vadd.f32 %v492_v20, %v486_v19 }
 0x131   : > { %v502_v22 = vadd.f32 %v501_v62, %v493_v21 }
 0x133   : > { %v503_v23 = vrot.slane %v502_v22, 4 }
 0x135   : > { %v504_v24 = vadd.f32 %v503_v23, %v502_v22 }
 0x137   : > { %v505_v26 = vrot.slane %v504_v24, 2 }
 0x139   : > { %v506_v30 = vadd.f32 %v505_v26, %v504_v24 }
 0x13b   : > { %v507_v31 = vrot.slane %v506_v30, 1 }
 0x13d   : > { %v508_v37 = vadd.f32 %v507_v31, %v506_v30  ;;  %v858_v31 = vld [vmem:[%s1133_s3 + $0x40] sm:$0xff] }
 0x13f   : > { %v514_v53 = vmul.f32 %v508_v37, %v1096_v43 }
 0x141   : > { %v519_v59 = vmul.f32 %v518_v45, %v514_v53  ;;  %v539_v60 = vmul.f32 %v837_v46, %v514_v53  ;;  %v560_v63 = vmul.f32 %v840_v38, %v514_v53  ;;  %v581_v0 = vmul.f32 %v843_v54, %v514_v53 }
 0x142   : > { %v602_v1 = vmul.f32 %v846_v55, %v514_v53  ;;  %v623_v2 = vmul.f32 %v849_v56, %v514_v53  ;;  %v644_v3 = vmul.f32 %v852_v57, %v514_v53  ;;  %v665_v4 = vmul.f32 %v855_v58, %v514_v53 }
 0x143   : > { %v523_v6 = vsub.f32 %v520_v40, %v519_v59  ;;  %v544_v7 = vsub.f32 %v838_v41, %v539_v60  ;;  %v565_v8 = vsub.f32 %v841_v42, %v560_v63  ;;  %v586_v9 = vsub.f32 %v844_v12, %v581_v0 }
 0x144   : > { %v607_v14 = vsub.f32 %v847_v48, %v602_v1  ;;  %v628_v15 = vsub.f32 %v850_v49, %v623_v2  ;;  %v649_v16 = vsub.f32 %v853_v50, %v644_v3  ;;  %v670_v17 = vsub.f32 %v856_v51, %v665_v4 }
 0x145   : > { %v524_v19 = vsel %vm1164_vm3, %v523_v6, %v520_v40  ;;  %v545_v20 = vsel %vm1164_vm3, %v544_v7, %v838_v41  ;;  %v566_v21 = vsel %vm1164_vm3, %v565_v8, %v841_v42  ;;  %v587_v62 = vsel %vm1164_vm3, %v586_v9, %v844_v12 }
 0x146   : > { %v532_v22 = vsel %vm1137_vm15, %v518_v45, %v524_v19  ;;  %v553_v23 = vsel %vm1146_vm1, %v837_v46, %v545_v20  ;;  %v574_v24 = vsel %vm1155_vm2, %v840_v38, %v566_v21  ;;  %v595_v25 = vsel %vm1170_vm4, %v843_v54, %v587_v62  ;;  %vm699_vm15 = vmand %vm1034_vm5, %vm698_vm11 }
 0x147   : > { %533 = vst [vmem:[%s1129_s30] sm:$0xff] %v532_v22  ;;  %839 = vst [vmem:[%s1129_s30 + $0x8] sm:$0xff] %v553_v23  ;;  %v608_v26 = vsel %vm1164_vm3, %v607_v14, %v847_v48  ;;  %v629_v27 = vsel %vm1164_vm3, %v628_v15, %v850_v49  ;;  %v650_v28 = vsel %vm1164_vm3, %v649_v16, %v853_v50 }
 0x148   : > { %842 = vst [vmem:[%s1129_s30 + $0x10] sm:$0xff] %v574_v24  ;;  %845 = vst [vmem:[%s1129_s30 + $0x18] sm:$0xff] %v595_v25  ;;  %v671_v30 = vsel %vm1164_vm3, %v670_v17, %v856_v51  ;;  %v616_v33 = vsel %vm1195_vm10, %v846_v55, %v608_v26  ;;  %v637_v34 = vsel %vm1203_vm12, %v849_v56, %v629_v27 }
 0x149   : > { %v658_v35 = vsel %vm1211_vm13, %v852_v57, %v650_v28  ;;  %v679_v36 = vsel %vm1219_vm14, %v855_v58, %v671_v30  ;;  %848 = vst [vmem:[%s1129_s30 + $0x20] sm:$0xff] %v616_v33  ;;  %851 = vst [vmem:[%s1129_s30 + $0x28] sm:$0xff] %v637_v34  ;;  %v686_v37 = vmul.f32 %v858_v31, %v514_v53 }
 0x14a   : > { %854 = vst [vmem:[%s1129_s30 + $0x30] sm:$0xff] %v658_v35  ;;  %857 = vst [vmem:[%s1129_s30 + $0x38] sm:$0xff] %v679_v36 }
 0x14b   : > { %v691_v39 = vsub.f32 %v859_v32, %v686_v37 }
 0x14d   : > { %v692_v40 = vsel %vm1164_vm3, %v691_v39, %v859_v32 }
 0x14e   : > { %v700_v41 = vsel %vm699_vm15, %v858_v31, %v692_v40 }
 0x14f   : > { %860 = vst [vmem:[%s1129_s30 + $0x40] sm:$0xff] %v700_v41 }
 0x152   :  { %108 = sbr.rel (!%p106_p0) target bundleno = 7 (0x7), region = 177 }
 0x156   : > { %v703_v42 = vld [vmem:[%s702_s4] ss:$0 sm:$0xff] }
 0x157   : > { %v708_v44 = vsel %vm1034_vm5, %v1009_v29, %v703_v42 }
 0x158   : > { %709 = vst [vmem:[%s702_s4] sm:$0x1] %v708_v44 }
 0x15f   :  { %v759_v61 = vld [vmem:[#allocation1] sm:$0xff]  ;;  %v761_v12 = vld [vmem:[#allocation1 + $0x8] sm:$0xff]  ;;  %v763_v29 = vld [vmem:[#allocation1 + $0x10] sm:$0xff] }
 0x160   :  { %760 = vst [vmem:[%s1321_s1] sm:$0xff] %v759_v61  ;;  %762 = vst [vmem:[%s1321_s1 + $0x8] sm:$0xff] %v761_v12  ;;  %v765_v52 = vld [vmem:[#allocation1 + $0x18] sm:$0xff]  ;;  %v767_v45 = vld [vmem:[#allocation1 + $0x20] sm:$0xff] }
 0x161   :  { %764 = vst [vmem:[%s1321_s1 + $0x10] sm:$0xff] %v763_v29  ;;  %766 = vst [vmem:[%s1321_s1 + $0x18] sm:$0xff] %v765_v52  ;;  %v769_v46 = vld [vmem:[#allocation1 + $0x28] sm:$0xff]  ;;  %v771_v10 = vld [vmem:[#allocation1 + $0x30] sm:$0xff] }
 0x162   :  { %768 = vst [vmem:[%s1321_s1 + $0x20] sm:$0xff] %v767_v45  ;;  %v773_v47 = vld [vmem:[#allocation1 + $0x38] sm:$0xff]  ;;  %770 = vst [vmem:[%s1321_s1 + $0x28] sm:$0xff] %v769_v46  ;;  %v775_v48 = vld [vmem:[#allocation1 + $0x40] sm:$0xff] }
 0x163   :  { %772 = vst [vmem:[%s1321_s1 + $0x30] sm:$0xff] %v771_v10  ;;  %774 = vst [vmem:[%s1321_s1 + $0x38] sm:$0xff] %v773_v47 }
 0x164   :  { %893 = shalt.err (!%p890_p5)
}
 0x165   :  { %s894_s27 = scalar_lea.hbm %s1322_s2, 16 }
 0x166   :  { %p895_p6 = scmp.ne.s32.totalorder %s1322_s2, %s894_s27  ;;  %p898_p7 = scmp.lt.u32.totalorder %s894_s27, %s1322_s2 }
 0x168   :  { %p900_p8 = pnand %p898_p7, %p895_p6 }
 0x16a   :  { %903 = shalt.err (!%p900_p8)
}
 0x16b   :  { %789 = dma.vmem_to_hbm [thread:$0]  %s787_s10, 16, %s1322_s2, [#allocation4]   ;;  %776 = vst [vmem:[%s1321_s1 + $0x40] sm:$0xff] %v775_v48 }
 0x16c   :  { %908 = dma.done.wait [#allocation4], 16  }
 0x16d   :  { %909 = vsyncadd [#allocation4], 4294967280 }
 0x16e   :  { %793 = vsyncpa [#allocation4], 1 }

// kernel: iconv_forward.1
= control target key start
LH: loop header
LB: loop body
LE: loop exit
PB: predicated region body
PF: predicated region fallthrough
CT: control target
= control target key end

     0   :  { %s8568_s12 = smov 0   ;;  %s10121_s0 = inlined_call_operand.vmem [shape: bf16[2,16,16,128], index: 0, kind: input, shape index: {}]   ;;  %s10122_s1 = inlined_call_operand.vmem [shape: bf16[1152,128], index: 1, kind: input, shape index: {}]   ;;  %s10123_s2 = inlined_call_operand.vmem [shape: bf16[1152,128], index: 2, kind: input, shape index: {}]   ;;  %s10124_s3 = inlined_call_operand.vmem [shape: f32[2,256,128], index: 3, kind: output, shape index: {}]  }
   0x1 LB: > { %s6321_s13 = sadd.s32 4294967295, %s8546_s12   ;;  %p6325_p0 = scmp.ge.s32.totalorder %s8546_s12, 1  ;;  %s8546_s12 = sphi %s8568_s12, %s13_s12  }
   0x2   : > { %p137_p1 = scmp.lt.s32.totalorder %s8546_s12, 3 }
   0x4   : > { %p138_p2 = pnand %p6325_p0, %p137_p1 }
   0x5   : > { %v8373_v0 = vld [vmem:[%s10122_s1 + $0x40] sm:$0xff] (!%p138_p2)   ;;  %p161_p3 = scmp.lt.s32.totalorder (!%p138_p2), %s6321_s13, 1  ;;  %v8374_v1 = vld [vmem:[%s10122_s1 + $0x48] sm:$0xff] (!%p138_p2)   ;;  %v8375_v2 = vld [vmem:[%s10122_s1 + $0x50] sm:$0xff] (!%p138_p2)  }
   0x6   : > { %141 = sbr.rel (%p138_p2) target bundleno = 1761 (0x6e1), region = 32  ;;  %6989 = vmatprep.subr.bf16.mxu0 (!%p138_p2), %v8373_v0  ;;  %v8376_v3 = vld [vmem:[%s10122_s1 + $0x58] sm:$0xff] (!%p138_p2)   ;;  %v8377_v11 = vld [vmem:[%s10122_s1 + $0x60] sm:$0xff] (!%p138_p2)   ;;  %v8378_v23 = vld [vmem:[%s10122_s1 + $0x68] sm:$0xff] (!%p138_p2)  }
   0x7   : > { %6990 = vmatpush3.bf16.msra.mxu0 (!%p138_p2), %v8373_v0  ;;  %v8379_v34 = vld [vmem:[%s10122_s1 + $0x70] sm:$0xff] (!%p138_p2)   ;;  %v8380_v46 = vld [vmem:[%s10122_s1 + $0x78] sm:$0xff] (!%p138_p2)   ;;  %v8381_v56 = vld [vmem:[%s10122_s1] sm:$0xff] (!%p138_p2)  }
   0x8   : > { %6991 = vmatprep.subr.bf16.mxu0 (!%p138_p2), %v8374_v1 }
   0xb   : > { %6992 = vmatpush3.bf16.msra.mxu0 (!%p138_p2), %v8374_v1 }
   0xc   : > { %6993 = vmatprep.subr.bf16.mxu0 (!%p138_p2), %v8375_v2 }
   0xd   : > { %s10126_s13 = smov (!%p161_p3, %s6321_s13), 1 }
   0xe   : > { %s6476_s20 = sshll.u32 %s10126_s13, 7  ;;  %s6477_s7 = sshll.u32 %s10126_s13, 8 }
   0xf   : > { %s8591_s23 = scalar_lea.vmem %s10121_s0, %s6476_s20  ;;  %6994 = vmatpush3.bf16.msra.mxu0 %v8375_v2  ;;  %s10064_s9 = scalar_lea.vmem %s10124_s3, %s6477_s7 }
  0x10   : > { %v6479_v4 = vld [vmem:[%s8591_s23] sm:$0xff]   ;;  %v6542_v7 = vld [vmem:[%s8591_s23 + $0x8] sm:$0xff]   ;;  %v6543_v10 = vld [vmem:[%s8591_s23 + $0x10] sm:$0xff]   ;;  %6995 = vmatprep.subr.bf16.mxu0 %v8376_v3 }
  0x11   : > { %v6480_v5 = vunpack.c.l.bf16 %v6479_v4  ;;  %v6481_v6 = vunpack.c.h.bf16 %v6479_v4  ;;  %v6484_v8 = vunpack.c.l.bf16 %v6542_v7  ;;  %v6485_v9 = vunpack.c.h.bf16 %v6542_v7  ;;  %v6544_v14 = vld [vmem:[%s8591_s23 + $0x18] sm:$0xff]   ;;  %v6545_v17 = vld [vmem:[%s8591_s23 + $0x20] sm:$0xff]   ;;  %v6546_v20 = vld [vmem:[%s8591_s23 + $0x28] sm:$0xff]  }
  0x12   : > { %v6488_v12 = vunpack.c.l.bf16 %v6543_v10  ;;  %v6489_v13 = vunpack.c.h.bf16 %v6543_v10  ;;  %v6492_v15 = vunpack.c.l.bf16 %v6544_v14  ;;  %v6493_v16 = vunpack.c.h.bf16 %v6544_v14  ;;  %v6547_v24 = vld [vmem:[%s8591_s23 + $0x30] sm:$0xff]   ;;  %v6548_v25 = vld [vmem:[%s8591_s23 + $0x38] sm:$0xff]   ;;  %v6549_v33 = vld [vmem:[%s8591_s23 + $0x40] sm:$0xff]  }
  0x13   : > { %237 = vst [vmem:[#allocation2 + $0x19] sm:$0xff] %v6480_v5  ;;  %238 = vst [vmem:[#allocation2 + $0x21] sm:$0xff] %v6481_v6  ;;  %v6496_v18 = vunpack.c.l.bf16 %v6545_v17  ;;  %v6497_v19 = vunpack.c.h.bf16 %v6545_v17  ;;  %6996 = vmatpush3.bf16.msra.mxu0 %v8376_v3  ;;  %v6500_v21 = vunpack.c.l.bf16 %v6546_v20  ;;  %v6501_v22 = vunpack.c.h.bf16 %v6546_v20  ;;  %v6550_v37 = vld [vmem:[%s8591_s23 + $0x48] sm:$0xff]   ;;  %v6551_v40 = vld [vmem:[%s8591_s23 + $0x50] sm:$0xff]  }
  0x14   : > { %239 = vst [vmem:[#allocation2 + $0x31] sm:$0xff] %v6484_v8  ;;  %240 = vst [vmem:[#allocation2 + $0x39] sm:$0xff] %v6485_v9  ;;  %6997 = vmatprep.subr.bf16.mxu0 %v8377_v11  ;;  %v6504_v26 = vunpack.c.l.bf16 %v6547_v24  ;;  %v6505_v27 = vunpack.c.h.bf16 %v6547_v24  ;;  %v6508_v28 = vunpack.c.l.bf16 %v6548_v25  ;;  %v6509_v29 = vunpack.c.h.bf16 %v6548_v25  ;;  %v6552_v43 = vld [vmem:[%s8591_s23 + $0x58] sm:$0xff]   ;;  %v6553_v47 = vld [vmem:[%s8591_s23 + $0x60] sm:$0xff]  }
  0x15   : > { %241 = vst [vmem:[#allocation2 + $0x49] sm:$0xff] %v6488_v12  ;;  %242 = vst [vmem:[#allocation2 + $0x51] sm:$0xff] %v6489_v13  ;;  %v6512_v35 = vunpack.c.l.bf16 %v6549_v33  ;;  %v6513_v36 = vunpack.c.h.bf16 %v6549_v33  ;;  %v6516_v38 = vunpack.c.l.bf16 %v6550_v37  ;;  %v6517_v39 = vunpack.c.h.bf16 %v6550_v37  ;;  %v6554_v48 = vld [vmem:[%s8591_s23 + $0x68] sm:$0xff]   ;;  %v6555_v55 = vld [vmem:[%s8591_s23 + $0x70] sm:$0xff]  }
  0x16   : > { %243 = vst [vmem:[#allocation2 + $0x61] sm:$0xff] %v6492_v15  ;;  %244 = vst [vmem:[#allocation2 + $0x69] sm:$0xff] %v6493_v16  ;;  %v6520_v41 = vunpack.c.l.bf16 %v6551_v40  ;;  %v6521_v42 = vunpack.c.h.bf16 %v6551_v40  ;;  %v6524_v44 = vunpack.c.l.bf16 %v6552_v43  ;;  %v6525_v45 = vunpack.c.h.bf16 %v6552_v43  ;;  %v8382_v63 = vld [vmem:[%s8591_s23] sm:$0xff]  ;;  %v8383_v4 = vld [vmem:[%s8591_s23 + $0x8] sm:$0xff] }
  0x17   : > { %245 = vst [vmem:[#allocation2 + $0x79] sm:$0xff] %v6496_v18  ;;  %246 = vst [vmem:[#allocation2 + $0x81] sm:$0xff] %v6497_v19  ;;  %6998 = vmatpush3.bf16.msra.mxu0 %v8377_v11  ;;  %v6528_v49 = vunpack.c.l.bf16 %v6553_v47  ;;  %v6529_v50 = vunpack.c.h.bf16 %v6553_v47  ;;  %v6532_v51 = vunpack.c.l.bf16 %v6554_v48  ;;  %v6533_v52 = vunpack.c.h.bf16 %v6554_v48  ;;  %v8384_v6 = vld [vmem:[%s10122_s1 + $0x8] sm:$0xff]   ;;  %v8387_v10 = vld [vmem:[%s10122_s1 + $0x10] sm:$0xff]  }
  0x18   : > { %247 = vst [vmem:[#allocation2 + $0x91] sm:$0xff] %v6500_v21  ;;  %248 = vst [vmem:[#allocation2 + $0x99] sm:$0xff] %v6501_v22  ;;  %6999 = vmatprep.subr.bf16.mxu0 %v8378_v23  ;;  %v6536_v57 = vunpack.c.l.bf16 %v6555_v55  ;;  %v6537_v58 = vunpack.c.h.bf16 %v6555_v55  ;;  %v8385_v11 = vld [vmem:[%s8591_s23 + $0x10] sm:$0xff]  ;;  %v8386_v14 = vld [vmem:[%s8591_s23 + $0x18] sm:$0xff] }
  0x19   : > { %249 = vst [vmem:[#allocation2 + $0xa9] sm:$0xff] %v6504_v26  ;;  %250 = vst [vmem:[#allocation2 + $0xb1] sm:$0xff] %v6505_v27  ;;  %v8390_v15 = vld [vmem:[%s10122_s1 + $0x18] sm:$0xff]   ;;  %v8393_v18 = vld [vmem:[%s10122_s1 + $0x20] sm:$0xff]  }
  0x1a   : > { %v269_v30 = vld [vmem:[#allocation2 + $0x28] sm:$0x1]  ;;  %v301_v31 = vld [vmem:[#allocation2 + $0x19] sm:$0x1]  ;;  %v8610_v32 = vld [vmem:[#allocation2 + $0x20] sm:$0xff]  ;;  %251 = vst [vmem:[#allocation2 + $0xc1] sm:$0xff] %v6508_v28 }
  0x1b   : > { %285 = vst [vmem:[#allocation2 + $0x18] sm:$0x1] %v269_v30  ;;  %317 = vst [vmem:[#allocation2 + $0x29] sm:$0x1] %v301_v31  ;;  %7000 = vmatpush3.bf16.msra.mxu0 %v8378_v23  ;;  %v270_v59 = vld [vmem:[#allocation2 + $0x40] sm:$0x1] }
  0x1c   : > { %337 = vst [vmem:[#allocation2 + $0x8] sm:$0xff] %v8610_v32  ;;  %252 = vst [vmem:[#allocation2 + $0xc9] sm:$0xff] %v6509_v29  ;;  %7001 = vmatprep.subr.bf16.mxu0 %v8379_v34  ;;  %v271_v60 = vld [vmem:[#allocation2 + $0x58] sm:$0x1]  ;;  %v8388_v20 = vld [vmem:[%s8591_s23 + $0x20] sm:$0xff] }
  0x1d   : > { %253 = vst [vmem:[#allocation2 + $0xd9] sm:$0xff] %v6512_v35  ;;  %254 = vst [vmem:[#allocation2 + $0xe1] sm:$0xff] %v6513_v36  ;;  %v272_v61 = vld [vmem:[#allocation2 + $0x70] sm:$0x1]  ;;  %v8389_v21 = vld [vmem:[%s8591_s23 + $0x28] sm:$0xff] }
  0x1e   : > { %255 = vst [vmem:[#allocation2 + $0xf1] sm:$0xff] %v6516_v38  ;;  %256 = vst [vmem:[#allocation2 + $0xf9] sm:$0xff] %v6517_v39  ;;  %v273_v62 = vld [vmem:[#allocation2 + $0x88] sm:$0x1]  ;;  %v302_v22 = vld [vmem:[#allocation2 + $0x31] sm:$0x1] }
  0x1f   : > { %257 = vst [vmem:[#allocation2 + $0x109] sm:$0xff] %v6520_v41  ;;  %258 = vst [vmem:[#allocation2 + $0x111] sm:$0xff] %v6521_v42  ;;  %7002 = vmatpush3.bf16.msra.mxu0 %v8379_v34  ;;  %v274_v0 = vld [vmem:[#allocation2 + $0xa0] sm:$0x1]  ;;  %v8396_v23 = vld [vmem:[%s10122_s1 + $0x28] sm:$0xff]  }
  0x20   : > { %259 = vst [vmem:[#allocation2 + $0x121] sm:$0xff] %v6524_v44  ;;  %260 = vst [vmem:[#allocation2 + $0x129] sm:$0xff] %v6525_v45  ;;  %7003 = vmatprep.subr.bf16.mxu0 %v8380_v46  ;;  %v275_v5 = vld [vmem:[#allocation2 + $0xb8] sm:$0x1]  ;;  %v303_v24 = vld [vmem:[#allocation2 + $0x49] sm:$0x1] }
  0x21   : > { %261 = vst [vmem:[#allocation2 + $0x139] sm:$0xff] %v6528_v49  ;;  %262 = vst [vmem:[#allocation2 + $0x141] sm:$0xff] %v6529_v50  ;;  %v304_v25 = vld [vmem:[#allocation2 + $0x61] sm:$0x1]  ;;  %v8399_v26 = vld [vmem:[%s10122_s1 + $0x30] sm:$0xff]  }
  0x22   : > { %v8625_v53 = vld [vmem:[#allocation2 + $0x18] sm:$0xff]  ;;  %v335_v54 = vld [vmem:[#allocation2 + $0x28] sm:$0x3]  ;;  %263 = vst [vmem:[#allocation2 + $0x151] sm:$0xff] %v6532_v51  ;;  %264 = vst [vmem:[#allocation2 + $0x159] sm:$0xff] %v6533_v52 }
  0x23   : > { %336 = vst [vmem:[#allocation2] sm:$0xff] %v8625_v53  ;;  %338 = vst [vmem:[#allocation2 + $0x10] sm:$0x3] %v335_v54  ;;  %7004 = vmatpush3.bf16.msra.mxu0 %v8380_v46  ;;  %v276_v7 = vld [vmem:[#allocation2 + $0xd0] sm:$0x1]  ;;  %v8392_v30 = vld [vmem:[%s8591_s23 + $0x38] sm:$0xff]  ;;  %v8687_v50 = vpack.c.bf16 %v8610_v32, %v8625_v53 }
  0x24   : > { %286 = vst [vmem:[#allocation2 + $0x30] sm:$0x1] %v270_v59  ;;  %265 = vst [vmem:[#allocation2 + $0x169] sm:$0xff] %v6536_v57  ;;  %7037 = vmatprep.subr.bf16.mxu0 %v8381_v56  ;;  %v277_v8 = vld [vmem:[#allocation2 + $0xe8] sm:$0x1]  ;;  %v8391_v29 = vld [vmem:[%s8591_s23 + $0x30] sm:$0xff] }
  0x25   : > { %266 = vst [vmem:[#allocation2 + $0x171] sm:$0xff] %v6537_v58  ;;  %287 = vst [vmem:[#allocation2 + $0x48] sm:$0x1] %v271_v60  ;;  %v278_v9 = vld [vmem:[#allocation2 + $0x100] sm:$0x1]  ;;  %v8402_v31 = vld [vmem:[%s10122_s1 + $0x38] sm:$0xff]  }
  0x26   : > { %288 = vst [vmem:[#allocation2 + $0x60] sm:$0x1] %v272_v61  ;;  %289 = vst [vmem:[#allocation2 + $0x78] sm:$0x1] %v273_v62  ;;  %v279_v12 = vld [vmem:[#allocation2 + $0x118] sm:$0x1] }
  0x27   : > { %290 = vst [vmem:[#allocation2 + $0x90] sm:$0x1] %v274_v0  ;;  %291 = vst [vmem:[#allocation2 + $0xa8] sm:$0x1] %v275_v5  ;;  %v280_v13 = vld [vmem:[#allocation2 + $0x130] sm:$0x1] }
  0x28   : > { %292 = vst [vmem:[#allocation2 + $0xc0] sm:$0x1] %v276_v7  ;;  %293 = vst [vmem:[#allocation2 + $0xd8] sm:$0x1] %v277_v8  ;;  %v281_v16 = vld [vmem:[#allocation2 + $0x148] sm:$0x1] }
  0x29   : > { %294 = vst [vmem:[#allocation2 + $0xf0] sm:$0x1] %v278_v9  ;;  %295 = vst [vmem:[#allocation2 + $0x108] sm:$0x1] %v279_v12  ;;  %v282_v17 = vld [vmem:[#allocation2 + $0x160] sm:$0x1] }
  0x2a   : > { %v411_v1 = vld [vmem:[#allocation2 + $0x1] sm:$0xff]  ;;  %v412_v2 = vld [vmem:[#allocation2 + $0x9] sm:$0xff]  ;;  %296 = vst [vmem:[#allocation2 + $0x120] sm:$0x1] %v280_v13  ;;  %297 = vst [vmem:[#allocation2 + $0x138] sm:$0x1] %v281_v16 }
  0x2b   : > { %v443_v3 = vpack.c.bf16 %v412_v2, %v411_v1  ;;  %298 = vst [vmem:[#allocation2 + $0x150] sm:$0x1] %v282_v17  ;;  %318 = vst [vmem:[#allocation2 + $0x41] sm:$0x1] %v302_v22  ;;  %v305_v27 = vld [vmem:[#allocation2 + $0x79] sm:$0x1] }
  0x2c   : > { %v283_v19 = vld [vmem:[#allocation2 + $0x178] sm:$0x1]  ;;  %319 = vst [vmem:[#allocation2 + $0x59] sm:$0x1] %v303_v24  ;;  %320 = vst [vmem:[#allocation2 + $0x71] sm:$0x1] %v304_v25 }
  0x2d   : > { %7005 = vmatprep.mubr.bf16.mxu0 %v443_v3  ;;  %299 = vst [vmem:[#allocation2 + $0x168] sm:$0x1] %v283_v19  ;;  %321 = vst [vmem:[#allocation2 + $0x89] sm:$0x1] %v305_v27  ;;  %v306_v28 = vld [vmem:[#allocation2 + $0x91] sm:$0x1] }
  0x2e   : > { %7006 = vmatmul.mubr.bf16.vlgmr.msra.gmra.mrb[0].mxu0 %v8382_v63  ;;  %322 = vst [vmem:[#allocation2 + $0xa1] sm:$0x1] %v306_v28  ;;  %v307_v33 = vld [vmem:[#allocation2 + $0xa9] sm:$0x1]  ;;  %v308_v34 = vld [vmem:[#allocation2 + $0xc1] sm:$0x1] }
  0x2f   : > { %7038 = vmatpush3.bf16.msra.mxu0 %v8381_v56  ;;  %7009 = vmatprep.mubr.bf16.mxu0 %v8383_v4  ;;  %323 = vst [vmem:[#allocation2 + $0xb9] sm:$0x1] %v307_v33  ;;  %324 = vst [vmem:[#allocation2 + $0xd1] sm:$0x1] %v308_v34  ;;  %v309_v35 = vld [vmem:[#allocation2 + $0xd9] sm:$0x1] }
  0x30   : > { %7039 = vmatprep.subr.bf16.mxu0 %v8384_v6  ;;  %325 = vst [vmem:[#allocation2 + $0xe9] sm:$0x1] %v309_v35  ;;  %v8404_v36 = vld [vmem:[%s10122_s1 + $0x80] sm:$0xff]   ;;  %v310_v38 = vld [vmem:[#allocation2 + $0xf1] sm:$0x1]  ;;  %v8395_v39 = vld [vmem:[%s8591_s23 + $0x48] sm:$0xff] }
  0x31   : > { %v8394_v37 = vld [vmem:[%s8591_s23 + $0x40] sm:$0xff]  ;;  %326 = vst [vmem:[#allocation2 + $0x101] sm:$0x1] %v310_v38  ;;  %v311_v40 = vld [vmem:[#allocation2 + $0x109] sm:$0x1]  ;;  %v8667_v41 = vld [vmem:[%s8591_s23 + $0x50] sm:$0xff] }
  0x32   : > { %327 = vst [vmem:[#allocation2 + $0x119] sm:$0x1] %v311_v40  ;;  %v312_v42 = vld [vmem:[#allocation2 + $0x121] sm:$0x1]  ;;  %v8670_v43 = vld [vmem:[%s8591_s23 + $0x58] sm:$0xff]  ;;  %v8678_v47 = vld [vmem:[%s8591_s23 + $0x68] sm:$0xff] }
  0x33   : > { %7040 = vmatpush3.bf16.msra.mxu0 %v8384_v6  ;;  %328 = vst [vmem:[#allocation2 + $0x131] sm:$0x1] %v312_v42  ;;  %v313_v44 = vld [vmem:[#allocation2 + $0x139] sm:$0x1]  ;;  %v8675_v45 = vld [vmem:[%s8591_s23 + $0x60] sm:$0xff]  ;;  %v8683_v49 = vld [vmem:[%s8591_s23 + $0x70] sm:$0xff] }
  0x34   : > { %7041 = vmatprep.subr.bf16.mxu0 %v8387_v10  ;;  %329 = vst [vmem:[#allocation2 + $0x149] sm:$0x1] %v313_v44  ;;  %v314_v46 = vld [vmem:[#allocation2 + $0x151] sm:$0x1]  ;;  %v315_v48 = vld [vmem:[#allocation2 + $0x169] sm:$0x1] }
  0x35   : > { %330 = vst [vmem:[#allocation2 + $0x161] sm:$0x1] %v314_v46  ;;  %331 = vst [vmem:[#allocation2 + $0x179] sm:$0x1] %v315_v48  ;;  %v352_v51 = vld [vmem:[#allocation2 + $0x38] sm:$0xff]  ;;  %v351_v52 = vld [vmem:[#allocation2 + $0x30] sm:$0xff] }
  0x36   : > { %7010 = vmatmul.mubr.bf16.gmra.mrb[4].mxu0 %v8385_v11  ;;  %v8405_v54 = vld [vmem:[%s10122_s1 + $0x88] sm:$0xff]   ;;  %v8694_v55 = vpack.c.bf16 %v352_v51, %v351_v52  ;;  %v354_v57 = vld [vmem:[#allocation2 + $0x50] sm:$0xff]  ;;  %v355_v53 = vld [vmem:[#allocation2 + $0x60] sm:$0xff] }
  0x37   : > { %7013 = vmatprep.mubr.bf16.mxu0 %v8386_v14  ;;  %7042 = vmatpush3.bf16.msra.mxu0 %v8387_v10  ;;  %v353_v56 = vld [vmem:[#allocation2 + $0x48] sm:$0xff]  ;;  %v8406_v32 = vld [vmem:[%s10122_s1 + $0x90] sm:$0xff]   ;;  %v8407_v60 = vld [vmem:[%s10122_s1 + $0x98] sm:$0xff]  }
  0x38   : > { %7043 = vmatprep.subr.bf16.mxu0 %v8390_v15  ;;  %v356_v58 = vld [vmem:[#allocation2 + $0x68] sm:$0xff]  ;;  %v8701_v59 = vpack.c.bf16 %v354_v57, %v353_v56  ;;  %v357_v62 = vld [vmem:[#allocation2 + $0x78] sm:$0xff]  ;;  %v358_v63 = vld [vmem:[#allocation2 + $0x80] sm:$0xff] }
  0x39   : > { %v8706_v61 = vpack.c.bf16 %v356_v58, %v355_v53  ;;  %v360_v0 = vld [vmem:[#allocation2 + $0x98] sm:$0xff]  ;;  %v8408_v1 = vld [vmem:[%s10122_s1 + $0xa0] sm:$0xff]   ;;  %v359_v2 = vld [vmem:[#allocation2 + $0x90] sm:$0xff]  ;;  %v8713_v3 = vpack.c.bf16 %v358_v63, %v357_v62 }
  0x3a   : > { %v8409_v4 = vld [vmem:[%s10122_s1 + $0xa8] sm:$0xff]   ;;  %v8718_v5 = vpack.c.bf16 %v360_v0, %v359_v2  ;;  %v362_v7 = vld [vmem:[#allocation2 + $0xb0] sm:$0xff]  ;;  %v363_v8 = vld [vmem:[#allocation2 + $0xc0] sm:$0xff] }
  0x3b   : > { %7044 = vmatpush3.bf16.msra.mxu0 %v8390_v15  ;;  %v361_v6 = vld [vmem:[#allocation2 + $0xa8] sm:$0xff]  ;;  %v8410_v10 = vld [vmem:[%s10122_s1 + $0xb0] sm:$0xff]   ;;  %v8411_v12 = vld [vmem:[%s10122_s1 + $0xb8] sm:$0xff]  }
  0x3c   : > { %7045 = vmatprep.subr.bf16.mxu0 %v8393_v18  ;;  %v364_v9 = vld [vmem:[#allocation2 + $0xc8] sm:$0xff]  ;;  %v8725_v11 = vpack.c.bf16 %v362_v7, %v361_v6  ;;  %v365_v14 = vld [vmem:[#allocation2 + $0xd8] sm:$0xff]  ;;  %v366_v15 = vld [vmem:[#allocation2 + $0xe0] sm:$0xff] }
  0x3d   : > { %v8730_v13 = vpack.c.bf16 %v364_v9, %v363_v8  ;;  %v367_v16 = vld [vmem:[#allocation2 + $0xf0] sm:$0xff]  ;;  %v368_v17 = vld [vmem:[#allocation2 + $0xf8] sm:$0xff]  ;;  %v8737_v19 = vpack.c.bf16 %v366_v15, %v365_v14  ;;  %v371_v24 = vld [vmem:[#allocation2 + $0x120] sm:$0xff] }
  0x3e   : > { %7014 = vmatmul.mubr.bf16.gmra.mrb[8].mxu0 %v8388_v20  ;;  %v8739_v20 = vpack.c.bf16 %v368_v17, %v367_v16  ;;  %v370_v22 = vld [vmem:[#allocation2 + $0x110] sm:$0xff]  ;;  %v6556_v25 = vld [vmem:[%s8591_s23 + $0x78] sm:$0xff]   ;;  %v377_v38 = vld [vmem:[#allocation2 + $0x168] sm:$0xff] }
  0x3f   : > { %7017 = vmatprep.mubr.bf16.mxu0 %v8389_v21  ;;  %7046 = vmatpush3.bf16.msra.mxu0 %v8393_v18  ;;  %v8412_v18 = vld [vmem:[%s10122_s1 + $0xc0] sm:$0xff]   ;;  %v369_v21 = vld [vmem:[#allocation2 + $0x108] sm:$0xff]  ;;  %v6541_v27 = vunpack.c.h.bf16 %v6556_v25  ;;  %v375_v33 = vld [vmem:[#allocation2 + $0x150] sm:$0xff]  ;;  %v6540_v35 = vunpack.c.l.bf16 %v6556_v25 }
  0x40   : > { %7047 = vmatprep.subr.bf16.mxu0 %v8396_v23  ;;  %v893_v40 = vld [vmem:[#allocation2 + $0x2] sm:$0xff]  ;;  %v894_v42 = vld [vmem:[#allocation2 + $0xa] sm:$0xff]  ;;  %v895_v52 = vld [vmem:[#allocation2 + $0x1a] sm:$0xff] }
  0x41   : > { %268 = vst [vmem:[#allocation2 + $0x189] sm:$0xff] %v6541_v27  ;;  %267 = vst [vmem:[#allocation2 + $0x181] sm:$0xff] %v6540_v35  ;;  %v925_v46 = vpack.c.bf16 %v894_v42, %v893_v40  ;;  %v897_v56 = vld [vmem:[#allocation2 + $0x32] sm:$0xff]  ;;  %v898_v57 = vld [vmem:[#allocation2 + $0x3a] sm:$0xff] }
  0x42   : > { %v8413_v53 = vld [vmem:[%s10122_s1 + $0xc8] sm:$0xff]   ;;  %v900_v62 = vld [vmem:[#allocation2 + $0x52] sm:$0xff]  ;;  %v903_v7 = vld [vmem:[#allocation2 + $0x7a] sm:$0xff] }
  0x43   : > { %7048 = vmatpush3.bf16.msra.mxu0 %v8396_v23  ;;  %v372_v23 = vld [vmem:[#allocation2 + $0x128] sm:$0xff]  ;;  %v8415_v6 = vld [vmem:[%s10122_s1 + $0xd8] sm:$0xff]   ;;  %v8420_v35 = vld [vmem:[%s10122_s1 + $0x100] sm:$0xff]  }
  0x44   : > { %7049 = vmatprep.subr.bf16.mxu0 %v8399_v26  ;;  %v8746_v28 = vpack.c.bf16 %v372_v23, %v371_v24  ;;  %v901_v63 = vld [vmem:[#allocation2 + $0x62] sm:$0xff]  ;;  %v902_v0 = vld [vmem:[#allocation2 + $0x6a] sm:$0xff]  ;;  %v905_v9 = vld [vmem:[#allocation2 + $0x92] sm:$0xff] }
  0x45   : > { %v904_v8 = vld [vmem:[#allocation2 + $0x82] sm:$0xff]  ;;  %v907_v17 = vld [vmem:[#allocation2 + $0xaa] sm:$0xff]  ;;  %v8419_v27 = vld [vmem:[%s10122_s1 + $0xf8] sm:$0xff]  }
  0x46   : > { %7018 = vmatmul.mubr.bf16.gmra.mrb[12].mxu0 %v8391_v29  ;;  %v373_v29 = vld [vmem:[#allocation2 + $0x138] sm:$0xff]  ;;  %v8789_v14 = vpack.c.bf16 %v904_v8, %v903_v7  ;;  %v8417_v16 = vld [vmem:[%s10122_s1 + $0xe8] sm:$0xff]   ;;  %v8418_v23 = vld [vmem:[%s10122_s1 + $0xf0] sm:$0xff]  }
  0x47   : > { %7021 = vmatprep.mubr.bf16.mxu0 %v8392_v30  ;;  %7050 = vmatpush3.bf16.msra.mxu0 %v8399_v26  ;;  %v8744_v26 = vpack.c.bf16 %v370_v22, %v369_v21  ;;  %v374_v30 = vld [vmem:[#allocation2 + $0x140] sm:$0xff]  ;;  %v910_v22 = vld [vmem:[#allocation2 + $0xca] sm:$0xff]  ;;  %v916_v40 = vld [vmem:[#allocation2 + $0x112] sm:$0xff] }
  0x48   : > { %7051 = vmatprep.subr.bf16.mxu0 %v8402_v31  ;;  %v8750_v34 = vpack.c.bf16 %v374_v30, %v373_v29  ;;  %v8760_v51 = vld [vmem:[#allocation2 + $0x188] sm:$0xff]  ;;  %v911_v29 = vld [vmem:[#allocation2 + $0xda] sm:$0xff]  ;;  %v8422_v8 = vld [vmem:[%s10122_s1 + $0x110] sm:$0xff]  }
  0x49   : > { %345 = vst [vmem:[#allocation2 + $0x1a0] sm:$0xff] %v8760_v51  ;;  %v909_v21 = vld [vmem:[#allocation2 + $0xc2] sm:$0xff] }
  0x4a   : > { %v8803_v25 = vpack.c.bf16 %v910_v22, %v909_v21  ;;  %v912_v30 = vld [vmem:[#allocation2 + $0xe2] sm:$0xff] }
  0x4b   : > { %7052 = vmatpush3.bf16.msra.mxu0 %v8402_v31  ;;  %v376_v31 = vld [vmem:[#allocation2 + $0x158] sm:$0xff]  ;;  %v917_v42 = vld [vmem:[#allocation2 + $0x122] sm:$0xff] }
  0x4c   : > { %7085 = vmatprep.subr.bf16.mxu0 %v8404_v36  ;;  %v8421_v7 = vld [vmem:[%s10122_s1 + $0x108] sm:$0xff]  }
  0x4e   : > { %7022 = vmatmul.mubr.bf16.gmra.mrb[16].mxu0 %v8394_v37  ;;  %v284_v37 = vld [vmem:[#allocation2 + $0x190] sm:$0x1] }
  0x4f   : > { %7025 = vmatprep.mubr.bf16.mxu0 %v8395_v39  ;;  %300 = vst [vmem:[#allocation2 + $0x180] sm:$0x1] %v284_v37  ;;  %v378_v39 = vld [vmem:[#allocation2 + $0x170] sm:$0xff]  ;;  %v8813_v37 = vpack.c.bf16 %v912_v30, %v911_v29  ;;  %v1514_v29 = vld [vmem:[#allocation2 + $0x99] sm:$0xff] }
  0x50   : > { %v8756_v44 = vpack.c.bf16 %v378_v39, %v377_v38  ;;  %v915_v39 = vld [vmem:[#allocation2 + $0x10a] sm:$0xff] }
  0x51   : > { %v1515_v30 = vld [vmem:[#allocation2 + $0xa9] sm:$0xff] }
  0x56   : > { %7026 = vmatmul.mubr.bf16.gmra.mrb[20].mxu0 %v8667_v41  ;;  %v8758_v48 = vld [vmem:[#allocation2 + $0x180] sm:$0xff] }
  0x57   : > { %7029 = vmatprep.mubr.bf16.mxu0 %v8670_v43  ;;  %344 = vst [vmem:[#allocation2 + $0x198] sm:$0xff] %v8758_v48 }
  0x5e   : > { %7030 = vmatmul.mubr.bf16.gmra.mrb[24].mxu0 %v8675_v45 }
  0x5f   : > { %7033 = vmatprep.mubr.bf16.mxu0 %v8678_v47 }
  0x66   : > { %7034 = vmatmul.mubr.bf16.gmra.mrb[28].mxu0 %v8683_v49 }
  0x67   : > { %7053 = vmatprep.mubr.bf16.mxu0 %v8687_v50 }
  0x6e   : > { %7054 = vmatmul.mubr.bf16.vlgmr.msra.gmra.mrb[0].mxu0 %v8687_v50 }
  0x6f   : > { %7086 = vmatpush3.bf16.msra.mxu0 %v8404_v36  ;;  %7057 = vmatprep.mubr.bf16.mxu0 %v8694_v55  ;;  %v8752_v36 = vpack.c.bf16 %v376_v31, %v375_v33  ;;  %v913_v31 = vld [vmem:[#allocation2 + $0xf2] sm:$0xff]  ;;  %v914_v33 = vld [vmem:[#allocation2 + $0xfa] sm:$0xff] }
  0x70   : > { %7087 = vmatprep.subr.bf16.mxu0 %v8405_v54  ;;  %v8815_v38 = vpack.c.bf16 %v914_v33, %v913_v31  ;;  %v1516_v31 = vld [vmem:[#allocation2 + $0xb1] sm:$0xff]  ;;  %v8432_v33 = vld [vmem:[%s10122_s1 + $0x160] sm:$0xff]  }
  0x73   : > { %7088 = vmatpush3.bf16.msra.mxu0 %v8405_v54  ;;  %v896_v54 = vld [vmem:[#allocation2 + $0x22] sm:$0xff] }
  0x74   : > { %7089 = vmatprep.subr.bf16.mxu0 %v8406_v32  ;;  %v8765_v58 = vpack.c.bf16 %v896_v54, %v895_v52  ;;  %v8819_v52 = vpack.c.bf16 %v916_v40, %v915_v39  ;;  %v8904_v39 = vpack.c.bf16 %v1516_v31, %v1515_v30  ;;  %v8433_v40 = vld [vmem:[%s10122_s1 + $0x168] sm:$0xff]   ;;  %v2133_v31 = vld [vmem:[#allocation2 + $0x110] sm:$0xff] }
  0x75   : > { %v2132_v30 = vld [vmem:[#allocation2 + $0x108] sm:$0xff] }
  0x76   : > { %7058 = vmatmul.mubr.bf16.gmra.mrb[4].mxu0 %v8701_v59 }
  0x77   : > { %7061 = vmatprep.mubr.bf16.mxu0 %v8706_v61  ;;  %7090 = vmatpush3.bf16.msra.mxu0 %v8406_v32  ;;  %v8767_v32 = vpack.c.bf16 %v898_v57, %v897_v56  ;;  %v919_v56 = vld [vmem:[#allocation2 + $0x13a] sm:$0xff]  ;;  %v920_v57 = vld [vmem:[#allocation2 + $0x142] sm:$0xff] }
  0x78   : > { %7091 = vmatprep.subr.bf16.mxu0 %v8407_v60 }
  0x7b   : > { %7092 = vmatpush3.bf16.msra.mxu0 %v8407_v60  ;;  %v899_v60 = vld [vmem:[#allocation2 + $0x4a] sm:$0xff] }
  0x7c   : > { %7093 = vmatprep.subr.bf16.mxu0 %v8408_v1  ;;  %v8777_v2 = vpack.c.bf16 %v900_v62, %v899_v60  ;;  %v922_v60 = vld [vmem:[#allocation2 + $0x15a] sm:$0xff]  ;;  %v8825_v62 = vpack.c.bf16 %v920_v57, %v919_v56 }
  0x7d   : > { %v8537_v56 = vld [vmem:[%s8591_s23 + $0x38] sm:$0xff]  ;;  %v8538_v57 = vld [vmem:[%s8591_s23 + $0x40] sm:$0xff] }
  0x7e   : > { %7062 = vmatmul.mubr.bf16.gmra.mrb[8].mxu0 %v8713_v3 }
  0x7f   : > { %7065 = vmatprep.mubr.bf16.mxu0 %v8718_v5  ;;  %7094 = vmatpush3.bf16.msra.mxu0 %v8408_v1  ;;  %v8414_v1 = vld [vmem:[%s10122_s1 + $0xd0] sm:$0xff]  }
  0x80   : > { %7095 = vmatprep.subr.bf16.mxu0 %v8409_v4 }
  0x83   : > { %7096 = vmatpush3.bf16.msra.mxu0 %v8409_v4  ;;  %v8779_v4 = vpack.c.bf16 %v902_v0, %v901_v63  ;;  %v923_v0 = vld [vmem:[#allocation2 + $0x16a] sm:$0xff] }
  0x84   : > { %7097 = vmatprep.subr.bf16.mxu0 %v8410_v10 }
  0x86   : > { %7066 = vmatmul.mubr.bf16.gmra.mrb[12].mxu0 %v8725_v11 }
  0x87   : > { %7069 = vmatprep.mubr.bf16.mxu0 %v8730_v13  ;;  %7098 = vmatpush3.bf16.msra.mxu0 %v8410_v10  ;;  %v906_v10 = vld [vmem:[#allocation2 + $0x9a] sm:$0xff] }
  0x88   : > { %7099 = vmatprep.subr.bf16.mxu0 %v8411_v12  ;;  %v8791_v15 = vpack.c.bf16 %v906_v10, %v905_v9  ;;  %v8875_v9 = vpack.c.bf16 %v8760_v51, %v8758_v48  ;;  %v1510_v48 = vld [vmem:[#allocation2 + $0x69] sm:$0xff]  ;;  %v1511_v51 = vld [vmem:[#allocation2 + $0x79] sm:$0xff] }
  0x8b   : > { %7100 = vmatpush3.bf16.msra.mxu0 %v8411_v12  ;;  %v8416_v12 = vld [vmem:[%s10122_s1 + $0xe0] sm:$0xff]  }
  0x8c   : > { %7133 = vmatprep.subr.bf16.mxu0 %v8412_v18 }
  0x8e   : > { %7070 = vmatmul.mubr.bf16.gmra.mrb[16].mxu0 %v8737_v19 }
  0x8f   : > { %7073 = vmatprep.mubr.bf16.mxu0 %v8739_v20 }
  0x96   : > { %7074 = vmatmul.mubr.bf16.gmra.mrb[20].mxu0 %v8744_v26 }
  0x97   : > { %7077 = vmatprep.mubr.bf16.mxu0 %v8746_v28 }
  0x9e   : > { %7078 = vmatmul.mubr.bf16.gmra.mrb[24].mxu0 %v8750_v34 }
  0x9f   : > { %7081 = vmatprep.mubr.bf16.mxu0 %v8752_v36 }
  0xa6   : > { %7082 = vmatmul.mubr.bf16.gmra.mrb[28].mxu0 %v8756_v44 }
  0xa7   : > { %7101 = vmatprep.mubr.bf16.mxu0 %v925_v46  ;;  %v918_v46 = vld [vmem:[#allocation2 + $0x12a] sm:$0xff] }
  0xa8   : > { %v8821_v54 = vpack.c.bf16 %v918_v46, %v917_v42  ;;  %v8434_v42 = vld [vmem:[%s10122_s1 + $0x170] sm:$0xff]   ;;  %v8435_v46 = vld [vmem:[%s10122_s1 + $0x178] sm:$0xff]  }
  0xae   : > { %7102 = vmatmul.mubr.bf16.vlgmr.msra.gmra.mrb[0].mxu0 %v8765_v58 }
  0xaf   : > { %7134 = vmatpush3.bf16.msra.mxu0 %v8412_v18  ;;  %7105 = vmatprep.mubr.bf16.mxu0 %v8767_v32  ;;  %v908_v18 = vld [vmem:[#allocation2 + $0xb2] sm:$0xff] }
  0xb0   : > { %7135 = vmatprep.subr.bf16.mxu0 %v8413_v53  ;;  %v8801_v24 = vpack.c.bf16 %v908_v18, %v907_v17  ;;  %v1512_v17 = vld [vmem:[#allocation2 + $0x81] sm:$0xff]  ;;  %v8430_v18 = vld [vmem:[%s10122_s1 + $0x150] sm:$0xff]  }
  0xb1   : > { %v8892_v22 = vpack.c.bf16 %v1512_v17, %v1511_v51  ;;  %v2130_v51 = vld [vmem:[#allocation2 + $0xf0] sm:$0xff]  ;;  %v2131_v17 = vld [vmem:[#allocation2 + $0xf8] sm:$0xff] }
  0xb3   : > { %7136 = vmatpush3.bf16.msra.mxu0 %v8413_v53  ;;  %v921_v53 = vld [vmem:[#allocation2 + $0x152] sm:$0xff] }
  0xb4   : > { %7137 = vmatprep.subr.bf16.mxu0 %v8414_v1  ;;  %v8827_v63 = vpack.c.bf16 %v922_v60, %v921_v53  ;;  %v8437_v53 = vld [vmem:[%s10122_s1 + $0x180] sm:$0xff]   ;;  %v8539_v60 = vld [vmem:[%s8591_s23 + $0x48] sm:$0xff] }
  0xb6   : > { %7106 = vmatmul.mubr.bf16.gmra.mrb[4].mxu0 %v8777_v2 }
  0xb7   : > { %7109 = vmatprep.mubr.bf16.mxu0 %v8779_v4  ;;  %7138 = vmatpush3.bf16.msra.mxu0 %v8414_v1  ;;  %v924_v1 = vld [vmem:[#allocation2 + $0x172] sm:$0xff] }
  0xb8   : > { %7139 = vmatprep.subr.bf16.mxu0 %v8415_v6 }
  0xbb   : > { %7140 = vmatpush3.bf16.msra.mxu0 %v8415_v6  ;;  %v8831_v6 = vpack.c.bf16 %v924_v1, %v923_v0  ;;  %v8929_v0 = vld [vmem:[%s8591_s23 + $0x78] sm:$0xff]  ;;  %v8438_v1 = vld [vmem:[%s10122_s1 + $0x188] sm:$0xff]  }
  0xbc   : > { %7141 = vmatprep.subr.bf16.mxu0 %v8416_v12 }
  0xbe   : > { %7110 = vmatmul.mubr.bf16.gmra.mrb[8].mxu0 %v8789_v14 }
  0xbf   : > { %7113 = vmatprep.mubr.bf16.mxu0 %v8791_v15  ;;  %7142 = vmatpush3.bf16.msra.mxu0 %v8416_v12 }
  0xc0   : > { %7143 = vmatprep.subr.bf16.mxu0 %v8417_v16 }
  0xc3   : > { %7144 = vmatpush3.bf16.msra.mxu0 %v8417_v16 }
  0xc4   : > { %7145 = vmatprep.subr.bf16.mxu0 %v8418_v23 }
  0xc6   : > { %7114 = vmatmul.mubr.bf16.gmra.mrb[12].mxu0 %v8801_v24 }
  0xc7   : > { %7117 = vmatprep.mubr.bf16.mxu0 %v8803_v25  ;;  %7146 = vmatpush3.bf16.msra.mxu0 %v8418_v23  ;;  %v8431_v23 = vld [vmem:[%s10122_s1 + $0x158] sm:$0xff]  }
  0xc8   : > { %7147 = vmatprep.subr.bf16.mxu0 %v8419_v27 }
  0xcb   : > { %7148 = vmatpush3.bf16.msra.mxu0 %v8419_v27  ;;  %v1513_v27 = vld [vmem:[#allocation2 + $0x91] sm:$0xff] }
  0xcc   : > { %7181 = vmatprep.subr.bf16.mxu0 %v8420_v35 }
  0xce   : > { %7118 = vmatmul.mubr.bf16.gmra.mrb[16].mxu0 %v8813_v37 }
  0xcf   : > { %7121 = vmatprep.mubr.bf16.mxu0 %v8815_v38 }
  0xd6   : > { %7122 = vmatmul.mubr.bf16.gmra.mrb[20].mxu0 %v8819_v52 }
  0xd7   : > { %7125 = vmatprep.mubr.bf16.mxu0 %v8821_v54 }
  0xde   : > { %7126 = vmatmul.mubr.bf16.gmra.mrb[24].mxu0 %v8825_v62 }
  0xdf   : > { %7129 = vmatprep.mubr.bf16.mxu0 %v8827_v63 }
  0xe6   : > { %7130 = vmatmul.mubr.bf16.gmra.mrb[28].mxu0 %v8831_v6 }
  0xe7   : > { %7149 = vmatprep.mubr.bf16.mxu0 %v8687_v50  ;;  %v8423_v50 = vld [vmem:[%s10122_s1 + $0x118] sm:$0xff]  }
  0xee   : > { %7150 = vmatmul.mubr.bf16.vlgmr.msra.gmra.mrb[0].mxu0 %v8694_v55  ;;  %v8424_v55 = vld [vmem:[%s10122_s1 + $0x120] sm:$0xff]  }
  0xef   : > { %7182 = vmatpush3.bf16.msra.mxu0 %v8420_v35  ;;  %7153 = vmatprep.mubr.bf16.mxu0 %v8701_v59  ;;  %v8425_v59 = vld [vmem:[%s10122_s1 + $0x128] sm:$0xff]   ;;  %v8902_v35 = vpack.c.bf16 %v1514_v29, %v1513_v27  ;;  %v2154_v27 = vpack.c.bf16 %v2131_v17, %v2130_v51  ;;  %v8452_v29 = vld [vmem:[%s10122_s1 + $0x1f8] sm:$0xff]  }
  0xf0   : > { %7183 = vmatprep.subr.bf16.mxu0 %v8421_v7  ;;  %v2729_v51 = vld [vmem:[#allocation2 + $0x6a] sm:$0xff] }
  0xf3   : > { %7184 = vmatpush3.bf16.msra.mxu0 %v8421_v7 }
  0xf4   : > { %7185 = vmatprep.subr.bf16.mxu0 %v8422_v8 }
  0xf6   : > { %7154 = vmatmul.mubr.bf16.gmra.mrb[4].mxu0 %v8706_v61  ;;  %v8426_v61 = vld [vmem:[%s10122_s1 + $0x130] sm:$0xff]  }
  0xf7   : > { %7157 = vmatprep.mubr.bf16.mxu0 %v8713_v3  ;;  %7186 = vmatpush3.bf16.msra.mxu0 %v8422_v8  ;;  %v8427_v3 = vld [vmem:[%s10122_s1 + $0x138] sm:$0xff]  }
  0xf8   : > { %7187 = vmatprep.subr.bf16.mxu0 %v8423_v50 }
  0xfb   : > { %7188 = vmatpush3.bf16.msra.mxu0 %v8423_v50  ;;  %v2121_v50 = vld [vmem:[#allocation2 + $0x80] sm:$0xff] }
  0xfc   : > { %7189 = vmatprep.subr.bf16.mxu0 %v8424_v55 }
  0xfe   : > { %7158 = vmatmul.mubr.bf16.gmra.mrb[8].mxu0 %v8718_v5  ;;  %v8428_v5 = vld [vmem:[%s10122_s1 + $0x140] sm:$0xff]  }
  0xff   : > { %7161 = vmatprep.mubr.bf16.mxu0 %v8725_v11  ;;  %7190 = vmatpush3.bf16.msra.mxu0 %v8424_v55  ;;  %v316_v11 = vld [vmem:[#allocation2 + $0x181] sm:$0x1]  ;;  %v2122_v55 = vld [vmem:[#allocation2 + $0x90] sm:$0xff] }
 0x100   : > { %7191 = vmatprep.subr.bf16.mxu0 %v8425_v59  ;;  %332 = vst [vmem:[#allocation2 + $0x191] sm:$0x1] %v316_v11  ;;  %v8448_v11 = vld [vmem:[%s10122_s1 + $0x1d8] sm:$0xff]  }
 0x103   : > { %7192 = vmatpush3.bf16.msra.mxu0 %v8425_v59  ;;  %v2123_v59 = vld [vmem:[#allocation2 + $0x98] sm:$0xff] }
 0x104   : > { %7193 = vmatprep.subr.bf16.mxu0 %v8426_v61 }
 0x106   : > { %7162 = vmatmul.mubr.bf16.gmra.mrb[12].mxu0 %v8730_v13  ;;  %v1503_v13 = vld [vmem:[#allocation2 + $0x19] sm:$0xff] }
 0x107   : > { %7165 = vmatprep.mubr.bf16.mxu0 %v8737_v19  ;;  %7194 = vmatpush3.bf16.msra.mxu0 %v8426_v61  ;;  %v1504_v19 = vld [vmem:[#allocation2 + $0x21] sm:$0xff]  ;;  %v8447_v61 = vld [vmem:[%s10122_s1 + $0x1d0] sm:$0xff]  }
 0x108   : > { %7195 = vmatprep.subr.bf16.mxu0 %v8427_v3  ;;  %v1535_v10 = vpack.c.bf16 %v1504_v19, %v1503_v13  ;;  %v2124_v13 = vld [vmem:[#allocation2 + $0xa8] sm:$0xff]  ;;  %v2125_v19 = vld [vmem:[#allocation2 + $0xb0] sm:$0xff] }
 0x10b   : > { %7196 = vmatpush3.bf16.msra.mxu0 %v8427_v3 }
 0x10c   : > { %7229 = vmatprep.subr.bf16.mxu0 %v8428_v5 }
 0x10e   : > { %7166 = vmatmul.mubr.bf16.gmra.mrb[16].mxu0 %v8739_v20  ;;  %v1505_v20 = vld [vmem:[#allocation2 + $0x31] sm:$0xff] }
 0x10f   : > { %7169 = vmatprep.mubr.bf16.mxu0 %v8744_v26  ;;  %v1506_v26 = vld [vmem:[#allocation2 + $0x39] sm:$0xff] }
 0x110   : > { %v8878_v12 = vpack.c.bf16 %v1506_v26, %v1505_v20  ;;  %v2127_v20 = vld [vmem:[#allocation2 + $0xc8] sm:$0xff]  ;;  %v8449_v26 = vld [vmem:[%s10122_s1 + $0x1e0] sm:$0xff]  }
 0x116   : > { %7170 = vmatmul.mubr.bf16.gmra.mrb[20].mxu0 %v8746_v28  ;;  %v1507_v28 = vld [vmem:[#allocation2 + $0x49] sm:$0xff] }
 0x117   : > { %7173 = vmatprep.mubr.bf16.mxu0 %v8750_v34  ;;  %v1508_v34 = vld [vmem:[#allocation2 + $0x51] sm:$0xff] }
 0x118   : > { %v8880_v16 = vpack.c.bf16 %v1508_v34, %v1507_v28  ;;  %v2151_v28 = vpack.c.bf16 %v2125_v19, %v2124_v13  ;;  %v2449_v19 = vld [vmem:[#allocation2 + $0x199] sm:$0xff] }
 0x11e   : > { %7174 = vmatmul.mubr.bf16.gmra.mrb[24].mxu0 %v8752_v36  ;;  %v8429_v36 = vld [vmem:[%s10122_s1 + $0x148] sm:$0xff]  }
 0x11f   : > { %7177 = vmatprep.mubr.bf16.mxu0 %v8756_v44  ;;  %v1509_v44 = vld [vmem:[#allocation2 + $0x61] sm:$0xff] }
 0x120   : > { %v8890_v21 = vpack.c.bf16 %v1510_v48, %v1509_v44  ;;  %v2128_v44 = vld [vmem:[#allocation2 + $0xd8] sm:$0xff]  ;;  %v2129_v48 = vld [vmem:[#allocation2 + $0xe0] sm:$0xff] }
 0x126   : > { %7178 = vmatmul.mubr.bf16.gmra.mrb[28].mxu0 %v8875_v9 }
 0x127   : > { %7197 = vmatprep.mubr.bf16.mxu0 %v1535_v10  ;;  %v2126_v10 = vld [vmem:[#allocation2 + $0xc0] sm:$0xff] }
 0x128   : > { %v2152_v34 = vpack.c.bf16 %v2127_v20, %v2126_v10  ;;  %v2724_v20 = vld [vmem:[#allocation2 + $0x32] sm:$0xff] }
 0x12e   : > { %7198 = vmatmul.mubr.bf16.vlgmr.msra.gmra.mrb[0].mxu0 %v8878_v12 }
 0x12f   : > { %7230 = vmatpush3.bf16.msra.mxu0 %v8428_v5  ;;  %7201 = vmatprep.mubr.bf16.mxu0 %v8880_v16  ;;  %v2150_v5 = vpack.c.bf16 %v2123_v59, %v2122_v55  ;;  %v2443_v55 = vld [vmem:[#allocation2 + $0x151] sm:$0xff]  ;;  %v2444_v59 = vld [vmem:[#allocation2 + $0x159] sm:$0xff] }
 0x130   : > { %7231 = vmatprep.subr.bf16.mxu0 %v8429_v36 }
 0x133   : > { %7232 = vmatpush3.bf16.msra.mxu0 %v8429_v36  ;;  %v8450_v36 = vld [vmem:[%s10122_s1 + $0x1e8] sm:$0xff]  }
 0x134   : > { %7233 = vmatprep.subr.bf16.mxu0 %v8430_v18 }
 0x136   : > { %7202 = vmatmul.mubr.bf16.gmra.mrb[4].mxu0 %v8890_v21 }
 0x137   : > { %7205 = vmatprep.mubr.bf16.mxu0 %v8892_v22  ;;  %7234 = vmatpush3.bf16.msra.mxu0 %v8430_v18  ;;  %v8451_v18 = vld [vmem:[%s10122_s1 + $0x1f0] sm:$0xff]  }
 0x138   : > { %7235 = vmatprep.subr.bf16.mxu0 %v8431_v23 }
 0x13b   : > { %7236 = vmatpush3.bf16.msra.mxu0 %v8431_v23  ;;  %v2153_v23 = vpack.c.bf16 %v2129_v48, %v2128_v44  ;;  %v2727_v44 = vld [vmem:[#allocation2 + $0x52] sm:$0xff]  ;;  %v2728_v48 = vld [vmem:[#allocation2 + $0x62] sm:$0xff] }
 0x13c   : > { %7237 = vmatprep.subr.bf16.mxu0 %v8432_v33 }
 0x13e   : > { %7206 = vmatmul.mubr.bf16.gmra.mrb[8].mxu0 %v8902_v35 }
 0x13f   : > { %7209 = vmatprep.mubr.bf16.mxu0 %v8904_v39  ;;  %7238 = vmatpush3.bf16.msra.mxu0 %v8432_v33  ;;  %v2134_v33 = vld [vmem:[#allocation2 + $0x120] sm:$0xff] }
 0x140   : > { %7239 = vmatprep.subr.bf16.mxu0 %v8433_v40 }
 0x143   : > { %7240 = vmatpush3.bf16.msra.mxu0 %v8433_v40  ;;  %v2135_v40 = vld [vmem:[#allocation2 + $0x128] sm:$0xff] }
 0x144   : > { %7241 = vmatprep.subr.bf16.mxu0 %v8434_v42 }
 0x146   : > { %7210 = vmatmul.mubr.bf16.gmra.mrb[12].mxu0 %v8537_v56  ;;  %v2156_v56 = vpack.c.bf16 %v2135_v40, %v2134_v33  ;;  %v2734_v33 = vld [vmem:[#allocation2 + $0xaa] sm:$0xff]  ;;  %v2735_v40 = vld [vmem:[#allocation2 + $0xb2] sm:$0xff] }
 0x147   : > { %7213 = vmatprep.mubr.bf16.mxu0 %v8538_v57  ;;  %7242 = vmatpush3.bf16.msra.mxu0 %v8434_v42  ;;  %v8453_v42 = vld [vmem:[%s10122_s1 + $0x200] sm:$0xff]   ;;  %v2136_v57 = vld [vmem:[#allocation2 + $0x138] sm:$0xff] }
 0x148   : > { %7243 = vmatprep.subr.bf16.mxu0 %v8435_v46 }
 0x14b   : > { %7244 = vmatpush3.bf16.msra.mxu0 %v8435_v46  ;;  %v2155_v46 = vpack.c.bf16 %v2133_v31, %v2132_v30 }
 0x14c   : > { %7277 = vmatprep.subr.bf16.mxu0 %v8437_v53 }
 0x14e   : > { %7214 = vmatmul.mubr.bf16.gmra.mrb[16].mxu0 %v8539_v60  ;;  %v2138_v60 = vld [vmem:[#allocation2 + $0x150] sm:$0xff] }
 0x14f   : > { %7217 = vmatprep.mubr.bf16.mxu0 %v8667_v41  ;;  %v8439_v41 = vld [vmem:[%s10122_s1 + $0x190] sm:$0xff]  }
 0x156   : > { %7218 = vmatmul.mubr.bf16.gmra.mrb[20].mxu0 %v8670_v43  ;;  %v8440_v43 = vld [vmem:[%s10122_s1 + $0x198] sm:$0xff]  }
 0x157   : > { %7221 = vmatprep.mubr.bf16.mxu0 %v8675_v45  ;;  %v8441_v45 = vld [vmem:[%s10122_s1 + $0x1a0] sm:$0xff]  }
 0x15e   : > { %7222 = vmatmul.mubr.bf16.gmra.mrb[24].mxu0 %v8678_v47  ;;  %v8442_v47 = vld [vmem:[%s10122_s1 + $0x1a8] sm:$0xff]  }
 0x15f   : > { %7225 = vmatprep.mubr.bf16.mxu0 %v8683_v49  ;;  %v8443_v49 = vld [vmem:[%s10122_s1 + $0x1b0] sm:$0xff]  }
 0x166   : > { %7226 = vmatmul.mubr.bf16.gmra.mrb[28].mxu0 %v8929_v0 }
 0x167   : > { %7245 = vmatprep.mubr.bf16.mxu0 %v8765_v58  ;;  %v8444_v58 = vld [vmem:[%s10122_s1 + $0x1b8] sm:$0xff]  }
 0x16e   : > { %7246 = vmatmul.mubr.bf16.vlgmr.msra.gmra.mrb[0].mxu0 %v8767_v32  ;;  %v8445_v32 = vld [vmem:[%s10122_s1 + $0x1c0] sm:$0xff]  }
 0x16f   : > { %7278 = vmatpush3.bf16.msra.mxu0 %v8437_v53  ;;  %7249 = vmatprep.mubr.bf16.mxu0 %v8777_v2  ;;  %v342_v2 = vld [vmem:[#allocation2 + $0x190] sm:$0x3]  ;;  %v2137_v53 = vld [vmem:[#allocation2 + $0x140] sm:$0xff] }
 0x170   : > { %7279 = vmatprep.subr.bf16.mxu0 %v8438_v1  ;;  %346 = vst [vmem:[#allocation2 + $0x1a8] sm:$0x3] %v342_v2 }
 0x173   : > { %7280 = vmatpush3.bf16.msra.mxu0 %v8438_v1  ;;  %v2139_v1 = vld [vmem:[#allocation2 + $0x158] sm:$0xff] }
 0x174   : > { %7281 = vmatprep.subr.bf16.mxu0 %v8439_v41 }
 0x176   : > { %7250 = vmatmul.mubr.bf16.gmra.mrb[4].mxu0 %v8779_v4  ;;  %v1838_v4 = vld [vmem:[#allocation2 + $0x182] sm:$0xff] }
 0x177   : > { %7253 = vmatprep.mubr.bf16.mxu0 %v8789_v14  ;;  %7282 = vmatpush3.bf16.msra.mxu0 %v8439_v41  ;;  %v1839_v14 = vld [vmem:[#allocation2 + $0x18a] sm:$0xff]  ;;  %v2157_v41 = vpack.c.bf16 %v2137_v53, %v2136_v57  ;;  %v2450_v10 = vld [vmem:[#allocation2 + $0x1a1] sm:$0xff] }
 0x178   : > { %7283 = vmatprep.subr.bf16.mxu0 %v8440_v43  ;;  %v2738_v53 = vld [vmem:[#allocation2 + $0xda] sm:$0xff] }
 0x17b   : > { %7284 = vmatpush3.bf16.msra.mxu0 %v8440_v43  ;;  %v2158_v43 = vpack.c.bf16 %v2139_v1, %v2138_v60  ;;  %v2739_v60 = vld [vmem:[#allocation2 + $0xe2] sm:$0xff]  ;;  %v2740_v1 = vld [vmem:[#allocation2 + $0xf2] sm:$0xff] }
 0x17c   : > { %7285 = vmatprep.subr.bf16.mxu0 %v8441_v45 }
 0x17e   : > { %7254 = vmatmul.mubr.bf16.gmra.mrb[8].mxu0 %v8791_v15  ;;  %v2114_v15 = vld [vmem:[#allocation2 + $0x30] sm:$0xff] }
 0x17f   : > { %7257 = vmatprep.mubr.bf16.mxu0 %v8801_v24  ;;  %7286 = vmatpush3.bf16.msra.mxu0 %v8441_v45  ;;  %v2115_v24 = vld [vmem:[#allocation2 + $0x38] sm:$0xff]  ;;  %v2140_v45 = vld [vmem:[#allocation2 + $0x168] sm:$0xff] }
 0x180   : > { %7287 = vmatprep.subr.bf16.mxu0 %v8442_v47 }
 0x183   : > { %7288 = vmatpush3.bf16.msra.mxu0 %v8442_v47  ;;  %v2141_v47 = vld [vmem:[#allocation2 + $0x170] sm:$0xff] }
 0x184   : > { %7289 = vmatprep.subr.bf16.mxu0 %v8443_v49 }
 0x186   : > { %7258 = vmatmul.mubr.bf16.gmra.mrb[12].mxu0 %v8803_v25  ;;  %v8971_v25 = vpack.c.bf16 %v1839_v14, %v1838_v4  ;;  %v8458_v4 = vld [vmem:[%s10122_s1 + $0x228] sm:$0xff]   ;;  %v2435_v14 = vld [vmem:[#allocation2 + $0xf1] sm:$0xff] }
 0x187   : > { %7261 = vmatprep.mubr.bf16.mxu0 %v8813_v37  ;;  %7290 = vmatpush3.bf16.msra.mxu0 %v8443_v49  ;;  %v2146_v37 = vpack.c.bf16 %v2115_v24, %v2114_v15  ;;  %v2159_v49 = vpack.c.bf16 %v2141_v47, %v2140_v45  ;;  %v2436_v15 = vld [vmem:[#allocation2 + $0xf9] sm:$0xff]  ;;  %v8459_v24 = vld [vmem:[%s10122_s1 + $0x230] sm:$0xff]  }
 0x188   : > { %7291 = vmatprep.subr.bf16.mxu0 %v8444_v58  ;;  %v2742_v47 = vld [vmem:[#allocation2 + $0x10a] sm:$0xff] }
 0x18b   : > { %7292 = vmatpush3.bf16.msra.mxu0 %v8444_v58  ;;  %v8454_v58 = vld [vmem:[%s10122_s1 + $0x208] sm:$0xff]  }
 0x18c   : > { %7325 = vmatprep.subr.bf16.mxu0 %v8445_v32 }
 0x18e   : > { %7262 = vmatmul.mubr.bf16.gmra.mrb[16].mxu0 %v8815_v38  ;;  %v2116_v38 = vld [vmem:[#allocation2 + $0x48] sm:$0xff] }
 0x18f   : > { %7265 = vmatprep.mubr.bf16.mxu0 %v8819_v52  ;;  %v2117_v52 = vld [vmem:[#allocation2 + $0x50] sm:$0xff] }
 0x190   : > { %v2147_v7 = vpack.c.bf16 %v2117_v52, %v2116_v38  ;;  %v2459_v38 = vpack.c.bf16 %v2436_v15, %v2435_v14  ;;  %v8460_v52 = vld [vmem:[%s10122_s1 + $0x238] sm:$0xff]   ;;  %v2750_v14 = vld [vmem:[#allocation2 + $0x16a] sm:$0xff] }
 0x191   : > { %v2751_v15 = vld [vmem:[#allocation2 + $0x172] sm:$0xff] }
 0x196   : > { %7266 = vmatmul.mubr.bf16.gmra.mrb[20].mxu0 %v8821_v54  ;;  %v2118_v54 = vld [vmem:[#allocation2 + $0x60] sm:$0xff] }
 0x197   : > { %7269 = vmatprep.mubr.bf16.mxu0 %v8825_v62  ;;  %v2119_v62 = vld [vmem:[#allocation2 + $0x68] sm:$0xff] }
 0x198   : > { %v2148_v8 = vpack.c.bf16 %v2119_v62, %v2118_v54  ;;  %v2438_v54 = vld [vmem:[#allocation2 + $0x111] sm:$0xff]  ;;  %v2439_v62 = vld [vmem:[#allocation2 + $0x121] sm:$0xff] }
 0x19e   : > { %7270 = vmatmul.mubr.bf16.gmra.mrb[24].mxu0 %v8827_v63  ;;  %v8446_v63 = vld [vmem:[%s10122_s1 + $0x1c8] sm:$0xff]  }
 0x19f   : > { %7273 = vmatprep.mubr.bf16.mxu0 %v8831_v6  ;;  %v2120_v6 = vld [vmem:[#allocation2 + $0x78] sm:$0xff] }
 0x1a0   : > { %v2149_v3 = vpack.c.bf16 %v2121_v50, %v2120_v6  ;;  %v2441_v6 = vld [vmem:[#allocation2 + $0x139] sm:$0xff]  ;;  %v2442_v50 = vld [vmem:[#allocation2 + $0x141] sm:$0xff] }
 0x1a6   : > { %7274 = vmatmul.mubr.bf16.gmra.mrb[28].mxu0 %v8971_v25 }
 0x1a7   : > { %7293 = vmatprep.mubr.bf16.mxu0 %v2146_v37 }
 0x1ae   : > { %7294 = vmatmul.mubr.bf16.vlgmr.msra.gmra.mrb[0].mxu0 %v2147_v7  ;;  %v2440_v7 = vld [vmem:[#allocation2 + $0x129] sm:$0xff] }
 0x1af   : > { %7326 = vmatpush3.bf16.msra.mxu0 %v8445_v32  ;;  %7297 = vmatprep.mubr.bf16.mxu0 %v2148_v8  ;;  %v8455_v32 = vld [vmem:[%s10122_s1 + $0x210] sm:$0xff]  }
 0x1b0   : > { %7327 = vmatprep.subr.bf16.mxu0 %v8446_v63 }
 0x1b3   : > { %7328 = vmatpush3.bf16.msra.mxu0 %v8446_v63  ;;  %v2461_v63 = vpack.c.bf16 %v2440_v7, %v2439_v62  ;;  %v8464_v62 = vld [vmem:[%s10123_s2 + $0x58] sm:$0xff]   ;;  %v8465_v7 = vld [vmem:[%s10123_s2 + $0x60] sm:$0xff]  }
 0x1b4   : > { %7329 = vmatprep.subr.bf16.mxu0 %v8447_v61 }
 0x1b6   : > { %7298 = vmatmul.mubr.bf16.gmra.mrb[4].mxu0 %v2149_v3  ;;  %v2463_v3 = vpack.c.bf16 %v2444_v59, %v2443_v55 }
 0x1b7   : > { %7301 = vmatprep.mubr.bf16.mxu0 %v2150_v5  ;;  %7330 = vmatpush3.bf16.msra.mxu0 %v8447_v61  ;;  %v2462_v61 = vpack.c.bf16 %v2442_v50, %v2441_v6  ;;  %v2445_v5 = vld [vmem:[#allocation2 + $0x169] sm:$0xff] }
 0x1b8   : > { %7331 = vmatprep.subr.bf16.mxu0 %v8448_v11 }
 0x1bb   : > { %7332 = vmatpush3.bf16.msra.mxu0 %v8448_v11  ;;  %v2446_v11 = vld [vmem:[#allocation2 + $0x171] sm:$0xff] }
 0x1bc   : > { %7333 = vmatprep.subr.bf16.mxu0 %v8449_v26  ;;  %v2464_v13 = vpack.c.bf16 %v2446_v11, %v2445_v5 }
 0x1be   : > { %7302 = vmatmul.mubr.bf16.gmra.mrb[8].mxu0 %v2151_v28  ;;  %v2466_v28 = vpack.c.bf16 %v2450_v10, %v2449_v19 }
 0x1bf   : > { %7305 = vmatprep.mubr.bf16.mxu0 %v2152_v34  ;;  %7334 = vmatpush3.bf16.msra.mxu0 %v8449_v26  ;;  %v2725_v26 = vld [vmem:[#allocation2 + $0x3a] sm:$0xff] }
 0x1c0   : > { %7335 = vmatprep.subr.bf16.mxu0 %v8450_v36  ;;  %v2756_v34 = vpack.c.bf16 %v2725_v26, %v2724_v20  ;;  %v9073_v20 = vld [vmem:[%s10123_s2] sm:$0xff]  }
 0x1c3   : > { %7336 = vmatpush3.bf16.msra.mxu0 %v8450_v36  ;;  %v2726_v36 = vld [vmem:[#allocation2 + $0x4a] sm:$0xff] }
 0x1c4   : > { %7337 = vmatprep.subr.bf16.mxu0 %v8451_v18  ;;  %v2757_v17 = vpack.c.bf16 %v2727_v44, %v2726_v36 }
 0x1c6   : > { %7306 = vmatmul.mubr.bf16.gmra.mrb[12].mxu0 %v2153_v23  ;;  %v2730_v23 = vld [vmem:[#allocation2 + $0x7a] sm:$0xff] }
 0x1c7   : > { %7309 = vmatprep.mubr.bf16.mxu0 %v2154_v27  ;;  %7338 = vmatpush3.bf16.msra.mxu0 %v8451_v18  ;;  %v2758_v18 = vpack.c.bf16 %v2729_v51, %v2728_v48  ;;  %v2731_v27 = vld [vmem:[#allocation2 + $0x82] sm:$0xff] }
 0x1c8   : > { %7339 = vmatprep.subr.bf16.mxu0 %v8452_v29  ;;  %v2759_v30 = vpack.c.bf16 %v2731_v27, %v2730_v23 }
 0x1cb   : > { %7340 = vmatpush3.bf16.msra.mxu0 %v8452_v29  ;;  %v2732_v29 = vld [vmem:[#allocation2 + $0x92] sm:$0xff] }
 0x1cc   : > { %7373 = vmatprep.subr.bf16.mxu0 %v8453_v42 }
 0x1ce   : > { %7310 = vmatmul.mubr.bf16.gmra.mrb[16].mxu0 %v2155_v46  ;;  %v2737_v46 = vld [vmem:[#allocation2 + $0xca] sm:$0xff] }
 0x1cf   : > { %7313 = vmatprep.mubr.bf16.mxu0 %v2156_v56  ;;  %v2761_v56 = vpack.c.bf16 %v2735_v40, %v2734_v33 }
 0x1d6   : > { %7314 = vmatmul.mubr.bf16.gmra.mrb[20].mxu0 %v2157_v41  ;;  %v2741_v41 = vld [vmem:[#allocation2 + $0xfa] sm:$0xff] }
 0x1d7   : > { %7317 = vmatprep.mubr.bf16.mxu0 %v2158_v43  ;;  %v2763_v43 = vpack.c.bf16 %v2739_v60, %v2738_v53  ;;  %v2764_v45 = vpack.c.bf16 %v2741_v41, %v2740_v1 }
 0x1de   : > { %7318 = vmatmul.mubr.bf16.gmra.mrb[24].mxu0 %v2159_v49  ;;  %v2743_v49 = vld [vmem:[#allocation2 + $0x112] sm:$0xff] }
 0x1df   : > { %7321 = vmatprep.mubr.bf16.mxu0 %v8875_v9 }
 0x1e6   : > { %7322 = vmatmul.mubr.bf16.gmra.mrb[28].mxu0 %v8875_v9  ;;  %v8456_v9 = vld [vmem:[%s10122_s1 + $0x218] sm:$0xff]  }
 0x1e7   : > { %7341 = vmatprep.mubr.bf16.mxu0 %v8878_v12  ;;  %v2431_v12 = vld [vmem:[#allocation2 + $0xc1] sm:$0xff] }
 0x1ee   : > { %7342 = vmatmul.mubr.bf16.vlgmr.msra.gmra.mrb[0].mxu0 %v8880_v16  ;;  %v2432_v16 = vld [vmem:[#allocation2 + $0xc9] sm:$0xff] }
 0x1ef   : > { %7374 = vmatpush3.bf16.msra.mxu0 %v8453_v42  ;;  %7345 = vmatprep.mubr.bf16.mxu0 %v8890_v21  ;;  %v8457_v21 = vld [vmem:[%s10122_s1 + $0x220] sm:$0xff]   ;;  %v2457_v2 = vpack.c.bf16 %v2432_v16, %v2431_v12 }
 0x1f0   : > { %7375 = vmatprep.subr.bf16.mxu0 %v8454_v58  ;;  %v2736_v42 = vld [vmem:[#allocation2 + $0xc2] sm:$0xff]  ;;  %v2746_v16 = vld [vmem:[#allocation2 + $0x13a] sm:$0xff] }
 0x1f1   : > { %v2762_v57 = vpack.c.bf16 %v2737_v46, %v2736_v42 }
 0x1f3   : > { %7376 = vmatpush3.bf16.msra.mxu0 %v8454_v58  ;;  %v2744_v58 = vld [vmem:[#allocation2 + $0x122] sm:$0xff] }
 0x1f4   : > { %7377 = vmatprep.subr.bf16.mxu0 %v8455_v32 }
 0x1f6   : > { %7346 = vmatmul.mubr.bf16.gmra.mrb[4].mxu0 %v8892_v22  ;;  %v2433_v22 = vld [vmem:[#allocation2 + $0xd9] sm:$0xff] }
 0x1f7   : > { %7349 = vmatprep.mubr.bf16.mxu0 %v8902_v35  ;;  %7378 = vmatpush3.bf16.msra.mxu0 %v8455_v32  ;;  %v2434_v35 = vld [vmem:[#allocation2 + $0xe1] sm:$0xff]  ;;  %v2745_v32 = vld [vmem:[#allocation2 + $0x12a] sm:$0xff] }
 0x1f8   : > { %7379 = vmatprep.subr.bf16.mxu0 %v8456_v9  ;;  %v2458_v37 = vpack.c.bf16 %v2434_v35, %v2433_v22  ;;  %v2766_v12 = vpack.c.bf16 %v2745_v32, %v2744_v58 }
 0x1fb   : > { %7380 = vmatpush3.bf16.msra.mxu0 %v8456_v9  ;;  %v2765_v9 = vpack.c.bf16 %v2743_v49, %v2742_v47 }
 0x1fc   : > { %7381 = vmatprep.subr.bf16.mxu0 %v8457_v21 }
 0x1fe   : > { %7350 = vmatmul.mubr.bf16.gmra.mrb[8].mxu0 %v8904_v39  ;;  %v2437_v39 = vld [vmem:[#allocation2 + $0x109] sm:$0xff] }
 0x1ff   : > { %7353 = vmatprep.mubr.bf16.mxu0 %v2457_v2  ;;  %7382 = vmatpush3.bf16.msra.mxu0 %v8457_v21  ;;  %v2460_v8 = vpack.c.bf16 %v2438_v54, %v2437_v39  ;;  %v2747_v21 = vld [vmem:[#allocation2 + $0x142] sm:$0xff]  ;;  %v2748_v2 = vld [vmem:[#allocation2 + $0x152] sm:$0xff] }
 0x200   : > { %7383 = vmatprep.subr.bf16.mxu0 %v8458_v4  ;;  %v2767_v22 = vpack.c.bf16 %v2747_v21, %v2746_v16  ;;  %v8461_v39 = vld [vmem:[%s10123_s2 + $0x40] sm:$0xff]   ;;  %v8462_v54 = vld [vmem:[%s10123_s2 + $0x48] sm:$0xff]  }
 0x201   : > { %7421 = vmatprep.subr.bf16.mxu1 %v8461_v39 }
 0x202   : > { %7422 = vmatpush3.bf16.msra.mxu1 %v8461_v39 }
 0x203   : > { %7384 = vmatpush3.bf16.msra.mxu0 %v8458_v4  ;;  %v2749_v4 = vld [vmem:[#allocation2 + $0x15a] sm:$0xff]  ;;  %7423 = vmatprep.subr.bf16.mxu1 %v8462_v54 }
 0x204   : > { %7385 = vmatprep.subr.bf16.mxu0 %v8459_v24  ;;  %v2768_v35 = vpack.c.bf16 %v2749_v4, %v2748_v2 }
 0x206   : > { %7354 = vmatmul.mubr.bf16.gmra.mrb[12].mxu0 %v2458_v37  ;;  %v2754_v37 = vld [vmem:[#allocation2 + $0x19a] sm:$0xff]  ;;  %7424 = vmatpush3.bf16.msra.mxu1 %v8462_v54 }
 0x207   : > { %7357 = vmatprep.mubr.bf16.mxu0 %v2459_v38  ;;  %7386 = vmatpush3.bf16.msra.mxu0 %v8459_v24  ;;  %v2769_v24 = vpack.c.bf16 %v2751_v15, %v2750_v14  ;;  %v2755_v38 = vld [vmem:[#allocation2 + $0x1a2] sm:$0xff] }
 0x208   : > { %7387 = vmatprep.subr.bf16.mxu0 %v8460_v52 }
 0x20b   : > { %7388 = vmatpush3.bf16.msra.mxu0 %v8460_v52  ;;  %v2771_v52 = vpack.c.bf16 %v2755_v38, %v2754_v37 }
 0x20e   : > { %7358 = vmatmul.mubr.bf16.gmra.mrb[16].mxu0 %v2460_v8  ;;  %v8466_v8 = vld [vmem:[%s10123_s2 + $0x68] sm:$0xff]  }
 0x20f   : > { %7361 = vmatprep.mubr.bf16.mxu0 %v2461_v63  ;;  %v8467_v63 = vld [vmem:[%s10123_s2 + $0x70] sm:$0xff]  }
 0x216   : > { %7362 = vmatmul.mubr.bf16.gmra.mrb[20].mxu0 %v2462_v61  ;;  %v8468_v61 = vld [vmem:[%s10123_s2 + $0x78] sm:$0xff]  }
 0x217   : > { %7365 = vmatprep.mubr.bf16.mxu0 %v2463_v3 }
 0x21e   : > { %7366 = vmatmul.mubr.bf16.gmra.mrb[24].mxu0 %v2464_v13 }
 0x21f   : > { %7369 = vmatprep.mubr.bf16.mxu0 %v8929_v0  ;;  %v2733_v0 = vld [vmem:[#allocation2 + $0x9a] sm:$0xff] }
 0x220   : > { %v2760_v31 = vpack.c.bf16 %v2733_v0, %v2732_v29 }
 0x226   : > { %7370 = vmatmul.mubr.bf16.gmra.mrb[28].mxu0 %v2466_v28 }
 0x227   : > { %7389 = vmatprep.mubr.bf16.mxu0 %v2756_v34 }
 0x22e   : > { %7390 = vmatmul.mubr.bf16.vlgmr.msra.gmra.mrb[0].mxu0 %v2757_v17 }
 0x22f   : > { %7393 = vmatprep.mubr.bf16.mxu0 %v2758_v18 }
 0x236   : > { %7394 = vmatmul.mubr.bf16.gmra.mrb[4].mxu0 %v2759_v30 }
 0x237   : > { %7397 = vmatprep.mubr.bf16.mxu0 %v2760_v31 }
 0x23e   : > { %7398 = vmatmul.mubr.bf16.gmra.mrb[8].mxu0 %v2761_v56 }
 0x23f   : > { %7401 = vmatprep.mubr.bf16.mxu0 %v2762_v57 }
 0x246   : > { %7402 = vmatmul.mubr.bf16.gmra.mrb[12].mxu0 %v2763_v43 }
 0x247   : > { %7405 = vmatprep.mubr.bf16.mxu0 %v2764_v45 }
 0x24e   : > { %7406 = vmatmul.mubr.bf16.gmra.mrb[16].mxu0 %v2765_v9 }
 0x24f   : > { %7409 = vmatprep.mubr.bf16.mxu0 %v2766_v12 }
 0x256   : > { %7410 = vmatmul.mubr.bf16.gmra.mrb[20].mxu0 %v2767_v22 }
 0x257   : > { %7413 = vmatprep.mubr.bf16.mxu0 %v2768_v35 }
 0x25e   : > { %7414 = vmatmul.mubr.bf16.gmra.mrb[24].mxu0 %v2769_v24 }
 0x25f   : > { %7417 = vmatprep.mubr.bf16.mxu0 %v8971_v25  ;;  %v8463_v25 = vld [vmem:[%s10123_s2 + $0x50] sm:$0xff]  }
 0x260   : > { %7425 = vmatprep.subr.bf16.mxu1 %v8463_v25 }
 0x261   : > { %7426 = vmatpush3.bf16.msra.mxu1 %v8463_v25 }
 0x262   : > { %7427 = vmatprep.subr.bf16.mxu1 %v8464_v62 }
 0x265   : > { %7428 = vmatpush3.bf16.msra.mxu1 %v8464_v62 }
 0x266   : > { %7418 = vmatmul.mubr.bf16.gmra.mrb[28].mxu0 %v2771_v52  ;;  %7429 = vmatprep.subr.bf16.mxu1 %v8465_v7 }
 0x269   : > { %7430 = vmatpush3.bf16.msra.mxu1 %v8465_v7 }
 0x26a   : > { %7431 = vmatprep.subr.bf16.mxu1 %v8466_v8 }
 0x26d   : > { %7432 = vmatpush3.bf16.msra.mxu1 %v8466_v8 }
 0x26e   : > { %7433 = vmatprep.subr.bf16.mxu1 %v8467_v63 }
 0x271   : > { %7434 = vmatpush3.bf16.msra.mxu1 %v8467_v63 }
 0x272   : > { %7435 = vmatprep.subr.bf16.mxu1 %v8468_v61 }
 0x275   : > { %7436 = vmatpush3.bf16.msra.mxu1 %v8468_v61 }
 0x276   : > { %7469 = vmatprep.subr.bf16.mxu1 %v9073_v20 }
 0x301   : > { %v9050_v6 = vpop.f32.mrb[0].mxu0 }
 0x302   : > { %v9052_v50 = vpop.f32.mrb[1].mxu0  ;;  %v3069_v13 = vmul.f32 %v9050_v6, %v9050_v6 }
 0x303   : > { %v9054_v55 = vpop.f32.mrb[2].mxu0  ;;  %v3067_v3 = vmul.f32 %v9052_v50, %v9052_v50 }
 0x304   : > { %v9056_v59 = vpop.f32.mrb[3].mxu0  ;;  %v3070_v26 = vmul.f32 %v9054_v55, %v9054_v55 }
 0x305   : > { %v3029_v5 = vadd.f32 %v9056_v59, %v9052_v50  ;;  %v3068_v11 = vmul.f32 %v9056_v59, %v9056_v59 }
 0x307   : > { %v3030_v19 = vadd.f32 %v9050_v6, %v3029_v5  ;;  %v3099_v10 = vadd.f32 %v3068_v11, %v3067_v3 }
 0x309   : > { %v3100_v28 = vadd.f32 %v3099_v10, %v3069_v13  ;;  %v9077_v34 = vpop.f32.mrb[4].mxu0  ;;  %v3031_v36 = vadd.f32 %v9054_v55, %v3030_v19 }
 0x30a   : > { %v9080_v44 = vpop.f32.mrb[5].mxu0  ;;  %v3073_v30 = vmul.f32 %v9077_v34, %v9077_v34 }
 0x30b   : > { %v3032_v48 = vadd.f32 %v3031_v36, %v9080_v44  ;;  %v3071_v51 = vmul.f32 %v9080_v44, %v9080_v44  ;;  %v3101_v17 = vadd.f32 %v3100_v28, %v3070_v26  ;;  %v9085_v18 = vpop.f32.mrb[6].mxu0 }
 0x30c   : > { %v9087_v23 = vpop.f32.mrb[7].mxu0  ;;  %v3074_v40 = vmul.f32 %v9085_v18, %v9085_v18 }
 0x30d   : > { %v3102_v27 = vadd.f32 %v3101_v17, %v3071_v51  ;;  %v3033_v29 = vadd.f32 %v3032_v48, %v9087_v23  ;;  %v3072_v0 = vmul.f32 %v9087_v23, %v9087_v23 }
 0x30f   : > { %v3034_v31 = vadd.f32 %v9077_v34, %v3033_v29  ;;  %v3103_v33 = vadd.f32 %v3102_v27, %v3072_v0 }
 0x311   : > { %v3104_v42 = vadd.f32 %v3103_v33, %v3073_v30  ;;  %v9098_v46 = vpop.f32.mrb[8].mxu0  ;;  %v3035_v56 = vadd.f32 %v9085_v18, %v3034_v31 }
 0x312   : > { %v9101_v57 = vpop.f32.mrb[9].mxu0  ;;  %v3077_v58 = vmul.f32 %v9098_v46, %v9098_v46 }
 0x313   : > { %v3036_v53 = vadd.f32 %v3035_v56, %v9101_v57  ;;  %v3075_v60 = vmul.f32 %v9101_v57, %v9101_v57  ;;  %v3105_v1 = vadd.f32 %v3104_v42, %v3074_v40  ;;  %v9106_v41 = vpop.f32.mrb[10].mxu0 }
 0x314   : > { %v9108_v43 = vpop.f32.mrb[11].mxu0  ;;  %v3078_v12 = vmul.f32 %v9106_v41, %v9106_v41 }
 0x315   : > { %v3106_v45 = vadd.f32 %v3105_v1, %v3075_v60  ;;  %v3037_v47 = vadd.f32 %v3036_v53, %v9108_v43  ;;  %v3076_v49 = vmul.f32 %v9108_v43, %v9108_v43 }
 0x317   : > { %v3038_v32 = vadd.f32 %v9098_v46, %v3037_v47  ;;  %v3107_v9 = vadd.f32 %v3106_v45, %v3076_v49 }
 0x319   : > { %v3108_v16 = vadd.f32 %v3107_v9, %v3077_v58  ;;  %v9118_v21 = vpop.f32.mrb[12].mxu0  ;;  %v3039_v2 = vadd.f32 %v9106_v41, %v3038_v32 }
 0x31a   : > { %v9121_v4 = vpop.f32.mrb[13].mxu0  ;;  %v3081_v39 = vmul.f32 %v9118_v21, %v9118_v21 }
 0x31b   : > { %v3040_v22 = vadd.f32 %v3039_v2, %v9121_v4  ;;  %v3079_v35 = vmul.f32 %v9121_v4, %v9121_v4  ;;  %v3109_v14 = vadd.f32 %v3108_v16, %v3078_v12  ;;  %v9126_v15 = vpop.f32.mrb[14].mxu0 }
 0x31c   : > { %v9128_v24 = vpop.f32.mrb[15].mxu0  ;;  %v3082_v62 = vmul.f32 %v9126_v15, %v9126_v15 }
 0x31d   : > { %v3110_v37 = vadd.f32 %v3109_v14, %v3079_v35  ;;  %v3041_v38 = vadd.f32 %v3040_v22, %v9128_v24  ;;  %v3080_v52 = vmul.f32 %v9128_v24, %v9128_v24 }
 0x31f   : > { %v3042_v54 = vadd.f32 %v9118_v21, %v3041_v38  ;;  %v3111_v25 = vadd.f32 %v3110_v37, %v3080_v52 }
 0x321   : > { %v3112_v7 = vadd.f32 %v3111_v25, %v3081_v39  ;;  %v9138_v8 = vpop.f32.mrb[16].mxu0  ;;  %v3043_v63 = vadd.f32 %v9126_v15, %v3042_v54 }
 0x322   : > { %v9141_v61 = vpop.f32.mrb[17].mxu0  ;;  %v3085_v36 = vmul.f32 %v9138_v8, %v9138_v8 }
 0x323   : > { %v3044_v3 = vadd.f32 %v3043_v63, %v9141_v61  ;;  %v3083_v5 = vmul.f32 %v9141_v61, %v9141_v61  ;;  %v3113_v11 = vadd.f32 %v3112_v7, %v3082_v62  ;;  %v9146_v13 = vpop.f32.mrb[18].mxu0 }
 0x324   : > { %v9148_v19 = vpop.f32.mrb[19].mxu0  ;;  %v3086_v17 = vmul.f32 %v9146_v13, %v9146_v13 }
 0x325   : > { %v3114_v10 = vadd.f32 %v3113_v11, %v3083_v5  ;;  %v3045_v26 = vadd.f32 %v3044_v3, %v9148_v19  ;;  %v3084_v28 = vmul.f32 %v9148_v19, %v9148_v19 }
 0x327   : > { %v3046_v48 = vadd.f32 %v9138_v8, %v3045_v26  ;;  %v3115_v51 = vadd.f32 %v3114_v10, %v3084_v28 }
 0x329   : > { %v3116_v27 = vadd.f32 %v3115_v51, %v3085_v36  ;;  %v9158_v29 = vpop.f32.mrb[20].mxu0  ;;  %v3047_v0 = vadd.f32 %v9146_v13, %v3046_v48 }
 0x32a   : > { %v9161_v30 = vpop.f32.mrb[21].mxu0  ;;  %v3089_v45 = vmul.f32 %v9158_v29, %v9158_v29 }
 0x32b   : > { %v3048_v31 = vadd.f32 %v3047_v0, %v9161_v30  ;;  %v3087_v33 = vmul.f32 %v9161_v30, %v9161_v30  ;;  %v3117_v40 = vadd.f32 %v3116_v27, %v3086_v17  ;;  %v9166_v42 = vpop.f32.mrb[22].mxu0 }
 0x32c   : > { %v9168_v56 = vpop.f32.mrb[23].mxu0  ;;  %v3090_v58 = vmul.f32 %v9166_v42, %v9166_v42 }
 0x32d   : > { %v3118_v53 = vadd.f32 %v3117_v40, %v3087_v33  ;;  %v3049_v60 = vadd.f32 %v3048_v31, %v9168_v56  ;;  %v3088_v1 = vmul.f32 %v9168_v56, %v9168_v56 }
 0x32f   : > { %v3050_v47 = vadd.f32 %v9158_v29, %v3049_v60  ;;  %v3119_v49 = vadd.f32 %v3118_v53, %v3088_v1 }
 0x331   : > { %v3120_v32 = vadd.f32 %v3119_v49, %v3089_v45  ;;  %v9178_v9 = vpop.f32.mrb[24].mxu0  ;;  %v3051_v12 = vadd.f32 %v9166_v42, %v3050_v47 }
 0x332   : > { %v9181_v16 = vpop.f32.mrb[25].mxu0  ;;  %v3093_v54 = vmul.f32 %v9178_v9, %v9178_v9 }
 0x333   : > { %v3052_v2 = vadd.f32 %v3051_v12, %v9181_v16  ;;  %v3091_v22 = vmul.f32 %v9181_v16, %v9181_v16  ;;  %v3121_v35 = vadd.f32 %v3120_v32, %v3090_v58  ;;  %v9186_v14 = vpop.f32.mrb[26].mxu0 }
 0x334   : > { %v9188_v37 = vpop.f32.mrb[27].mxu0  ;;  %v3094_v7 = vmul.f32 %v9186_v14, %v9186_v14 }
 0x335   : > { %v3122_v38 = vadd.f32 %v3121_v35, %v3091_v22  ;;  %v3053_v52 = vadd.f32 %v3052_v2, %v9188_v37  ;;  %v3092_v39 = vmul.f32 %v9188_v37, %v9188_v37 }
 0x337   : > { %v3054_v25 = vadd.f32 %v9178_v9, %v3053_v52  ;;  %v3123_v62 = vadd.f32 %v3122_v38, %v3092_v39 }
 0x339   : > { %v3124_v63 = vadd.f32 %v3123_v62, %v3093_v54  ;;  %v9198_v3 = vpop.f32.mrb[28].mxu0  ;;  %v3055_v5 = vadd.f32 %v9186_v14, %v3054_v25 }
 0x33a   : > { %v9201_v11 = vpop.f32.mrb[29].mxu0  ;;  %v3097_v0 = vmul.f32 %v9198_v3, %v9198_v3 }
 0x33b   : > { %v3056_v10 = vadd.f32 %v3055_v5, %v9201_v11  ;;  %v3095_v26 = vmul.f32 %v9201_v11, %v9201_v11  ;;  %v3125_v28 = vadd.f32 %v3124_v63, %v3094_v7  ;;  %v9206_v36 = vpop.f32.mrb[30].mxu0 }
 0x33c   : > { %v9208_v48 = vpop.f32.mrb[31].mxu0  ;;  %v3098_v40 = vmul.f32 %v9206_v36, %v9206_v36 }
 0x33d   : > { %v3126_v51 = vadd.f32 %v3125_v28, %v3095_v26  ;;  %v3057_v17 = vadd.f32 %v3056_v10, %v9208_v48  ;;  %v3096_v27 = vmul.f32 %v9208_v48, %v9208_v48 }
 0x33f   : > { %v3058_v31 = vadd.f32 %v9198_v3, %v3057_v17  ;;  %v3127_v33 = vadd.f32 %v3126_v51, %v3096_v27 }
 0x341   : > { %v3059_v53 = vadd.f32 %v9206_v36, %v3058_v31  ;;  %v3128_v60 = vadd.f32 %v3127_v33, %v3097_v0 }
 0x343   : > { %v3060_v1 = vrot.slane %v3059_v53, 4  ;;  %v3129_v45 = vadd.f32 %v3128_v60, %v3098_v40 }
 0x345   : > { %v3061_v47 = vadd.f32 %v3060_v1, %v3059_v53  ;;  %v3130_v49 = vrot.slane %v3129_v45, 4 }
 0x347   : > { %v3062_v58 = vrot.slane %v3061_v47, 2  ;;  %v3131_v32 = vadd.f32 %v3130_v49, %v3129_v45 }
 0x349   : > { %v3063_v12 = vadd.f32 %v3062_v58, %v3061_v47  ;;  %v3132_v2 = vrot.slane %v3131_v32, 2 }
 0x34b   : > { %v3064_v22 = vrot.slane %v3063_v12, 1  ;;  %v3133_v35 = vadd.f32 %v3132_v2, %v3131_v32 }
 0x34d   : > { %v3065_v38 = vadd.f32 %v3064_v22, %v3063_v12  ;;  %v3134_v52 = vrot.slane %v3133_v35, 1 }
 0x34f   : > { %v9219_v39 = vmul.f32 0.00390625, %v3065_v38  ;;  %v3135_v54 = vadd.f32 %v3134_v52, %v3133_v35 }
 0x351   : > { %v3136_v25 = vmul.f32 0.00390625, %v3135_v54  ;;  %v3137_v62 = vmul.f32 %v9219_v39, %v9219_v39  ;;  %v3168_v7 = vsub.f32 %v9208_v48, %v9219_v39  ;;  %v3139_v63 = vsub.f32 %v9052_v50, %v9219_v39 }
 0x352   : > { %v3140_v5 = vsub.f32 %v9056_v59, %v9219_v39  ;;  %v3141_v10 = vsub.f32 %v9050_v6, %v9219_v39  ;;  %v3142_v26 = vsub.f32 %v9054_v55, %v9219_v39  ;;  %v3143_v28 = vsub.f32 %v9080_v44, %v9219_v39 }
 0x353   : > { %v3138_v51 = vsub.f32 %v3136_v25, %v3137_v62  ;;  %v3144_v17 = vsub.f32 %v9087_v23, %v9219_v39  ;;  %v3145_v48 = vsub.f32 %v9077_v34, %v9219_v39  ;;  %v3146_v50 = vsub.f32 %v9085_v18, %v9219_v39 }
 0x354   : > { %v3147_v59 = vsub.f32 %v9101_v57, %v9219_v39  ;;  %v3148_v6 = vsub.f32 %v9108_v43, %v9219_v39  ;;  %v3149_v55 = vsub.f32 %v9098_v46, %v9219_v39  ;;  %v3150_v44 = vsub.f32 %v9106_v41, %v9219_v39 }
 0x355   : > { %v3171_v27 = vadd.f32 1e-05, %v3138_v51  ;;  %v3151_v23 = vsub.f32 %v9121_v4, %v9219_v39  ;;  %v3152_v34 = vsub.f32 %v9128_v24, %v9219_v39  ;;  %v3153_v18 = vsub.f32 %v9118_v21, %v9219_v39 }
 0x356   : > { %v3154_v57 = vsub.f32 %v9126_v15, %v9219_v39  ;;  %v3155_v43 = vsub.f32 %v9141_v61, %v9219_v39  ;;  %v3156_v46 = vsub.f32 %v9148_v19, %v9219_v39  ;;  %v3157_v41 = vsub.f32 %v9138_v8, %v9219_v39 }
 0x357   : > { %8533 = vrsqrt.f32 %v3171_v27  ;;  %v3158_v4 = vsub.f32 %v9146_v13, %v9219_v39  ;;  %v3159_v24 = vsub.f32 %v9161_v30, %v9219_v39  ;;  %v3160_v21 = vsub.f32 %v9168_v56, %v9219_v39 }
 0x358   : > { %v3161_v15 = vsub.f32 %v9158_v29, %v9219_v39  ;;  %v3162_v61 = vsub.f32 %v9166_v42, %v9219_v39  ;;  %v3163_v19 = vsub.f32 %v9181_v16, %v9219_v39  ;;  %v3164_v8 = vsub.f32 %v9188_v37, %v9219_v39 }
 0x359   : > { %v3165_v13 = vsub.f32 %v9178_v9, %v9219_v39  ;;  %v3166_v30 = vsub.f32 %v9186_v14, %v9219_v39  ;;  %v3167_v56 = vsub.f32 %v9201_v11, %v9219_v39  ;;  %v3169_v29 = vsub.f32 %v9198_v3, %v9219_v39 }
 0x35a   : > { %v3170_v42 = vsub.f32 %v9206_v36, %v9219_v39 }
 0x361   : > { %v8534_v0 = vpop.eup %8533 }
 0x362   : > { %v9287_v16 = vmul.f32 %v8534_v0, %v3168_v7  ;;  %v9289_v31 = vmul.f32 %v8534_v0, %v3139_v63  ;;  %v9291_v37 = vmul.f32 %v8534_v0, %v3140_v5  ;;  %v9293_v9 = vmul.f32 %v8534_v0, %v3141_v10 }
 0x363   : > { %v9295_v33 = vmul.f32 %v8534_v0, %v3142_v26  ;;  %v9297_v14 = vmul.f32 %v8534_v0, %v3143_v28  ;;  %v9299_v11 = vmul.f32 %v8534_v0, %v3144_v17  ;;  %v9301_v40 = vmul.f32 %v8534_v0, %v3145_v48 }
 0x364   : > { %v3234_v3 = vmax.f32 %v9287_v16, 0.0  ;;  %v9304_v36 = vmul.f32 %v8534_v0, %v3146_v50  ;;  %v9306_v53 = vmul.f32 %v8534_v0, %v3147_v59  ;;  %v9308_v60 = vmul.f32 %v8534_v0, %v3148_v6 }
 0x365   : > { %v9310_v1 = vmul.f32 %v8534_v0, %v3149_v55  ;;  %v9312_v45 = vmul.f32 %v8534_v0, %v3150_v44  ;;  %v9314_v47 = vmul.f32 %v8534_v0, %v3151_v23  ;;  %v9316_v49 = vmul.f32 %v8534_v0, %v3152_v34 }
 0x366   : > { %3266 = vst [vmem:[#allocation2 + $0x171] sm:$0xff] %v3234_v3  ;;  %v9320_v58 = vmul.f32 %v8534_v0, %v3153_v18  ;;  %v9322_v32 = vmul.f32 %v8534_v0, %v3154_v57  ;;  %v9324_v12 = vmul.f32 %v8534_v0, %v3155_v43  ;;  %v9326_v2 = vmul.f32 %v8534_v0, %v3156_v46 }
 0x367   : > { %v9328_v22 = vmul.f32 %v8534_v0, %v3157_v41  ;;  %v9330_v35 = vmul.f32 %v8534_v0, %v3158_v4  ;;  %v9332_v38 = vmul.f32 %v8534_v0, %v3159_v24  ;;  %v9334_v52 = vmul.f32 %v8534_v0, %v3160_v21 }
 0x368   : > { %v9336_v39 = vmul.f32 %v8534_v0, %v3161_v15  ;;  %v9338_v54 = vmul.f32 %v8534_v0, %v3162_v61  ;;  %v9340_v25 = vmul.f32 %v8534_v0, %v3163_v19  ;;  %v9342_v62 = vmul.f32 %v8534_v0, %v3164_v8 }
 0x369   : > { %v9344_v7 = vmul.f32 %v8534_v0, %v3165_v13  ;;  %v9346_v63 = vmul.f32 %v8534_v0, %v3166_v30  ;;  %v9348_v5 = vmul.f32 %v8534_v0, %v3167_v56  ;;  %v9350_v10 = vmul.f32 %v8534_v0, %v3169_v29 }
 0x36a   : > { %v9352_v26 = vmul.f32 %v8534_v0, %v3170_v42  ;;  %v3205_v28 = vmax.f32 %v9289_v31, 0.0  ;;  %v3206_v51 = vmax.f32 %v9291_v37, 0.0  ;;  %v3207_v17 = vmax.f32 %v9293_v9, 0.0 }
 0x36b   : > { %v3208_v48 = vmax.f32 %v9295_v33, 0.0  ;;  %v3209_v50 = vmax.f32 %v9297_v14, 0.0  ;;  %v3210_v59 = vmax.f32 %v9299_v11, 0.0  ;;  %v3211_v6 = vmax.f32 %v9301_v40, 0.0 }
 0x36c   : > { %v3212_v55 = vmax.f32 %v9304_v36, 0.0  ;;  %v3213_v44 = vmax.f32 %v9306_v53, 0.0  ;;  %v3214_v27 = vmax.f32 %v9308_v60, 0.0  ;;  %v3215_v23 = vmax.f32 %v9310_v1, 0.0  ;;  %3237 = vst [vmem:[#allocation2 + $0x19] sm:$0xff] %v3205_v28  ;;  %3238 = vst [vmem:[#allocation2 + $0x21] sm:$0xff] %v3206_v51 }
 0x36d   : > { %3239 = vst [vmem:[#allocation2 + $0x31] sm:$0xff] %v3207_v17  ;;  %v3216_v34 = vmax.f32 %v9312_v45, 0.0  ;;  %v3217_v18 = vmax.f32 %v9314_v47, 0.0  ;;  %v3218_v57 = vmax.f32 %v9316_v49, 0.0  ;;  %v3219_v43 = vmax.f32 %v9320_v58, 0.0  ;;  %3240 = vst [vmem:[#allocation2 + $0x39] sm:$0xff] %v3208_v48 }
 0x36e   : > { %3241 = vst [vmem:[#allocation2 + $0x49] sm:$0xff] %v3209_v50  ;;  %3242 = vst [vmem:[#allocation2 + $0x51] sm:$0xff] %v3210_v59  ;;  %v3283_v46 = vld [vmem:[#allocation2 + $0x178] sm:$0x1]  ;;  %v3220_v41 = vmax.f32 %v9322_v32, 0.0  ;;  %v3221_v4 = vmax.f32 %v9324_v12, 0.0  ;;  %v9387_v9 = vpack.c.bf16 %v3206_v51, %v3205_v28  ;;  %v9389_v33 = vpack.c.bf16 %v3208_v48, %v3207_v17 }
 0x36f   : > { %3243 = vst [vmem:[#allocation2 + $0x61] sm:$0xff] %v3211_v6  ;;  %v3222_v24 = vmax.f32 %v9326_v2, 0.0  ;;  %v3223_v21 = vmax.f32 %v9328_v22, 0.0  ;;  %3244 = vst [vmem:[#allocation2 + $0x69] sm:$0xff] %v3212_v55  ;;  %v3224_v15 = vmax.f32 %v9330_v35, 0.0  ;;  %v3225_v61 = vmax.f32 %v9332_v38, 0.0 }
 0x370   : > { %3245 = vst [vmem:[#allocation2 + $0x79] sm:$0xff] %v3213_v44  ;;  %3246 = vst [vmem:[#allocation2 + $0x81] sm:$0xff] %v3214_v27  ;;  %v3226_v19 = vmax.f32 %v9334_v52, 0.0  ;;  %v3227_v8 = vmax.f32 %v9336_v39, 0.0  ;;  %v3228_v13 = vmax.f32 %v9338_v54, 0.0  ;;  %v3229_v30 = vmax.f32 %v9340_v25, 0.0 }
 0x371   : > { %3247 = vst [vmem:[#allocation2 + $0x91] sm:$0xff] %v3215_v23  ;;  %3299 = vst [vmem:[#allocation2 + $0x168] sm:$0x1] %v3283_v46  ;;  %v3230_v56 = vmax.f32 %v9342_v62, 0.0  ;;  %v3231_v29 = vmax.f32 %v9344_v7, 0.0  ;;  %v3232_v42 = vmax.f32 %v9346_v63, 0.0  ;;  %v9391_v14 = vpack.c.bf16 %v3210_v59, %v3209_v50 }
 0x372   : > { %3248 = vst [vmem:[#allocation2 + $0x99] sm:$0xff] %v3216_v34  ;;  %3249 = vst [vmem:[#allocation2 + $0xa9] sm:$0xff] %v3217_v18  ;;  %v3233_v0 = vmax.f32 %v9348_v5, 0.0  ;;  %v3235_v31 = vmax.f32 %v9350_v10, 0.0  ;;  %v3236_v37 = vmax.f32 %v9352_v26, 0.0  ;;  %v9393_v11 = vpack.c.bf16 %v3212_v55, %v3211_v6  ;;  %v8470_v55 = vld [vmem:[%s10123_s2 + $0x8] sm:$0xff]  }
 0x373   : > { %3250 = vst [vmem:[#allocation2 + $0xb1] sm:$0xff] %v3218_v57  ;;  %3251 = vst [vmem:[#allocation2 + $0xc1] sm:$0xff] %v3219_v43  ;;  %v3269_v40 = vld [vmem:[#allocation2 + $0x28] sm:$0x1]  ;;  %v3301_v36 = vld [vmem:[#allocation2 + $0x19] sm:$0x1]  ;;  %v9397_v1 = vpack.c.bf16 %v3214_v27, %v3213_v44  ;;  %v9399_v45 = vpack.c.bf16 %v3216_v34, %v3215_v23  ;;  %v9401_v47 = vpack.c.bf16 %v3218_v57, %v3217_v18 }
 0x374   : > { %3252 = vst [vmem:[#allocation2 + $0xc9] sm:$0xff] %v3220_v41  ;;  %3253 = vst [vmem:[#allocation2 + $0xd9] sm:$0xff] %v3221_v4  ;;  %v3334_v60 = vld [vmem:[#allocation2 + $0x20] sm:$0xff]  ;;  %v9403_v49 = vpack.c.bf16 %v3220_v41, %v3219_v43  ;;  %v9405_v58 = vpack.c.bf16 %v3222_v24, %v3221_v4  ;;  %v9407_v32 = vpack.c.bf16 %v3224_v15, %v3223_v21  ;;  %v3302_v6 = vld [vmem:[#allocation2 + $0x31] sm:$0x1] }
 0x375   : > { %3254 = vst [vmem:[#allocation2 + $0xe1] sm:$0xff] %v3222_v24  ;;  %3255 = vst [vmem:[#allocation2 + $0xf1] sm:$0xff] %v3223_v21  ;;  %v9409_v12 = vpack.c.bf16 %v3226_v19, %v3225_v61  ;;  %v9411_v2 = vpack.c.bf16 %v3228_v13, %v3227_v8  ;;  %v3270_v53 = vld [vmem:[#allocation2 + $0x40] sm:$0x1]  ;;  %v3271_v22 = vld [vmem:[#allocation2 + $0x58] sm:$0x1]  ;;  %v9413_v35 = vpack.c.bf16 %v3230_v56, %v3229_v30 }
 0x376   : > { %3256 = vst [vmem:[#allocation2 + $0xf9] sm:$0xff] %v3224_v15  ;;  %3257 = vst [vmem:[#allocation2 + $0x109] sm:$0xff] %v3225_v61  ;;  %v9415_v38 = vpack.c.bf16 %v3232_v42, %v3231_v29  ;;  %v9419_v52 = vpack.c.bf16 %v3234_v3, %v3233_v0  ;;  %v3272_v39 = vld [vmem:[#allocation2 + $0x70] sm:$0x1]  ;;  %v3303_v44 = vld [vmem:[#allocation2 + $0x49] sm:$0x1] }
 0x377   : > { %3258 = vst [vmem:[#allocation2 + $0x111] sm:$0xff] %v3226_v19  ;;  %3259 = vst [vmem:[#allocation2 + $0x121] sm:$0xff] %v3227_v8  ;;  %v3273_v54 = vld [vmem:[#allocation2 + $0x88] sm:$0x1]  ;;  %v3304_v27 = vld [vmem:[#allocation2 + $0x61] sm:$0x1] }
 0x378   : > { %3260 = vst [vmem:[#allocation2 + $0x129] sm:$0xff] %v3228_v13  ;;  %3261 = vst [vmem:[#allocation2 + $0x139] sm:$0xff] %v3229_v30  ;;  %v3305_v23 = vld [vmem:[#allocation2 + $0x79] sm:$0x1]  ;;  %v3306_v34 = vld [vmem:[#allocation2 + $0x91] sm:$0x1] }
 0x379   : > { %3262 = vst [vmem:[#allocation2 + $0x141] sm:$0xff] %v3230_v56  ;;  %3263 = vst [vmem:[#allocation2 + $0x151] sm:$0xff] %v3231_v29  ;;  %v3274_v25 = vld [vmem:[#allocation2 + $0xa0] sm:$0x1]  ;;  %v3307_v18 = vld [vmem:[#allocation2 + $0xa9] sm:$0x1] }
 0x37a   : > { %3264 = vst [vmem:[#allocation2 + $0x159] sm:$0xff] %v3232_v42  ;;  %3265 = vst [vmem:[#allocation2 + $0x169] sm:$0xff] %v3233_v0  ;;  %v3275_v62 = vld [vmem:[#allocation2 + $0xb8] sm:$0x1]  ;;  %v8471_v57 = vld [vmem:[%s10123_s2 + $0x10] sm:$0xff]  }
 0x37b   : > { %3267 = vst [vmem:[#allocation2 + $0x181] sm:$0xff] %v3235_v31  ;;  %3268 = vst [vmem:[#allocation2 + $0x189] sm:$0xff] %v3236_v37  ;;  %v3276_v7 = vld [vmem:[#allocation2 + $0xd0] sm:$0x1]  ;;  %v3308_v43 = vld [vmem:[#allocation2 + $0xc1] sm:$0x1] }
 0x37c   : > { %3285 = vst [vmem:[#allocation2 + $0x18] sm:$0x1] %v3269_v40  ;;  %3317 = vst [vmem:[#allocation2 + $0x29] sm:$0x1] %v3301_v36  ;;  %v3277_v63 = vld [vmem:[#allocation2 + $0xe8] sm:$0x1] }
 0x37d   : > { %3337 = vst [vmem:[#allocation2 + $0x8] sm:$0xff] %v3334_v60  ;;  %3286 = vst [vmem:[#allocation2 + $0x30] sm:$0x1] %v3270_v53  ;;  %v3278_v5 = vld [vmem:[#allocation2 + $0x100] sm:$0x1]  ;;  %v8472_v24 = vld [vmem:[%s10123_s2 + $0x18] sm:$0xff]  }
 0x37e   : > { %3287 = vst [vmem:[#allocation2 + $0x48] sm:$0x1] %v3271_v22  ;;  %3288 = vst [vmem:[#allocation2 + $0x60] sm:$0x1] %v3272_v39  ;;  %v3279_v10 = vld [vmem:[#allocation2 + $0x118] sm:$0x1] }
 0x37f   : > { %3289 = vst [vmem:[#allocation2 + $0x78] sm:$0x1] %v3273_v54  ;;  %3290 = vst [vmem:[#allocation2 + $0x90] sm:$0x1] %v3274_v25  ;;  %v3280_v16 = vld [vmem:[#allocation2 + $0x130] sm:$0x1] }
 0x380   : > { %3291 = vst [vmem:[#allocation2 + $0xa8] sm:$0x1] %v3275_v62  ;;  %3292 = vst [vmem:[#allocation2 + $0xc0] sm:$0x1] %v3276_v7  ;;  %v3281_v51 = vld [vmem:[#allocation2 + $0x148] sm:$0x1] }
 0x381   : > { %3293 = vst [vmem:[#allocation2 + $0xd8] sm:$0x1] %v3277_v63  ;;  %3294 = vst [vmem:[#allocation2 + $0xf0] sm:$0x1] %v3278_v5  ;;  %v3282_v17 = vld [vmem:[#allocation2 + $0x160] sm:$0x1] }
 0x382   : > { %3295 = vst [vmem:[#allocation2 + $0x108] sm:$0x1] %v3279_v10  ;;  %3296 = vst [vmem:[#allocation2 + $0x120] sm:$0x1] %v3280_v16  ;;  %v3309_v46 = vld [vmem:[#allocation2 + $0xd9] sm:$0x1] }
 0x383   : > { %v3333_v3 = vld [vmem:[#allocation2 + $0x18] sm:$0xff]  ;;  %v3335_v26 = vld [vmem:[#allocation2 + $0x28] sm:$0x3]  ;;  %3297 = vst [vmem:[#allocation2 + $0x138] sm:$0x1] %v3281_v51  ;;  %v8473_v19 = vld [vmem:[%s10123_s2 + $0x20] sm:$0xff]  }
 0x384   : > { %3336 = vst [vmem:[#allocation2] sm:$0xff] %v3333_v3  ;;  %3338 = vst [vmem:[#allocation2 + $0x10] sm:$0x3] %v3335_v26  ;;  %v9421_v28 = vpack.c.bf16 %v3334_v60, %v3333_v3  ;;  %v3310_v41 = vld [vmem:[#allocation2 + $0xf1] sm:$0x1]  ;;  %v4227_v13 = vld [vmem:[#allocation2 + $0x188] sm:$0xff] }
 0x385   : > { %3298 = vst [vmem:[#allocation2 + $0x150] sm:$0x1] %v3282_v17  ;;  %3318 = vst [vmem:[#allocation2 + $0x41] sm:$0x1] %v3302_v6  ;;  %v3311_v4 = vld [vmem:[#allocation2 + $0x109] sm:$0x1] }
 0x386   : > { %3319 = vst [vmem:[#allocation2 + $0x59] sm:$0x1] %v3303_v44  ;;  %3320 = vst [vmem:[#allocation2 + $0x71] sm:$0x1] %v3304_v27  ;;  %v3313_v21 = vld [vmem:[#allocation2 + $0x139] sm:$0x1] }
 0x387   : > { %3321 = vst [vmem:[#allocation2 + $0x89] sm:$0x1] %v3305_v23  ;;  %3322 = vst [vmem:[#allocation2 + $0xa1] sm:$0x1] %v3306_v34  ;;  %v3314_v15 = vld [vmem:[#allocation2 + $0x151] sm:$0x1] }
 0x388   : > { %3323 = vst [vmem:[#allocation2 + $0xb9] sm:$0x1] %v3307_v18  ;;  %3324 = vst [vmem:[#allocation2 + $0xd1] sm:$0x1] %v3308_v43  ;;  %v3315_v61 = vld [vmem:[#allocation2 + $0x169] sm:$0x1] }
 0x389   : > { %3325 = vst [vmem:[#allocation2 + $0xe9] sm:$0x1] %v3309_v46  ;;  %3326 = vst [vmem:[#allocation2 + $0x101] sm:$0x1] %v3310_v41  ;;  %v3284_v8 = vld [vmem:[#allocation2 + $0x190] sm:$0x1] }
 0x38a   : > { %3327 = vst [vmem:[#allocation2 + $0x119] sm:$0x1] %v3311_v4  ;;  %3329 = vst [vmem:[#allocation2 + $0x149] sm:$0x1] %v3313_v21  ;;  %v8474_v30 = vld [vmem:[%s10123_s2 + $0x28] sm:$0xff]   ;;  %v8475_v56 = vld [vmem:[%s10123_s2 + $0x30] sm:$0xff]  }
 0x38b   : > { %v3409_v48 = vld [vmem:[#allocation2 + $0x1] sm:$0xff]  ;;  %v3410_v50 = vld [vmem:[#allocation2 + $0x9] sm:$0xff]  ;;  %3330 = vst [vmem:[#allocation2 + $0x161] sm:$0x1] %v3314_v15  ;;  %3331 = vst [vmem:[#allocation2 + $0x179] sm:$0x1] %v3315_v61 }
 0x38c   : > { %v3441_v59 = vpack.c.bf16 %v3410_v50, %v3409_v48  ;;  %3300 = vst [vmem:[#allocation2 + $0x180] sm:$0x1] %v3284_v8  ;;  %3343 = vst [vmem:[#allocation2 + $0x1a0] sm:$0xff] %v4227_v13  ;;  %v8476_v0 = vld [vmem:[%s10123_s2 + $0x38] sm:$0xff]   ;;  %v3316_v31 = vld [vmem:[#allocation2 + $0x181] sm:$0x1] }
 0x38d   : > { %3332 = vst [vmem:[#allocation2 + $0x191] sm:$0x1] %v3316_v31  ;;  %v8477_v37 = vld [vmem:[%s10123_s2 + $0x80] sm:$0xff]   ;;  %v8479_v36 = vld [vmem:[%s10123_s2 + $0x90] sm:$0xff]   ;;  %v3351_v60 = vld [vmem:[#allocation2 + $0x48] sm:$0xff] }
 0x38e   : > { %7437 = vmatprep.mubr.bf16.mxu1 %v3441_v59  ;;  %v3357_v53 = vld [vmem:[#allocation2 + $0x90] sm:$0xff]  ;;  %v3356_v22 = vld [vmem:[#allocation2 + $0x80] sm:$0xff]  ;;  %v3359_v25 = vld [vmem:[#allocation2 + $0xa8] sm:$0xff] }
 0x38f   : > { %7438 = vmatmul.mubr.bf16.vlgmr.msra.gmra.mrb[0].mxu1 %v9387_v9  ;;  %v8483_v54 = vld [vmem:[%s10123_s2 + $0xb0] sm:$0xff]   ;;  %v3361_v62 = vld [vmem:[#allocation2 + $0xc0] sm:$0xff]  ;;  %v3362_v5 = vld [vmem:[#allocation2 + $0xc8] sm:$0xff] }
 0x390   : > { %7470 = vmatpush3.bf16.msra.mxu1 %v9073_v20  ;;  %7441 = vmatprep.mubr.bf16.mxu1 %v9389_v33  ;;  %v3312_v20 = vld [vmem:[#allocation2 + $0x121] sm:$0x1]  ;;  %v3349_v33 = vld [vmem:[#allocation2 + $0x30] sm:$0xff]  ;;  %v8484_v10 = vld [vmem:[%s10123_s2 + $0xb8] sm:$0xff]   ;;  %v9505_v16 = vpack.c.bf16 %v3362_v5, %v3361_v62 }
 0x391   : > { %7471 = vmatprep.subr.bf16.mxu1 %v8470_v55  ;;  %3328 = vst [vmem:[#allocation2 + $0x131] sm:$0x1] %v3312_v20  ;;  %v3360_v7 = vld [vmem:[#allocation2 + $0xb0] sm:$0xff]  ;;  %v8485_v3 = vld [vmem:[%s10123_s2 + $0xc0] sm:$0xff]   ;;  %v3363_v26 = vld [vmem:[#allocation2 + $0xd8] sm:$0xff] }
 0x392   : > { %v9500_v63 = vpack.c.bf16 %v3360_v7, %v3359_v25  ;;  %v3365_v51 = vld [vmem:[#allocation2 + $0xf0] sm:$0xff]  ;;  %v3364_v17 = vld [vmem:[#allocation2 + $0xe0] sm:$0xff]  ;;  %v3366_v50 = vld [vmem:[#allocation2 + $0xf8] sm:$0xff] }
 0x393   : > { %v4226_v29 = vld [vmem:[#allocation2 + $0x180] sm:$0xff]  ;;  %v9512_v48 = vpack.c.bf16 %v3364_v17, %v3363_v26  ;;  %v9514_v59 = vpack.c.bf16 %v3366_v50, %v3365_v51  ;;  %v3367_v6 = vld [vmem:[#allocation2 + $0x108] sm:$0xff]  ;;  %v3368_v44 = vld [vmem:[#allocation2 + $0x110] sm:$0xff] }
 0x394   : > { %7472 = vmatpush3.bf16.msra.mxu1 %v8470_v55  ;;  %v9448_v42 = vpack.c.bf16 %v4227_v13, %v4226_v29  ;;  %3342 = vst [vmem:[#allocation2 + $0x198] sm:$0xff] %v4226_v29  ;;  %v3341_v9 = vld [vmem:[#allocation2 + $0x190] sm:$0x3]  ;;  %v3369_v55 = vld [vmem:[#allocation2 + $0x120] sm:$0xff]  ;;  %v9518_v27 = vpack.c.bf16 %v3368_v44, %v3367_v6  ;;  %v3370_v23 = vld [vmem:[#allocation2 + $0x128] sm:$0xff] }
 0x395   : > { %7473 = vmatprep.subr.bf16.mxu1 %v8471_v57  ;;  %3344 = vst [vmem:[#allocation2 + $0x1a8] sm:$0x3] %v3341_v9  ;;  %v9520_v34 = vpack.c.bf16 %v3370_v23, %v3369_v55  ;;  %v3371_v18 = vld [vmem:[#allocation2 + $0x138] sm:$0xff]  ;;  %v3372_v43 = vld [vmem:[#allocation2 + $0x140] sm:$0xff]  ;;  %v3375_v20 = vld [vmem:[#allocation2 + $0x168] sm:$0xff] }
 0x396   : > { %v9524_v46 = vpack.c.bf16 %v3372_v43, %v3371_v18  ;;  %v3374_v41 = vld [vmem:[#allocation2 + $0x158] sm:$0xff]  ;;  %v3892_v21 = vld [vmem:[#allocation2 + $0xa] sm:$0xff]  ;;  %v3894_v8 = vld [vmem:[#allocation2 + $0x22] sm:$0xff] }
 0x397   : > { %7442 = vmatmul.mubr.bf16.gmra.mrb[4].mxu1 %v9391_v14  ;;  %v3350_v14 = vld [vmem:[#allocation2 + $0x38] sm:$0xff]  ;;  %v3376_v15 = vld [vmem:[#allocation2 + $0x170] sm:$0xff]  ;;  %v3907_v5 = vld [vmem:[#allocation2 + $0xc2] sm:$0xff] }
 0x398   : > { %7445 = vmatprep.mubr.bf16.mxu1 %v9393_v11  ;;  %7474 = vmatpush3.bf16.msra.mxu1 %v8471_v57  ;;  %v8478_v11 = vld [vmem:[%s10123_s2 + $0x88] sm:$0xff]   ;;  %v9469_v40 = vpack.c.bf16 %v3350_v14, %v3349_v33  ;;  %v3373_v57 = vld [vmem:[#allocation2 + $0x150] sm:$0xff]  ;;  %v9530_v61 = vpack.c.bf16 %v3376_v15, %v3375_v20  ;;  %v3896_v13 = vld [vmem:[#allocation2 + $0x3a] sm:$0xff] }
 0x399   : > { %7475 = vmatprep.subr.bf16.mxu1 %v8472_v24  ;;  %v9526_v4 = vpack.c.bf16 %v3374_v41, %v3373_v57  ;;  %v3895_v29 = vld [vmem:[#allocation2 + $0x32] sm:$0xff]  ;;  %v3900_v33 = vld [vmem:[#allocation2 + $0x6a] sm:$0xff]  ;;  %v8493_v26 = vld [vmem:[%s10123_s2 + $0x100] sm:$0xff]  }
 0x39a   : > { %v9538_v31 = vpack.c.bf16 %v3896_v13, %v3895_v29  ;;  %v3898_v9 = vld [vmem:[#allocation2 + $0x52] sm:$0xff]  ;;  %v3897_v14 = vld [vmem:[#allocation2 + $0x4a] sm:$0xff]  ;;  %v3910_v51 = vld [vmem:[#allocation2 + $0xe2] sm:$0xff] }
 0x39b   : > { %v3908_v25 = vld [vmem:[#allocation2 + $0xca] sm:$0xff]  ;;  %v3912_v17 = vld [vmem:[#allocation2 + $0xfa] sm:$0xff]  ;;  %v3911_v55 = vld [vmem:[#allocation2 + $0xf2] sm:$0xff] }
 0x39c   : > { %7476 = vmatpush3.bf16.msra.mxu1 %v8472_v24  ;;  %v3891_v24 = vld [vmem:[#allocation2 + $0x2] sm:$0xff]  ;;  %v3905_v62 = vld [vmem:[#allocation2 + $0xaa] sm:$0xff]  ;;  %v3909_v50 = vld [vmem:[#allocation2 + $0xda] sm:$0xff]  ;;  %v9583_v44 = vpack.c.bf16 %v3912_v17, %v3911_v55 }
 0x39d   : > { %7477 = vmatprep.subr.bf16.mxu1 %v8473_v19  ;;  %v9581_v6 = vpack.c.bf16 %v3910_v51, %v3909_v50  ;;  %v3914_v23 = vld [vmem:[#allocation2 + $0x112] sm:$0xff]  ;;  %v3916_v18 = vld [vmem:[#allocation2 + $0x12a] sm:$0xff]  ;;  %v3915_v41 = vld [vmem:[#allocation2 + $0x122] sm:$0xff] }
 0x39e   : > { %v3913_v57 = vld [vmem:[#allocation2 + $0x10a] sm:$0xff]  ;;  %v9589_v20 = vpack.c.bf16 %v3916_v18, %v3915_v41  ;;  %v3917_v15 = vld [vmem:[#allocation2 + $0x13a] sm:$0xff] }
 0x39f   : > { %7446 = vmatmul.mubr.bf16.gmra.mrb[8].mxu1 %v9397_v1  ;;  %v3353_v1 = vld [vmem:[#allocation2 + $0x60] sm:$0xff]  ;;  %v9587_v43 = vpack.c.bf16 %v3914_v23, %v3913_v57  ;;  %v3921_v29 = vld [vmem:[#allocation2 + $0x16a] sm:$0xff]  ;;  %v8508_v57 = vld [vmem:[%s10123_s2 + $0x178] sm:$0xff]  }
 0x3a0   : > { %7449 = vmatprep.mubr.bf16.mxu1 %v9399_v45  ;;  %7478 = vmatpush3.bf16.msra.mxu1 %v8473_v19  ;;  %v3352_v45 = vld [vmem:[#allocation2 + $0x50] sm:$0xff]  ;;  %v3923_v19 = vpack.c.bf16 %v3892_v21, %v3891_v24  ;;  %v3918_v24 = vld [vmem:[#allocation2 + $0x142] sm:$0xff]  ;;  %v3920_v21 = vld [vmem:[#allocation2 + $0x15a] sm:$0xff] }
 0x3a1   : > { %7479 = vmatprep.subr.bf16.mxu1 %v8474_v30  ;;  %v8507_v51 = vld [vmem:[%s10123_s2 + $0x170] sm:$0xff]   ;;  %v4515_v17 = vld [vmem:[#allocation2 + $0xc1] sm:$0xff]  ;;  %v4517_v55 = vld [vmem:[#allocation2 + $0xd9] sm:$0xff] }
 0x3a2   : > { %v4516_v50 = vld [vmem:[#allocation2 + $0xc9] sm:$0xff]  ;;  %v4518_v23 = vld [vmem:[#allocation2 + $0xe1] sm:$0xff] }
 0x3a3   : > { %v9678_v18 = vpack.c.bf16 %v4516_v50, %v4515_v17  ;;  %v9683_v41 = vpack.c.bf16 %v4518_v23, %v4517_v55  ;;  %v8521_v50 = vld [vmem:[%s10123_s2 + $0x1e0] sm:$0xff]   ;;  %v5121_v55 = vld [vmem:[#allocation2 + $0xa8] sm:$0xff] }
 0x3a4   : > { %7480 = vmatpush3.bf16.msra.mxu1 %v8474_v30  ;;  %v3893_v30 = vld [vmem:[#allocation2 + $0x1a] sm:$0xff] }
 0x3a5   : > { %7481 = vmatprep.subr.bf16.mxu1 %v8475_v56  ;;  %v5123_v23 = vld [vmem:[#allocation2 + $0xc0] sm:$0xff] }
 0x3a7   : > { %7450 = vmatmul.mubr.bf16.gmra.mrb[12].mxu1 %v9401_v47  ;;  %v9476_v47 = vpack.c.bf16 %v3352_v45, %v3351_v60  ;;  %v8488_v60 = vld [vmem:[%s10123_s2 + $0xd8] sm:$0xff]   ;;  %v8489_v45 = vld [vmem:[%s10123_s2 + $0xe0] sm:$0xff]  }
 0x3a8   : > { %7453 = vmatprep.mubr.bf16.mxu1 %v9403_v49  ;;  %7482 = vmatpush3.bf16.msra.mxu1 %v8475_v56  ;;  %v3354_v49 = vld [vmem:[#allocation2 + $0x68] sm:$0xff]  ;;  %v9533_v56 = vpack.c.bf16 %v3894_v8, %v3893_v30  ;;  %v3919_v8 = vld [vmem:[#allocation2 + $0x152] sm:$0xff] }
 0x3a9   : > { %7483 = vmatprep.subr.bf16.mxu1 %v8476_v0  ;;  %v9595_v13 = vpack.c.bf16 %v3920_v21, %v3919_v8  ;;  %v3922_v30 = vld [vmem:[#allocation2 + $0x172] sm:$0xff]  ;;  %v4521_v8 = vld [vmem:[#allocation2 + $0x109] sm:$0xff] }
 0x3aa   : > { %v4519_v21 = vld [vmem:[#allocation2 + $0xf1] sm:$0xff] }
 0x3ac   : > { %7484 = vmatpush3.bf16.msra.mxu1 %v8476_v0  ;;  %v8486_v0 = vld [vmem:[%s10123_s2 + $0xc8] sm:$0xff]  }
 0x3ad   : > { %7517 = vmatprep.subr.bf16.mxu1 %v8477_v37 }
 0x3af   : > { %7454 = vmatmul.mubr.bf16.gmra.mrb[16].mxu1 %v9405_v58  ;;  %v8480_v58 = vld [vmem:[%s10123_s2 + $0x98] sm:$0xff]  }
 0x3b0   : > { %7457 = vmatprep.mubr.bf16.mxu1 %v9407_v32  ;;  %v9481_v32 = vpack.c.bf16 %v3354_v49, %v3353_v1  ;;  %v3902_v49 = vld [vmem:[#allocation2 + $0x82] sm:$0xff] }
 0x3b7   : > { %7458 = vmatmul.mubr.bf16.gmra.mrb[20].mxu1 %v9409_v12  ;;  %v8481_v12 = vld [vmem:[%s10123_s2 + $0xa0] sm:$0xff]  }
 0x3b8   : > { %7461 = vmatprep.mubr.bf16.mxu1 %v9411_v2  ;;  %v3355_v2 = vld [vmem:[#allocation2 + $0x78] sm:$0xff] }
 0x3bf   : > { %7462 = vmatmul.mubr.bf16.gmra.mrb[24].mxu1 %v9413_v35  ;;  %v9488_v35 = vpack.c.bf16 %v3356_v22, %v3355_v2  ;;  %v8490_v22 = vld [vmem:[%s10123_s2 + $0xe8] sm:$0xff]  }
 0x3c0   : > { %7465 = vmatprep.mubr.bf16.mxu1 %v9415_v38  ;;  %v3358_v38 = vld [vmem:[#allocation2 + $0x98] sm:$0xff] }
 0x3c1   : > { %v9493_v39 = vpack.c.bf16 %v3358_v38, %v3357_v53  ;;  %v3903_v53 = vld [vmem:[#allocation2 + $0x92] sm:$0xff] }
 0x3c7   : > { %7466 = vmatmul.mubr.bf16.gmra.mrb[28].mxu1 %v9419_v52  ;;  %v8482_v52 = vld [vmem:[%s10123_s2 + $0xa8] sm:$0xff]  }
 0x3c8   : > { %7485 = vmatprep.mubr.bf16.mxu1 %v9421_v28 }
 0x3cf   : > { %7486 = vmatmul.mubr.bf16.vlgmr.msra.gmra.mrb[0].mxu1 %v9421_v28 }
 0x3d0   : > { %7518 = vmatpush3.bf16.msra.mxu1 %v8477_v37  ;;  %7489 = vmatprep.mubr.bf16.mxu1 %v9469_v40  ;;  %v8487_v37 = vld [vmem:[%s10123_s2 + $0xd0] sm:$0xff]  }
 0x3d1   : > { %7519 = vmatprep.subr.bf16.mxu1 %v8478_v11 }
 0x3d4   : > { %7520 = vmatpush3.bf16.msra.mxu1 %v8478_v11  ;;  %v9545_v11 = vpack.c.bf16 %v3898_v9, %v3897_v14  ;;  %v8495_v9 = vld [vmem:[%s10123_s2 + $0x110] sm:$0xff]   ;;  %v4504_v14 = vld [vmem:[#allocation2 + $0x39] sm:$0xff] }
 0x3d5   : > { %7521 = vmatprep.subr.bf16.mxu1 %v8479_v36 }
 0x3d7   : > { %7490 = vmatmul.mubr.bf16.gmra.mrb[4].mxu1 %v9476_v47 }
 0x3d8   : > { %7493 = vmatprep.mubr.bf16.mxu1 %v9481_v32  ;;  %7522 = vmatpush3.bf16.msra.mxu1 %v8479_v36  ;;  %v3899_v36 = vld [vmem:[#allocation2 + $0x62] sm:$0xff] }
 0x3d9   : > { %7523 = vmatprep.subr.bf16.mxu1 %v8480_v58  ;;  %v9550_v1 = vpack.c.bf16 %v3900_v33, %v3899_v36  ;;  %v4503_v33 = vld [vmem:[#allocation2 + $0x31] sm:$0xff]  ;;  %v4505_v36 = vld [vmem:[#allocation2 + $0x49] sm:$0xff] }
 0x3dc   : > { %7524 = vmatpush3.bf16.msra.mxu1 %v8480_v58  ;;  %v3904_v58 = vld [vmem:[#allocation2 + $0x9a] sm:$0xff] }
 0x3dd   : > { %7525 = vmatprep.subr.bf16.mxu1 %v8481_v12  ;;  %v9562_v38 = vpack.c.bf16 %v3904_v58, %v3903_v53 }
 0x3df   : > { %7494 = vmatmul.mubr.bf16.gmra.mrb[8].mxu1 %v9488_v35 }
 0x3e0   : > { %7497 = vmatprep.mubr.bf16.mxu1 %v9493_v39  ;;  %7526 = vmatpush3.bf16.msra.mxu1 %v8481_v12  ;;  %v3901_v12 = vld [vmem:[#allocation2 + $0x7a] sm:$0xff] }
 0x3e1   : > { %7527 = vmatprep.subr.bf16.mxu1 %v8482_v52  ;;  %v9557_v2 = vpack.c.bf16 %v3902_v49, %v3901_v12  ;;  %v4510_v49 = vld [vmem:[#allocation2 + $0x81] sm:$0xff]  ;;  %v8504_v12 = vld [vmem:[%s10123_s2 + $0x158] sm:$0xff]  }
 0x3e4   : > { %7528 = vmatpush3.bf16.msra.mxu1 %v8482_v52  ;;  %v8491_v52 = vld [vmem:[%s10123_s2 + $0xf0] sm:$0xff]  }
 0x3e5   : > { %7529 = vmatprep.subr.bf16.mxu1 %v8483_v54 }
 0x3e7   : > { %7498 = vmatmul.mubr.bf16.gmra.mrb[12].mxu1 %v9500_v63 }
 0x3e8   : > { %7501 = vmatprep.mubr.bf16.mxu1 %v9505_v16  ;;  %7530 = vmatpush3.bf16.msra.mxu1 %v8483_v54  ;;  %v3906_v54 = vld [vmem:[#allocation2 + $0xb2] sm:$0xff] }
 0x3e9   : > { %7531 = vmatprep.subr.bf16.mxu1 %v8484_v10  ;;  %v9569_v7 = vpack.c.bf16 %v3906_v54, %v3905_v62  ;;  %v4512_v54 = vld [vmem:[#allocation2 + $0x99] sm:$0xff]  ;;  %v4514_v62 = vld [vmem:[#allocation2 + $0xb1] sm:$0xff] }
 0x3ec   : > { %7532 = vmatpush3.bf16.msra.mxu1 %v8484_v10  ;;  %v8492_v10 = vld [vmem:[%s10123_s2 + $0xf8] sm:$0xff]  }
 0x3ed   : > { %7565 = vmatprep.subr.bf16.mxu1 %v8485_v3 }
 0x3ef   : > { %7502 = vmatmul.mubr.bf16.gmra.mrb[16].mxu1 %v9512_v48 }
 0x3f0   : > { %7505 = vmatprep.mubr.bf16.mxu1 %v9514_v59 }
 0x3f7   : > { %7506 = vmatmul.mubr.bf16.gmra.mrb[20].mxu1 %v9518_v27 }
 0x3f8   : > { %7509 = vmatprep.mubr.bf16.mxu1 %v9520_v34 }
 0x3ff   : > { %7510 = vmatmul.mubr.bf16.gmra.mrb[24].mxu1 %v9524_v46 }
 0x400   : > { %7513 = vmatprep.mubr.bf16.mxu1 %v9526_v4 }
 0x407   : > { %7514 = vmatmul.mubr.bf16.gmra.mrb[28].mxu1 %v9530_v61 }
 0x408   : > { %7533 = vmatprep.mubr.bf16.mxu1 %v3923_v19  ;;  %v9593_v19 = vpack.c.bf16 %v3918_v24, %v3917_v15  ;;  %v8509_v24 = vld [vmem:[%s10123_s2 + $0x180] sm:$0xff]  }
 0x409   : > { %v4520_v15 = vld [vmem:[#allocation2 + $0xf9] sm:$0xff] }
 0x40f   : > { %7534 = vmatmul.mubr.bf16.vlgmr.msra.gmra.mrb[0].mxu1 %v9533_v56 }
 0x410   : > { %7566 = vmatpush3.bf16.msra.mxu1 %v8485_v3  ;;  %7537 = vmatprep.mubr.bf16.mxu1 %v9538_v31  ;;  %v9574_v3 = vpack.c.bf16 %v3908_v25, %v3907_v5  ;;  %v4513_v25 = vld [vmem:[#allocation2 + $0xa9] sm:$0xff] }
 0x411   : > { %7567 = vmatprep.subr.bf16.mxu1 %v8486_v0 }
 0x414   : > { %7568 = vmatpush3.bf16.msra.mxu1 %v8486_v0  ;;  %v9599_v0 = vpack.c.bf16 %v3922_v30, %v3921_v29  ;;  %v4522_v30 = vld [vmem:[#allocation2 + $0x111] sm:$0xff]  ;;  %v9690_v29 = vpack.c.bf16 %v4520_v15, %v4519_v21  ;;  %v5124_v21 = vld [vmem:[#allocation2 + $0xc8] sm:$0xff] }
 0x415   : > { %7569 = vmatprep.subr.bf16.mxu1 %v8487_v37  ;;  %v8522_v15 = vld [vmem:[%s10123_s2 + $0x1e8] sm:$0xff]  }
 0x417   : > { %7538 = vmatmul.mubr.bf16.gmra.mrb[4].mxu1 %v9545_v11 }
 0x418   : > { %7541 = vmatprep.mubr.bf16.mxu1 %v9550_v1  ;;  %7570 = vmatpush3.bf16.msra.mxu1 %v8487_v37  ;;  %v8494_v37 = vld [vmem:[%s10123_s2 + $0x108] sm:$0xff]  }
 0x419   : > { %7571 = vmatprep.subr.bf16.mxu1 %v8488_v60 }
 0x41c   : > { %7572 = vmatpush3.bf16.msra.mxu1 %v8488_v60  ;;  %v9642_v60 = vpack.c.bf16 %v4504_v14, %v4503_v33 }
 0x41d   : > { %7573 = vmatprep.subr.bf16.mxu1 %v8489_v45 }
 0x41f   : > { %7542 = vmatmul.mubr.bf16.gmra.mrb[8].mxu1 %v9557_v2 }
 0x420   : > { %7545 = vmatprep.mubr.bf16.mxu1 %v9562_v38  ;;  %7574 = vmatpush3.bf16.msra.mxu1 %v8489_v45  ;;  %v4509_v45 = vld [vmem:[#allocation2 + $0x79] sm:$0xff] }
 0x421   : > { %7575 = vmatprep.subr.bf16.mxu1 %v8490_v22  ;;  %v9659_v53 = vpack.c.bf16 %v4510_v49, %v4509_v45  ;;  %v5112_v45 = vld [vmem:[#allocation2 + $0x38] sm:$0xff] }
 0x424   : > { %7576 = vmatpush3.bf16.msra.mxu1 %v8490_v22  ;;  %v8505_v22 = vld [vmem:[%s10123_s2 + $0x160] sm:$0xff]  }
 0x425   : > { %7577 = vmatprep.subr.bf16.mxu1 %v8491_v52 }
 0x427   : > { %7546 = vmatmul.mubr.bf16.gmra.mrb[12].mxu1 %v9569_v7 }
 0x428   : > { %7549 = vmatprep.mubr.bf16.mxu1 %v9574_v3  ;;  %7578 = vmatpush3.bf16.msra.mxu1 %v8491_v52  ;;  %v4511_v52 = vld [vmem:[#allocation2 + $0x91] sm:$0xff] }
 0x429   : > { %7579 = vmatprep.subr.bf16.mxu1 %v8492_v10  ;;  %v9666_v5 = vpack.c.bf16 %v4512_v54, %v4511_v52  ;;  %v5117_v52 = vld [vmem:[#allocation2 + $0x78] sm:$0xff]  ;;  %v5119_v54 = vld [vmem:[#allocation2 + $0x90] sm:$0xff] }
 0x42c   : > { %7580 = vmatpush3.bf16.msra.mxu1 %v8492_v10  ;;  %v8506_v10 = vld [vmem:[%s10123_s2 + $0x168] sm:$0xff]  }
 0x42d   : > { %7613 = vmatprep.subr.bf16.mxu1 %v8493_v26 }
 0x42f   : > { %7550 = vmatmul.mubr.bf16.gmra.mrb[16].mxu1 %v9581_v6 }
 0x430   : > { %7553 = vmatprep.mubr.bf16.mxu1 %v9583_v44 }
 0x437   : > { %7554 = vmatmul.mubr.bf16.gmra.mrb[20].mxu1 %v9587_v43 }
 0x438   : > { %7557 = vmatprep.mubr.bf16.mxu1 %v9589_v20 }
 0x43f   : > { %7558 = vmatmul.mubr.bf16.gmra.mrb[24].mxu1 %v9593_v19 }
 0x440   : > { %7561 = vmatprep.mubr.bf16.mxu1 %v9595_v13 }
 0x447   : > { %7562 = vmatmul.mubr.bf16.gmra.mrb[28].mxu1 %v9599_v0 }
 0x448   : > { %7581 = vmatprep.mubr.bf16.mxu1 %v9421_v28  ;;  %v8496_v28 = vld [vmem:[%s10123_s2 + $0x118] sm:$0xff]  }
 0x44f   : > { %7582 = vmatmul.mubr.bf16.vlgmr.msra.gmra.mrb[0].mxu1 %v9469_v40  ;;  %v8497_v40 = vld [vmem:[%s10123_s2 + $0x120] sm:$0xff]  }
 0x450   : > { %7614 = vmatpush3.bf16.msra.mxu1 %v8493_v26  ;;  %7585 = vmatprep.mubr.bf16.mxu1 %v9476_v47  ;;  %v8498_v47 = vld [vmem:[%s10123_s2 + $0x128] sm:$0xff]   ;;  %v9671_v26 = vpack.c.bf16 %v4514_v62, %v4513_v25  ;;  %v5118_v25 = vld [vmem:[#allocation2 + $0x80] sm:$0xff] }
 0x451   : > { %7615 = vmatprep.subr.bf16.mxu1 %v8494_v37  ;;  %v5146_v62 = vpack.c.bf16 %v5118_v25, %v5117_v52  ;;  %v5734_v25 = vld [vmem:[#allocation2 + $0xca] sm:$0xff] }
 0x454   : > { %7616 = vmatpush3.bf16.msra.mxu1 %v8494_v37  ;;  %v9692_v37 = vpack.c.bf16 %v4522_v30, %v4521_v8  ;;  %v5149_v8 = vpack.c.bf16 %v5124_v21, %v5123_v23  ;;  %v8523_v30 = vld [vmem:[%s10123_s2 + $0x1f0] sm:$0xff]   ;;  %v5735_v23 = vld [vmem:[#allocation2 + $0xda] sm:$0xff] }
 0x455   : > { %7617 = vmatprep.subr.bf16.mxu1 %v8495_v9 }
 0x457   : > { %7586 = vmatmul.mubr.bf16.gmra.mrb[4].mxu1 %v9481_v32  ;;  %v8499_v32 = vld [vmem:[%s10123_s2 + $0x130] sm:$0xff]  }
 0x458   : > { %7589 = vmatprep.mubr.bf16.mxu1 %v9488_v35  ;;  %7618 = vmatpush3.bf16.msra.mxu1 %v8495_v9  ;;  %v8500_v35 = vld [vmem:[%s10123_s2 + $0x138] sm:$0xff]   ;;  %v4523_v9 = vld [vmem:[#allocation2 + $0x121] sm:$0xff] }
 0x459   : > { %7619 = vmatprep.subr.bf16.mxu1 %v8496_v28 }
 0x45c   : > { %7620 = vmatpush3.bf16.msra.mxu1 %v8496_v28  ;;  %v4524_v28 = vld [vmem:[#allocation2 + $0x129] sm:$0xff] }
 0x45d   : > { %7621 = vmatprep.subr.bf16.mxu1 %v8497_v40 }
 0x45f   : > { %7590 = vmatmul.mubr.bf16.gmra.mrb[8].mxu1 %v9493_v39  ;;  %v8501_v39 = vld [vmem:[%s10123_s2 + $0x140] sm:$0xff]  }
 0x460   : > { %7593 = vmatprep.mubr.bf16.mxu1 %v9500_v63  ;;  %7622 = vmatpush3.bf16.msra.mxu1 %v8497_v40  ;;  %v4501_v63 = vld [vmem:[#allocation2 + $0x19] sm:$0xff] }
 0x461   : > { %7623 = vmatprep.subr.bf16.mxu1 %v8498_v47  ;;  %v4525_v40 = vld [vmem:[#allocation2 + $0x139] sm:$0xff] }
 0x464   : > { %7624 = vmatpush3.bf16.msra.mxu1 %v8498_v47  ;;  %v4526_v47 = vld [vmem:[#allocation2 + $0x141] sm:$0xff] }
 0x465   : > { %7625 = vmatprep.subr.bf16.mxu1 %v8499_v32 }
 0x467   : > { %7594 = vmatmul.mubr.bf16.gmra.mrb[12].mxu1 %v9505_v16  ;;  %v4502_v16 = vld [vmem:[#allocation2 + $0x21] sm:$0xff] }
 0x468   : > { %7597 = vmatprep.mubr.bf16.mxu1 %v9512_v48  ;;  %7626 = vmatpush3.bf16.msra.mxu1 %v8499_v32  ;;  %v4533_v48 = vpack.c.bf16 %v4502_v16, %v4501_v63  ;;  %v9696_v32 = vpack.c.bf16 %v4524_v28, %v4523_v9  ;;  %v4528_v63 = vld [vmem:[#allocation2 + $0x159] sm:$0xff]  ;;  %v4529_v16 = vld [vmem:[#allocation2 + $0x169] sm:$0xff] }
 0x469   : > { %7627 = vmatprep.subr.bf16.mxu1 %v8500_v35  ;;  %v5125_v9 = vld [vmem:[#allocation2 + $0xd8] sm:$0xff]  ;;  %v5127_v28 = vld [vmem:[#allocation2 + $0xf0] sm:$0xff] }
 0x46c   : > { %7628 = vmatpush3.bf16.msra.mxu1 %v8500_v35  ;;  %v9698_v35 = vpack.c.bf16 %v4526_v47, %v4525_v40  ;;  %v5126_v40 = vld [vmem:[#allocation2 + $0xe0] sm:$0xff] }
 0x46d   : > { %7661 = vmatprep.subr.bf16.mxu1 %v8501_v39  ;;  %v5150_v47 = vpack.c.bf16 %v5126_v40, %v5125_v9 }
 0x46f   : > { %7598 = vmatmul.mubr.bf16.gmra.mrb[16].mxu1 %v9514_v59  ;;  %v4506_v59 = vld [vmem:[#allocation2 + $0x51] sm:$0xff] }
 0x470   : > { %7601 = vmatprep.mubr.bf16.mxu1 %v9518_v27  ;;  %v8502_v27 = vld [vmem:[%s10123_s2 + $0x148] sm:$0xff]  }
 0x477   : > { %7602 = vmatmul.mubr.bf16.gmra.mrb[20].mxu1 %v9520_v34  ;;  %v9647_v34 = vpack.c.bf16 %v4506_v59, %v4505_v36  ;;  %v4531_v36 = vld [vmem:[#allocation2 + $0x181] sm:$0xff]  ;;  %v4532_v59 = vld [vmem:[#allocation2 + $0x189] sm:$0xff] }
 0x478   : > { %7605 = vmatprep.mubr.bf16.mxu1 %v9524_v46  ;;  %v8503_v46 = vld [vmem:[%s10123_s2 + $0x150] sm:$0xff]  }
 0x47f   : > { %7606 = vmatmul.mubr.bf16.gmra.mrb[24].mxu1 %v9526_v4  ;;  %v4507_v4 = vld [vmem:[#allocation2 + $0x61] sm:$0xff] }
 0x480   : > { %7609 = vmatprep.mubr.bf16.mxu1 %v9530_v61  ;;  %v4508_v61 = vld [vmem:[#allocation2 + $0x69] sm:$0xff] }
 0x481   : > { %v9654_v58 = vpack.c.bf16 %v4508_v61, %v4507_v4  ;;  %v8511_v4 = vld [vmem:[%s10123_s2 + $0x190] sm:$0xff]  }
 0x487   : > { %7610 = vmatmul.mubr.bf16.gmra.mrb[28].mxu1 %v9448_v42 }
 0x488   : > { %7629 = vmatprep.mubr.bf16.mxu1 %v4533_v48  ;;  %v4530_v48 = vld [vmem:[#allocation2 + $0x171] sm:$0xff] }
 0x489   : > { %v9704_v14 = vpack.c.bf16 %v4530_v48, %v4529_v16  ;;  %v8525_v48 = vld [vmem:[%s10123_s2 + $0x200] sm:$0xff]  }
 0x48f   : > { %7630 = vmatmul.mubr.bf16.vlgmr.msra.gmra.mrb[0].mxu1 %v9642_v60 }
 0x490   : > { %7662 = vmatpush3.bf16.msra.mxu1 %v8501_v39  ;;  %7633 = vmatprep.mubr.bf16.mxu1 %v9647_v34  ;;  %v4527_v39 = vld [vmem:[#allocation2 + $0x151] sm:$0xff] }
 0x491   : > { %7663 = vmatprep.subr.bf16.mxu1 %v8502_v27  ;;  %v9702_v33 = vpack.c.bf16 %v4528_v63, %v4527_v39  ;;  %v5128_v39 = vld [vmem:[#allocation2 + $0xf8] sm:$0xff] }
 0x492   : > { %v8524_v63 = vld [vmem:[%s10123_s2 + $0x1f8] sm:$0xff]   ;;  %v5151_v16 = vpack.c.bf16 %v5128_v39, %v5127_v28  ;;  %v5741_v28 = vld [vmem:[#allocation2 + $0x122] sm:$0xff] }
 0x493   : > { %v5746_v39 = vld [vmem:[#allocation2 + $0x15a] sm:$0xff] }
 0x494   : > { %7664 = vmatpush3.bf16.msra.mxu1 %v8502_v27  ;;  %v9708_v27 = vpack.c.bf16 %v4532_v59, %v4531_v36  ;;  %v5129_v36 = vld [vmem:[#allocation2 + $0x108] sm:$0xff]  ;;  %v5131_v59 = vld [vmem:[#allocation2 + $0x120] sm:$0xff] }
 0x495   : > { %7665 = vmatprep.subr.bf16.mxu1 %v8503_v46 }
 0x497   : > { %7634 = vmatmul.mubr.bf16.gmra.mrb[4].mxu1 %v9654_v58 }
 0x498   : > { %7637 = vmatprep.mubr.bf16.mxu1 %v9659_v53  ;;  %7666 = vmatpush3.bf16.msra.mxu1 %v8503_v46  ;;  %v8510_v46 = vld [vmem:[%s10123_s2 + $0x188] sm:$0xff]  }
 0x499   : > { %7667 = vmatprep.subr.bf16.mxu1 %v8504_v12 }
 0x49c   : > { %7668 = vmatpush3.bf16.msra.mxu1 %v8504_v12  ;;  %v5114_v12 = vld [vmem:[#allocation2 + $0x50] sm:$0xff] }
 0x49d   : > { %7669 = vmatprep.subr.bf16.mxu1 %v8505_v22 }
 0x49f   : > { %7638 = vmatmul.mubr.bf16.gmra.mrb[8].mxu1 %v9666_v5 }
 0x4a0   : > { %7641 = vmatprep.mubr.bf16.mxu1 %v9671_v26  ;;  %7670 = vmatpush3.bf16.msra.mxu1 %v8505_v22  ;;  %v5116_v22 = vld [vmem:[#allocation2 + $0x68] sm:$0xff] }
 0x4a1   : > { %7671 = vmatprep.subr.bf16.mxu1 %v8506_v10 }
 0x4a4   : > { %7672 = vmatpush3.bf16.msra.mxu1 %v8506_v10  ;;  %v5120_v10 = vld [vmem:[#allocation2 + $0x98] sm:$0xff] }
 0x4a5   : > { %7673 = vmatprep.subr.bf16.mxu1 %v8507_v51  ;;  %v5147_v17 = vpack.c.bf16 %v5120_v10, %v5119_v54  ;;  %v5732_v54 = vld [vmem:[#allocation2 + $0xb2] sm:$0xff] }
 0x4a7   : > { %7642 = vmatmul.mubr.bf16.gmra.mrb[12].mxu1 %v9678_v18 }
 0x4a8   : > { %7645 = vmatprep.mubr.bf16.mxu1 %v9683_v41  ;;  %7674 = vmatpush3.bf16.msra.mxu1 %v8507_v51  ;;  %v8520_v51 = vld [vmem:[%s10123_s2 + $0x1d8] sm:$0xff]  }
 0x4a9   : > { %7675 = vmatprep.subr.bf16.mxu1 %v8508_v57 }
 0x4ac   : > { %7676 = vmatpush3.bf16.msra.mxu1 %v8508_v57  ;;  %v5122_v57 = vld [vmem:[#allocation2 + $0xb0] sm:$0xff] }
 0x4ad   : > { %7709 = vmatprep.subr.bf16.mxu1 %v8509_v24 }
 0x4af   : > { %7646 = vmatmul.mubr.bf16.gmra.mrb[16].mxu1 %v9690_v29 }
 0x4b0   : > { %7649 = vmatprep.mubr.bf16.mxu1 %v9692_v37 }
 0x4b7   : > { %7650 = vmatmul.mubr.bf16.gmra.mrb[20].mxu1 %v9696_v32 }
 0x4b8   : > { %7653 = vmatprep.mubr.bf16.mxu1 %v9698_v35 }
 0x4bf   : > { %7654 = vmatmul.mubr.bf16.gmra.mrb[24].mxu1 %v9702_v33 }
 0x4c0   : > { %7657 = vmatprep.mubr.bf16.mxu1 %v9704_v14 }
 0x4c7   : > { %7658 = vmatmul.mubr.bf16.gmra.mrb[28].mxu1 %v9708_v27 }
 0x4c8   : > { %7677 = vmatprep.mubr.bf16.mxu1 %v9533_v56  ;;  %v8512_v56 = vld [vmem:[%s10123_s2 + $0x198] sm:$0xff]  }
 0x4cf   : > { %7678 = vmatmul.mubr.bf16.vlgmr.msra.gmra.mrb[0].mxu1 %v9538_v31  ;;  %v8513_v31 = vld [vmem:[%s10123_s2 + $0x1a0] sm:$0xff]  }
 0x4d0   : > { %7710 = vmatpush3.bf16.msra.mxu1 %v8509_v24  ;;  %7681 = vmatprep.mubr.bf16.mxu1 %v9545_v11  ;;  %v8514_v11 = vld [vmem:[%s10123_s2 + $0x1a8] sm:$0xff]   ;;  %v5148_v24 = vpack.c.bf16 %v5122_v57, %v5121_v55  ;;  %v5738_v55 = vld [vmem:[#allocation2 + $0xfa] sm:$0xff] }
 0x4d1   : > { %7711 = vmatprep.subr.bf16.mxu1 %v8510_v46 }
 0x4d4   : > { %7712 = vmatpush3.bf16.msra.mxu1 %v8510_v46  ;;  %v5130_v46 = vld [vmem:[#allocation2 + $0x110] sm:$0xff] }
 0x4d5   : > { %7713 = vmatprep.subr.bf16.mxu1 %v8511_v4 }
 0x4d7   : > { %7682 = vmatmul.mubr.bf16.gmra.mrb[4].mxu1 %v9550_v1  ;;  %v8515_v1 = vld [vmem:[%s10123_s2 + $0x1b0] sm:$0xff]  }
 0x4d8   : > { %7685 = vmatprep.mubr.bf16.mxu1 %v9557_v2  ;;  %7714 = vmatpush3.bf16.msra.mxu1 %v8511_v4  ;;  %v8516_v2 = vld [vmem:[%s10123_s2 + $0x1b8] sm:$0xff]   ;;  %v5152_v4 = vpack.c.bf16 %v5130_v46, %v5129_v36  ;;  %v5747_v46 = vld [vmem:[#allocation2 + $0x16a] sm:$0xff] }
 0x4d9   : > { %7715 = vmatprep.subr.bf16.mxu1 %v8512_v56 }
 0x4dc   : > { %7716 = vmatpush3.bf16.msra.mxu1 %v8512_v56  ;;  %v5132_v56 = vld [vmem:[#allocation2 + $0x128] sm:$0xff] }
 0x4dd   : > { %7717 = vmatprep.subr.bf16.mxu1 %v8513_v31 }
 0x4df   : > { %7686 = vmatmul.mubr.bf16.gmra.mrb[8].mxu1 %v9562_v38  ;;  %v8517_v38 = vld [vmem:[%s10123_s2 + $0x1c0] sm:$0xff]  }
 0x4e0   : > { %7689 = vmatprep.mubr.bf16.mxu1 %v9569_v7  ;;  %7718 = vmatpush3.bf16.msra.mxu1 %v8513_v31  ;;  %v4837_v7 = vld [vmem:[#allocation2 + $0x18a] sm:$0xff]  ;;  %v5153_v31 = vpack.c.bf16 %v5132_v56, %v5131_v59  ;;  %v5748_v59 = vld [vmem:[#allocation2 + $0x172] sm:$0xff]  ;;  %v5751_v56 = vld [vmem:[#allocation2 + $0x19a] sm:$0xff] }
 0x4e1   : > { %7719 = vmatprep.subr.bf16.mxu1 %v8514_v11 }
 0x4e4   : > { %7720 = vmatpush3.bf16.msra.mxu1 %v8514_v11  ;;  %v5133_v11 = vld [vmem:[#allocation2 + $0x138] sm:$0xff] }
 0x4e5   : > { %7721 = vmatprep.subr.bf16.mxu1 %v8515_v1 }
 0x4e7   : > { %7690 = vmatmul.mubr.bf16.gmra.mrb[12].mxu1 %v9574_v3  ;;  %v5111_v3 = vld [vmem:[#allocation2 + $0x30] sm:$0xff] }
 0x4e8   : > { %7693 = vmatprep.mubr.bf16.mxu1 %v9581_v6  ;;  %7722 = vmatpush3.bf16.msra.mxu1 %v8515_v1  ;;  %v4836_v6 = vld [vmem:[#allocation2 + $0x182] sm:$0xff]  ;;  %v5143_v49 = vpack.c.bf16 %v5112_v45, %v5111_v3  ;;  %v5135_v1 = vld [vmem:[#allocation2 + $0x150] sm:$0xff] }
 0x4e9   : > { %7723 = vmatprep.subr.bf16.mxu1 %v8516_v2  ;;  %v9750_v61 = vpack.c.bf16 %v4837_v7, %v4836_v6  ;;  %v5136_v7 = vld [vmem:[#allocation2 + $0x158] sm:$0xff]  ;;  %v5137_v6 = vld [vmem:[#allocation2 + $0x168] sm:$0xff]  ;;  %v5138_v45 = vld [vmem:[#allocation2 + $0x170] sm:$0xff] }
 0x4ea   : > { %v5155_v3 = vpack.c.bf16 %v5136_v7, %v5135_v1 }
 0x4ec   : > { %7724 = vmatpush3.bf16.msra.mxu1 %v8516_v2  ;;  %v5134_v2 = vld [vmem:[#allocation2 + $0x140] sm:$0xff] }
 0x4ed   : > { %7757 = vmatprep.subr.bf16.mxu1 %v8517_v38 }
 0x4ef   : > { %7694 = vmatmul.mubr.bf16.gmra.mrb[16].mxu1 %v9583_v44  ;;  %v5113_v44 = vld [vmem:[#allocation2 + $0x48] sm:$0xff] }
 0x4f0   : > { %7697 = vmatprep.mubr.bf16.mxu1 %v9587_v43  ;;  %v5115_v43 = vld [vmem:[#allocation2 + $0x60] sm:$0xff] }
 0x4f7   : > { %7698 = vmatmul.mubr.bf16.gmra.mrb[20].mxu1 %v9589_v20  ;;  %v5144_v20 = vpack.c.bf16 %v5114_v12, %v5113_v44  ;;  %v8526_v44 = vld [vmem:[%s10123_s2 + $0x208] sm:$0xff]  }
 0x4f8   : > { %7701 = vmatprep.mubr.bf16.mxu1 %v9593_v19  ;;  %v8518_v19 = vld [vmem:[%s10123_s2 + $0x1c8] sm:$0xff]  }
 0x4ff   : > { %7702 = vmatmul.mubr.bf16.gmra.mrb[24].mxu1 %v9595_v13  ;;  %v5145_v13 = vpack.c.bf16 %v5116_v22, %v5115_v43  ;;  %v8527_v43 = vld [vmem:[%s10123_s2 + $0x210] sm:$0xff]  }
 0x500   : > { %7705 = vmatprep.mubr.bf16.mxu1 %v9599_v0  ;;  %v8519_v0 = vld [vmem:[%s10123_s2 + $0x1d0] sm:$0xff]  }
 0x501   : > { %v5723_v22 = vld [vmem:[#allocation2 + $0x4a] sm:$0xff] }
 0x507   : > { %7706 = vmatmul.mubr.bf16.gmra.mrb[28].mxu1 %v9750_v61 }
 0x508   : > { %7725 = vmatprep.mubr.bf16.mxu1 %v5143_v49  ;;  %v5156_v49 = vpack.c.bf16 %v5138_v45, %v5137_v6 }
 0x50f   : > { %7726 = vmatmul.mubr.bf16.vlgmr.msra.gmra.mrb[0].mxu1 %v5144_v20  ;;  %v5724_v20 = vld [vmem:[#allocation2 + $0x52] sm:$0xff] }
 0x510   : > { %7758 = vmatpush3.bf16.msra.mxu1 %v8517_v38  ;;  %7729 = vmatprep.mubr.bf16.mxu1 %v5145_v13  ;;  %v5154_v38 = vpack.c.bf16 %v5134_v2, %v5133_v11  ;;  %v5727_v13 = vld [vmem:[#allocation2 + $0x7a] sm:$0xff] }
 0x511   : > { %7759 = vmatprep.subr.bf16.mxu1 %v8518_v19 }
 0x514   : > { %7760 = vmatpush3.bf16.msra.mxu1 %v8518_v19  ;;  %v5725_v19 = vld [vmem:[#allocation2 + $0x62] sm:$0xff] }
 0x515   : > { %7761 = vmatprep.subr.bf16.mxu1 %v8519_v0 }
 0x517   : > { %7730 = vmatmul.mubr.bf16.gmra.mrb[4].mxu1 %v5146_v62  ;;  %v5731_v62 = vld [vmem:[#allocation2 + $0xaa] sm:$0xff] }
 0x518   : > { %7733 = vmatprep.mubr.bf16.mxu1 %v5147_v17  ;;  %7762 = vmatpush3.bf16.msra.mxu1 %v8519_v0  ;;  %v5729_v0 = vld [vmem:[#allocation2 + $0x92] sm:$0xff]  ;;  %v5758_v10 = vpack.c.bf16 %v5732_v54, %v5731_v62 }
 0x519   : > { %7763 = vmatprep.subr.bf16.mxu1 %v8520_v51 }
 0x51c   : > { %7764 = vmatpush3.bf16.msra.mxu1 %v8520_v51  ;;  %v5733_v51 = vld [vmem:[#allocation2 + $0xc2] sm:$0xff] }
 0x51d   : > { %7765 = vmatprep.subr.bf16.mxu1 %v8521_v50  ;;  %v5759_v17 = vpack.c.bf16 %v5734_v25, %v5733_v51 }
 0x51f   : > { %7734 = vmatmul.mubr.bf16.gmra.mrb[8].mxu1 %v5148_v24  ;;  %v5737_v24 = vld [vmem:[#allocation2 + $0xf2] sm:$0xff] }
 0x520   : > { %7737 = vmatprep.mubr.bf16.mxu1 %v5149_v8  ;;  %7766 = vmatpush3.bf16.msra.mxu1 %v8521_v50  ;;  %v5736_v50 = vld [vmem:[#allocation2 + $0xe2] sm:$0xff]  ;;  %v5761_v21 = vpack.c.bf16 %v5738_v55, %v5737_v24  ;;  %v5742_v8 = vld [vmem:[#allocation2 + $0x12a] sm:$0xff] }
 0x521   : > { %7767 = vmatprep.subr.bf16.mxu1 %v8522_v15  ;;  %v5760_v57 = vpack.c.bf16 %v5736_v50, %v5735_v23  ;;  %v5763_v40 = vpack.c.bf16 %v5742_v8, %v5741_v28 }
 0x524   : > { %7768 = vmatpush3.bf16.msra.mxu1 %v8522_v15  ;;  %v5740_v15 = vld [vmem:[#allocation2 + $0x112] sm:$0xff] }
 0x525   : > { %7769 = vmatprep.subr.bf16.mxu1 %v8523_v30 }
 0x527   : > { %7738 = vmatmul.mubr.bf16.gmra.mrb[12].mxu1 %v5150_v47  ;;  %v5744_v47 = vld [vmem:[#allocation2 + $0x142] sm:$0xff] }
 0x528   : > { %7741 = vmatprep.mubr.bf16.mxu1 %v5151_v16  ;;  %7770 = vmatpush3.bf16.msra.mxu1 %v8523_v30  ;;  %v5739_v30 = vld [vmem:[#allocation2 + $0x10a] sm:$0xff] }
 0x529   : > { %7771 = vmatprep.subr.bf16.mxu1 %v8524_v63  ;;  %v5762_v9 = vpack.c.bf16 %v5740_v15, %v5739_v30 }
 0x52c   : > { %7772 = vmatpush3.bf16.msra.mxu1 %v8524_v63  ;;  %v5743_v63 = vld [vmem:[#allocation2 + $0x13a] sm:$0xff] }
 0x52d   : > { %7805 = vmatprep.subr.bf16.mxu1 %v8525_v48  ;;  %v5764_v16 = vpack.c.bf16 %v5744_v47, %v5743_v63 }
 0x52f   : > { %7742 = vmatmul.mubr.bf16.gmra.mrb[16].mxu1 %v5152_v4  ;;  %v5766_v4 = vpack.c.bf16 %v5748_v59, %v5747_v46 }
 0x530   : > { %7745 = vmatprep.mubr.bf16.mxu1 %v5153_v31  ;;  %v5752_v31 = vld [vmem:[#allocation2 + $0x1a2] sm:$0xff] }
 0x531   : > { %v5768_v11 = vpack.c.bf16 %v5752_v31, %v5751_v56 }
 0x537   : > { %7746 = vmatmul.mubr.bf16.gmra.mrb[20].mxu1 %v5154_v38 }
 0x538   : > { %7749 = vmatprep.mubr.bf16.mxu1 %v5155_v3 }
 0x53f   : > { %7750 = vmatmul.mubr.bf16.gmra.mrb[24].mxu1 %v5156_v49 }
 0x540   : > { %7753 = vmatprep.mubr.bf16.mxu1 %v9448_v42 }
 0x547   : > { %7754 = vmatmul.mubr.bf16.gmra.mrb[28].mxu1 %v9448_v42  ;;  %v8528_v42 = vld [vmem:[%s10123_s2 + $0x218] sm:$0xff]  }
 0x548   : > { %7773 = vmatprep.mubr.bf16.mxu1 %v9642_v60  ;;  %v8529_v60 = vld [vmem:[%s10123_s2 + $0x220] sm:$0xff]  }
 0x54f   : > { %7774 = vmatmul.mubr.bf16.vlgmr.msra.gmra.mrb[0].mxu1 %v9647_v34  ;;  %v8530_v34 = vld [vmem:[%s10123_s2 + $0x228] sm:$0xff]  }
 0x550   : > { %7806 = vmatpush3.bf16.msra.mxu1 %v8525_v48  ;;  %7777 = vmatprep.mubr.bf16.mxu1 %v9654_v58  ;;  %v8531_v58 = vld [vmem:[%s10123_s2 + $0x230] sm:$0xff]  }
 0x551   : > { %7807 = vmatprep.subr.bf16.mxu1 %v8526_v44  ;;  %v5745_v48 = vld [vmem:[#allocation2 + $0x152] sm:$0xff] }
 0x552   : > { %v5765_v36 = vpack.c.bf16 %v5746_v39, %v5745_v48 }
 0x554   : > { %7808 = vmatpush3.bf16.msra.mxu1 %v8526_v44 }
 0x555   : > { %7809 = vmatprep.subr.bf16.mxu1 %v8527_v43 }
 0x557   : > { %7778 = vmatmul.mubr.bf16.gmra.mrb[4].mxu1 %v9659_v53  ;;  %v8532_v53 = vld [vmem:[%s10123_s2 + $0x238] sm:$0xff]  }
 0x558   : > { %7781 = vmatprep.mubr.bf16.mxu1 %v9666_v5  ;;  %7810 = vmatpush3.bf16.msra.mxu1 %v8527_v43  ;;  %v5446_v5 = vld [vmem:[#allocation2 + $0x199] sm:$0xff] }
 0x559   : > { %7811 = vmatprep.subr.bf16.mxu1 %v8528_v42 }
 0x55c   : > { %7812 = vmatpush3.bf16.msra.mxu1 %v8528_v42 }
 0x55d   : > { %7813 = vmatprep.subr.bf16.mxu1 %v8529_v60 }
 0x55f   : > { %7782 = vmatmul.mubr.bf16.gmra.mrb[8].mxu1 %v9671_v26  ;;  %v5447_v26 = vld [vmem:[#allocation2 + $0x1a1] sm:$0xff] }
 0x560   : > { %7785 = vmatprep.mubr.bf16.mxu1 %v9678_v18  ;;  %7814 = vmatpush3.bf16.msra.mxu1 %v8529_v60  ;;  %v5722_v18 = vld [vmem:[#allocation2 + $0x3a] sm:$0xff] }
 0x561   : > { %7815 = vmatprep.subr.bf16.mxu1 %v8530_v34 }
 0x564   : > { %7816 = vmatpush3.bf16.msra.mxu1 %v8530_v34 }
 0x565   : > { %7817 = vmatprep.subr.bf16.mxu1 %v8531_v58 }
 0x567   : > { %7786 = vmatmul.mubr.bf16.gmra.mrb[12].mxu1 %v9683_v41  ;;  %v5463_v41 = vpack.c.bf16 %v5447_v26, %v5446_v5 }
 0x568   : > { %7789 = vmatprep.mubr.bf16.mxu1 %v9690_v29  ;;  %7818 = vmatpush3.bf16.msra.mxu1 %v8531_v58  ;;  %v5721_v29 = vld [vmem:[#allocation2 + $0x32] sm:$0xff] }
 0x569   : > { %7819 = vmatprep.subr.bf16.mxu1 %v8532_v53  ;;  %v5753_v12 = vpack.c.bf16 %v5722_v18, %v5721_v29 }
 0x56c   : > { %7820 = vmatpush3.bf16.msra.mxu1 %v8532_v53 }
 0x56f   : > { %7790 = vmatmul.mubr.bf16.gmra.mrb[16].mxu1 %v9692_v37  ;;  %v5726_v37 = vld [vmem:[#allocation2 + $0x6a] sm:$0xff] }
 0x570   : > { %7793 = vmatprep.mubr.bf16.mxu1 %v9696_v32  ;;  %v5754_v32 = vpack.c.bf16 %v5724_v20, %v5723_v22 }
 0x577   : > { %7794 = vmatmul.mubr.bf16.gmra.mrb[20].mxu1 %v9698_v35  ;;  %v5755_v35 = vpack.c.bf16 %v5726_v37, %v5725_v19 }
 0x578   : > { %7797 = vmatprep.mubr.bf16.mxu1 %v9702_v33  ;;  %v5728_v33 = vld [vmem:[#allocation2 + $0x82] sm:$0xff] }
 0x57f   : > { %7798 = vmatmul.mubr.bf16.gmra.mrb[24].mxu1 %v9704_v14  ;;  %v5730_v14 = vld [vmem:[#allocation2 + $0x9a] sm:$0xff] }
 0x580   : > { %7801 = vmatprep.mubr.bf16.mxu1 %v9708_v27  ;;  %v5756_v27 = vpack.c.bf16 %v5728_v33, %v5727_v13  ;;  %v5757_v52 = vpack.c.bf16 %v5730_v14, %v5729_v0 }
 0x587   : > { %7802 = vmatmul.mubr.bf16.gmra.mrb[28].mxu1 %v5463_v41 }
 0x588   : > { %7821 = vmatprep.mubr.bf16.mxu1 %v5753_v12 }
 0x58f   : > { %7822 = vmatmul.mubr.bf16.vlgmr.msra.gmra.mrb[0].mxu1 %v5754_v32 }
 0x590   : > { %7825 = vmatprep.mubr.bf16.mxu1 %v5755_v35 }
 0x597   : > { %7826 = vmatmul.mubr.bf16.gmra.mrb[4].mxu1 %v5756_v27 }
 0x598   : > { %7829 = vmatprep.mubr.bf16.mxu1 %v5757_v52 }
 0x59f   : > { %7830 = vmatmul.mubr.bf16.gmra.mrb[8].mxu1 %v5758_v10 }
 0x5a0   : > { %7833 = vmatprep.mubr.bf16.mxu1 %v5759_v17 }
 0x5a7   : > { %7834 = vmatmul.mubr.bf16.gmra.mrb[12].mxu1 %v5760_v57 }
 0x5a8   : > { %7837 = vmatprep.mubr.bf16.mxu1 %v5761_v21 }
 0x5af   : > { %7838 = vmatmul.mubr.bf16.gmra.mrb[16].mxu1 %v5762_v9 }
 0x5b0   : > { %7841 = vmatprep.mubr.bf16.mxu1 %v5763_v40 }
 0x5b7   : > { %7842 = vmatmul.mubr.bf16.gmra.mrb[20].mxu1 %v5764_v16 }
 0x5b8   : > { %7845 = vmatprep.mubr.bf16.mxu1 %v5765_v36 }
 0x5bf   : > { %7846 = vmatmul.mubr.bf16.gmra.mrb[24].mxu1 %v5766_v4 }
 0x5c0   : > { %7849 = vmatprep.mubr.bf16.mxu1 %v9750_v61 }
 0x5c7   : > { %7850 = vmatmul.mubr.bf16.gmra.mrb[28].mxu1 %v5768_v11 }
 0x662   : > { %v9816_v1 = vpop.f32.mrb[0].mxu1 }
 0x663   : > { %v9818_v2 = vpop.f32.mrb[1].mxu1  ;;  %v6066_v45 = vmul.f32 %v9816_v1, %v9816_v1 }
 0x664   : > { %v9820_v38 = vpop.f32.mrb[2].mxu1  ;;  %v6064_v3 = vmul.f32 %v9818_v2, %v9818_v2 }
 0x665   : > { %v9822_v7 = vpop.f32.mrb[3].mxu1  ;;  %v6067_v43 = vmul.f32 %v9820_v38, %v9820_v38 }
 0x666   : > { %v6026_v6 = vadd.f32 %v9822_v7, %v9818_v2  ;;  %v6065_v61 = vmul.f32 %v9822_v7, %v9822_v7 }
 0x668   : > { %v6027_v49 = vadd.f32 %v9816_v1, %v6026_v6  ;;  %v6096_v44 = vadd.f32 %v6065_v61, %v6064_v3 }
 0x66a   : > { %v6097_v42 = vadd.f32 %v6096_v44, %v6066_v45  ;;  %v9835_v60 = vpop.f32.mrb[4].mxu1  ;;  %v6028_v34 = vadd.f32 %v9820_v38, %v6027_v49 }
 0x66b   : > { %v9838_v58 = vpop.f32.mrb[5].mxu1  ;;  %v6070_v37 = vmul.f32 %v9835_v60, %v9835_v60 }
 0x66c   : > { %v6029_v53 = vadd.f32 %v6028_v34, %v9838_v58  ;;  %v6068_v5 = vmul.f32 %v9838_v58, %v9838_v58  ;;  %v6098_v26 = vadd.f32 %v6097_v42, %v6067_v43  ;;  %v9843_v18 = vpop.f32.mrb[6].mxu1 }
 0x66d   : > { %v9845_v41 = vpop.f32.mrb[7].mxu1  ;;  %v6071_v19 = vmul.f32 %v9843_v18, %v9843_v18 }
 0x66e   : > { %v6099_v29 = vadd.f32 %v6098_v26, %v6068_v5  ;;  %v6030_v12 = vadd.f32 %v6029_v53, %v9845_v41  ;;  %v6069_v20 = vmul.f32 %v9845_v41, %v9845_v41 }
 0x670   : > { %v6031_v22 = vadd.f32 %v9835_v60, %v6030_v12  ;;  %v6100_v32 = vadd.f32 %v6099_v29, %v6069_v20 }
 0x672   : > { %v6101_v35 = vadd.f32 %v6100_v32, %v6070_v37  ;;  %v9855_v33 = vpop.f32.mrb[8].mxu1  ;;  %v6032_v14 = vadd.f32 %v9843_v18, %v6031_v22 }
 0x673   : > { %v9858_v13 = vpop.f32.mrb[9].mxu1  ;;  %v6074_v17 = vmul.f32 %v9855_v33, %v9855_v33 }
 0x674   : > { %v6033_v27 = vadd.f32 %v6032_v14, %v9858_v13  ;;  %v6072_v0 = vmul.f32 %v9858_v13, %v9858_v13  ;;  %v6102_v52 = vadd.f32 %v6101_v35, %v6071_v19  ;;  %v9863_v54 = vpop.f32.mrb[10].mxu1 }
 0x675   : > { %v9865_v25 = vpop.f32.mrb[11].mxu1  ;;  %v6075_v23 = vmul.f32 %v9863_v54, %v9863_v54 }
 0x676   : > { %v6103_v62 = vadd.f32 %v6102_v52, %v6072_v0  ;;  %v6034_v10 = vadd.f32 %v6033_v27, %v9865_v25  ;;  %v6073_v51 = vmul.f32 %v9865_v25, %v9865_v25 }
 0x678   : > { %v6035_v50 = vadd.f32 %v9855_v33, %v6034_v10  ;;  %v6104_v55 = vadd.f32 %v6103_v62, %v6073_v51 }
 0x67a   : > { %v6105_v57 = vadd.f32 %v6104_v55, %v6074_v17  ;;  %v9875_v24 = vpop.f32.mrb[12].mxu1  ;;  %v6036_v21 = vadd.f32 %v9863_v54, %v6035_v50 }
 0x67b   : > { %v9878_v15 = vpop.f32.mrb[13].mxu1  ;;  %v6078_v16 = vmul.f32 %v9875_v24, %v9875_v24 }
 0x67c   : > { %v6037_v8 = vadd.f32 %v6036_v21, %v9878_v15  ;;  %v6076_v30 = vmul.f32 %v9878_v15, %v9878_v15  ;;  %v6106_v9 = vadd.f32 %v6105_v57, %v6075_v23  ;;  %v9883_v28 = vpop.f32.mrb[14].mxu1 }
 0x67d   : > { %v9885_v40 = vpop.f32.mrb[15].mxu1  ;;  %v6079_v59 = vmul.f32 %v9883_v28, %v9883_v28 }
 0x67e   : > { %v6107_v47 = vadd.f32 %v6106_v9, %v6076_v30  ;;  %v6038_v39 = vadd.f32 %v6037_v8, %v9885_v40  ;;  %v6077_v63 = vmul.f32 %v9885_v40, %v9885_v40 }
 0x680   : > { %v6039_v48 = vadd.f32 %v9875_v24, %v6038_v39  ;;  %v6108_v36 = vadd.f32 %v6107_v47, %v6077_v63 }
 0x682   : > { %v6109_v46 = vadd.f32 %v6108_v36, %v6078_v16  ;;  %v9895_v4 = vpop.f32.mrb[16].mxu1  ;;  %v6040_v56 = vadd.f32 %v9883_v28, %v6039_v48 }
 0x683   : > { %v9898_v31 = vpop.f32.mrb[17].mxu1  ;;  %v6082_v42 = vmul.f32 %v9895_v4, %v9895_v4 }
 0x684   : > { %v6041_v11 = vadd.f32 %v6040_v56, %v9898_v31  ;;  %v6080_v3 = vmul.f32 %v9898_v31, %v9898_v31  ;;  %v6110_v6 = vadd.f32 %v6109_v46, %v6079_v59  ;;  %v9903_v61 = vpop.f32.mrb[18].mxu1 }
 0x685   : > { %v9905_v45 = vpop.f32.mrb[19].mxu1  ;;  %v6083_v5 = vmul.f32 %v9903_v61, %v9903_v61 }
 0x686   : > { %v6111_v49 = vadd.f32 %v6110_v6, %v6080_v3  ;;  %v6042_v44 = vadd.f32 %v6041_v11, %v9905_v45  ;;  %v6081_v43 = vmul.f32 %v9905_v45, %v9905_v45 }
 0x688   : > { %v6043_v34 = vadd.f32 %v9895_v4, %v6042_v44  ;;  %v6112_v53 = vadd.f32 %v6111_v49, %v6081_v43 }
 0x68a   : > { %v6113_v26 = vadd.f32 %v6112_v53, %v6082_v42  ;;  %v9915_v29 = vpop.f32.mrb[20].mxu1  ;;  %v6044_v12 = vadd.f32 %v9903_v61, %v6043_v34 }
 0x68b   : > { %v9918_v20 = vpop.f32.mrb[21].mxu1  ;;  %v6086_v52 = vmul.f32 %v9915_v29, %v9915_v29 }
 0x68c   : > { %v6045_v37 = vadd.f32 %v6044_v12, %v9918_v20  ;;  %v6084_v22 = vmul.f32 %v9918_v20, %v9918_v20  ;;  %v6114_v32 = vadd.f32 %v6113_v26, %v6083_v5  ;;  %v9923_v19 = vpop.f32.mrb[22].mxu1 }
 0x68d   : > { %v9925_v35 = vpop.f32.mrb[23].mxu1  ;;  %v6087_v51 = vmul.f32 %v9923_v19, %v9923_v19 }
 0x68e   : > { %v6115_v14 = vadd.f32 %v6114_v32, %v6084_v22  ;;  %v6046_v27 = vadd.f32 %v6045_v37, %v9925_v35  ;;  %v6085_v0 = vmul.f32 %v9925_v35, %v9925_v35 }
 0x690   : > { %v6047_v62 = vadd.f32 %v9915_v29, %v6046_v27  ;;  %v6116_v10 = vadd.f32 %v6115_v14, %v6085_v0 }
 0x692   : > { %v6117_v17 = vadd.f32 %v6116_v10, %v6086_v52  ;;  %v9935_v50 = vpop.f32.mrb[24].mxu1  ;;  %v6048_v55 = vadd.f32 %v9923_v19, %v6047_v62 }
 0x693   : > { %v9938_v23 = vpop.f32.mrb[25].mxu1  ;;  %v6090_v16 = vmul.f32 %v9935_v50, %v9935_v50 }
 0x694   : > { %v6049_v57 = vadd.f32 %v6048_v55, %v9938_v23  ;;  %v6088_v21 = vmul.f32 %v9938_v23, %v9938_v23  ;;  %v6118_v8 = vadd.f32 %v6117_v17, %v6087_v51  ;;  %v9943_v30 = vpop.f32.mrb[26].mxu1 }
 0x695   : > { %v9945_v9 = vpop.f32.mrb[27].mxu1  ;;  %v6091_v59 = vmul.f32 %v9943_v30, %v9943_v30 }
 0x696   : > { %v6119_v47 = vadd.f32 %v6118_v8, %v6088_v21  ;;  %v6050_v39 = vadd.f32 %v6049_v57, %v9945_v9  ;;  %v6089_v63 = vmul.f32 %v9945_v9, %v9945_v9 }
 0x698   : > { %v6051_v48 = vadd.f32 %v9935_v50, %v6050_v39  ;;  %v6120_v36 = vadd.f32 %v6119_v47, %v6089_v63 }
 0x69a   : > { %v6121_v46 = vadd.f32 %v6120_v36, %v6090_v16  ;;  %v9955_v56 = vpop.f32.mrb[28].mxu1  ;;  %v6052_v11 = vadd.f32 %v9943_v30, %v6051_v48 }
 0x69b   : > { %v9958_v3 = vpop.f32.mrb[29].mxu1  ;;  %v6094_v26 = vmul.f32 %v9955_v56, %v9955_v56 }
 0x69c   : > { %v6053_v6 = vadd.f32 %v6052_v11, %v9958_v3  ;;  %v6092_v49 = vmul.f32 %v9958_v3, %v9958_v3  ;;  %v6122_v44 = vadd.f32 %v6121_v46, %v6091_v59  ;;  %v9963_v43 = vpop.f32.mrb[30].mxu1 }
 0x69d   : > { %v9965_v42 = vpop.f32.mrb[31].mxu1  ;;  %v6095_v22 = vmul.f32 %v9963_v43, %v9963_v43 }
 0x69e   : > { %v6123_v34 = vadd.f32 %v6122_v44, %v6092_v49  ;;  %v6054_v53 = vadd.f32 %v6053_v6, %v9965_v42  ;;  %v6093_v5 = vmul.f32 %v9965_v42, %v9965_v42 }
 0x6a0   : > { %v6055_v12 = vadd.f32 %v9955_v56, %v6054_v53  ;;  %v6124_v37 = vadd.f32 %v6123_v34, %v6093_v5 }
 0x6a2   : > { %v6056_v32 = vadd.f32 %v9963_v43, %v6055_v12  ;;  %v6125_v14 = vadd.f32 %v6124_v37, %v6094_v26 }
 0x6a4   : > { %v6057_v27 = vrot.slane %v6056_v32, 4  ;;  %v6126_v0 = vadd.f32 %v6125_v14, %v6095_v22 }
 0x6a6   : > { %v6058_v52 = vadd.f32 %v6057_v27, %v6056_v32  ;;  %v6127_v62 = vrot.slane %v6126_v0, 4 }
 0x6a8   : > { %v6059_v10 = vrot.slane %v6058_v52, 2  ;;  %v6128_v51 = vadd.f32 %v6127_v62, %v6126_v0 }
 0x6aa   : > { %v6060_v17 = vadd.f32 %v6059_v10, %v6058_v52  ;;  %v6129_v55 = vrot.slane %v6128_v51, 2 }
 0x6ac   : > { %v6061_v57 = vrot.slane %v6060_v17, 1  ;;  %v6130_v21 = vadd.f32 %v6129_v55, %v6128_v51 }
 0x6ae   : > { %v6062_v8 = vadd.f32 %v6061_v57, %v6060_v17  ;;  %v6131_v47 = vrot.slane %v6130_v21, 1 }
 0x6b0   : > { %v9976_v39 = vmul.f32 0.00390625, %v6062_v8  ;;  %v6132_v63 = vadd.f32 %v6131_v47, %v6130_v21 }
 0x6b2   : > { %v6133_v16 = vmul.f32 0.00390625, %v6132_v63  ;;  %v6134_v48 = vmul.f32 %v9976_v39, %v9976_v39  ;;  %v6136_v36 = vsub.f32 %v9818_v2, %v9976_v39  ;;  %v6137_v59 = vsub.f32 %v9822_v7, %v9976_v39 }
 0x6b3   : > { %v6138_v46 = vsub.f32 %v9816_v1, %v9976_v39  ;;  %v6139_v11 = vsub.f32 %v9820_v38, %v9976_v39  ;;  %v6140_v6 = vsub.f32 %v9838_v58, %v9976_v39  ;;  %v6141_v49 = vsub.f32 %v9845_v41, %v9976_v39 }
 0x6b4   : > { %v6135_v44 = vsub.f32 %v6133_v16, %v6134_v48  ;;  %v6142_v34 = vsub.f32 %v9835_v60, %v9976_v39  ;;  %v6143_v2 = vsub.f32 %v9843_v18, %v9976_v39  ;;  %v6144_v7 = vsub.f32 %v9858_v13, %v9976_v39 }
 0x6b5   : > { %v6145_v1 = vsub.f32 %v9865_v25, %v9976_v39  ;;  %v6146_v38 = vsub.f32 %v9855_v33, %v9976_v39  ;;  %v6147_v58 = vsub.f32 %v9863_v54, %v9976_v39  ;;  %v6148_v41 = vsub.f32 %v9878_v15, %v9976_v39 }
 0x6b6   : > { %v6149_v60 = vsub.f32 %v9885_v40, %v9976_v39  ;;  %v6150_v18 = vsub.f32 %v9875_v24, %v9976_v39  ;;  %v6151_v13 = vsub.f32 %v9883_v28, %v9976_v39  ;;  %v6152_v25 = vsub.f32 %v9898_v31, %v9976_v39 }
 0x6b7   : > { %v6153_v33 = vsub.f32 %v9905_v45, %v9976_v39  ;;  %v6154_v54 = vsub.f32 %v9895_v4, %v9976_v39  ;;  %v6155_v15 = vsub.f32 %v9903_v61, %v9976_v39  ;;  %v6156_v40 = vsub.f32 %v9918_v20, %v9976_v39 }
 0x6b8   : > { %v6157_v24 = vsub.f32 %v9925_v35, %v9976_v39  ;;  %v6158_v28 = vsub.f32 %v9915_v29, %v9976_v39  ;;  %v6159_v31 = vsub.f32 %v9923_v19, %v9976_v39  ;;  %v6160_v45 = vsub.f32 %v9938_v23, %v9976_v39 }
 0x6b9   : > { %v6161_v4 = vsub.f32 %v9945_v9, %v9976_v39  ;;  %v6162_v61 = vsub.f32 %v9935_v50, %v9976_v39  ;;  %v6163_v20 = vsub.f32 %v9943_v30, %v9976_v39  ;;  %v6164_v35 = vsub.f32 %v9958_v3, %v9976_v39 }
 0x6ba   : > { %v6165_v29 = vsub.f32 %v9965_v42, %v9976_v39  ;;  %v6166_v19 = vsub.f32 %v9955_v56, %v9976_v39  ;;  %v6167_v23 = vsub.f32 %v9963_v43, %v9976_v39  ;;  %v6168_v53 = vadd.f32 1e-05, %v6135_v44 }
 0x6bc   : > { %8535 = vrsqrt.f32 %v6168_v53 }
 0x6c6   : > { %v8536_v9 = vpop.eup %8535 }
 0x6c7   : > { %v6170_v5 = vmul.f32 %v8536_v9, %v6136_v36  ;;  %v6171_v50 = vmul.f32 %v8536_v9, %v6137_v59  ;;  %v6172_v26 = vmul.f32 %v8536_v9, %v6138_v46  ;;  %v6173_v30 = vmul.f32 %v8536_v9, %v6139_v11 }
 0x6c8   : > { %v6174_v12 = vmul.f32 %v8536_v9, %v6140_v6  ;;  %v6175_v37 = vmul.f32 %v8536_v9, %v6141_v49  ;;  %v6176_v3 = vmul.f32 %v8536_v9, %v6142_v34  ;;  %v6177_v22 = vmul.f32 %v8536_v9, %v6143_v2 }
 0x6c9   : > { %v6178_v32 = vmul.f32 %v8536_v9, %v6144_v7  ;;  %v6179_v42 = vmul.f32 %v8536_v9, %v6145_v1  ;;  %v6180_v14 = vmul.f32 %v8536_v9, %v6146_v38  ;;  %v6181_v27 = vmul.f32 %v8536_v9, %v6147_v58 }
 0x6ca   : > { %v6182_v56 = vmul.f32 %v8536_v9, %v6148_v41  ;;  %v6183_v0 = vmul.f32 %v8536_v9, %v6149_v60  ;;  %v6184_v52 = vmul.f32 %v8536_v9, %v6150_v18  ;;  %v6185_v43 = vmul.f32 %v8536_v9, %v6151_v13 }
 0x6cb   : > { %v6186_v62 = vmul.f32 %v8536_v9, %v6152_v25  ;;  %v6187_v10 = vmul.f32 %v8536_v9, %v6153_v33  ;;  %v6188_v51 = vmul.f32 %v8536_v9, %v6154_v54  ;;  %v6189_v17 = vmul.f32 %v8536_v9, %v6155_v15 }
 0x6cc   : > { %v10045_v55 = vmul.f32 %v8536_v9, %v6156_v40  ;;  %v10047_v57 = vmul.f32 %v8536_v9, %v6157_v24  ;;  %v10049_v21 = vmul.f32 %v8536_v9, %v6158_v28  ;;  %v10051_v8 = vmul.f32 %v8536_v9, %v6159_v31 }
 0x6cd   : > { %v10053_v47 = vmul.f32 %v8536_v9, %v6160_v45  ;;  %v10055_v39 = vmul.f32 %v8536_v9, %v6161_v4  ;;  %v10057_v63 = vmul.f32 %v8536_v9, %v6162_v61  ;;  %v10059_v16 = vmul.f32 %v8536_v9, %v6163_v20 }
 0x6ce   : > { %v10066_v48 = vmul.f32 %v8536_v9, %v6164_v35  ;;  %v10068_v36 = vmul.f32 %v8536_v9, %v6165_v29  ;;  %v10070_v59 = vmul.f32 %v8536_v9, %v6166_v19  ;;  %v10072_v46 = vmul.f32 %v8536_v9, %v6167_v23 }
 0x6cf   : > { %v6202_v11 = vmax.f32 %v6170_v5, 0.0  ;;  %v6203_v6 = vmax.f32 %v6171_v50, 0.0  ;;  %v6204_v49 = vmax.f32 %v6172_v26, 0.0  ;;  %v6205_v44 = vmax.f32 %v6173_v30, 0.0 }
 0x6d0   : > { %v6206_v34 = vmax.f32 %v6174_v12, 0.0  ;;  %v6207_v2 = vmax.f32 %v6175_v37, 0.0  ;;  %v6208_v7 = vmax.f32 %v6176_v3, 0.0  ;;  %v6209_v1 = vmax.f32 %v6177_v22, 0.0 }
 0x6d1   : > { %v6210_v38 = vmax.f32 %v6178_v32, 0.0  ;;  %v6211_v58 = vmax.f32 %v6179_v42, 0.0  ;;  %v6212_v41 = vmax.f32 %v6180_v14, 0.0  ;;  %v6213_v60 = vmax.f32 %v6181_v27, 0.0  ;;  %6234 = vst [vmem:[%s10064_s9] sm:$0xff] %v6202_v11  ;;  %6235 = vst [vmem:[%s10064_s9 + $0x8] sm:$0xff] %v6203_v6 }
 0x6d2   : > { %6236 = vst [vmem:[%s10064_s9 + $0x10] sm:$0xff] %v6204_v49  ;;  %6237 = vst [vmem:[%s10064_s9 + $0x18] sm:$0xff] %v6205_v44  ;;  %v6214_v18 = vmax.f32 %v6182_v56, 0.0  ;;  %v6215_v13 = vmax.f32 %v6183_v0, 0.0  ;;  %v6216_v25 = vmax.f32 %v6184_v52, 0.0  ;;  %v6217_v33 = vmax.f32 %v6185_v43, 0.0 }
 0x6d3   : > { %6238 = vst [vmem:[%s10064_s9 + $0x20] sm:$0xff] %v6206_v34  ;;  %6239 = vst [vmem:[%s10064_s9 + $0x28] sm:$0xff] %v6207_v2  ;;  %v6218_v54 = vmax.f32 %v6186_v62, 0.0  ;;  %v6219_v15 = vmax.f32 %v6187_v10, 0.0  ;;  %v6220_v40 = vmax.f32 %v6188_v51, 0.0  ;;  %v6221_v24 = vmax.f32 %v6189_v17, 0.0 }
 0x6d4   : > { %6240 = vst [vmem:[%s10064_s9 + $0x30] sm:$0xff] %v6208_v7  ;;  %6241 = vst [vmem:[%s10064_s9 + $0x38] sm:$0xff] %v6209_v1  ;;  %v6222_v28 = vmax.f32 %v10045_v55, 0.0  ;;  %v6223_v31 = vmax.f32 %v10047_v57, 0.0  ;;  %v6224_v45 = vmax.f32 %v10049_v21, 0.0  ;;  %v6225_v4 = vmax.f32 %v10051_v8, 0.0 }
 0x6d5   : > { %6242 = vst [vmem:[%s10064_s9 + $0x40] sm:$0xff] %v6210_v38  ;;  %6243 = vst [vmem:[%s10064_s9 + $0x48] sm:$0xff] %v6211_v58  ;;  %v6226_v61 = vmax.f32 %v10053_v47, 0.0  ;;  %v6227_v20 = vmax.f32 %v10055_v39, 0.0  ;;  %v6228_v35 = vmax.f32 %v10057_v63, 0.0  ;;  %v6229_v29 = vmax.f32 %v10059_v16, 0.0 }
 0x6d6   : > { %6244 = vst [vmem:[%s10064_s9 + $0x50] sm:$0xff] %v6212_v41  ;;  %6245 = vst [vmem:[%s10064_s9 + $0x58] sm:$0xff] %v6213_v60  ;;  %v6230_v19 = vmax.f32 %v10066_v48, 0.0  ;;  %v6231_v23 = vmax.f32 %v10068_v36, 0.0  ;;  %v6232_v53 = vmax.f32 %v10070_v59, 0.0  ;;  %v6233_v9 = vmax.f32 %v10072_v46, 0.0 }
 0x6d7   : > { %6246 = vst [vmem:[%s10064_s9 + $0x60] sm:$0xff] %v6214_v18  ;;  %6247 = vst [vmem:[%s10064_s9 + $0x68] sm:$0xff] %v6215_v13 }
 0x6d8   : > { %6248 = vst [vmem:[%s10064_s9 + $0x70] sm:$0xff] %v6216_v25  ;;  %6249 = vst [vmem:[%s10064_s9 + $0x78] sm:$0xff] %v6217_v33 }
 0x6d9   : > { %6250 = vst [vmem:[%s10064_s9 + $0x80] sm:$0xff] %v6218_v54  ;;  %6251 = vst [vmem:[%s10064_s9 + $0x88] sm:$0xff] %v6219_v15 }
 0x6da   : > { %6252 = vst [vmem:[%s10064_s9 + $0x90] sm:$0xff] %v6220_v40  ;;  %6253 = vst [vmem:[%s10064_s9 + $0x98] sm:$0xff] %v6221_v24 }
 0x6db   : > { %6254 = vst [vmem:[%s10064_s9 + $0xa0] sm:$0xff] %v6222_v28  ;;  %6255 = vst [vmem:[%s10064_s9 + $0xa8] sm:$0xff] %v6223_v31 }
 0x6dc   : > { %6256 = vst [vmem:[%s10064_s9 + $0xb0] sm:$0xff] %v6224_v45  ;;  %6257 = vst [vmem:[%s10064_s9 + $0xb8] sm:$0xff] %v6225_v4 }
 0x6dd   : > { %6258 = vst [vmem:[%s10064_s9 + $0xc0] sm:$0xff] %v6226_v61  ;;  %6259 = vst [vmem:[%s10064_s9 + $0xc8] sm:$0xff] %v6227_v20 }
 0x6de   : > { %6260 = vst [vmem:[%s10064_s9 + $0xd0] sm:$0xff] %v6228_v35  ;;  %6261 = vst [vmem:[%s10064_s9 + $0xd8] sm:$0xff] %v6229_v29 }
 0x6df   : > { %6262 = vst [vmem:[%s10064_s9 + $0xe0] sm:$0xff] %v6230_v19  ;;  %6263 = vst [vmem:[%s10064_s9 + $0xe8] sm:$0xff] %v6231_v23 }
 0x6e0   : > { %6264 = vst [vmem:[%s10064_s9 + $0xf0] sm:$0xff] %v6232_v53  ;;  %6265 = vst [vmem:[%s10064_s9 + $0xf8] sm:$0xff] %v6233_v9 }
 0x6e1 PF: > { %s13_s12 = sadd.s32 1, %s8546_s12  }
 0x6e2   : > { %p10_p4 = scmp.ge.s32.totalorder %s13_s12, 4  }
 0x6e4   :  { %12 = sbr.rel (!%p10_p4) target bundleno = 1 (0x1), region = 66 }

</bundles_post_ra>
